<compile_context>
chip_gen: v7x
topology: tpu7x:2x2x1
jax: 0.10.0
libtpu: 0.0.40
codegen_flags: <defaults>
</compile_context>

<pallas_src>
import math
import functools

import jax
import jax.numpy as jnp
from jax.experimental import pallas as pl
from jax.experimental.pallas import tpu as pltpu


# ----------------------------------------------------------------------------
# Kernel 1: first conv layer (Cin=1, K=3) as VPU shift-and-add, relu fused.
# ----------------------------------------------------------------------------
def _conv1_sa_kernel(x_ref, w_ref, b_ref, o_ref, *, L_out, K):
    x = x_ref[0]                                    # (1, L)
    w = w_ref[...]                                  # (Cout, K)
    acc = w[:, 0:1] * x[0:1, 0:L_out]               # (Cout, L_out)
    for k in range(1, K):
        acc = acc + w[:, k:k + 1] * x[0:1, k:k + L_out]
    acc = acc + b_ref[...]                          # bias (Cout, 1)
    o_ref[0] = jnp.maximum(acc, 0.0).astype(o_ref.dtype)


def conv1d_cin1(x, w, b):
    """Conv1d(Cin=1, K=3, pad=0) + ReLU.  x: (B, 1, L), w: (Cout, 1, K)."""
    B, Cin, L = x.shape
    Cout, _, K = w.shape
    assert Cin == 1
    L_out = L - K + 1
    return pl.pallas_call(
        functools.partial(_conv1_sa_kernel, L_out=L_out, K=K),
        out_shape=jax.ShapeDtypeStruct((B, Cout, L_out), x.dtype),
        grid=(B,),
        in_specs=[
            pl.BlockSpec((1, 1, L), lambda i: (i, 0, 0)),
            pl.BlockSpec((Cout, K), lambda i: (0, 0)),
            pl.BlockSpec((Cout, 1), lambda i: (0, 0)),
        ],
        out_specs=pl.BlockSpec((1, Cout, L_out), lambda i: (i, 0, 0)),
        compiler_params=pltpu.CompilerParams(dimension_semantics=("parallel",)),
    )(x, w[:, 0, :], b.reshape(Cout, 1))


# ----------------------------------------------------------------------------
# Kernel 2: wide-contraction convs via im2col + MXU matmul (relu fused),
# gridded over batch (parallel -> can use both v7x TensorCores).
# ----------------------------------------------------------------------------
def _conv_mm_kernel(c_ref, w_ref, b_ref, o_ref):
    y = jnp.dot(c_ref[0], w_ref[...], preferred_element_type=jnp.float32) + b_ref[...]
    o_ref[0] = jnp.maximum(y, 0.0).astype(o_ref.dtype)


def conv1d_im2col(x, w, b, padding=0):
    """Conv1d + ReLU via im2col.  x: (B, Cin, L), w: (Cout, Cin, K)."""
    B, Cin, L = x.shape
    Cout, _, K = w.shape
    if padding:
        x = jnp.pad(x, ((0, 0), (0, 0), (padding, padding)))
    L_out = x.shape[2] - K + 1
    cols = jnp.stack([x[:, :, i:i + L_out] for i in range(K)], axis=-1)   # (B,Cin,L_out,K)
    cols = cols.transpose(0, 2, 1, 3).reshape(B, L_out, Cin * K)
    w2 = w.reshape(Cout, Cin * K).T                                       # (Cin*K, Cout)
    y = pl.pallas_call(
        _conv_mm_kernel,
        out_shape=jax.ShapeDtypeStruct((B, L_out, Cout), x.dtype),
        grid=(B,),
        in_specs=[
            pl.BlockSpec((1, L_out, Cin * K), lambda i: (i, 0, 0)),
            pl.BlockSpec((Cin * K, Cout), lambda i: (0, 0)),
            pl.BlockSpec((1, Cout), lambda i: (0, 0)),
        ],
        out_specs=pl.BlockSpec((1, L_out, Cout), lambda i: (i, 0, 0)),
        compiler_params=pltpu.CompilerParams(dimension_semantics=("parallel",)),
    )(cols, w2, b.reshape(1, Cout))
    return y.transpose(0, 2, 1)                                           # (B, Cout, L_out)


# ----------------------------------------------------------------------------
# Kernel 3: fused transformer-encoder STACK (all nlayers in one pallas_call).
# Grid over batch (attention is per-batch) -> parallel across v7x's 2 TCs.
# ----------------------------------------------------------------------------
def _layernorm(x, g, b, eps):
    mu = jnp.mean(x, axis=-1, keepdims=True)
    var = jnp.mean(jnp.square(x - mu), axis=-1, keepdims=True)
    return (x - mu) * jax.lax.rsqrt(var + eps) * g + b


def _encoder_stack_kernel(x_ref, w_in_ref, w_out_ref, w_ff1_ref, w_ff2_ref, vec_ref,
                          o_ref, *, nhead, eps):
    nlayers = w_in_ref.shape[0]
    _, S, E = x_ref.shape
    F = w_ff1_ref.shape[2]
    hd = E // nhead
    scale = 1.0 / math.sqrt(hd)

    h = x_ref[0]                                           # (S, E) f32
    for l in range(nlayers):
        w_in = w_in_ref[l]                                 # (E, 3E)
        w_out = w_out_ref[l]                               # (E, E)
        w_ff1 = w_ff1_ref[l]                               # (E, F)
        w_ff2 = w_ff2_ref[l]                               # (F, E)
        vec = vec_ref[l]                                   # (8, 128) packed biases/LN params
        b_in, b_out = vec[0:1, :3 * E], vec[1:2, :E]
        ln1_g, ln1_b = vec[2:3, :E], vec[3:4, :E]
        b_ff1, b_ff2 = vec[4:5, :F], vec[5:6, :E]
        ln2_g, ln2_b = vec[6:7, :E], vec[7:8, :E]

        # --- multi-head self-attention: all heads in-kernel, no extra launches.
        qkv = jnp.dot(h, w_in, preferred_element_type=jnp.float32) + b_in   # (S, 3E)
        attn = b_out                                                        # out-proj bias
        for n in range(nhead):
            c = n * hd
            q = qkv[:, c:c + hd] * scale
            k = qkv[:, E + c:E + c + hd]
            v = qkv[:, 2 * E + c:2 * E + c + hd]
            s = jax.lax.dot_general(q, k, (((1,), (1,)), ((), ())),
                                    preferred_element_type=jnp.float32)     # (S, S)
            s = s - jnp.max(s, axis=-1, keepdims=True)
            p = jnp.exp(s)
            p = p / jnp.sum(p, axis=-1, keepdims=True)
            ctx = jnp.dot(p, v, preferred_element_type=jnp.float32)         # (S, hd)
            # fold the output projection per head: concat(heads) @ w_out
            attn = attn + jnp.dot(ctx, w_out[c:c + hd, :],
                                  preferred_element_type=jnp.float32)
        h = _layernorm(h + attn, ln1_g, ln1_b, eps)

        # --- feed-forward (relu), post-norm (PyTorch norm_first=False).
        ff = jnp.maximum(jnp.dot(h, w_ff1, preferred_element_type=jnp.float32) + b_ff1, 0.0)
        ff = jnp.dot(ff, w_ff2, preferred_element_type=jnp.float32) + b_ff2
        h = _layernorm(h + ff, ln2_g, ln2_b, eps)
    o_ref[0] = h.astype(o_ref.dtype)


def encoder_stack(x, enc, *, nhead, eps=1e-5):
    """x: (B, S, E) batch-first (math-equivalent to the reference's (S, B, E))."""
    B, S, E = x.shape
    nlayers = enc["w_in"].shape[0]
    F = enc["w_ff1"].shape[2]
    return pl.pallas_call(
        functools.partial(_encoder_stack_kernel, nhead=nhead, eps=eps),
        out_shape=jax.ShapeDtypeStruct((B, S, E), x.dtype),
        grid=(B,),
        in_specs=[
            pl.BlockSpec((1, S, E), lambda i: (i, 0, 0)),
            pl.BlockSpec((nlayers, E, 3 * E), lambda i: (0, 0, 0)),
            pl.BlockSpec((nlayers, E, E), lambda i: (0, 0, 0)),
            pl.BlockSpec((nlayers, E, F), lambda i: (0, 0, 0)),
            pl.BlockSpec((nlayers, F, E), lambda i: (0, 0, 0)),
            pl.BlockSpec((nlayers, 8, 128), lambda i: (0, 0, 0)),
        ],
        out_specs=pl.BlockSpec((1, S, E), lambda i: (i, 0, 0)),
        compiler_params=pltpu.CompilerParams(dimension_semantics=("parallel",)),
    )(x, enc["w_in"], enc["w_out"], enc["w_ff1"], enc["w_ff2"], enc["vec"])


# ----------------------------------------------------------------------------
# Kernel 4: fused SelfAttentionPooling + decoder MLP (one call per branch).
# ----------------------------------------------------------------------------
def _pool_decoder_kernel(x_ref, pack_ref, *rest, B, n_lin):
    w_refs, o_ref = rest[:n_lin], rest[n_lin]
    E = x_ref.shape[2]
    pw = pack_ref[0:1, :E]                              # pooling weight (1, E)
    pb = pack_ref[1:2, 0:1]                             # pooling bias   (1, 1)
    ws = [w_refs[i][...] for i in range(n_lin)]
    biases = [pack_ref[2 + i:3 + i, :ws[i].shape[1]] for i in range(n_lin)]
    for b in range(B):
        xb = x_ref[b]                                   # (S, E)
        s = jnp.sum(xb * pw, axis=-1, keepdims=True) + pb       # (S, 1)
        s = s - jnp.max(s, axis=0, keepdims=True)
        a = jnp.exp(s)
        a = a / jnp.sum(a, axis=0, keepdims=True)               # softmax over seq
        h = jnp.sum(xb * a, axis=0, keepdims=True)              # (1, E) pooled
        for i in range(n_lin):
            # decoder Sequential: Linear chains (Dropout is identity in eval)
            h = jnp.dot(h, ws[i], preferred_element_type=jnp.float32) + biases[i]
        o_ref[b:b + 1, :] = h.astype(o_ref.dtype)


def pool_and_decode(x, pd):
    B, S, E = x.shape
    ws = pd["ws"]
    pack = pd["pack"]
    n_lin = len(ws)
    out_dim = ws[-1].shape[1]
    in_specs = [pl.BlockSpec((B, S, E), lambda i: (0, 0, 0)),
                pl.BlockSpec(pack.shape, lambda i: (0, 0))]
    for w in ws:
        in_specs.append(pl.BlockSpec(w.shape, lambda i: (0, 0)))
    return pl.pallas_call(
        functools.partial(_pool_decoder_kernel, B=B, n_lin=n_lin),
        out_shape=jax.ShapeDtypeStruct((B, out_dim), x.dtype),
        grid=(1,),
        in_specs=in_specs,
        out_specs=pl.BlockSpec((B, out_dim), lambda i: (0, 0)),
    )(x, pack, *ws)


# ----------------------------------------------------------------------------
# Kernel 5: fused head:  cat(logits, logits2) -> fc_out1 -> relu -> fc_out2.
# The concat is folded into a split matmul over fc_out1's input dim.
# ----------------------------------------------------------------------------
def _head_kernel(l1_ref, l2_ref, w1_ref, b1_ref, w2_ref, b2_ref, o_ref):
    l1, l2 = l1_ref[...], l2_ref[...]
    w1 = w1_ref[...]
    d1 = l1.shape[1]
    h = (jnp.dot(l1, w1[:d1, :], preferred_element_type=jnp.float32)
         + jnp.dot(l2, w1[d1:, :], preferred_element_type=jnp.float32)
         + b1_ref[...])
    h = jnp.maximum(h, 0.0)
    # TODO(synk): dropout(p=0.1) between relu and fc_out2 is identity (eval mode).
    o_ref[...] = (jnp.dot(h, w2_ref[...], preferred_element_type=jnp.float32)
                  + b2_ref[...]).astype(o_ref.dtype)


def head(l1, l2, head_params):
    (w1, b1), (w2, b2) = head_params
    B = l1.shape[0]
    n_out = w2.shape[1]
    b1_2d, b2_2d = b1.reshape(1, -1), b2.reshape(1, -1)

    def full2d(a):
        return pl.BlockSpec(a.shape, lambda i: (0, 0))

    return pl.pallas_call(
        _head_kernel,
        out_shape=jax.ShapeDtypeStruct((B, n_out), l1.dtype),
        grid=(1,),
        in_specs=[full2d(l1), full2d(l2), full2d(w1), full2d(b1_2d),
                  full2d(w2), full2d(b2_2d)],
        out_specs=pl.BlockSpec((B, n_out), lambda i: (0, 0)),
    )(l1, l2, w1, b1_2d, w2, b2_2d)


# ----------------------------------------------------------------------------
# XLA glue: maxpool, positional-encoding table (precomputed at init).
# ----------------------------------------------------------------------------
def maxpool1d(x):
    B, C, L = x.shape
    L2 = L // 2
    return jnp.max(x[:, :, :L2 * 2].reshape(B, C, L2, 2), axis=-1)


def positional_encoding_table(d, max_len=5000):
    assert d % 2 == 0, "PE dim must be even (matches PyTorch 0::2/1::2 layout)"
    position = jnp.arange(max_len, dtype=jnp.float32)[:, None]
    div_term = jnp.exp(jnp.arange(0, d, 2, dtype=jnp.float32) * (-math.log(10000.0) / d))
    angles = position * div_term
    return jnp.stack([jnp.sin(angles), jnp.cos(angles)], axis=-1).reshape(max_len, d)


def add_positional_encoding(x, pe):
    # Faithful to the reference: PE applied to the conv output (B, C, L) as
    # x + pe[:x.size(0)] -> indexes by batch, broadcasts over channels.
    B, C, L = x.shape
    return x + pe[:B][:, None, :]


# ----------------------------------------------------------------------------
# Parameters (deterministic synthetic init; shapes follow the nn.Module).
# Biases / LN params are pre-packed into 128-lane rows for the fused kernels.
# ----------------------------------------------------------------------------
def init_params(key, d_model=32, nhead=4, dim_ff=64, nlayers=2, pe_d1=8, pe_d2=6):
    assert 3 * d_model <= 128 and dim_ff <= 128, "bias packing assumes <=128 lanes"
    keys = iter(jax.random.split(key, 64))

    def lin(fan_in, fan_out):
        bound = 1.0 / math.sqrt(fan_in)
        w = jax.random.uniform(next(keys), (fan_in, fan_out), jnp.float32, -bound, bound)
        return w, jnp.zeros((fan_out,), jnp.float32)

    def conv(cin, cout, ksz):
        bound = 1.0 / math.sqrt(cin * ksz)
        w = jax.random.uniform(next(keys), (cout, cin, ksz), jnp.float32, -bound, bound)
        return w, jnp.zeros((cout,), jnp.float32)

    def row128(v):
        v = jnp.asarray(v, jnp.float32).reshape(-1)
        return jnp.pad(v, (0, 128 - v.shape[0]))[None, :]

    p = {}
    p["conv1"] = conv(1, 128, 3)
    p["conv2"] = conv(128, d_model, 3)
    p["conv"] = conv(d_model, d_model, 3)
    p["conv1_rri"] = conv(1, 128, 3)
    p["conv2_rri"] = conv(128, d_model, 3)

    # One encoder-layer init re-used for every layer of both encoders (matches
    # TransformerEncoder deep-copying the single encoder_layers object).
    w_in, b_in = lin(d_model, 3 * d_model)
    w_out, b_out = lin(d_model, d_model)
    w_ff1, b_ff1 = lin(d_model, dim_ff)
    w_ff2, b_ff2 = lin(dim_ff, d_model)
    ones = jnp.ones((d_model,), jnp.float32)
    zeros = jnp.zeros((d_model,), jnp.float32)
    vec = jnp.concatenate([row128(b_in), row128(b_out), row128(ones), row128(zeros),
                           row128(b_ff1), row128(b_ff2), row128(ones), row128(zeros)],
                          axis=0)                                        # (8, 128)

    def stack(a):
        return jnp.stack([a] * nlayers, axis=0)

    enc = dict(w_in=stack(w_in), w_out=stack(w_out), w_ff1=stack(w_ff1),
               w_ff2=stack(w_ff2), vec=stack(vec))
    p["enc1"] = enc
    p["enc2"] = dict(enc)

    def pool_dec(linears):
        pw, pb = lin(d_model, 1)            # SelfAttentionPooling: nn.Linear(d, 1)
        rows = [row128(pw.reshape(-1)), row128(pb)] + [row128(b) for (_, b) in linears]
        return {"pack": jnp.concatenate(rows, axis=0), "ws": [w for (w, _) in linears]}

    p["pool_dec1"] = pool_dec([lin(d_model, d_model), lin(d_model, d_model),
                               lin(d_model, 64)])
    p["pool_dec2"] = pool_dec([lin(d_model, d_model), lin(d_model, 64)])
    p["head"] = (lin(64 + 64, 64), lin(64, 1))

    # PE tables hoisted out of forward (perf review): computed once at init.
    p["pe1"] = positional_encoding_table(pe_d1)
    p["pe2"] = positional_encoding_table(pe_d2)
    return p


# ----------------------------------------------------------------------------
# Forward pass (mirrors TransformerModel.forward; all dropout = identity).
# TODO(synk): training-mode dropout (p=0.5 / 0.1) not implemented; eval semantics.
# ----------------------------------------------------------------------------
def forward(params, src, src2, *, nhead, n_conv_layers):
    # ---- ECG branch ----
    x = src.reshape(-1, 1, src.shape[1])                    # (B, 1, L)
    x = conv1d_cin1(x, *params["conv1"])
    x = conv1d_im2col(x, *params["conv2"], padding=1)
    for _ in range(n_conv_layers):
        x = conv1d_im2col(x, *params["conv"], padding=0)
        x = maxpool1d(x)
    x = add_positional_encoding(x, params["pe1"])
    # batch-first (B, S, E) is mathematically identical to the reference's
    # permute(2, 0, 1) seq-first layout; only memory layout differs.
    x = jnp.transpose(x, (0, 2, 1))
    x = encoder_stack(x, params["enc1"], nhead=nhead)
    logits = pool_and_decode(x, params["pool_dec1"])        # (B, 64)

    # ---- RRI branch ----
    y = src2.reshape(-1, 1, src2.shape[1])
    y = conv1d_cin1(y, *params["conv1_rri"])
    y = conv1d_im2col(y, *params["conv2_rri"], padding=0)
    y = add_positional_encoding(y, params["pe2"])
    y = jnp.transpose(y, (0, 2, 1))
    y = encoder_stack(y, params["enc2"], nhead=nhead)
    logits2 = pool_and_decode(y, params["pool_dec2"])       # (B, 64)

    # ---- fused head: concat + fc_out1 + relu + fc_out2 ----
    return head(logits, logits2, params["head"])            # (B, 1)


if __name__ == "__main__":
    d_model, nhead, dim_ff, nlayers, n_conv_layers = 32, 4, 64, 2, 2
    B = 2
    L_ECG = 40   # -> post-conv seq length 8 (real data gives 748, hence PE(748))
    L_RRI = 10   # -> post-conv seq length 6 (matches PositionalEncoding(6))

    key = jax.random.PRNGKey(0)
    k_src, k_src2, k_par = jax.random.split(key, 3)
    src = jax.random.normal(k_src, (B, L_ECG), jnp.float32)
    src2 = jax.random.normal(k_src2, (B, L_RRI), jnp.float32)
    params = init_params(k_par, d_model, nhead, dim_ff, nlayers, pe_d1=8, pe_d2=6)

    fwd = jax.jit(functools.partial(forward, nhead=nhead, n_conv_layers=n_conv_layers))
    out = fwd(params, src, src2)
    jax.block_until_ready(out)
    assert out.shape == (B, 1) and out.dtype == jnp.float32
    print("KERNEL_OK")
</pallas_src>

<mosaic_0001>
module attributes {stable_mosaic.version = 11 : i64} {
  func.func @_conv1_sa_kernel(%arg0: i32, %arg1: memref<1x1x40xf32, #tpu.memory_space<vmem>>, %arg2: memref<128x3xf32, #tpu.memory_space<vmem>>, %arg3: memref<128x1xf32, #tpu.memory_space<vmem>>, %arg4: memref<1x128x38xf32, #tpu.memory_space<vmem>>) attributes {dimension_semantics = [#tpu.dimension_semantics<parallel>], iteration_bounds = array<i64: 2>, scalar_prefetch = 0 : i64, scratch_operands = 0 : i64, tpu.core_type = #tpu.core_type<tc>, window_params = [{transform_indices = @transform_0, window_bounds = array<i64: 1, 1, 40>}, {pipeline_mode = #tpu.pipeline_mode<synchronous>, transform_indices = @transform_1, window_bounds = array<i64: 128, 3>}, {pipeline_mode = #tpu.pipeline_mode<synchronous>, transform_indices = @transform_2, window_bounds = array<i64: 128, 1>}, {transform_indices = @transform_3, window_bounds = array<i64: 1, 128, 38>}]} {
    %c0 = arith.constant 0 : index
    %c0_0 = arith.constant 0 : index
    %c0_1 = arith.constant 0 : index
    %0 = vector.load %arg1[%c0, %c0_0, %c0_1] : memref<1x1x40xf32, #tpu.memory_space<vmem>>, vector<1x1x40xf32>
    %1 = vector.shape_cast %0 : vector<1x1x40xf32> to vector<1x40xf32>
    %c0_2 = arith.constant 0 : index
    %c0_3 = arith.constant 0 : index
    %2 = vector.load %arg2[%c0_2, %c0_3] : memref<128x3xf32, #tpu.memory_space<vmem>>, vector<128x3xf32>
    %3 = vector.extract_strided_slice %2 {offsets = [0, 0], sizes = [128, 1], strides = [1, 1]} : vector<128x3xf32> to vector<128x1xf32>
    %4 = vector.extract_strided_slice %1 {offsets = [0, 0], sizes = [1, 38], strides = [1, 1]} : vector<1x40xf32> to vector<1x38xf32>
    %5 = vector.broadcast %3 : vector<128x1xf32> to vector<128x38xf32>
    %6 = vector.broadcast %4 : vector<1x38xf32> to vector<128x38xf32>
    %7 = arith.mulf %5, %6 : vector<128x38xf32>
    %8 = vector.extract_strided_slice %2 {offsets = [0, 1], sizes = [128, 1], strides = [1, 1]} : vector<128x3xf32> to vector<128x1xf32>
    %9 = vector.extract_strided_slice %1 {offsets = [0, 1], sizes = [1, 38], strides = [1, 1]} : vector<1x40xf32> to vector<1x38xf32>
    %10 = vector.broadcast %8 : vector<128x1xf32> to vector<128x38xf32>
    %11 = vector.broadcast %9 : vector<1x38xf32> to vector<128x38xf32>
    %12 = arith.mulf %10, %11 : vector<128x38xf32>
    %13 = arith.addf %7, %12 : vector<128x38xf32>
    %14 = vector.extract_strided_slice %2 {offsets = [0, 2], sizes = [128, 1], strides = [1, 1]} : vector<128x3xf32> to vector<128x1xf32>
    %15 = vector.extract_strided_slice %1 {offsets = [0, 2], sizes = [1, 38], strides = [1, 1]} : vector<1x40xf32> to vector<1x38xf32>
    %16 = vector.broadcast %14 : vector<128x1xf32> to vector<128x38xf32>
    %17 = vector.broadcast %15 : vector<1x38xf32> to vector<128x38xf32>
    %18 = arith.mulf %16, %17 : vector<128x38xf32>
    %19 = arith.addf %13, %18 : vector<128x38xf32>
    %c0_4 = arith.constant 0 : index
    %c0_5 = arith.constant 0 : index
    %20 = vector.load %arg3[%c0_4, %c0_5] : memref<128x1xf32, #tpu.memory_space<vmem>>, vector<128x1xf32>
    %21 = vector.broadcast %20 : vector<128x1xf32> to vector<128x38xf32>
    %22 = arith.addf %19, %21 : vector<128x38xf32>
    %cst = arith.constant 0.000000e+00 : f32
    %23 = vector.broadcast %cst : f32 to vector<128x38xf32>
    %24 = arith.maximumf %22, %23 : vector<128x38xf32>
    %c0_6 = arith.constant 0 : index
    %c0_7 = arith.constant 0 : index
    %c0_8 = arith.constant 0 : index
    %25 = vector.load %arg4[%c0_6, %c0_7, %c0_8] : memref<1x128x38xf32, #tpu.memory_space<vmem>>, vector<1x128x38xf32>
    %26 = vector.shape_cast %25 : vector<1x128x38xf32> to vector<128x38xf32>
    %27 = vector.shape_cast %24 : vector<128x38xf32> to vector<1x128x38xf32>
    tpu.vector_store %arg4[%c0_6, %c0_7, %c0_8], %27 {strides = array<i32>} : memref<1x128x38xf32, #tpu.memory_space<vmem>>, vector<1x128x38xf32>,
    return
  }
  func.func @transform_0(%arg0: i32) -> (i32, i32, i32) {
    %c0_i32 = arith.constant 0 : i32
    %c0_i32_0 = arith.constant 0 : i32
    %c0_i32_1 = arith.constant 0 : i32
    return %arg0, %c0_i32, %c0_i32_0 : i32, i32, i32
  }
  func.func @transform_1(%arg0: i32) -> (i32, i32) {
    %c0_i32 = arith.constant 0 : i32
    %c0_i32_0 = arith.constant 0 : i32
    %c0_i32_1 = arith.constant 0 : i32
    return %c0_i32, %c0_i32_0 : i32, i32
  }
  func.func @transform_2(%arg0: i32) -> (i32, i32) {
    %c0_i32 = arith.constant 0 : i32
    %c0_i32_0 = arith.constant 0 : i32
    %c0_i32_1 = arith.constant 0 : i32
    return %c0_i32, %c0_i32_0 : i32, i32
  }
  func.func @transform_3(%arg0: i32) -> (i32, i32, i32) {
    %c0_i32 = arith.constant 0 : i32
    %c0_i32_0 = arith.constant 0 : i32
    %c0_i32_1 = arith.constant 0 : i32
    return %arg0, %c0_i32, %c0_i32_0 : i32, i32, i32
  }
}

module attributes {stable_mosaic.version = 11 : i64} {
  func.func @_conv_mm_kernel(%arg0: i32, %arg1: memref<1x38x384xf32, #tpu.memory_space<vmem>>, %arg2: memref<384x32xf32, #tpu.memory_space<vmem>>, %arg3: memref<1x32xf32, #tpu.memory_space<vmem>>, %arg4: memref<1x38x32xf32, #tpu.memory_space<vmem>>) attributes {dimension_semantics = [#tpu.dimension_semantics<parallel>], iteration_bounds = array<i64: 2>, scalar_prefetch = 0 : i64, scratch_operands = 0 : i64, tpu.core_type = #tpu.core_type<tc>, window_params = [{transform_indices = @transform_0, window_bounds = array<i64: 1, 38, 384>}, {pipeline_mode = #tpu.pipeline_mode<synchronous>, transform_indices = @transform_1, window_bounds = array<i64: 384, 32>}, {pipeline_mode = #tpu.pipeline_mode<synchronous>, transform_indices = @transform_2, window_bounds = array<i64: 1, 32>}, {transform_indices = @transform_3, window_bounds = array<i64: 1, 38, 32>}]} {
    %c0 = arith.constant 0 : index
    %c0_0 = arith.constant 0 : index
    %c0_1 = arith.constant 0 : index
    %0 = vector.load %arg1[%c0, %c0_0, %c0_1] : memref<1x38x384xf32, #tpu.memory_space<vmem>>, vector<1x38x384xf32>
    %1 = vector.shape_cast %0 : vector<1x38x384xf32> to vector<38x384xf32>
    %c0_2 = arith.constant 0 : index
    %c0_3 = arith.constant 0 : index
    %2 = vector.load %arg2[%c0_2, %c0_3] : memref<384x32xf32, #tpu.memory_space<vmem>>, vector<384x32xf32>
    %cst = arith.constant dense<0.000000e+00> : vector<38x32xf32>
    %3 = tpu.matmul %1, %2, %cst {dimension_numbers = #tpu.dot_dimension_numbers<[1], [0], [0], [1], [0, 0, 1, 1], [], []>} : vector<38x384xf32>, vector<384x32xf32>, vector<38x32xf32> -> vector<38x32xf32>
    %c0_4 = arith.constant 0 : index
    %c0_5 = arith.constant 0 : index
    %4 = vector.load %arg3[%c0_4, %c0_5] : memref<1x32xf32, #tpu.memory_space<vmem>>, vector<1x32xf32>
    %5 = vector.broadcast %4 : vector<1x32xf32> to vector<38x32xf32>
    %6 = arith.addf %3, %5 : vector<38x32xf32>
    %cst_6 = arith.constant 0.000000e+00 : f32
    %7 = vector.broadcast %cst_6 : f32 to vector<38x32xf32>
    %8 = arith.maximumf %6, %7 : vector<38x32xf32>
    %c0_7 = arith.constant 0 : index
    %c0_8 = arith.constant 0 : index
    %c0_9 = arith.constant 0 : index
    %9 = vector.load %arg4[%c0_7, %c0_8, %c0_9] : memref<1x38x32xf32, #tpu.memory_space<vmem>>, vector<1x38x32xf32>
    %10 = vector.shape_cast %9 : vector<1x38x32xf32> to vector<38x32xf32>
    %11 = vector.shape_cast %8 : vector<38x32xf32> to vector<1x38x32xf32>
    tpu.vector_store %arg4[%c0_7, %c0_8, %c0_9], %11 {strides = array<i32>} : memref<1x38x32xf32, #tpu.memory_space<vmem>>, vector<1x38x32xf32>,
    return
  }
  func.func @transform_0(%arg0: i32) -> (i32, i32, i32) {
    %c0_i32 = arith.constant 0 : i32
    %c0_i32_0 = arith.constant 0 : i32
    %c0_i32_1 = arith.constant 0 : i32
    return %arg0, %c0_i32, %c0_i32_0 : i32, i32, i32
  }
  func.func @transform_1(%arg0: i32) -> (i32, i32) {
    %c0_i32 = arith.constant 0 : i32
    %c0_i32_0 = arith.constant 0 : i32
    %c0_i32_1 = arith.constant 0 : i32
    return %c0_i32, %c0_i32_0 : i32, i32
  }
  func.func @transform_2(%arg0: i32) -> (i32, i32) {
    %c0_i32 = arith.constant 0 : i32
    %c0_i32_0 = arith.constant 0 : i32
    %c0_i32_1 = arith.constant 0 : i32
    return %c0_i32, %c0_i32_0 : i32, i32
  }
  func.func @transform_3(%arg0: i32) -> (i32, i32, i32) {
    %c0_i32 = arith.constant 0 : i32
    %c0_i32_0 = arith.constant 0 : i32
    %c0_i32_1 = arith.constant 0 : i32
    return %arg0, %c0_i32, %c0_i32_0 : i32, i32, i32
  }
}

module attributes {stable_mosaic.version = 11 : i64} {
  func.func @_conv_mm_kernel(%arg0: i32, %arg1: memref<1x36x96xf32, #tpu.memory_space<vmem>>, %arg2: memref<96x32xf32, #tpu.memory_space<vmem>>, %arg3: memref<1x32xf32, #tpu.memory_space<vmem>>, %arg4: memref<1x36x32xf32, #tpu.memory_space<vmem>>) attributes {dimension_semantics = [#tpu.dimension_semantics<parallel>], iteration_bounds = array<i64: 2>, scalar_prefetch = 0 : i64, scratch_operands = 0 : i64, tpu.core_type = #tpu.core_type<tc>, window_params = [{transform_indices = @transform_0, window_bounds = array<i64: 1, 36, 96>}, {pipeline_mode = #tpu.pipeline_mode<synchronous>, transform_indices = @transform_1, window_bounds = array<i64: 96, 32>}, {pipeline_mode = #tpu.pipeline_mode<synchronous>, transform_indices = @transform_2, window_bounds = array<i64: 1, 32>}, {transform_indices = @transform_3, window_bounds = array<i64: 1, 36, 32>}]} {
    %c0 = arith.constant 0 : index
    %c0_0 = arith.constant 0 : index
    %c0_1 = arith.constant 0 : index
    %0 = vector.load %arg1[%c0, %c0_0, %c0_1] : memref<1x36x96xf32, #tpu.memory_space<vmem>>, vector<1x36x96xf32>
    %1 = vector.shape_cast %0 : vector<1x36x96xf32> to vector<36x96xf32>
    %c0_2 = arith.constant 0 : index
    %c0_3 = arith.constant 0 : index
    %2 = vector.load %arg2[%c0_2, %c0_3] : memref<96x32xf32, #tpu.memory_space<vmem>>, vector<96x32xf32>
    %cst = arith.constant dense<0.000000e+00> : vector<36x32xf32>
    %3 = tpu.matmul %1, %2, %cst {dimension_numbers = #tpu.dot_dimension_numbers<[1], [0], [0], [1], [0, 0, 1, 1], [], []>} : vector<36x96xf32>, vector<96x32xf32>, vector<36x32xf32> -> vector<36x32xf32>
    %c0_4 = arith.constant 0 : index
    %c0_5 = arith.constant 0 : index
    %4 = vector.load %arg3[%c0_4, %c0_5] : memref<1x32xf32, #tpu.memory_space<vmem>>, vector<1x32xf32>
    %5 = vector.broadcast %4 : vector<1x32xf32> to vector<36x32xf32>
    %6 = arith.addf %3, %5 : vector<36x32xf32>
    %cst_6 = arith.constant 0.000000e+00 : f32
    %7 = vector.broadcast %cst_6 : f32 to vector<36x32xf32>
    %8 = arith.maximumf %6, %7 : vector<36x32xf32>
    %c0_7 = arith.constant 0 : index
    %c0_8 = arith.constant 0 : index
    %c0_9 = arith.constant 0 : index
    %9 = vector.load %arg4[%c0_7, %c0_8, %c0_9] : memref<1x36x32xf32, #tpu.memory_space<vmem>>, vector<1x36x32xf32>
    %10 = vector.shape_cast %9 : vector<1x36x32xf32> to vector<36x32xf32>
    %11 = vector.shape_cast %8 : vector<36x32xf32> to vector<1x36x32xf32>
    tpu.vector_store %arg4[%c0_7, %c0_8, %c0_9], %11 {strides = array<i32>} : memref<1x36x32xf32, #tpu.memory_space<vmem>>, vector<1x36x32xf32>,
    return
  }
  func.func @transform_0(%arg0: i32) -> (i32, i32, i32) {
    %c0_i32 = arith.constant 0 : i32
    %c0_i32_0 = arith.constant 0 : i32
    %c0_i32_1 = arith.constant 0 : i32
    return %arg0, %c0_i32, %c0_i32_0 : i32, i32, i32
  }
  func.func @transform_1(%arg0: i32) -> (i32, i32) {
    %c0_i32 = arith.constant 0 : i32
    %c0_i32_0 = arith.constant 0 : i32
    %c0_i32_1 = arith.constant 0 : i32
    return %c0_i32, %c0_i32_0 : i32, i32
  }
  func.func @transform_2(%arg0: i32) -> (i32, i32) {
    %c0_i32 = arith.constant 0 : i32
    %c0_i32_0 = arith.constant 0 : i32
    %c0_i32_1 = arith.constant 0 : i32
    return %c0_i32, %c0_i32_0 : i32, i32
  }
  func.func @transform_3(%arg0: i32) -> (i32, i32, i32) {
    %c0_i32 = arith.constant 0 : i32
    %c0_i32_0 = arith.constant 0 : i32
    %c0_i32_1 = arith.constant 0 : i32
    return %arg0, %c0_i32, %c0_i32_0 : i32, i32, i32
  }
}

module attributes {stable_mosaic.version = 11 : i64} {
  func.func @_conv_mm_kernel(%arg0: i32, %arg1: memref<1x16x96xf32, #tpu.memory_space<vmem>>, %arg2: memref<96x32xf32, #tpu.memory_space<vmem>>, %arg3: memref<1x32xf32, #tpu.memory_space<vmem>>, %arg4: memref<1x16x32xf32, #tpu.memory_space<vmem>>) attributes {dimension_semantics = [#tpu.dimension_semantics<parallel>], iteration_bounds = array<i64: 2>, scalar_prefetch = 0 : i64, scratch_operands = 0 : i64, tpu.core_type = #tpu.core_type<tc>, window_params = [{transform_indices = @transform_0, window_bounds = array<i64: 1, 16, 96>}, {pipeline_mode = #tpu.pipeline_mode<synchronous>, transform_indices = @transform_1, window_bounds = array<i64: 96, 32>}, {pipeline_mode = #tpu.pipeline_mode<synchronous>, transform_indices = @transform_2, window_bounds = array<i64: 1, 32>}, {transform_indices = @transform_3, window_bounds = array<i64: 1, 16, 32>}]} {
    %c0 = arith.constant 0 : index
    %c0_0 = arith.constant 0 : index
    %c0_1 = arith.constant 0 : index
    %0 = vector.load %arg1[%c0, %c0_0, %c0_1] : memref<1x16x96xf32, #tpu.memory_space<vmem>>, vector<1x16x96xf32>
    %1 = vector.shape_cast %0 : vector<1x16x96xf32> to vector<16x96xf32>
    %c0_2 = arith.constant 0 : index
    %c0_3 = arith.constant 0 : index
    %2 = vector.load %arg2[%c0_2, %c0_3] : memref<96x32xf32, #tpu.memory_space<vmem>>, vector<96x32xf32>
    %cst = arith.constant dense<0.000000e+00> : vector<16x32xf32>
    %3 = tpu.matmul %1, %2, %cst {dimension_numbers = #tpu.dot_dimension_numbers<[1], [0], [0], [1], [0, 0, 1, 1], [], []>} : vector<16x96xf32>, vector<96x32xf32>, vector<16x32xf32> -> vector<16x32xf32>
    %c0_4 = arith.constant 0 : index
    %c0_5 = arith.constant 0 : index
    %4 = vector.load %arg3[%c0_4, %c0_5] : memref<1x32xf32, #tpu.memory_space<vmem>>, vector<1x32xf32>
    %5 = vector.broadcast %4 : vector<1x32xf32> to vector<16x32xf32>
    %6 = arith.addf %3, %5 : vector<16x32xf32>
    %cst_6 = arith.constant 0.000000e+00 : f32
    %7 = vector.broadcast %cst_6 : f32 to vector<16x32xf32>
    %8 = arith.maximumf %6, %7 : vector<16x32xf32>
    %c0_7 = arith.constant 0 : index
    %c0_8 = arith.constant 0 : index
    %c0_9 = arith.constant 0 : index
    %9 = vector.load %arg4[%c0_7, %c0_8, %c0_9] : memref<1x16x32xf32, #tpu.memory_space<vmem>>, vector<1x16x32xf32>
    %10 = vector.shape_cast %9 : vector<1x16x32xf32> to vector<16x32xf32>
    %11 = vector.shape_cast %8 : vector<16x32xf32> to vector<1x16x32xf32>
    tpu.vector_store %arg4[%c0_7, %c0_8, %c0_9], %11 {strides = array<i32>} : memref<1x16x32xf32, #tpu.memory_space<vmem>>, vector<1x16x32xf32>,
    return
  }
  func.func @transform_0(%arg0: i32) -> (i32, i32, i32) {
    %c0_i32 = arith.constant 0 : i32
    %c0_i32_0 = arith.constant 0 : i32
    %c0_i32_1 = arith.constant 0 : i32
    return %arg0, %c0_i32, %c0_i32_0 : i32, i32, i32
  }
  func.func @transform_1(%arg0: i32) -> (i32, i32) {
    %c0_i32 = arith.constant 0 : i32
    %c0_i32_0 = arith.constant 0 : i32
    %c0_i32_1 = arith.constant 0 : i32
    return %c0_i32, %c0_i32_0 : i32, i32
  }
  func.func @transform_2(%arg0: i32) -> (i32, i32) {
    %c0_i32 = arith.constant 0 : i32
    %c0_i32_0 = arith.constant 0 : i32
    %c0_i32_1 = arith.constant 0 : i32
    return %c0_i32, %c0_i32_0 : i32, i32
  }
  func.func @transform_3(%arg0: i32) -> (i32, i32, i32) {
    %c0_i32 = arith.constant 0 : i32
    %c0_i32_0 = arith.constant 0 : i32
    %c0_i32_1 = arith.constant 0 : i32
    return %arg0, %c0_i32, %c0_i32_0 : i32, i32, i32
  }
}

module attributes {stable_mosaic.version = 11 : i64} {
  func.func @_pool_decoder_kernel(%arg0: i32, %arg1: memref<2x8x32xf32, #tpu.memory_space<vmem>>, %arg2: memref<5x128xf32, #tpu.memory_space<vmem>>, %arg3: memref<32x32xf32, #tpu.memory_space<vmem>>, %arg4: memref<32x32xf32, #tpu.memory_space<vmem>>, %arg5: memref<32x64xf32, #tpu.memory_space<vmem>>, %arg6: memref<2x64xf32, #tpu.memory_space<vmem>>) attributes {dimension_semantics = [#tpu.dimension_semantics<arbitrary>], iteration_bounds = array<i64: 1>, scalar_prefetch = 0 : i64, scratch_operands = 0 : i64, tpu.core_type = #tpu.core_type<tc>, window_params = [{pipeline_mode = #tpu.pipeline_mode<synchronous>, transform_indices = @transform_0, window_bounds = array<i64: 2, 8, 32>}, {pipeline_mode = #tpu.pipeline_mode<synchronous>, transform_indices = @transform_1, window_bounds = array<i64: 5, 128>}, {pipeline_mode = #tpu.pipeline_mode<synchronous>, transform_indices = @transform_2, window_bounds = array<i64: 32, 32>}, {pipeline_mode = #tpu.pipeline_mode<synchronous>, transform_indices = @transform_3, window_bounds = array<i64: 32, 32>}, {pipeline_mode = #tpu.pipeline_mode<synchronous>, transform_indices = @transform_4, window_bounds = array<i64: 32, 64>}, {pipeline_mode = #tpu.pipeline_mode<synchronous>, transform_indices = @transform_5, window_bounds = array<i64: 2, 64>}]} {
    %c0 = arith.constant 0 : index
    %c0_0 = arith.constant 0 : index
    %0 = vector.load %arg2[%c0, %c0_0] : memref<5x128xf32, #tpu.memory_space<vmem>>, vector<1x32xf32>
    %c1 = arith.constant 1 : index
    %c0_1 = arith.constant 0 : index
    %1 = vector.load %arg2[%c1, %c0_1] : memref<5x128xf32, #tpu.memory_space<vmem>>, vector<1x1xf32>
    %c0_2 = arith.constant 0 : index
    %c0_3 = arith.constant 0 : index
    %2 = vector.load %arg3[%c0_2, %c0_3] : memref<32x32xf32, #tpu.memory_space<vmem>>, vector<32x32xf32>
    %c0_4 = arith.constant 0 : index
    %c0_5 = arith.constant 0 : index
    %3 = vector.load %arg4[%c0_4, %c0_5] : memref<32x32xf32, #tpu.memory_space<vmem>>, vector<32x32xf32>
    %c0_6 = arith.constant 0 : index
    %c0_7 = arith.constant 0 : index
    %4 = vector.load %arg5[%c0_6, %c0_7] : memref<32x64xf32, #tpu.memory_space<vmem>>, vector<32x64xf32>
    %c2 = arith.constant 2 : index
    %c0_8 = arith.constant 0 : index
    %5 = vector.load %arg2[%c2, %c0_8] : memref<5x128xf32, #tpu.memory_space<vmem>>, vector<1x32xf32>
    %c3 = arith.constant 3 : index
    %c0_9 = arith.constant 0 : index
    %6 = vector.load %arg2[%c3, %c0_9] : memref<5x128xf32, #tpu.memory_space<vmem>>, vector<1x32xf32>
    %c4 = arith.constant 4 : index
    %c0_10 = arith.constant 0 : index
    %7 = vector.load %arg2[%c4, %c0_10] : memref<5x128xf32, #tpu.memory_space<vmem>>, vector<1x64xf32>
    %c0_11 = arith.constant 0 : index
    %c0_12 = arith.constant 0 : index
    %c0_13 = arith.constant 0 : index
    %8 = vector.load %arg1[%c0_11, %c0_12, %c0_13] : memref<2x8x32xf32, #tpu.memory_space<vmem>>, vector<1x8x32xf32>
    %9 = vector.shape_cast %8 : vector<1x8x32xf32> to vector<8x32xf32>
    %10 = vector.broadcast %0 : vector<1x32xf32> to vector<8x32xf32>
    %11 = arith.mulf %9, %10 : vector<8x32xf32>
    %cst = arith.constant dense<0.000000e+00> : vector<8xf32>
    %12 = vector.multi_reduction <add>, %11, %cst [1] : vector<8x32xf32> to vector<8xf32>
    %13 = vector.shape_cast %12 : vector<8xf32> to vector<8x1xf32>
    %14 = vector.broadcast %1 : vector<1x1xf32> to vector<8x1xf32>
    %15 = arith.addf %13, %14 : vector<8x1xf32>
    %cst_14 = arith.constant dense<0xFF800000> : vector<1xf32>
    %16 = vector.multi_reduction <maximumf>, %15, %cst_14 [0] : vector<8x1xf32> to vector<1xf32>
    %17 = vector.shape_cast %16 : vector<1xf32> to vector<1x1xf32>
    %18 = vector.broadcast %17 : vector<1x1xf32> to vector<8x1xf32>
    %19 = arith.subf %15, %18 : vector<8x1xf32>
    %20 = math.exp %19 : vector<8x1xf32>
    %cst_15 = arith.constant dense<0.000000e+00> : vector<1xf32>
    %21 = vector.multi_reduction <add>, %20, %cst_15 [0] : vector<8x1xf32> to vector<1xf32>
    %22 = vector.shape_cast %21 : vector<1xf32> to vector<1x1xf32>
    %23 = vector.broadcast %22 : vector<1x1xf32> to vector<8x1xf32>
    %24 = arith.divf %20, %23 : vector<8x1xf32>
    %25 = vector.broadcast %24 : vector<8x1xf32> to vector<8x32xf32>
    %26 = arith.mulf %9, %25 : vector<8x32xf32>
    %cst_16 = arith.constant dense<0.000000e+00> : vector<32xf32>
    %27 = vector.multi_reduction <add>, %26, %cst_16 [0] : vector<8x32xf32> to vector<32xf32>
    %28 = vector.shape_cast %27 : vector<32xf32> to vector<1x32xf32>
    %cst_17 = arith.constant dense<0.000000e+00> : vector<1x32xf32>
    %29 = tpu.matmul %28, %2, %cst_17 {dimension_numbers = #tpu.dot_dimension_numbers<[1], [0], [0], [1], [0, 0, 1, 1], [], []>} : vector<1x32xf32>, vector<32x32xf32>, vector<1x32xf32> -> vector<1x32xf32>
    %30 = arith.addf %29, %5 : vector<1x32xf32>
    %cst_18 = arith.constant dense<0.000000e+00> : vector<1x32xf32>
    %31 = tpu.matmul %30, %3, %cst_18 {dimension_numbers = #tpu.dot_dimension_numbers<[1], [0], [0], [1], [0, 0, 1, 1], [], []>} : vector<1x32xf32>, vector<32x32xf32>, vector<1x32xf32> -> vector<1x32xf32>
    %32 = arith.addf %31, %6 : vector<1x32xf32>
    %cst_19 = arith.constant dense<0.000000e+00> : vector<1x64xf32>
    %33 = tpu.matmul %32, %4, %cst_19 {dimension_numbers = #tpu.dot_dimension_numbers<[1], [0], [0], [1], [0, 0, 1, 1], [], []>} : vector<1x32xf32>, vector<32x64xf32>, vector<1x64xf32> -> vector<1x64xf32>
    %34 = arith.addf %33, %7 : vector<1x64xf32>
    %c0_20 = arith.constant 0 : index
    %c0_21 = arith.constant 0 : index
    %35 = vector.load %arg6[%c0_20, %c0_21] : memref<2x64xf32, #tpu.memory_space<vmem>>, vector<1x64xf32>
    tpu.vector_store %arg6[%c0_20, %c0_21], %34 {strides = array<i32>} : memref<2x64xf32, #tpu.memory_space<vmem>>, vector<1x64xf32>,
    %c1_22 = arith.constant 1 : index
    %c0_23 = arith.constant 0 : index
    %c0_24 = arith.constant 0 : index
    %36 = vector.load %arg1[%c1_22, %c0_23, %c0_24] : memref<2x8x32xf32, #tpu.memory_space<vmem>>, vector<1x8x32xf32>
    %37 = vector.shape_cast %36 : vector<1x8x32xf32> to vector<8x32xf32>
    %38 = vector.broadcast %0 : vector<1x32xf32> to vector<8x32xf32>
    %39 = arith.mulf %37, %38 : vector<8x32xf32>
    %cst_25 = arith.constant dense<0.000000e+00> : vector<8xf32>
    %40 = vector.multi_reduction <add>, %39, %cst_25 [1] : vector<8x32xf32> to vector<8xf32>
    %41 = vector.shape_cast %40 : vector<8xf32> to vector<8x1xf32>
    %42 = vector.broadcast %1 : vector<1x1xf32> to vector<8x1xf32>
    %43 = arith.addf %41, %42 : vector<8x1xf32>
    %cst_26 = arith.constant dense<0xFF800000> : vector<1xf32>
    %44 = vector.multi_reduction <maximumf>, %43, %cst_26 [0] : vector<8x1xf32> to vector<1xf32>
    %45 = vector.shape_cast %44 : vector<1xf32> to vector<1x1xf32>
    %46 = vector.broadcast %45 : vector<1x1xf32> to vector<8x1xf32>
    %47 = arith.subf %43, %46 : vector<8x1xf32>
    %48 = math.exp %47 : vector<8x1xf32>
    %cst_27 = arith.constant dense<0.000000e+00> : vector<1xf32>
    %49 = vector.multi_reduction <add>, %48, %cst_27 [0] : vector<8x1xf32> to vector<1xf32>
    %50 = vector.shape_cast %49 : vector<1xf32> to vector<1x1xf32>
    %51 = vector.broadcast %50 : vector<1x1xf32> to vector<8x1xf32>
    %52 = arith.divf %48, %51 : vector<8x1xf32>
    %53 = vector.broadcast %52 : vector<8x1xf32> to vector<8x32xf32>
    %54 = arith.mulf %37, %53 : vector<8x32xf32>
    %cst_28 = arith.constant dense<0.000000e+00> : vector<32xf32>
    %55 = vector.multi_reduction <add>, %54, %cst_28 [0] : vector<8x32xf32> to vector<32xf32>
    %56 = vector.shape_cast %55 : vector<32xf32> to vector<1x32xf32>
    %cst_29 = arith.constant dense<0.000000e+00> : vector<1x32xf32>
    %57 = tpu.matmul %56, %2, %cst_29 {dimension_numbers = #tpu.dot_dimension_numbers<[1], [0], [0], [1], [0, 0, 1, 1], [], []>} : vector<1x32xf32>, vector<32x32xf32>, vector<1x32xf32> -> vector<1x32xf32>
    %58 = arith.addf %57, %5 : vector<1x32xf32>
    %cst_30 = arith.constant dense<0.000000e+00> : vector<1x32xf32>
    %59 = tpu.matmul %58, %3, %cst_30 {dimension_numbers = #tpu.dot_dimension_numbers<[1], [0], [0], [1], [0, 0, 1, 1], [], []>} : vector<1x32xf32>, vector<32x32xf32>, vector<1x32xf32> -> vector<1x32xf32>
    %60 = arith.addf %59, %6 : vector<1x32xf32>
    %cst_31 = arith.constant dense<0.000000e+00> : vector<1x64xf32>
    %61 = tpu.matmul %60, %4, %cst_31 {dimension_numbers = #tpu.dot_dimension_numbers<[1], [0], [0], [1], [0, 0, 1, 1], [], []>} : vector<1x32xf32>, vector<32x64xf32>, vector<1x64xf32> -> vector<1x64xf32>
    %62 = arith.addf %61, %7 : vector<1x64xf32>
    %c1_32 = arith.constant 1 : index
    %c0_33 = arith.constant 0 : index
    %63 = vector.load %arg6[%c1_32, %c0_33] : memref<2x64xf32, #tpu.memory_space<vmem>>, vector<1x64xf32>
    tpu.vector_store %arg6[%c1_32, %c0_33], %62 {strides = array<i32>} : memref<2x64xf32, #tpu.memory_space<vmem>>, vector<1x64xf32>,
    return
  }
  func.func @transform_0(%arg0: i32) -> (i32, i32, i32) {
    %c0_i32 = arith.constant 0 : i32
    %c0_i32_0 = arith.constant 0 : i32
    %c0_i32_1 = arith.constant 0 : i32
    %c0_i32_2 = arith.constant 0 : i32
    return %c0_i32, %c0_i32_0, %c0_i32_1 : i32, i32, i32
  }
  func.func @transform_1(%arg0: i32) -> (i32, i32) {
    %c0_i32 = arith.constant 0 : i32
    %c0_i32_0 = arith.constant 0 : i32
    %c0_i32_1 = arith.constant 0 : i32
    return %c0_i32, %c0_i32_0 : i32, i32
  }
  func.func @transform_2(%arg0: i32) -> (i32, i32) {
    %c0_i32 = arith.constant 0 : i32
    %c0_i32_0 = arith.constant 0 : i32
    %c0_i32_1 = arith.constant 0 : i32
    return %c0_i32, %c0_i32_0 : i32, i32
  }
  func.func @transform_3(%arg0: i32) -> (i32, i32) {
    %c0_i32 = arith.constant 0 : i32
    %c0_i32_0 = arith.constant 0 : i32
    %c0_i32_1 = arith.constant 0 : i32
    return %c0_i32, %c0_i32_0 : i32, i32
  }
  func.func @transform_4(%arg0: i32) -> (i32, i32) {
    %c0_i32 = arith.constant 0 : i32
    %c0_i32_0 = arith.constant 0 : i32
    %c0_i32_1 = arith.constant 0 : i32
    return %c0_i32, %c0_i32_0 : i32, i32
  }
  func.func @transform_5(%arg0: i32) -> (i32, i32) {
    %c0_i32 = arith.constant 0 : i32
    %c0_i32_0 = arith.constant 0 : i32
    %c0_i32_1 = arith.constant 0 : i32
    return %c0_i32, %c0_i32_0 : i32, i32
  }
}

module attributes {stable_mosaic.version = 11 : i64} {
  func.func @_conv1_sa_kernel(%arg0: i32, %arg1: memref<1x1x10xf32, #tpu.memory_space<vmem>>, %arg2: memref<128x3xf32, #tpu.memory_space<vmem>>, %arg3: memref<128x1xf32, #tpu.memory_space<vmem>>, %arg4: memref<1x128x8xf32, #tpu.memory_space<vmem>>) attributes {dimension_semantics = [#tpu.dimension_semantics<parallel>], iteration_bounds = array<i64: 2>, scalar_prefetch = 0 : i64, scratch_operands = 0 : i64, tpu.core_type = #tpu.core_type<tc>, window_params = [{transform_indices = @transform_0, window_bounds = array<i64: 1, 1, 10>}, {pipeline_mode = #tpu.pipeline_mode<synchronous>, transform_indices = @transform_1, window_bounds = array<i64: 128, 3>}, {pipeline_mode = #tpu.pipeline_mode<synchronous>, transform_indices = @transform_2, window_bounds = array<i64: 128, 1>}, {transform_indices = @transform_3, window_bounds = array<i64: 1, 128, 8>}]} {
    %c0 = arith.constant 0 : index
    %c0_0 = arith.constant 0 : index
    %c0_1 = arith.constant 0 : index
    %0 = vector.load %arg1[%c0, %c0_0, %c0_1] : memref<1x1x10xf32, #tpu.memory_space<vmem>>, vector<1x1x10xf32>
    %1 = vector.shape_cast %0 : vector<1x1x10xf32> to vector<1x10xf32>
    %c0_2 = arith.constant 0 : index
    %c0_3 = arith.constant 0 : index
    %2 = vector.load %arg2[%c0_2, %c0_3] : memref<128x3xf32, #tpu.memory_space<vmem>>, vector<128x3xf32>
    %3 = vector.extract_strided_slice %2 {offsets = [0, 0], sizes = [128, 1], strides = [1, 1]} : vector<128x3xf32> to vector<128x1xf32>
    %4 = vector.extract_strided_slice %1 {offsets = [0, 0], sizes = [1, 8], strides = [1, 1]} : vector<1x10xf32> to vector<1x8xf32>
    %5 = vector.broadcast %3 : vector<128x1xf32> to vector<128x8xf32>
    %6 = vector.broadcast %4 : vector<1x8xf32> to vector<128x8xf32>
    %7 = arith.mulf %5, %6 : vector<128x8xf32>
    %8 = vector.extract_strided_slice %2 {offsets = [0, 1], sizes = [128, 1], strides = [1, 1]} : vector<128x3xf32> to vector<128x1xf32>
    %9 = vector.extract_strided_slice %1 {offsets = [0, 1], sizes = [1, 8], strides = [1, 1]} : vector<1x10xf32> to vector<1x8xf32>
    %10 = vector.broadcast %8 : vector<128x1xf32> to vector<128x8xf32>
    %11 = vector.broadcast %9 : vector<1x8xf32> to vector<128x8xf32>
    %12 = arith.mulf %10, %11 : vector<128x8xf32>
    %13 = arith.addf %7, %12 : vector<128x8xf32>
    %14 = vector.extract_strided_slice %2 {offsets = [0, 2], sizes = [128, 1], strides = [1, 1]} : vector<128x3xf32> to vector<128x1xf32>
    %15 = vector.extract_strided_slice %1 {offsets = [0, 2], sizes = [1, 8], strides = [1, 1]} : vector<1x10xf32> to vector<1x8xf32>
    %16 = vector.broadcast %14 : vector<128x1xf32> to vector<128x8xf32>
    %17 = vector.broadcast %15 : vector<1x8xf32> to vector<128x8xf32>
    %18 = arith.mulf %16, %17 : vector<128x8xf32>
    %19 = arith.addf %13, %18 : vector<128x8xf32>
    %c0_4 = arith.constant 0 : index
    %c0_5 = arith.constant 0 : index
    %20 = vector.load %arg3[%c0_4, %c0_5] : memref<128x1xf32, #tpu.memory_space<vmem>>, vector<128x1xf32>
    %21 = vector.broadcast %20 : vector<128x1xf32> to vector<128x8xf32>
    %22 = arith.addf %19, %21 : vector<128x8xf32>
    %cst = arith.constant 0.000000e+00 : f32
    %23 = vector.broadcast %cst : f32 to vector<128x8xf32>
    %24 = arith.maximumf %22, %23 : vector<128x8xf32>
    %c0_6 = arith.constant 0 : index
    %c0_7 = arith.constant 0 : index
    %c0_8 = arith.constant 0 : index
    %25 = vector.load %arg4[%c0_6, %c0_7, %c0_8] : memref<1x128x8xf32, #tpu.memory_space<vmem>>, vector<1x128x8xf32>
    %26 = vector.shape_cast %25 : vector<1x128x8xf32> to vector<128x8xf32>
    %27 = vector.shape_cast %24 : vector<128x8xf32> to vector<1x128x8xf32>
    tpu.vector_store %arg4[%c0_6, %c0_7, %c0_8], %27 {strides = array<i32>} : memref<1x128x8xf32, #tpu.memory_space<vmem>>, vector<1x128x8xf32>,
    return
  }
  func.func @transform_0(%arg0: i32) -> (i32, i32, i32) {
    %c0_i32 = arith.constant 0 : i32
    %c0_i32_0 = arith.constant 0 : i32
    %c0_i32_1 = arith.constant 0 : i32
    return %arg0, %c0_i32, %c0_i32_0 : i32, i32, i32
  }
  func.func @transform_1(%arg0: i32) -> (i32, i32) {
    %c0_i32 = arith.constant 0 : i32
    %c0_i32_0 = arith.constant 0 : i32
    %c0_i32_1 = arith.constant 0 : i32
    return %c0_i32, %c0_i32_0 : i32, i32
  }
  func.func @transform_2(%arg0: i32) -> (i32, i32) {
    %c0_i32 = arith.constant 0 : i32
    %c0_i32_0 = arith.constant 0 : i32
    %c0_i32_1 = arith.constant 0 : i32
    return %c0_i32, %c0_i32_0 : i32, i32
  }
  func.func @transform_3(%arg0: i32) -> (i32, i32, i32) {
    %c0_i32 = arith.constant 0 : i32
    %c0_i32_0 = arith.constant 0 : i32
    %c0_i32_1 = arith.constant 0 : i32
    return %arg0, %c0_i32, %c0_i32_0 : i32, i32, i32
  }
}

module attributes {stable_mosaic.version = 11 : i64} {
  func.func @_encoder_stack_kernel(%arg0: i32, %arg1: memref<1x8x32xf32, #tpu.memory_space<vmem>>, %arg2: memref<2x32x96xf32, #tpu.memory_space<vmem>>, %arg3: memref<2x32x32xf32, #tpu.memory_space<vmem>>, %arg4: memref<2x32x64xf32, #tpu.memory_space<vmem>>, %arg5: memref<2x64x32xf32, #tpu.memory_space<vmem>>, %arg6: memref<2x8x128xf32, #tpu.memory_space<vmem>>, %arg7: memref<1x8x32xf32, #tpu.memory_space<vmem>>) attributes {dimension_semantics = [#tpu.dimension_semantics<parallel>], iteration_bounds = array<i64: 2>, scalar_prefetch = 0 : i64, scratch_operands = 0 : i64, tpu.core_type = #tpu.core_type<tc>, window_params = [{transform_indices = @transform_0, window_bounds = array<i64: 1, 8, 32>}, {pipeline_mode = #tpu.pipeline_mode<synchronous>, transform_indices = @transform_1, window_bounds = array<i64: 2, 32, 96>}, {pipeline_mode = #tpu.pipeline_mode<synchronous>, transform_indices = @transform_2, window_bounds = array<i64: 2, 32, 32>}, {pipeline_mode = #tpu.pipeline_mode<synchronous>, transform_indices = @transform_3, window_bounds = array<i64: 2, 32, 64>}, {pipeline_mode = #tpu.pipeline_mode<synchronous>, transform_indices = @transform_4, window_bounds = array<i64: 2, 64, 32>}, {pipeline_mode = #tpu.pipeline_mode<synchronous>, transform_indices = @transform_5, window_bounds = array<i64: 2, 8, 128>}, {transform_indices = @transform_6, window_bounds = array<i64: 1, 8, 32>}]} {
    %c0 = arith.constant 0 : index
    %c0_0 = arith.constant 0 : index
    %c0_1 = arith.constant 0 : index
    %0 = vector.load %arg1[%c0, %c0_0, %c0_1] : memref<1x8x32xf32, #tpu.memory_space<vmem>>, vector<1x8x32xf32>
    %1 = vector.shape_cast %0 : vector<1x8x32xf32> to vector<8x32xf32>
    %c0_2 = arith.constant 0 : index
    %c0_3 = arith.constant 0 : index
    %c0_4 = arith.constant 0 : index
    %2 = vector.load %arg2[%c0_2, %c0_3, %c0_4] : memref<2x32x96xf32, #tpu.memory_space<vmem>>, vector<1x32x96xf32>
    %3 = vector.shape_cast %2 : vector<1x32x96xf32> to vector<32x96xf32>
    %c0_5 = arith.constant 0 : index
    %c0_6 = arith.constant 0 : index
    %c0_7 = arith.constant 0 : index
    %4 = vector.load %arg3[%c0_5, %c0_6, %c0_7] : memref<2x32x32xf32, #tpu.memory_space<vmem>>, vector<1x32x32xf32>
    %5 = vector.shape_cast %4 : vector<1x32x32xf32> to vector<32x32xf32>
    %c0_8 = arith.constant 0 : index
    %c0_9 = arith.constant 0 : index
    %c0_10 = arith.constant 0 : index
    %6 = vector.load %arg4[%c0_8, %c0_9, %c0_10] : memref<2x32x64xf32, #tpu.memory_space<vmem>>, vector<1x32x64xf32>
    %7 = vector.shape_cast %6 : vector<1x32x64xf32> to vector<32x64xf32>
    %c0_11 = arith.constant 0 : index
    %c0_12 = arith.constant 0 : index
    %c0_13 = arith.constant 0 : index
    %8 = vector.load %arg5[%c0_11, %c0_12, %c0_13] : memref<2x64x32xf32, #tpu.memory_space<vmem>>, vector<1x64x32xf32>
    %9 = vector.shape_cast %8 : vector<1x64x32xf32> to vector<64x32xf32>
    %c0_14 = arith.constant 0 : index
    %c0_15 = arith.constant 0 : index
    %c0_16 = arith.constant 0 : index
    %10 = vector.load %arg6[%c0_14, %c0_15, %c0_16] : memref<2x8x128xf32, #tpu.memory_space<vmem>>, vector<1x8x128xf32>
    %11 = vector.shape_cast %10 : vector<1x8x128xf32> to vector<8x128xf32>
    %12 = vector.extract_strided_slice %11 {offsets = [0, 0], sizes = [1, 96], strides = [1, 1]} : vector<8x128xf32> to vector<1x96xf32>
    %13 = vector.extract_strided_slice %11 {offsets = [1, 0], sizes = [1, 32], strides = [1, 1]} : vector<8x128xf32> to vector<1x32xf32>
    %14 = vector.extract_strided_slice %11 {offsets = [2, 0], sizes = [1, 32], strides = [1, 1]} : vector<8x128xf32> to vector<1x32xf32>
    %15 = vector.extract_strided_slice %11 {offsets = [3, 0], sizes = [1, 32], strides = [1, 1]} : vector<8x128xf32> to vector<1x32xf32>
    %16 = vector.extract_strided_slice %11 {offsets = [4, 0], sizes = [1, 64], strides = [1, 1]} : vector<8x128xf32> to vector<1x64xf32>
    %17 = vector.extract_strided_slice %11 {offsets = [5, 0], sizes = [1, 32], strides = [1, 1]} : vector<8x128xf32> to vector<1x32xf32>
    %18 = vector.extract_strided_slice %11 {offsets = [6, 0], sizes = [1, 32], strides = [1, 1]} : vector<8x128xf32> to vector<1x32xf32>
    %19 = vector.extract_strided_slice %11 {offsets = [7, 0], sizes = [1, 32], strides = [1, 1]} : vector<8x128xf32> to vector<1x32xf32>
    %cst = arith.constant dense<0.000000e+00> : vector<8x96xf32>
    %20 = tpu.matmul %1, %3, %cst {dimension_numbers = #tpu.dot_dimension_numbers<[1], [0], [0], [1], [0, 0, 1, 1], [], []>} : vector<8x32xf32>, vector<32x96xf32>, vector<8x96xf32> -> vector<8x96xf32>
    %21 = vector.broadcast %12 : vector<1x96xf32> to vector<8x96xf32>
    %22 = arith.addf %20, %21 : vector<8x96xf32>
    %23 = vector.extract_strided_slice %22 {offsets = [0, 0], sizes = [8, 8], strides = [1, 1]} : vector<8x96xf32> to vector<8x8xf32>
    %cst_17 = arith.constant 0.353553385 : f32
    %24 = vector.broadcast %cst_17 : f32 to vector<8x8xf32>
    %25 = arith.mulf %23, %24 : vector<8x8xf32>
    %26 = vector.extract_strided_slice %22 {offsets = [0, 32], sizes = [8, 8], strides = [1, 1]} : vector<8x96xf32> to vector<8x8xf32>
    %27 = vector.extract_strided_slice %22 {offsets = [0, 64], sizes = [8, 8], strides = [1, 1]} : vector<8x96xf32> to vector<8x8xf32>
    %cst_18 = arith.constant dense<0.000000e+00> : vector<8x8xf32>
    %28 = tpu.matmul %25, %26, %cst_18 {dimension_numbers = #tpu.dot_dimension_numbers<[1], [1], [0], [0], [0, 0, 1, 0], [], []>} : vector<8x8xf32>, vector<8x8xf32>, vector<8x8xf32> -> vector<8x8xf32>
    %cst_19 = arith.constant dense<0xFF800000> : vector<8xf32>
    %29 = vector.multi_reduction <maximumf>, %28, %cst_19 [1] : vector<8x8xf32> to vector<8xf32>
    %30 = vector.shape_cast %29 : vector<8xf32> to vector<8x1xf32>
    %31 = vector.broadcast %30 : vector<8x1xf32> to vector<8x8xf32>
    %32 = arith.subf %28, %31 : vector<8x8xf32>
    %33 = math.exp %32 : vector<8x8xf32>
    %cst_20 = arith.constant dense<0.000000e+00> : vector<8xf32>
    %34 = vector.multi_reduction <add>, %33, %cst_20 [1] : vector<8x8xf32> to vector<8xf32>
    %35 = vector.shape_cast %34 : vector<8xf32> to vector<8x1xf32>
    %36 = vector.broadcast %35 : vector<8x1xf32> to vector<8x8xf32>
    %37 = arith.divf %33, %36 : vector<8x8xf32>
    %cst_21 = arith.constant dense<0.000000e+00> : vector<8x8xf32>
    %38 = tpu.matmul %37, %27, %cst_21 {dimension_numbers = #tpu.dot_dimension_numbers<[1], [0], [0], [1], [0, 0, 1, 1], [], []>} : vector<8x8xf32>, vector<8x8xf32>, vector<8x8xf32> -> vector<8x8xf32>
    %39 = vector.extract_strided_slice %5 {offsets = [0, 0], sizes = [8, 32], strides = [1, 1]} : vector<32x32xf32> to vector<8x32xf32>
    %cst_22 = arith.constant dense<0.000000e+00> : vector<8x32xf32>
    %40 = tpu.matmul %38, %39, %cst_22 {dimension_numbers = #tpu.dot_dimension_numbers<[1], [0], [0], [1], [0, 0, 1, 1], [], []>} : vector<8x8xf32>, vector<8x32xf32>, vector<8x32xf32> -> vector<8x32xf32>
    %41 = vector.broadcast %13 : vector<1x32xf32> to vector<8x32xf32>
    %42 = arith.addf %41, %40 : vector<8x32xf32>
    %43 = vector.extract_strided_slice %22 {offsets = [0, 8], sizes = [8, 8], strides = [1, 1]} : vector<8x96xf32> to vector<8x8xf32>
    %cst_23 = arith.constant 0.353553385 : f32
    %44 = vector.broadcast %cst_23 : f32 to vector<8x8xf32>
    %45 = arith.mulf %43, %44 : vector<8x8xf32>
    %46 = vector.extract_strided_slice %22 {offsets = [0, 40], sizes = [8, 8], strides = [1, 1]} : vector<8x96xf32> to vector<8x8xf32>
    %47 = vector.extract_strided_slice %22 {offsets = [0, 72], sizes = [8, 8], strides = [1, 1]} : vector<8x96xf32> to vector<8x8xf32>
    %cst_24 = arith.constant dense<0.000000e+00> : vector<8x8xf32>
    %48 = tpu.matmul %45, %46, %cst_24 {dimension_numbers = #tpu.dot_dimension_numbers<[1], [1], [0], [0], [0, 0, 1, 0], [], []>} : vector<8x8xf32>, vector<8x8xf32>, vector<8x8xf32> -> vector<8x8xf32>
    %cst_25 = arith.constant dense<0xFF800000> : vector<8xf32>
    %49 = vector.multi_reduction <maximumf>, %48, %cst_25 [1] : vector<8x8xf32> to vector<8xf32>
    %50 = vector.shape_cast %49 : vector<8xf32> to vector<8x1xf32>
    %51 = vector.broadcast %50 : vector<8x1xf32> to vector<8x8xf32>
    %52 = arith.subf %48, %51 : vector<8x8xf32>
    %53 = math.exp %52 : vector<8x8xf32>
    %cst_26 = arith.constant dense<0.000000e+00> : vector<8xf32>
    %54 = vector.multi_reduction <add>, %53, %cst_26 [1] : vector<8x8xf32> to vector<8xf32>
    %55 = vector.shape_cast %54 : vector<8xf32> to vector<8x1xf32>
    %56 = vector.broadcast %55 : vector<8x1xf32> to vector<8x8xf32>
    %57 = arith.divf %53, %56 : vector<8x8xf32>
    %cst_27 = arith.constant dense<0.000000e+00> : vector<8x8xf32>
    %58 = tpu.matmul %57, %47, %cst_27 {dimension_numbers = #tpu.dot_dimension_numbers<[1], [0], [0], [1], [0, 0, 1, 1], [], []>} : vector<8x8xf32>, vector<8x8xf32>, vector<8x8xf32> -> vector<8x8xf32>
    %59 = vector.extract_strided_slice %5 {offsets = [8, 0], sizes = [8, 32], strides = [1, 1]} : vector<32x32xf32> to vector<8x32xf32>
    %cst_28 = arith.constant dense<0.000000e+00> : vector<8x32xf32>
    %60 = tpu.matmul %58, %59, %cst_28 {dimension_numbers = #tpu.dot_dimension_numbers<[1], [0], [0], [1], [0, 0, 1, 1], [], []>} : vector<8x8xf32>, vector<8x32xf32>, vector<8x32xf32> -> vector<8x32xf32>
    %61 = arith.addf %42, %60 : vector<8x32xf32>
    %62 = vector.extract_strided_slice %22 {offsets = [0, 16], sizes = [8, 8], strides = [1, 1]} : vector<8x96xf32> to vector<8x8xf32>
    %cst_29 = arith.constant 0.353553385 : f32
    %63 = vector.broadcast %cst_29 : f32 to vector<8x8xf32>
    %64 = arith.mulf %62, %63 : vector<8x8xf32>
    %65 = vector.extract_strided_slice %22 {offsets = [0, 48], sizes = [8, 8], strides = [1, 1]} : vector<8x96xf32> to vector<8x8xf32>
    %66 = vector.extract_strided_slice %22 {offsets = [0, 80], sizes = [8, 8], strides = [1, 1]} : vector<8x96xf32> to vector<8x8xf32>
    %cst_30 = arith.constant dense<0.000000e+00> : vector<8x8xf32>
    %67 = tpu.matmul %64, %65, %cst_30 {dimension_numbers = #tpu.dot_dimension_numbers<[1], [1], [0], [0], [0, 0, 1, 0], [], []>} : vector<8x8xf32>, vector<8x8xf32>, vector<8x8xf32> -> vector<8x8xf32>
    %cst_31 = arith.constant dense<0xFF800000> : vector<8xf32>
    %68 = vector.multi_reduction <maximumf>, %67, %cst_31 [1] : vector<8x8xf32> to vector<8xf32>
    %69 = vector.shape_cast %68 : vector<8xf32> to vector<8x1xf32>
    %70 = vector.broadcast %69 : vector<8x1xf32> to vector<8x8xf32>
    %71 = arith.subf %67, %70 : vector<8x8xf32>
    %72 = math.exp %71 : vector<8x8xf32>
    %cst_32 = arith.constant dense<0.000000e+00> : vector<8xf32>
    %73 = vector.multi_reduction <add>, %72, %cst_32 [1] : vector<8x8xf32> to vector<8xf32>
    %74 = vector.shape_cast %73 : vector<8xf32> to vector<8x1xf32>
    %75 = vector.broadcast %74 : vector<8x1xf32> to vector<8x8xf32>
    %76 = arith.divf %72, %75 : vector<8x8xf32>
    %cst_33 = arith.constant dense<0.000000e+00> : vector<8x8xf32>
    %77 = tpu.matmul %76, %66, %cst_33 {dimension_numbers = #tpu.dot_dimension_numbers<[1], [0], [0], [1], [0, 0, 1, 1], [], []>} : vector<8x8xf32>, vector<8x8xf32>, vector<8x8xf32> -> vector<8x8xf32>
    %78 = vector.extract_strided_slice %5 {offsets = [16, 0], sizes = [8, 32], strides = [1, 1]} : vector<32x32xf32> to vector<8x32xf32>
    %cst_34 = arith.constant dense<0.000000e+00> : vector<8x32xf32>
    %79 = tpu.matmul %77, %78, %cst_34 {dimension_numbers = #tpu.dot_dimension_numbers<[1], [0], [0], [1], [0, 0, 1, 1], [], []>} : vector<8x8xf32>, vector<8x32xf32>, vector<8x32xf32> -> vector<8x32xf32>
    %80 = arith.addf %61, %79 : vector<8x32xf32>
    %81 = vector.extract_strided_slice %22 {offsets = [0, 24], sizes = [8, 8], strides = [1, 1]} : vector<8x96xf32> to vector<8x8xf32>
    %cst_35 = arith.constant 0.353553385 : f32
    %82 = vector.broadcast %cst_35 : f32 to vector<8x8xf32>
    %83 = arith.mulf %81, %82 : vector<8x8xf32>
    %84 = vector.extract_strided_slice %22 {offsets = [0, 56], sizes = [8, 8], strides = [1, 1]} : vector<8x96xf32> to vector<8x8xf32>
    %85 = vector.extract_strided_slice %22 {offsets = [0, 88], sizes = [8, 8], strides = [1, 1]} : vector<8x96xf32> to vector<8x8xf32>
    %cst_36 = arith.constant dense<0.000000e+00> : vector<8x8xf32>
    %86 = tpu.matmul %83, %84, %cst_36 {dimension_numbers = #tpu.dot_dimension_numbers<[1], [1], [0], [0], [0, 0, 1, 0], [], []>} : vector<8x8xf32>, vector<8x8xf32>, vector<8x8xf32> -> vector<8x8xf32>
    %cst_37 = arith.constant dense<0xFF800000> : vector<8xf32>
    %87 = vector.multi_reduction <maximumf>, %86, %cst_37 [1] : vector<8x8xf32> to vector<8xf32>
    %88 = vector.shape_cast %87 : vector<8xf32> to vector<8x1xf32>
    %89 = vector.broadcast %88 : vector<8x1xf32> to vector<8x8xf32>
    %90 = arith.subf %86, %89 : vector<8x8xf32>
    %91 = math.exp %90 : vector<8x8xf32>
    %cst_38 = arith.constant dense<0.000000e+00> : vector<8xf32>
    %92 = vector.multi_reduction <add>, %91, %cst_38 [1] : vector<8x8xf32> to vector<8xf32>
    %93 = vector.shape_cast %92 : vector<8xf32> to vector<8x1xf32>
    %94 = vector.broadcast %93 : vector<8x1xf32> to vector<8x8xf32>
    %95 = arith.divf %91, %94 : vector<8x8xf32>
    %cst_39 = arith.constant dense<0.000000e+00> : vector<8x8xf32>
    %96 = tpu.matmul %95, %85, %cst_39 {dimension_numbers = #tpu.dot_dimension_numbers<[1], [0], [0], [1], [0, 0, 1, 1], [], []>} : vector<8x8xf32>, vector<8x8xf32>, vector<8x8xf32> -> vector<8x8xf32>
    %97 = vector.extract_strided_slice %5 {offsets = [24, 0], sizes = [8, 32], strides = [1, 1]} : vector<32x32xf32> to vector<8x32xf32>
    %cst_40 = arith.constant dense<0.000000e+00> : vector<8x32xf32>
    %98 = tpu.matmul %96, %97, %cst_40 {dimension_numbers = #tpu.dot_dimension_numbers<[1], [0], [0], [1], [0, 0, 1, 1], [], []>} : vector<8x8xf32>, vector<8x32xf32>, vector<8x32xf32> -> vector<8x32xf32>
    %99 = arith.addf %80, %98 : vector<8x32xf32>
    %100 = arith.addf %1, %99 : vector<8x32xf32>
    %cst_41 = arith.constant dense<0.000000e+00> : vector<8xf32>
    %101 = vector.multi_reduction <add>, %100, %cst_41 [1] : vector<8x32xf32> to vector<8xf32>
    %102 = vector.shape_cast %101 : vector<8xf32> to vector<8x1xf32>
    %cst_42 = arith.constant 3.200000e+01 : f32
    %103 = vector.broadcast %cst_42 : f32 to vector<8x1xf32>
    %104 = arith.divf %102, %103 : vector<8x1xf32>
    %105 = vector.broadcast %104 : vector<8x1xf32> to vector<8x32xf32>
    %106 = arith.subf %100, %105 : vector<8x32xf32>
    %107 = arith.mulf %106, %106 : vector<8x32xf32>
    %cst_43 = arith.constant dense<0.000000e+00> : vector<8xf32>
    %108 = vector.multi_reduction <add>, %107, %cst_43 [1] : vector<8x32xf32> to vector<8xf32>
    %109 = vector.shape_cast %108 : vector<8xf32> to vector<8x1xf32>
    %cst_44 = arith.constant 3.200000e+01 : f32
    %110 = vector.broadcast %cst_44 : f32 to vector<8x1xf32>
    %111 = arith.divf %109, %110 : vector<8x1xf32>
    %112 = vector.broadcast %104 : vector<8x1xf32> to vector<8x32xf32>
    %113 = arith.subf %100, %112 : vector<8x32xf32>
    %cst_45 = arith.constant 9.99999974E-6 : f32
    %114 = vector.broadcast %cst_45 : f32 to vector<8x1xf32>
    %115 = arith.addf %111, %114 : vector<8x1xf32>
    %116 = math.rsqrt %115 : vector<8x1xf32>
    %117 = vector.broadcast %116 : vector<8x1xf32> to vector<8x32xf32>
    %118 = arith.mulf %113, %117 : vector<8x32xf32>
    %119 = vector.broadcast %14 : vector<1x32xf32> to vector<8x32xf32>
    %120 = arith.mulf %118, %119 : vector<8x32xf32>
    %121 = vector.broadcast %15 : vector<1x32xf32> to vector<8x32xf32>
    %122 = arith.addf %120, %121 : vector<8x32xf32>
    %cst_46 = arith.constant dense<0.000000e+00> : vector<8x64xf32>
    %123 = tpu.matmul %122, %7, %cst_46 {dimension_numbers = #tpu.dot_dimension_numbers<[1], [0], [0], [1], [0, 0, 1, 1], [], []>} : vector<8x32xf32>, vector<32x64xf32>, vector<8x64xf32> -> vector<8x64xf32>
    %124 = vector.broadcast %16 : vector<1x64xf32> to vector<8x64xf32>
    %125 = arith.addf %123, %124 : vector<8x64xf32>
    %cst_47 = arith.constant 0.000000e+00 : f32
    %126 = vector.broadcast %cst_47 : f32 to vector<8x64xf32>
    %127 = arith.maximumf %125, %126 : vector<8x64xf32>
    %cst_48 = arith.constant dense<0.000000e+00> : vector<8x32xf32>
    %128 = tpu.matmul %127, %9, %cst_48 {dimension_numbers = #tpu.dot_dimension_numbers<[1], [0], [0], [1], [0, 0, 1, 1], [], []>} : vector<8x64xf32>, vector<64x32xf32>, vector<8x32xf32> -> vector<8x32xf32>
    %129 = vector.broadcast %17 : vector<1x32xf32> to vector<8x32xf32>
    %130 = arith.addf %128, %129 : vector<8x32xf32>
    %131 = arith.addf %122, %130 : vector<8x32xf32>
    %cst_49 = arith.constant dense<0.000000e+00> : vector<8xf32>
    %132 = vector.multi_reduction <add>, %131, %cst_49 [1] : vector<8x32xf32> to vector<8xf32>
    %133 = vector.shape_cast %132 : vector<8xf32> to vector<8x1xf32>
    %cst_50 = arith.constant 3.200000e+01 : f32
    %134 = vector.broadcast %cst_50 : f32 to vector<8x1xf32>
    %135 = arith.divf %133, %134 : vector<8x1xf32>
    %136 = vector.broadcast %135 : vector<8x1xf32> to vector<8x32xf32>
    %137 = arith.subf %131, %136 : vector<8x32xf32>
    %138 = arith.mulf %137, %137 : vector<8x32xf32>
    %cst_51 = arith.constant dense<0.000000e+00> : vector<8xf32>
    %139 = vector.multi_reduction <add>, %138, %cst_51 [1] : vector<8x32xf32> to vector<8xf32>
    %140 = vector.shape_cast %139 : vector<8xf32> to vector<8x1xf32>
    %cst_52 = arith.constant 3.200000e+01 : f32
    %141 = vector.broadcast %cst_52 : f32 to vector<8x1xf32>
    %142 = arith.divf %140, %141 : vector<8x1xf32>
    %143 = vector.broadcast %135 : vector<8x1xf32> to vector<8x32xf32>
    %144 = arith.subf %131, %143 : vector<8x32xf32>
    %cst_53 = arith.constant 9.99999974E-6 : f32
    %145 = vector.broadcast %cst_53 : f32 to vector<8x1xf32>
    %146 = arith.addf %142, %145 : vector<8x1xf32>
    %147 = math.rsqrt %146 : vector<8x1xf32>
    %148 = vector.broadcast %147 : vector<8x1xf32> to vector<8x32xf32>
    %149 = arith.mulf %144, %148 : vector<8x32xf32>
    %150 = vector.broadcast %18 : vector<1x32xf32> to vector<8x32xf32>
    %151 = arith.mulf %149, %150 : vector<8x32xf32>
    %152 = vector.broadcast %19 : vector<1x32xf32> to vector<8x32xf32>
    %153 = arith.addf %151, %152 : vector<8x32xf32>
    %c1 = arith.constant 1 : index
    %c0_54 = arith.constant 0 : index
    %c0_55 = arith.constant 0 : index
    %154 = vector.load %arg2[%c1, %c0_54, %c0_55] : memref<2x32x96xf32, #tpu.memory_space<vmem>>, vector<1x32x96xf32>
    %155 = vector.shape_cast %154 : vector<1x32x96xf32> to vector<32x96xf32>
    %c1_56 = arith.constant 1 : index
    %c0_57 = arith.constant 0 : index
    %c0_58 = arith.constant 0 : index
    %156 = vector.load %arg3[%c1_56, %c0_57, %c0_58] : memref<2x32x32xf32, #tpu.memory_space<vmem>>, vector<1x32x32xf32>
    %157 = vector.shape_cast %156 : vector<1x32x32xf32> to vector<32x32xf32>
    %c1_59 = arith.constant 1 : index
    %c0_60 = arith.constant 0 : index
    %c0_61 = arith.constant 0 : index
    %158 = vector.load %arg4[%c1_59, %c0_60, %c0_61] : memref<2x32x64xf32, #tpu.memory_space<vmem>>, vector<1x32x64xf32>
    %159 = vector.shape_cast %158 : vector<1x32x64xf32> to vector<32x64xf32>
    %c1_62 = arith.constant 1 : index
    %c0_63 = arith.constant 0 : index
    %c0_64 = arith.constant 0 : index
    %160 = vector.load %arg5[%c1_62, %c0_63, %c0_64] : memref<2x64x32xf32, #tpu.memory_space<vmem>>, vector<1x64x32xf32>
    %161 = vector.shape_cast %160 : vector<1x64x32xf32> to vector<64x32xf32>
    %c1_65 = arith.constant 1 : index
    %c0_66 = arith.constant 0 : index
    %c0_67 = arith.constant 0 : index
    %162 = vector.load %arg6[%c1_65, %c0_66, %c0_67] : memref<2x8x128xf32, #tpu.memory_space<vmem>>, vector<1x8x128xf32>
    %163 = vector.shape_cast %162 : vector<1x8x128xf32> to vector<8x128xf32>
    %164 = vector.extract_strided_slice %163 {offsets = [0, 0], sizes = [1, 96], strides = [1, 1]} : vector<8x128xf32> to vector<1x96xf32>
    %165 = vector.extract_strided_slice %163 {offsets = [1, 0], sizes = [1, 32], strides = [1, 1]} : vector<8x128xf32> to vector<1x32xf32>
    %166 = vector.extract_strided_slice %163 {offsets = [2, 0], sizes = [1, 32], strides = [1, 1]} : vector<8x128xf32> to vector<1x32xf32>
    %167 = vector.extract_strided_slice %163 {offsets = [3, 0], sizes = [1, 32], strides = [1, 1]} : vector<8x128xf32> to vector<1x32xf32>
    %168 = vector.extract_strided_slice %163 {offsets = [4, 0], sizes = [1, 64], strides = [1, 1]} : vector<8x128xf32> to vector<1x64xf32>
    %169 = vector.extract_strided_slice %163 {offsets = [5, 0], sizes = [1, 32], strides = [1, 1]} : vector<8x128xf32> to vector<1x32xf32>
    %170 = vector.extract_strided_slice %163 {offsets = [6, 0], sizes = [1, 32], strides = [1, 1]} : vector<8x128xf32> to vector<1x32xf32>
    %171 = vector.extract_strided_slice %163 {offsets = [7, 0], sizes = [1, 32], strides = [1, 1]} : vector<8x128xf32> to vector<1x32xf32>
    %cst_68 = arith.constant dense<0.000000e+00> : vector<8x96xf32>
    %172 = tpu.matmul %153, %155, %cst_68 {dimension_numbers = #tpu.dot_dimension_numbers<[1], [0], [0], [1], [0, 0, 1, 1], [], []>} : vector<8x32xf32>, vector<32x96xf32>, vector<8x96xf32> -> vector<8x96xf32>
    %173 = vector.broadcast %164 : vector<1x96xf32> to vector<8x96xf32>
    %174 = arith.addf %172, %173 : vector<8x96xf32>
    %175 = vector.extract_strided_slice %174 {offsets = [0, 0], sizes = [8, 8], strides = [1, 1]} : vector<8x96xf32> to vector<8x8xf32>
    %cst_69 = arith.constant 0.353553385 : f32
    %176 = vector.broadcast %cst_69 : f32 to vector<8x8xf32>
    %177 = arith.mulf %175, %176 : vector<8x8xf32>
    %178 = vector.extract_strided_slice %174 {offsets = [0, 32], sizes = [8, 8], strides = [1, 1]} : vector<8x96xf32> to vector<8x8xf32>
    %179 = vector.extract_strided_slice %174 {offsets = [0, 64], sizes = [8, 8], strides = [1, 1]} : vector<8x96xf32> to vector<8x8xf32>
    %cst_70 = arith.constant dense<0.000000e+00> : vector<8x8xf32>
    %180 = tpu.matmul %177, %178, %cst_70 {dimension_numbers = #tpu.dot_dimension_numbers<[1], [1], [0], [0], [0, 0, 1, 0], [], []>} : vector<8x8xf32>, vector<8x8xf32>, vector<8x8xf32> -> vector<8x8xf32>
    %cst_71 = arith.constant dense<0xFF800000> : vector<8xf32>
    %181 = vector.multi_reduction <maximumf>, %180, %cst_71 [1] : vector<8x8xf32> to vector<8xf32>
    %182 = vector.shape_cast %181 : vector<8xf32> to vector<8x1xf32>
    %183 = vector.broadcast %182 : vector<8x1xf32> to vector<8x8xf32>
    %184 = arith.subf %180, %183 : vector<8x8xf32>
    %185 = math.exp %184 : vector<8x8xf32>
    %cst_72 = arith.constant dense<0.000000e+00> : vector<8xf32>
    %186 = vector.multi_reduction <add>, %185, %cst_72 [1] : vector<8x8xf32> to vector<8xf32>
    %187 = vector.shape_cast %186 : vector<8xf32> to vector<8x1xf32>
    %188 = vector.broadcast %187 : vector<8x1xf32> to vector<8x8xf32>
    %189 = arith.divf %185, %188 : vector<8x8xf32>
    %cst_73 = arith.constant dense<0.000000e+00> : vector<8x8xf32>
    %190 = tpu.matmul %189, %179, %cst_73 {dimension_numbers = #tpu.dot_dimension_numbers<[1], [0], [0], [1], [0, 0, 1, 1], [], []>} : vector<8x8xf32>, vector<8x8xf32>, vector<8x8xf32> -> vector<8x8xf32>
    %191 = vector.extract_strided_slice %157 {offsets = [0, 0], sizes = [8, 32], strides = [1, 1]} : vector<32x32xf32> to vector<8x32xf32>
    %cst_74 = arith.constant dense<0.000000e+00> : vector<8x32xf32>
    %192 = tpu.matmul %190, %191, %cst_74 {dimension_numbers = #tpu.dot_dimension_numbers<[1], [0], [0], [1], [0, 0, 1, 1], [], []>} : vector<8x8xf32>, vector<8x32xf32>, vector<8x32xf32> -> vector<8x32xf32>
    %193 = vector.broadcast %165 : vector<1x32xf32> to vector<8x32xf32>
    %194 = arith.addf %193, %192 : vector<8x32xf32>
    %195 = vector.extract_strided_slice %174 {offsets = [0, 8], sizes = [8, 8], strides = [1, 1]} : vector<8x96xf32> to vector<8x8xf32>
    %cst_75 = arith.constant 0.353553385 : f32
    %196 = vector.broadcast %cst_75 : f32 to vector<8x8xf32>
    %197 = arith.mulf %195, %196 : vector<8x8xf32>
    %198 = vector.extract_strided_slice %174 {offsets = [0, 40], sizes = [8, 8], strides = [1, 1]} : vector<8x96xf32> to vector<8x8xf32>
    %199 = vector.extract_strided_slice %174 {offsets = [0, 72], sizes = [8, 8], strides = [1, 1]} : vector<8x96xf32> to vector<8x8xf32>
    %cst_76 = arith.constant dense<0.000000e+00> : vector<8x8xf32>
    %200 = tpu.matmul %197, %198, %cst_76 {dimension_numbers = #tpu.dot_dimension_numbers<[1], [1], [0], [0], [0, 0, 1, 0], [], []>} : vector<8x8xf32>, vector<8x8xf32>, vector<8x8xf32> -> vector<8x8xf32>
    %cst_77 = arith.constant dense<0xFF800000> : vector<8xf32>
    %201 = vector.multi_reduction <maximumf>, %200, %cst_77 [1] : vector<8x8xf32> to vector<8xf32>
    %202 = vector.shape_cast %201 : vector<8xf32> to vector<8x1xf32>
    %203 = vector.broadcast %202 : vector<8x1xf32> to vector<8x8xf32>
    %204 = arith.subf %200, %203 : vector<8x8xf32>
    %205 = math.exp %204 : vector<8x8xf32>
    %cst_78 = arith.constant dense<0.000000e+00> : vector<8xf32>
    %206 = vector.multi_reduction <add>, %205, %cst_78 [1] : vector<8x8xf32> to vector<8xf32>
    %207 = vector.shape_cast %206 : vector<8xf32> to vector<8x1xf32>
    %208 = vector.broadcast %207 : vector<8x1xf32> to vector<8x8xf32>
    %209 = arith.divf %205, %208 : vector<8x8xf32>
    %cst_79 = arith.constant dense<0.000000e+00> : vector<8x8xf32>
    %210 = tpu.matmul %209, %199, %cst_79 {dimension_numbers = #tpu.dot_dimension_numbers<[1], [0], [0], [1], [0, 0, 1, 1], [], []>} : vector<8x8xf32>, vector<8x8xf32>, vector<8x8xf32> -> vector<8x8xf32>
    %211 = vector.extract_strided_slice %157 {offsets = [8, 0], sizes = [8, 32], strides = [1, 1]} : vector<32x32xf32> to vector<8x32xf32>
    %cst_80 = arith.constant dense<0.000000e+00> : vector<8x32xf32>
    %212 = tpu.matmul %210, %211, %cst_80 {dimension_numbers = #tpu.dot_dimension_numbers<[1], [0], [0], [1], [0, 0, 1, 1], [], []>} : vector<8x8xf32>, vector<8x32xf32>, vector<8x32xf32> -> vector<8x32xf32>
    %213 = arith.addf %194, %212 : vector<8x32xf32>
    %214 = vector.extract_strided_slice %174 {offsets = [0, 16], sizes = [8, 8], strides = [1, 1]} : vector<8x96xf32> to vector<8x8xf32>
    %cst_81 = arith.constant 0.353553385 : f32
    %215 = vector.broadcast %cst_81 : f32 to vector<8x8xf32>
    %216 = arith.mulf %214, %215 : vector<8x8xf32>
    %217 = vector.extract_strided_slice %174 {offsets = [0, 48], sizes = [8, 8], strides = [1, 1]} : vector<8x96xf32> to vector<8x8xf32>
    %218 = vector.extract_strided_slice %174 {offsets = [0, 80], sizes = [8, 8], strides = [1, 1]} : vector<8x96xf32> to vector<8x8xf32>
    %cst_82 = arith.constant dense<0.000000e+00> : vector<8x8xf32>
    %219 = tpu.matmul %216, %217, %cst_82 {dimension_numbers = #tpu.dot_dimension_numbers<[1], [1], [0], [0], [0, 0, 1, 0], [], []>} : vector<8x8xf32>, vector<8x8xf32>, vector<8x8xf32> -> vector<8x8xf32>
    %cst_83 = arith.constant dense<0xFF800000> : vector<8xf32>
    %220 = vector.multi_reduction <maximumf>, %219, %cst_83 [1] : vector<8x8xf32> to vector<8xf32>
    %221 = vector.shape_cast %220 : vector<8xf32> to vector<8x1xf32>
    %222 = vector.broadcast %221 : vector<8x1xf32> to vector<8x8xf32>
    %223 = arith.subf %219, %222 : vector<8x8xf32>
    %224 = math.exp %223 : vector<8x8xf32>
    %cst_84 = arith.constant dense<0.000000e+00> : vector<8xf32>
    %225 = vector.multi_reduction <add>, %224, %cst_84 [1] : vector<8x8xf32> to vector<8xf32>
    %226 = vector.shape_cast %225 : vector<8xf32> to vector<8x1xf32>
    %227 = vector.broadcast %226 : vector<8x1xf32> to vector<8x8xf32>
    %228 = arith.divf %224, %227 : vector<8x8xf32>
    %cst_85 = arith.constant dense<0.000000e+00> : vector<8x8xf32>
    %229 = tpu.matmul %228, %218, %cst_85 {dimension_numbers = #tpu.dot_dimension_numbers<[1], [0], [0], [1], [0, 0, 1, 1], [], []>} : vector<8x8xf32>, vector<8x8xf32>, vector<8x8xf32> -> vector<8x8xf32>
    %230 = vector.extract_strided_slice %157 {offsets = [16, 0], sizes = [8, 32], strides = [1, 1]} : vector<32x32xf32> to vector<8x32xf32>
    %cst_86 = arith.constant dense<0.000000e+00> : vector<8x32xf32>
    %231 = tpu.matmul %229, %230, %cst_86 {dimension_numbers = #tpu.dot_dimension_numbers<[1], [0], [0], [1], [0, 0, 1, 1], [], []>} : vector<8x8xf32>, vector<8x32xf32>, vector<8x32xf32> -> vector<8x32xf32>
    %232 = arith.addf %213, %231 : vector<8x32xf32>
    %233 = vector.extract_strided_slice %174 {offsets = [0, 24], sizes = [8, 8], strides = [1, 1]} : vector<8x96xf32> to vector<8x8xf32>
    %cst_87 = arith.constant 0.353553385 : f32
    %234 = vector.broadcast %cst_87 : f32 to vector<8x8xf32>
    %235 = arith.mulf %233, %234 : vector<8x8xf32>
    %236 = vector.extract_strided_slice %174 {offsets = [0, 56], sizes = [8, 8], strides = [1, 1]} : vector<8x96xf32> to vector<8x8xf32>
    %237 = vector.extract_strided_slice %174 {offsets = [0, 88], sizes = [8, 8], strides = [1, 1]} : vector<8x96xf32> to vector<8x8xf32>
    %cst_88 = arith.constant dense<0.000000e+00> : vector<8x8xf32>
    %238 = tpu.matmul %235, %236, %cst_88 {dimension_numbers = #tpu.dot_dimension_numbers<[1], [1], [0], [0], [0, 0, 1, 0], [], []>} : vector<8x8xf32>, vector<8x8xf32>, vector<8x8xf32> -> vector<8x8xf32>
    %cst_89 = arith.constant dense<0xFF800000> : vector<8xf32>
    %239 = vector.multi_reduction <maximumf>, %238, %cst_89 [1] : vector<8x8xf32> to vector<8xf32>
    %240 = vector.shape_cast %239 : vector<8xf32> to vector<8x1xf32>
    %241 = vector.broadcast %240 : vector<8x1xf32> to vector<8x8xf32>
    %242 = arith.subf %238, %241 : vector<8x8xf32>
    %243 = math.exp %242 : vector<8x8xf32>
    %cst_90 = arith.constant dense<0.000000e+00> : vector<8xf32>
    %244 = vector.multi_reduction <add>, %243, %cst_90 [1] : vector<8x8xf32> to vector<8xf32>
    %245 = vector.shape_cast %244 : vector<8xf32> to vector<8x1xf32>
    %246 = vector.broadcast %245 : vector<8x1xf32> to vector<8x8xf32>
    %247 = arith.divf %243, %246 : vector<8x8xf32>
    %cst_91 = arith.constant dense<0.000000e+00> : vector<8x8xf32>
    %248 = tpu.matmul %247, %237, %cst_91 {dimension_numbers = #tpu.dot_dimension_numbers<[1], [0], [0], [1], [0, 0, 1, 1], [], []>} : vector<8x8xf32>, vector<8x8xf32>, vector<8x8xf32> -> vector<8x8xf32>
    %249 = vector.extract_strided_slice %157 {offsets = [24, 0], sizes = [8, 32], strides = [1, 1]} : vector<32x32xf32> to vector<8x32xf32>
    %cst_92 = arith.constant dense<0.000000e+00> : vector<8x32xf32>
    %250 = tpu.matmul %248, %249, %cst_92 {dimension_numbers = #tpu.dot_dimension_numbers<[1], [0], [0], [1], [0, 0, 1, 1], [], []>} : vector<8x8xf32>, vector<8x32xf32>, vector<8x32xf32> -> vector<8x32xf32>
    %251 = arith.addf %232, %250 : vector<8x32xf32>
    %252 = arith.addf %153, %251 : vector<8x32xf32>
    %cst_93 = arith.constant dense<0.000000e+00> : vector<8xf32>
    %253 = vector.multi_reduction <add>, %252, %cst_93 [1] : vector<8x32xf32> to vector<8xf32>
    %254 = vector.shape_cast %253 : vector<8xf32> to vector<8x1xf32>
    %cst_94 = arith.constant 3.200000e+01 : f32
    %255 = vector.broadcast %cst_94 : f32 to vector<8x1xf32>
    %256 = arith.divf %254, %255 : vector<8x1xf32>
    %257 = vector.broadcast %256 : vector<8x1xf32> to vector<8x32xf32>
    %258 = arith.subf %252, %257 : vector<8x32xf32>
    %259 = arith.mulf %258, %258 : vector<8x32xf32>
    %cst_95 = arith.constant dense<0.000000e+00> : vector<8xf32>
    %260 = vector.multi_reduction <add>, %259, %cst_95 [1] : vector<8x32xf32> to vector<8xf32>
    %261 = vector.shape_cast %260 : vector<8xf32> to vector<8x1xf32>
    %cst_96 = arith.constant 3.200000e+01 : f32
    %262 = vector.broadcast %cst_96 : f32 to vector<8x1xf32>
    %263 = arith.divf %261, %262 : vector<8x1xf32>
    %264 = vector.broadcast %256 : vector<8x1xf32> to vector<8x32xf32>
    %265 = arith.subf %252, %264 : vector<8x32xf32>
    %cst_97 = arith.constant 9.99999974E-6 : f32
    %266 = vector.broadcast %cst_97 : f32 to vector<8x1xf32>
    %267 = arith.addf %263, %266 : vector<8x1xf32>
    %268 = math.rsqrt %267 : vector<8x1xf32>
    %269 = vector.broadcast %268 : vector<8x1xf32> to vector<8x32xf32>
    %270 = arith.mulf %265, %269 : vector<8x32xf32>
    %271 = vector.broadcast %166 : vector<1x32xf32> to vector<8x32xf32>
    %272 = arith.mulf %270, %271 : vector<8x32xf32>
    %273 = vector.broadcast %167 : vector<1x32xf32> to vector<8x32xf32>
    %274 = arith.addf %272, %273 : vector<8x32xf32>
    %cst_98 = arith.constant dense<0.000000e+00> : vector<8x64xf32>
    %275 = tpu.matmul %274, %159, %cst_98 {dimension_numbers = #tpu.dot_dimension_numbers<[1], [0], [0], [1], [0, 0, 1, 1], [], []>} : vector<8x32xf32>, vector<32x64xf32>, vector<8x64xf32> -> vector<8x64xf32>
    %276 = vector.broadcast %168 : vector<1x64xf32> to vector<8x64xf32>
    %277 = arith.addf %275, %276 : vector<8x64xf32>
    %cst_99 = arith.constant 0.000000e+00 : f32
    %278 = vector.broadcast %cst_99 : f32 to vector<8x64xf32>
    %279 = arith.maximumf %277, %278 : vector<8x64xf32>
    %cst_100 = arith.constant dense<0.000000e+00> : vector<8x32xf32>
    %280 = tpu.matmul %279, %161, %cst_100 {dimension_numbers = #tpu.dot_dimension_numbers<[1], [0], [0], [1], [0, 0, 1, 1], [], []>} : vector<8x64xf32>, vector<64x32xf32>, vector<8x32xf32> -> vector<8x32xf32>
    %281 = vector.broadcast %169 : vector<1x32xf32> to vector<8x32xf32>
    %282 = arith.addf %280, %281 : vector<8x32xf32>
    %283 = arith.addf %274, %282 : vector<8x32xf32>
    %cst_101 = arith.constant dense<0.000000e+00> : vector<8xf32>
    %284 = vector.multi_reduction <add>, %283, %cst_101 [1] : vector<8x32xf32> to vector<8xf32>
    %285 = vector.shape_cast %284 : vector<8xf32> to vector<8x1xf32>
    %cst_102 = arith.constant 3.200000e+01 : f32
    %286 = vector.broadcast %cst_102 : f32 to vector<8x1xf32>
    %287 = arith.divf %285, %286 : vector<8x1xf32>
    %288 = vector.broadcast %287 : vector<8x1xf32> to vector<8x32xf32>
    %289 = arith.subf %283, %288 : vector<8x32xf32>
    %290 = arith.mulf %289, %289 : vector<8x32xf32>
    %cst_103 = arith.constant dense<0.000000e+00> : vector<8xf32>
    %291 = vector.multi_reduction <add>, %290, %cst_103 [1] : vector<8x32xf32> to vector<8xf32>
    %292 = vector.shape_cast %291 : vector<8xf32> to vector<8x1xf32>
    %cst_104 = arith.constant 3.200000e+01 : f32
    %293 = vector.broadcast %cst_104 : f32 to vector<8x1xf32>
    %294 = arith.divf %292, %293 : vector<8x1xf32>
    %295 = vector.broadcast %287 : vector<8x1xf32> to vector<8x32xf32>
    %296 = arith.subf %283, %295 : vector<8x32xf32>
    %cst_105 = arith.constant 9.99999974E-6 : f32
    %297 = vector.broadcast %cst_105 : f32 to vector<8x1xf32>
    %298 = arith.addf %294, %297 : vector<8x1xf32>
    %299 = math.rsqrt %298 : vector<8x1xf32>
    %300 = vector.broadcast %299 : vector<8x1xf32> to vector<8x32xf32>
    %301 = arith.mulf %296, %300 : vector<8x32xf32>
    %302 = vector.broadcast %170 : vector<1x32xf32> to vector<8x32xf32>
    %303 = arith.mulf %301, %302 : vector<8x32xf32>
    %304 = vector.broadcast %171 : vector<1x32xf32> to vector<8x32xf32>
    %305 = arith.addf %303, %304 : vector<8x32xf32>
    %c0_106 = arith.constant 0 : index
    %c0_107 = arith.constant 0 : index
    %c0_108 = arith.constant 0 : index
    %306 = vector.load %arg7[%c0_106, %c0_107, %c0_108] : memref<1x8x32xf32, #tpu.memory_space<vmem>>, vector<1x8x32xf32>
    %307 = vector.shape_cast %306 : vector<1x8x32xf32> to vector<8x32xf32>
    %308 = vector.shape_cast %305 : vector<8x32xf32> to vector<1x8x32xf32>
    tpu.vector_store %arg7[%c0_106, %c0_107, %c0_108], %308 {strides = array<i32>} : memref<1x8x32xf32, #tpu.memory_space<vmem>>, vector<1x8x32xf32>,
    return
  }
  func.func @transform_0(%arg0: i32) -> (i32, i32, i32) {
    %c0_i32 = arith.constant 0 : i32
    %c0_i32_0 = arith.constant 0 : i32
    %c0_i32_1 = arith.constant 0 : i32
    return %arg0, %c0_i32, %c0_i32_0 : i32, i32, i32
  }
  func.func @transform_1(%arg0: i32) -> (i32, i32, i32) {
    %c0_i32 = arith.constant 0 : i32
    %c0_i32_0 = arith.constant 0 : i32
    %c0_i32_1 = arith.constant 0 : i32
    %c0_i32_2 = arith.constant 0 : i32
    return %c0_i32, %c0_i32_0, %c0_i32_1 : i32, i32, i32
  }
  func.func @transform_2(%arg0: i32) -> (i32, i32, i32) {
    %c0_i32 = arith.constant 0 : i32
    %c0_i32_0 = arith.constant 0 : i32
    %c0_i32_1 = arith.constant 0 : i32
    %c0_i32_2 = arith.constant 0 : i32
    return %c0_i32, %c0_i32_0, %c0_i32_1 : i32, i32, i32
  }
  func.func @transform_3(%arg0: i32) -> (i32, i32, i32) {
    %c0_i32 = arith.constant 0 : i32
    %c0_i32_0 = arith.constant 0 : i32
    %c0_i32_1 = arith.constant 0 : i32
    %c0_i32_2 = arith.constant 0 : i32
    return %c0_i32, %c0_i32_0, %c0_i32_1 : i32, i32, i32
  }
  func.func @transform_4(%arg0: i32) -> (i32, i32, i32) {
    %c0_i32 = arith.constant 0 : i32
    %c0_i32_0 = arith.constant 0 : i32
    %c0_i32_1 = arith.constant 0 : i32
    %c0_i32_2 = arith.constant 0 : i32
    return %c0_i32, %c0_i32_0, %c0_i32_1 : i32, i32, i32
  }
  func.func @transform_5(%arg0: i32) -> (i32, i32, i32) {
    %c0_i32 = arith.constant 0 : i32
    %c0_i32_0 = arith.constant 0 : i32
    %c0_i32_1 = arith.constant 0 : i32
    %c0_i32_2 = arith.constant 0 : i32
    return %c0_i32, %c0_i32_0, %c0_i32_1 : i32, i32, i32
  }
  func.func @transform_6(%arg0: i32) -> (i32, i32, i32) {
    %c0_i32 = arith.constant 0 : i32
    %c0_i32_0 = arith.constant 0 : i32
    %c0_i32_1 = arith.constant 0 : i32
    return %arg0, %c0_i32, %c0_i32_0 : i32, i32, i32
  }
}

module attributes {stable_mosaic.version = 11 : i64} {
  func.func @_conv_mm_kernel(%arg0: i32, %arg1: memref<1x6x384xf32, #tpu.memory_space<vmem>>, %arg2: memref<384x32xf32, #tpu.memory_space<vmem>>, %arg3: memref<1x32xf32, #tpu.memory_space<vmem>>, %arg4: memref<1x6x32xf32, #tpu.memory_space<vmem>>) attributes {dimension_semantics = [#tpu.dimension_semantics<parallel>], iteration_bounds = array<i64: 2>, scalar_prefetch = 0 : i64, scratch_operands = 0 : i64, tpu.core_type = #tpu.core_type<tc>, window_params = [{transform_indices = @transform_0, window_bounds = array<i64: 1, 6, 384>}, {pipeline_mode = #tpu.pipeline_mode<synchronous>, transform_indices = @transform_1, window_bounds = array<i64: 384, 32>}, {pipeline_mode = #tpu.pipeline_mode<synchronous>, transform_indices = @transform_2, window_bounds = array<i64: 1, 32>}, {transform_indices = @transform_3, window_bounds = array<i64: 1, 6, 32>}]} {
    %c0 = arith.constant 0 : index
    %c0_0 = arith.constant 0 : index
    %c0_1 = arith.constant 0 : index
    %0 = vector.load %arg1[%c0, %c0_0, %c0_1] : memref<1x6x384xf32, #tpu.memory_space<vmem>>, vector<1x6x384xf32>
    %1 = vector.shape_cast %0 : vector<1x6x384xf32> to vector<6x384xf32>
    %c0_2 = arith.constant 0 : index
    %c0_3 = arith.constant 0 : index
    %2 = vector.load %arg2[%c0_2, %c0_3] : memref<384x32xf32, #tpu.memory_space<vmem>>, vector<384x32xf32>
    %cst = arith.constant dense<0.000000e+00> : vector<6x32xf32>
    %3 = tpu.matmul %1, %2, %cst {dimension_numbers = #tpu.dot_dimension_numbers<[1], [0], [0], [1], [0, 0, 1, 1], [], []>} : vector<6x384xf32>, vector<384x32xf32>, vector<6x32xf32> -> vector<6x32xf32>
    %c0_4 = arith.constant 0 : index
    %c0_5 = arith.constant 0 : index
    %4 = vector.load %arg3[%c0_4, %c0_5] : memref<1x32xf32, #tpu.memory_space<vmem>>, vector<1x32xf32>
    %5 = vector.broadcast %4 : vector<1x32xf32> to vector<6x32xf32>
    %6 = arith.addf %3, %5 : vector<6x32xf32>
    %cst_6 = arith.constant 0.000000e+00 : f32
    %7 = vector.broadcast %cst_6 : f32 to vector<6x32xf32>
    %8 = arith.maximumf %6, %7 : vector<6x32xf32>
    %c0_7 = arith.constant 0 : index
    %c0_8 = arith.constant 0 : index
    %c0_9 = arith.constant 0 : index
    %9 = vector.load %arg4[%c0_7, %c0_8, %c0_9] : memref<1x6x32xf32, #tpu.memory_space<vmem>>, vector<1x6x32xf32>
    %10 = vector.shape_cast %9 : vector<1x6x32xf32> to vector<6x32xf32>
    %11 = vector.shape_cast %8 : vector<6x32xf32> to vector<1x6x32xf32>
    tpu.vector_store %arg4[%c0_7, %c0_8, %c0_9], %11 {strides = array<i32>} : memref<1x6x32xf32, #tpu.memory_space<vmem>>, vector<1x6x32xf32>,
    return
  }
  func.func @transform_0(%arg0: i32) -> (i32, i32, i32) {
    %c0_i32 = arith.constant 0 : i32
    %c0_i32_0 = arith.constant 0 : i32
    %c0_i32_1 = arith.constant 0 : i32
    return %arg0, %c0_i32, %c0_i32_0 : i32, i32, i32
  }
  func.func @transform_1(%arg0: i32) -> (i32, i32) {
    %c0_i32 = arith.constant 0 : i32
    %c0_i32_0 = arith.constant 0 : i32
    %c0_i32_1 = arith.constant 0 : i32
    return %c0_i32, %c0_i32_0 : i32, i32
  }
  func.func @transform_2(%arg0: i32) -> (i32, i32) {
    %c0_i32 = arith.constant 0 : i32
    %c0_i32_0 = arith.constant 0 : i32
    %c0_i32_1 = arith.constant 0 : i32
    return %c0_i32, %c0_i32_0 : i32, i32
  }
  func.func @transform_3(%arg0: i32) -> (i32, i32, i32) {
    %c0_i32 = arith.constant 0 : i32
    %c0_i32_0 = arith.constant 0 : i32
    %c0_i32_1 = arith.constant 0 : i32
    return %arg0, %c0_i32, %c0_i32_0 : i32, i32, i32
  }
}

module attributes {stable_mosaic.version = 11 : i64} {
  func.func @_encoder_stack_kernel(%arg0: i32, %arg1: memref<1x6x32xf32, #tpu.memory_space<vmem>>, %arg2: memref<2x32x96xf32, #tpu.memory_space<vmem>>, %arg3: memref<2x32x32xf32, #tpu.memory_space<vmem>>, %arg4: memref<2x32x64xf32, #tpu.memory_space<vmem>>, %arg5: memref<2x64x32xf32, #tpu.memory_space<vmem>>, %arg6: memref<2x8x128xf32, #tpu.memory_space<vmem>>, %arg7: memref<1x6x32xf32, #tpu.memory_space<vmem>>) attributes {dimension_semantics = [#tpu.dimension_semantics<parallel>], iteration_bounds = array<i64: 2>, scalar_prefetch = 0 : i64, scratch_operands = 0 : i64, tpu.core_type = #tpu.core_type<tc>, window_params = [{transform_indices = @transform_0, window_bounds = array<i64: 1, 6, 32>}, {pipeline_mode = #tpu.pipeline_mode<synchronous>, transform_indices = @transform_1, window_bounds = array<i64: 2, 32, 96>}, {pipeline_mode = #tpu.pipeline_mode<synchronous>, transform_indices = @transform_2, window_bounds = array<i64: 2, 32, 32>}, {pipeline_mode = #tpu.pipeline_mode<synchronous>, transform_indices = @transform_3, window_bounds = array<i64: 2, 32, 64>}, {pipeline_mode = #tpu.pipeline_mode<synchronous>, transform_indices = @transform_4, window_bounds = array<i64: 2, 64, 32>}, {pipeline_mode = #tpu.pipeline_mode<synchronous>, transform_indices = @transform_5, window_bounds = array<i64: 2, 8, 128>}, {transform_indices = @transform_6, window_bounds = array<i64: 1, 6, 32>}]} {
    %c0 = arith.constant 0 : index
    %c0_0 = arith.constant 0 : index
    %c0_1 = arith.constant 0 : index
    %0 = vector.load %arg1[%c0, %c0_0, %c0_1] : memref<1x6x32xf32, #tpu.memory_space<vmem>>, vector<1x6x32xf32>
    %1 = vector.shape_cast %0 : vector<1x6x32xf32> to vector<6x32xf32>
    %c0_2 = arith.constant 0 : index
    %c0_3 = arith.constant 0 : index
    %c0_4 = arith.constant 0 : index
    %2 = vector.load %arg2[%c0_2, %c0_3, %c0_4] : memref<2x32x96xf32, #tpu.memory_space<vmem>>, vector<1x32x96xf32>
    %3 = vector.shape_cast %2 : vector<1x32x96xf32> to vector<32x96xf32>
    %c0_5 = arith.constant 0 : index
    %c0_6 = arith.constant 0 : index
    %c0_7 = arith.constant 0 : index
    %4 = vector.load %arg3[%c0_5, %c0_6, %c0_7] : memref<2x32x32xf32, #tpu.memory_space<vmem>>, vector<1x32x32xf32>
    %5 = vector.shape_cast %4 : vector<1x32x32xf32> to vector<32x32xf32>
    %c0_8 = arith.constant 0 : index
    %c0_9 = arith.constant 0 : index
    %c0_10 = arith.constant 0 : index
    %6 = vector.load %arg4[%c0_8, %c0_9, %c0_10] : memref<2x32x64xf32, #tpu.memory_space<vmem>>, vector<1x32x64xf32>
    %7 = vector.shape_cast %6 : vector<1x32x64xf32> to vector<32x64xf32>
    %c0_11 = arith.constant 0 : index
    %c0_12 = arith.constant 0 : index
    %c0_13 = arith.constant 0 : index
    %8 = vector.load %arg5[%c0_11, %c0_12, %c0_13] : memref<2x64x32xf32, #tpu.memory_space<vmem>>, vector<1x64x32xf32>
    %9 = vector.shape_cast %8 : vector<1x64x32xf32> to vector<64x32xf32>
    %c0_14 = arith.constant 0 : index
    %c0_15 = arith.constant 0 : index
    %c0_16 = arith.constant 0 : index
    %10 = vector.load %arg6[%c0_14, %c0_15, %c0_16] : memref<2x8x128xf32, #tpu.memory_space<vmem>>, vector<1x8x128xf32>
    %11 = vector.shape_cast %10 : vector<1x8x128xf32> to vector<8x128xf32>
    %12 = vector.extract_strided_slice %11 {offsets = [0, 0], sizes = [1, 96], strides = [1, 1]} : vector<8x128xf32> to vector<1x96xf32>
    %13 = vector.extract_strided_slice %11 {offsets = [1, 0], sizes = [1, 32], strides = [1, 1]} : vector<8x128xf32> to vector<1x32xf32>
    %14 = vector.extract_strided_slice %11 {offsets = [2, 0], sizes = [1, 32], strides = [1, 1]} : vector<8x128xf32> to vector<1x32xf32>
    %15 = vector.extract_strided_slice %11 {offsets = [3, 0], sizes = [1, 32], strides = [1, 1]} : vector<8x128xf32> to vector<1x32xf32>
    %16 = vector.extract_strided_slice %11 {offsets = [4, 0], sizes = [1, 64], strides = [1, 1]} : vector<8x128xf32> to vector<1x64xf32>
    %17 = vector.extract_strided_slice %11 {offsets = [5, 0], sizes = [1, 32], strides = [1, 1]} : vector<8x128xf32> to vector<1x32xf32>
    %18 = vector.extract_strided_slice %11 {offsets = [6, 0], sizes = [1, 32], strides = [1, 1]} : vector<8x128xf32> to vector<1x32xf32>
    %19 = vector.extract_strided_slice %11 {offsets = [7, 0], sizes = [1, 32], strides = [1, 1]} : vector<8x128xf32> to vector<1x32xf32>
    %cst = arith.constant dense<0.000000e+00> : vector<6x96xf32>
    %20 = tpu.matmul %1, %3, %cst {dimension_numbers = #tpu.dot_dimension_numbers<[1], [0], [0], [1], [0, 0, 1, 1], [], []>} : vector<6x32xf32>, vector<32x96xf32>, vector<6x96xf32> -> vector<6x96xf32>
    %21 = vector.broadcast %12 : vector<1x96xf32> to vector<6x96xf32>
    %22 = arith.addf %20, %21 : vector<6x96xf32>
    %23 = vector.extract_strided_slice %22 {offsets = [0, 0], sizes = [6, 8], strides = [1, 1]} : vector<6x96xf32> to vector<6x8xf32>
    %cst_17 = arith.constant 0.353553385 : f32
    %24 = vector.broadcast %cst_17 : f32 to vector<6x8xf32>
    %25 = arith.mulf %23, %24 : vector<6x8xf32>
    %26 = vector.extract_strided_slice %22 {offsets = [0, 32], sizes = [6, 8], strides = [1, 1]} : vector<6x96xf32> to vector<6x8xf32>
    %27 = vector.extract_strided_slice %22 {offsets = [0, 64], sizes = [6, 8], strides = [1, 1]} : vector<6x96xf32> to vector<6x8xf32>
    %cst_18 = arith.constant dense<0.000000e+00> : vector<6x6xf32>
    %28 = tpu.matmul %25, %26, %cst_18 {dimension_numbers = #tpu.dot_dimension_numbers<[1], [1], [0], [0], [0, 0, 1, 0], [], []>} : vector<6x8xf32>, vector<6x8xf32>, vector<6x6xf32> -> vector<6x6xf32>
    %cst_19 = arith.constant dense<0xFF800000> : vector<6xf32>
    %29 = vector.multi_reduction <maximumf>, %28, %cst_19 [1] : vector<6x6xf32> to vector<6xf32>
    %30 = vector.shape_cast %29 : vector<6xf32> to vector<6x1xf32>
    %31 = vector.broadcast %30 : vector<6x1xf32> to vector<6x6xf32>
    %32 = arith.subf %28, %31 : vector<6x6xf32>
    %33 = math.exp %32 : vector<6x6xf32>
    %cst_20 = arith.constant dense<0.000000e+00> : vector<6xf32>
    %34 = vector.multi_reduction <add>, %33, %cst_20 [1] : vector<6x6xf32> to vector<6xf32>
    %35 = vector.shape_cast %34 : vector<6xf32> to vector<6x1xf32>
    %36 = vector.broadcast %35 : vector<6x1xf32> to vector<6x6xf32>
    %37 = arith.divf %33, %36 : vector<6x6xf32>
    %cst_21 = arith.constant dense<0.000000e+00> : vector<6x8xf32>
    %38 = tpu.matmul %37, %27, %cst_21 {dimension_numbers = #tpu.dot_dimension_numbers<[1], [0], [0], [1], [0, 0, 1, 1], [], []>} : vector<6x6xf32>, vector<6x8xf32>, vector<6x8xf32> -> vector<6x8xf32>
    %39 = vector.extract_strided_slice %5 {offsets = [0, 0], sizes = [8, 32], strides = [1, 1]} : vector<32x32xf32> to vector<8x32xf32>
    %cst_22 = arith.constant dense<0.000000e+00> : vector<6x32xf32>
    %40 = tpu.matmul %38, %39, %cst_22 {dimension_numbers = #tpu.dot_dimension_numbers<[1], [0], [0], [1], [0, 0, 1, 1], [], []>} : vector<6x8xf32>, vector<8x32xf32>, vector<6x32xf32> -> vector<6x32xf32>
    %41 = vector.broadcast %13 : vector<1x32xf32> to vector<6x32xf32>
    %42 = arith.addf %41, %40 : vector<6x32xf32>
    %43 = vector.extract_strided_slice %22 {offsets = [0, 8], sizes = [6, 8], strides = [1, 1]} : vector<6x96xf32> to vector<6x8xf32>
    %cst_23 = arith.constant 0.353553385 : f32
    %44 = vector.broadcast %cst_23 : f32 to vector<6x8xf32>
    %45 = arith.mulf %43, %44 : vector<6x8xf32>
    %46 = vector.extract_strided_slice %22 {offsets = [0, 40], sizes = [6, 8], strides = [1, 1]} : vector<6x96xf32> to vector<6x8xf32>
    %47 = vector.extract_strided_slice %22 {offsets = [0, 72], sizes = [6, 8], strides = [1, 1]} : vector<6x96xf32> to vector<6x8xf32>
    %cst_24 = arith.constant dense<0.000000e+00> : vector<6x6xf32>
    %48 = tpu.matmul %45, %46, %cst_24 {dimension_numbers = #tpu.dot_dimension_numbers<[1], [1], [0], [0], [0, 0, 1, 0], [], []>} : vector<6x8xf32>, vector<6x8xf32>, vector<6x6xf32> -> vector<6x6xf32>
    %cst_25 = arith.constant dense<0xFF800000> : vector<6xf32>
    %49 = vector.multi_reduction <maximumf>, %48, %cst_25 [1] : vector<6x6xf32> to vector<6xf32>
    %50 = vector.shape_cast %49 : vector<6xf32> to vector<6x1xf32>
    %51 = vector.broadcast %50 : vector<6x1xf32> to vector<6x6xf32>
    %52 = arith.subf %48, %51 : vector<6x6xf32>
    %53 = math.exp %52 : vector<6x6xf32>
    %cst_26 = arith.constant dense<0.000000e+00> : vector<6xf32>
    %54 = vector.multi_reduction <add>, %53, %cst_26 [1] : vector<6x6xf32> to vector<6xf32>
    %55 = vector.shape_cast %54 : vector<6xf32> to vector<6x1xf32>
    %56 = vector.broadcast %55 : vector<6x1xf32> to vector<6x6xf32>
    %57 = arith.divf %53, %56 : vector<6x6xf32>
    %cst_27 = arith.constant dense<0.000000e+00> : vector<6x8xf32>
    %58 = tpu.matmul %57, %47, %cst_27 {dimension_numbers = #tpu.dot_dimension_numbers<[1], [0], [0], [1], [0, 0, 1, 1], [], []>} : vector<6x6xf32>, vector<6x8xf32>, vector<6x8xf32> -> vector<6x8xf32>
    %59 = vector.extract_strided_slice %5 {offsets = [8, 0], sizes = [8, 32], strides = [1, 1]} : vector<32x32xf32> to vector<8x32xf32>
    %cst_28 = arith.constant dense<0.000000e+00> : vector<6x32xf32>
    %60 = tpu.matmul %58, %59, %cst_28 {dimension_numbers = #tpu.dot_dimension_numbers<[1], [0], [0], [1], [0, 0, 1, 1], [], []>} : vector<6x8xf32>, vector<8x32xf32>, vector<6x32xf32> -> vector<6x32xf32>
    %61 = arith.addf %42, %60 : vector<6x32xf32>
    %62 = vector.extract_strided_slice %22 {offsets = [0, 16], sizes = [6, 8], strides = [1, 1]} : vector<6x96xf32> to vector<6x8xf32>
    %cst_29 = arith.constant 0.353553385 : f32
    %63 = vector.broadcast %cst_29 : f32 to vector<6x8xf32>
    %64 = arith.mulf %62, %63 : vector<6x8xf32>
    %65 = vector.extract_strided_slice %22 {offsets = [0, 48], sizes = [6, 8], strides = [1, 1]} : vector<6x96xf32> to vector<6x8xf32>
    %66 = vector.extract_strided_slice %22 {offsets = [0, 80], sizes = [6, 8], strides = [1, 1]} : vector<6x96xf32> to vector<6x8xf32>
    %cst_30 = arith.constant dense<0.000000e+00> : vector<6x6xf32>
    %67 = tpu.matmul %64, %65, %cst_30 {dimension_numbers = #tpu.dot_dimension_numbers<[1], [1], [0], [0], [0, 0, 1, 0], [], []>} : vector<6x8xf32>, vector<6x8xf32>, vector<6x6xf32> -> vector<6x6xf32>
    %cst_31 = arith.constant dense<0xFF800000> : vector<6xf32>
    %68 = vector.multi_reduction <maximumf>, %67, %cst_31 [1] : vector<6x6xf32> to vector<6xf32>
    %69 = vector.shape_cast %68 : vector<6xf32> to vector<6x1xf32>
    %70 = vector.broadcast %69 : vector<6x1xf32> to vector<6x6xf32>
    %71 = arith.subf %67, %70 : vector<6x6xf32>
    %72 = math.exp %71 : vector<6x6xf32>
    %cst_32 = arith.constant dense<0.000000e+00> : vector<6xf32>
    %73 = vector.multi_reduction <add>, %72, %cst_32 [1] : vector<6x6xf32> to vector<6xf32>
    %74 = vector.shape_cast %73 : vector<6xf32> to vector<6x1xf32>
    %75 = vector.broadcast %74 : vector<6x1xf32> to vector<6x6xf32>
    %76 = arith.divf %72, %75 : vector<6x6xf32>
    %cst_33 = arith.constant dense<0.000000e+00> : vector<6x8xf32>
    %77 = tpu.matmul %76, %66, %cst_33 {dimension_numbers = #tpu.dot_dimension_numbers<[1], [0], [0], [1], [0, 0, 1, 1], [], []>} : vector<6x6xf32>, vector<6x8xf32>, vector<6x8xf32> -> vector<6x8xf32>
    %78 = vector.extract_strided_slice %5 {offsets = [16, 0], sizes = [8, 32], strides = [1, 1]} : vector<32x32xf32> to vector<8x32xf32>
    %cst_34 = arith.constant dense<0.000000e+00> : vector<6x32xf32>
    %79 = tpu.matmul %77, %78, %cst_34 {dimension_numbers = #tpu.dot_dimension_numbers<[1], [0], [0], [1], [0, 0, 1, 1], [], []>} : vector<6x8xf32>, vector<8x32xf32>, vector<6x32xf32> -> vector<6x32xf32>
    %80 = arith.addf %61, %79 : vector<6x32xf32>
    %81 = vector.extract_strided_slice %22 {offsets = [0, 24], sizes = [6, 8], strides = [1, 1]} : vector<6x96xf32> to vector<6x8xf32>
    %cst_35 = arith.constant 0.353553385 : f32
    %82 = vector.broadcast %cst_35 : f32 to vector<6x8xf32>
    %83 = arith.mulf %81, %82 : vector<6x8xf32>
    %84 = vector.extract_strided_slice %22 {offsets = [0, 56], sizes = [6, 8], strides = [1, 1]} : vector<6x96xf32> to vector<6x8xf32>
    %85 = vector.extract_strided_slice %22 {offsets = [0, 88], sizes = [6, 8], strides = [1, 1]} : vector<6x96xf32> to vector<6x8xf32>
    %cst_36 = arith.constant dense<0.000000e+00> : vector<6x6xf32>
    %86 = tpu.matmul %83, %84, %cst_36 {dimension_numbers = #tpu.dot_dimension_numbers<[1], [1], [0], [0], [0, 0, 1, 0], [], []>} : vector<6x8xf32>, vector<6x8xf32>, vector<6x6xf32> -> vector<6x6xf32>
    %cst_37 = arith.constant dense<0xFF800000> : vector<6xf32>
    %87 = vector.multi_reduction <maximumf>, %86, %cst_37 [1] : vector<6x6xf32> to vector<6xf32>
    %88 = vector.shape_cast %87 : vector<6xf32> to vector<6x1xf32>
    %89 = vector.broadcast %88 : vector<6x1xf32> to vector<6x6xf32>
    %90 = arith.subf %86, %89 : vector<6x6xf32>
    %91 = math.exp %90 : vector<6x6xf32>
    %cst_38 = arith.constant dense<0.000000e+00> : vector<6xf32>
    %92 = vector.multi_reduction <add>, %91, %cst_38 [1] : vector<6x6xf32> to vector<6xf32>
    %93 = vector.shape_cast %92 : vector<6xf32> to vector<6x1xf32>
    %94 = vector.broadcast %93 : vector<6x1xf32> to vector<6x6xf32>
    %95 = arith.divf %91, %94 : vector<6x6xf32>
    %cst_39 = arith.constant dense<0.000000e+00> : vector<6x8xf32>
    %96 = tpu.matmul %95, %85, %cst_39 {dimension_numbers = #tpu.dot_dimension_numbers<[1], [0], [0], [1], [0, 0, 1, 1], [], []>} : vector<6x6xf32>, vector<6x8xf32>, vector<6x8xf32> -> vector<6x8xf32>
    %97 = vector.extract_strided_slice %5 {offsets = [24, 0], sizes = [8, 32], strides = [1, 1]} : vector<32x32xf32> to vector<8x32xf32>
    %cst_40 = arith.constant dense<0.000000e+00> : vector<6x32xf32>
    %98 = tpu.matmul %96, %97, %cst_40 {dimension_numbers = #tpu.dot_dimension_numbers<[1], [0], [0], [1], [0, 0, 1, 1], [], []>} : vector<6x8xf32>, vector<8x32xf32>, vector<6x32xf32> -> vector<6x32xf32>
    %99 = arith.addf %80, %98 : vector<6x32xf32>
    %100 = arith.addf %1, %99 : vector<6x32xf32>
    %cst_41 = arith.constant dense<0.000000e+00> : vector<6xf32>
    %101 = vector.multi_reduction <add>, %100, %cst_41 [1] : vector<6x32xf32> to vector<6xf32>
    %102 = vector.shape_cast %101 : vector<6xf32> to vector<6x1xf32>
    %cst_42 = arith.constant 3.200000e+01 : f32
    %103 = vector.broadcast %cst_42 : f32 to vector<6x1xf32>
    %104 = arith.divf %102, %103 : vector<6x1xf32>
    %105 = vector.broadcast %104 : vector<6x1xf32> to vector<6x32xf32>
    %106 = arith.subf %100, %105 : vector<6x32xf32>
    %107 = arith.mulf %106, %106 : vector<6x32xf32>
    %cst_43 = arith.constant dense<0.000000e+00> : vector<6xf32>
    %108 = vector.multi_reduction <add>, %107, %cst_43 [1] : vector<6x32xf32> to vector<6xf32>
    %109 = vector.shape_cast %108 : vector<6xf32> to vector<6x1xf32>
    %cst_44 = arith.constant 3.200000e+01 : f32
    %110 = vector.broadcast %cst_44 : f32 to vector<6x1xf32>
    %111 = arith.divf %109, %110 : vector<6x1xf32>
    %112 = vector.broadcast %104 : vector<6x1xf32> to vector<6x32xf32>
    %113 = arith.subf %100, %112 : vector<6x32xf32>
    %cst_45 = arith.constant 9.99999974E-6 : f32
    %114 = vector.broadcast %cst_45 : f32 to vector<6x1xf32>
    %115 = arith.addf %111, %114 : vector<6x1xf32>
    %116 = math.rsqrt %115 : vector<6x1xf32>
    %117 = vector.broadcast %116 : vector<6x1xf32> to vector<6x32xf32>
    %118 = arith.mulf %113, %117 : vector<6x32xf32>
    %119 = vector.broadcast %14 : vector<1x32xf32> to vector<6x32xf32>
    %120 = arith.mulf %118, %119 : vector<6x32xf32>
    %121 = vector.broadcast %15 : vector<1x32xf32> to vector<6x32xf32>
    %122 = arith.addf %120, %121 : vector<6x32xf32>
    %cst_46 = arith.constant dense<0.000000e+00> : vector<6x64xf32>
    %123 = tpu.matmul %122, %7, %cst_46 {dimension_numbers = #tpu.dot_dimension_numbers<[1], [0], [0], [1], [0, 0, 1, 1], [], []>} : vector<6x32xf32>, vector<32x64xf32>, vector<6x64xf32> -> vector<6x64xf32>
    %124 = vector.broadcast %16 : vector<1x64xf32> to vector<6x64xf32>
    %125 = arith.addf %123, %124 : vector<6x64xf32>
    %cst_47 = arith.constant 0.000000e+00 : f32
    %126 = vector.broadcast %cst_47 : f32 to vector<6x64xf32>
    %127 = arith.maximumf %125, %126 : vector<6x64xf32>
    %cst_48 = arith.constant dense<0.000000e+00> : vector<6x32xf32>
    %128 = tpu.matmul %127, %9, %cst_48 {dimension_numbers = #tpu.dot_dimension_numbers<[1], [0], [0], [1], [0, 0, 1, 1], [], []>} : vector<6x64xf32>, vector<64x32xf32>, vector<6x32xf32> -> vector<6x32xf32>
    %129 = vector.broadcast %17 : vector<1x32xf32> to vector<6x32xf32>
    %130 = arith.addf %128, %129 : vector<6x32xf32>
    %131 = arith.addf %122, %130 : vector<6x32xf32>
    %cst_49 = arith.constant dense<0.000000e+00> : vector<6xf32>
    %132 = vector.multi_reduction <add>, %131, %cst_49 [1] : vector<6x32xf32> to vector<6xf32>
    %133 = vector.shape_cast %132 : vector<6xf32> to vector<6x1xf32>
    %cst_50 = arith.constant 3.200000e+01 : f32
    %134 = vector.broadcast %cst_50 : f32 to vector<6x1xf32>
    %135 = arith.divf %133, %134 : vector<6x1xf32>
    %136 = vector.broadcast %135 : vector<6x1xf32> to vector<6x32xf32>
    %137 = arith.subf %131, %136 : vector<6x32xf32>
    %138 = arith.mulf %137, %137 : vector<6x32xf32>
    %cst_51 = arith.constant dense<0.000000e+00> : vector<6xf32>
    %139 = vector.multi_reduction <add>, %138, %cst_51 [1] : vector<6x32xf32> to vector<6xf32>
    %140 = vector.shape_cast %139 : vector<6xf32> to vector<6x1xf32>
    %cst_52 = arith.constant 3.200000e+01 : f32
    %141 = vector.broadcast %cst_52 : f32 to vector<6x1xf32>
    %142 = arith.divf %140, %141 : vector<6x1xf32>
    %143 = vector.broadcast %135 : vector<6x1xf32> to vector<6x32xf32>
    %144 = arith.subf %131, %143 : vector<6x32xf32>
    %cst_53 = arith.constant 9.99999974E-6 : f32
    %145 = vector.broadcast %cst_53 : f32 to vector<6x1xf32>
    %146 = arith.addf %142, %145 : vector<6x1xf32>
    %147 = math.rsqrt %146 : vector<6x1xf32>
    %148 = vector.broadcast %147 : vector<6x1xf32> to vector<6x32xf32>
    %149 = arith.mulf %144, %148 : vector<6x32xf32>
    %150 = vector.broadcast %18 : vector<1x32xf32> to vector<6x32xf32>
    %151 = arith.mulf %149, %150 : vector<6x32xf32>
    %152 = vector.broadcast %19 : vector<1x32xf32> to vector<6x32xf32>
    %153 = arith.addf %151, %152 : vector<6x32xf32>
    %c1 = arith.constant 1 : index
    %c0_54 = arith.constant 0 : index
    %c0_55 = arith.constant 0 : index
    %154 = vector.load %arg2[%c1, %c0_54, %c0_55] : memref<2x32x96xf32, #tpu.memory_space<vmem>>, vector<1x32x96xf32>
    %155 = vector.shape_cast %154 : vector<1x32x96xf32> to vector<32x96xf32>
    %c1_56 = arith.constant 1 : index
    %c0_57 = arith.constant 0 : index
    %c0_58 = arith.constant 0 : index
    %156 = vector.load %arg3[%c1_56, %c0_57, %c0_58] : memref<2x32x32xf32, #tpu.memory_space<vmem>>, vector<1x32x32xf32>
    %157 = vector.shape_cast %156 : vector<1x32x32xf32> to vector<32x32xf32>
    %c1_59 = arith.constant 1 : index
    %c0_60 = arith.constant 0 : index
    %c0_61 = arith.constant 0 : index
    %158 = vector.load %arg4[%c1_59, %c0_60, %c0_61] : memref<2x32x64xf32, #tpu.memory_space<vmem>>, vector<1x32x64xf32>
    %159 = vector.shape_cast %158 : vector<1x32x64xf32> to vector<32x64xf32>
    %c1_62 = arith.constant 1 : index
    %c0_63 = arith.constant 0 : index
    %c0_64 = arith.constant 0 : index
    %160 = vector.load %arg5[%c1_62, %c0_63, %c0_64] : memref<2x64x32xf32, #tpu.memory_space<vmem>>, vector<1x64x32xf32>
    %161 = vector.shape_cast %160 : vector<1x64x32xf32> to vector<64x32xf32>
    %c1_65 = arith.constant 1 : index
    %c0_66 = arith.constant 0 : index
    %c0_67 = arith.constant 0 : index
    %162 = vector.load %arg6[%c1_65, %c0_66, %c0_67] : memref<2x8x128xf32, #tpu.memory_space<vmem>>, vector<1x8x128xf32>
    %163 = vector.shape_cast %162 : vector<1x8x128xf32> to vector<8x128xf32>
    %164 = vector.extract_strided_slice %163 {offsets = [0, 0], sizes = [1, 96], strides = [1, 1]} : vector<8x128xf32> to vector<1x96xf32>
    %165 = vector.extract_strided_slice %163 {offsets = [1, 0], sizes = [1, 32], strides = [1, 1]} : vector<8x128xf32> to vector<1x32xf32>
    %166 = vector.extract_strided_slice %163 {offsets = [2, 0], sizes = [1, 32], strides = [1, 1]} : vector<8x128xf32> to vector<1x32xf32>
    %167 = vector.extract_strided_slice %163 {offsets = [3, 0], sizes = [1, 32], strides = [1, 1]} : vector<8x128xf32> to vector<1x32xf32>
    %168 = vector.extract_strided_slice %163 {offsets = [4, 0], sizes = [1, 64], strides = [1, 1]} : vector<8x128xf32> to vector<1x64xf32>
    %169 = vector.extract_strided_slice %163 {offsets = [5, 0], sizes = [1, 32], strides = [1, 1]} : vector<8x128xf32> to vector<1x32xf32>
    %170 = vector.extract_strided_slice %163 {offsets = [6, 0], sizes = [1, 32], strides = [1, 1]} : vector<8x128xf32> to vector<1x32xf32>
    %171 = vector.extract_strided_slice %163 {offsets = [7, 0], sizes = [1, 32], strides = [1, 1]} : vector<8x128xf32> to vector<1x32xf32>
    %cst_68 = arith.constant dense<0.000000e+00> : vector<6x96xf32>
    %172 = tpu.matmul %153, %155, %cst_68 {dimension_numbers = #tpu.dot_dimension_numbers<[1], [0], [0], [1], [0, 0, 1, 1], [], []>} : vector<6x32xf32>, vector<32x96xf32>, vector<6x96xf32> -> vector<6x96xf32>
    %173 = vector.broadcast %164 : vector<1x96xf32> to vector<6x96xf32>
    %174 = arith.addf %172, %173 : vector<6x96xf32>
    %175 = vector.extract_strided_slice %174 {offsets = [0, 0], sizes = [6, 8], strides = [1, 1]} : vector<6x96xf32> to vector<6x8xf32>
    %cst_69 = arith.constant 0.353553385 : f32
    %176 = vector.broadcast %cst_69 : f32 to vector<6x8xf32>
    %177 = arith.mulf %175, %176 : vector<6x8xf32>
    %178 = vector.extract_strided_slice %174 {offsets = [0, 32], sizes = [6, 8], strides = [1, 1]} : vector<6x96xf32> to vector<6x8xf32>
    %179 = vector.extract_strided_slice %174 {offsets = [0, 64], sizes = [6, 8], strides = [1, 1]} : vector<6x96xf32> to vector<6x8xf32>
    %cst_70 = arith.constant dense<0.000000e+00> : vector<6x6xf32>
    %180 = tpu.matmul %177, %178, %cst_70 {dimension_numbers = #tpu.dot_dimension_numbers<[1], [1], [0], [0], [0, 0, 1, 0], [], []>} : vector<6x8xf32>, vector<6x8xf32>, vector<6x6xf32> -> vector<6x6xf32>
    %cst_71 = arith.constant dense<0xFF800000> : vector<6xf32>
    %181 = vector.multi_reduction <maximumf>, %180, %cst_71 [1] : vector<6x6xf32> to vector<6xf32>
    %182 = vector.shape_cast %181 : vector<6xf32> to vector<6x1xf32>
    %183 = vector.broadcast %182 : vector<6x1xf32> to vector<6x6xf32>
    %184 = arith.subf %180, %183 : vector<6x6xf32>
    %185 = math.exp %184 : vector<6x6xf32>
    %cst_72 = arith.constant dense<0.000000e+00> : vector<6xf32>
    %186 = vector.multi_reduction <add>, %185, %cst_72 [1] : vector<6x6xf32> to vector<6xf32>
    %187 = vector.shape_cast %186 : vector<6xf32> to vector<6x1xf32>
    %188 = vector.broadcast %187 : vector<6x1xf32> to vector<6x6xf32>
    %189 = arith.divf %185, %188 : vector<6x6xf32>
    %cst_73 = arith.constant dense<0.000000e+00> : vector<6x8xf32>
    %190 = tpu.matmul %189, %179, %cst_73 {dimension_numbers = #tpu.dot_dimension_numbers<[1], [0], [0], [1], [0, 0, 1, 1], [], []>} : vector<6x6xf32>, vector<6x8xf32>, vector<6x8xf32> -> vector<6x8xf32>
    %191 = vector.extract_strided_slice %157 {offsets = [0, 0], sizes = [8, 32], strides = [1, 1]} : vector<32x32xf32> to vector<8x32xf32>
    %cst_74 = arith.constant dense<0.000000e+00> : vector<6x32xf32>
    %192 = tpu.matmul %190, %191, %cst_74 {dimension_numbers = #tpu.dot_dimension_numbers<[1], [0], [0], [1], [0, 0, 1, 1], [], []>} : vector<6x8xf32>, vector<8x32xf32>, vector<6x32xf32> -> vector<6x32xf32>
    %193 = vector.broadcast %165 : vector<1x32xf32> to vector<6x32xf32>
    %194 = arith.addf %193, %192 : vector<6x32xf32>
    %195 = vector.extract_strided_slice %174 {offsets = [0, 8], sizes = [6, 8], strides = [1, 1]} : vector<6x96xf32> to vector<6x8xf32>
    %cst_75 = arith.constant 0.353553385 : f32
    %196 = vector.broadcast %cst_75 : f32 to vector<6x8xf32>
    %197 = arith.mulf %195, %196 : vector<6x8xf32>
    %198 = vector.extract_strided_slice %174 {offsets = [0, 40], sizes = [6, 8], strides = [1, 1]} : vector<6x96xf32> to vector<6x8xf32>
    %199 = vector.extract_strided_slice %174 {offsets = [0, 72], sizes = [6, 8], strides = [1, 1]} : vector<6x96xf32> to vector<6x8xf32>
    %cst_76 = arith.constant dense<0.000000e+00> : vector<6x6xf32>
    %200 = tpu.matmul %197, %198, %cst_76 {dimension_numbers = #tpu.dot_dimension_numbers<[1], [1], [0], [0], [0, 0, 1, 0], [], []>} : vector<6x8xf32>, vector<6x8xf32>, vector<6x6xf32> -> vector<6x6xf32>
    %cst_77 = arith.constant dense<0xFF800000> : vector<6xf32>
    %201 = vector.multi_reduction <maximumf>, %200, %cst_77 [1] : vector<6x6xf32> to vector<6xf32>
    %202 = vector.shape_cast %201 : vector<6xf32> to vector<6x1xf32>
    %203 = vector.broadcast %202 : vector<6x1xf32> to vector<6x6xf32>
    %204 = arith.subf %200, %203 : vector<6x6xf32>
    %205 = math.exp %204 : vector<6x6xf32>
    %cst_78 = arith.constant dense<0.000000e+00> : vector<6xf32>
    %206 = vector.multi_reduction <add>, %205, %cst_78 [1] : vector<6x6xf32> to vector<6xf32>
    %207 = vector.shape_cast %206 : vector<6xf32> to vector<6x1xf32>
    %208 = vector.broadcast %207 : vector<6x1xf32> to vector<6x6xf32>
    %209 = arith.divf %205, %208 : vector<6x6xf32>
    %cst_79 = arith.constant dense<0.000000e+00> : vector<6x8xf32>
    %210 = tpu.matmul %209, %199, %cst_79 {dimension_numbers = #tpu.dot_dimension_numbers<[1], [0], [0], [1], [0, 0, 1, 1], [], []>} : vector<6x6xf32>, vector<6x8xf32>, vector<6x8xf32> -> vector<6x8xf32>
    %211 = vector.extract_strided_slice %157 {offsets = [8, 0], sizes = [8, 32], strides = [1, 1]} : vector<32x32xf32> to vector<8x32xf32>
    %cst_80 = arith.constant dense<0.000000e+00> : vector<6x32xf32>
    %212 = tpu.matmul %210, %211, %cst_80 {dimension_numbers = #tpu.dot_dimension_numbers<[1], [0], [0], [1], [0, 0, 1, 1], [], []>} : vector<6x8xf32>, vector<8x32xf32>, vector<6x32xf32> -> vector<6x32xf32>
    %213 = arith.addf %194, %212 : vector<6x32xf32>
    %214 = vector.extract_strided_slice %174 {offsets = [0, 16], sizes = [6, 8], strides = [1, 1]} : vector<6x96xf32> to vector<6x8xf32>
    %cst_81 = arith.constant 0.353553385 : f32
    %215 = vector.broadcast %cst_81 : f32 to vector<6x8xf32>
    %216 = arith.mulf %214, %215 : vector<6x8xf32>
    %217 = vector.extract_strided_slice %174 {offsets = [0, 48], sizes = [6, 8], strides = [1, 1]} : vector<6x96xf32> to vector<6x8xf32>
    %218 = vector.extract_strided_slice %174 {offsets = [0, 80], sizes = [6, 8], strides = [1, 1]} : vector<6x96xf32> to vector<6x8xf32>
    %cst_82 = arith.constant dense<0.000000e+00> : vector<6x6xf32>
    %219 = tpu.matmul %216, %217, %cst_82 {dimension_numbers = #tpu.dot_dimension_numbers<[1], [1], [0], [0], [0, 0, 1, 0], [], []>} : vector<6x8xf32>, vector<6x8xf32>, vector<6x6xf32> -> vector<6x6xf32>
    %cst_83 = arith.constant dense<0xFF800000> : vector<6xf32>
    %220 = vector.multi_reduction <maximumf>, %219, %cst_83 [1] : vector<6x6xf32> to vector<6xf32>
    %221 = vector.shape_cast %220 : vector<6xf32> to vector<6x1xf32>
    %222 = vector.broadcast %221 : vector<6x1xf32> to vector<6x6xf32>
    %223 = arith.subf %219, %222 : vector<6x6xf32>
    %224 = math.exp %223 : vector<6x6xf32>
    %cst_84 = arith.constant dense<0.000000e+00> : vector<6xf32>
    %225 = vector.multi_reduction <add>, %224, %cst_84 [1] : vector<6x6xf32> to vector<6xf32>
    %226 = vector.shape_cast %225 : vector<6xf32> to vector<6x1xf32>
    %227 = vector.broadcast %226 : vector<6x1xf32> to vector<6x6xf32>
    %228 = arith.divf %224, %227 : vector<6x6xf32>
    %cst_85 = arith.constant dense<0.000000e+00> : vector<6x8xf32>
    %229 = tpu.matmul %228, %218, %cst_85 {dimension_numbers = #tpu.dot_dimension_numbers<[1], [0], [0], [1], [0, 0, 1, 1], [], []>} : vector<6x6xf32>, vector<6x8xf32>, vector<6x8xf32> -> vector<6x8xf32>
    %230 = vector.extract_strided_slice %157 {offsets = [16, 0], sizes = [8, 32], strides = [1, 1]} : vector<32x32xf32> to vector<8x32xf32>
    %cst_86 = arith.constant dense<0.000000e+00> : vector<6x32xf32>
    %231 = tpu.matmul %229, %230, %cst_86 {dimension_numbers = #tpu.dot_dimension_numbers<[1], [0], [0], [1], [0, 0, 1, 1], [], []>} : vector<6x8xf32>, vector<8x32xf32>, vector<6x32xf32> -> vector<6x32xf32>
    %232 = arith.addf %213, %231 : vector<6x32xf32>
    %233 = vector.extract_strided_slice %174 {offsets = [0, 24], sizes = [6, 8], strides = [1, 1]} : vector<6x96xf32> to vector<6x8xf32>
    %cst_87 = arith.constant 0.353553385 : f32
    %234 = vector.broadcast %cst_87 : f32 to vector<6x8xf32>
    %235 = arith.mulf %233, %234 : vector<6x8xf32>
    %236 = vector.extract_strided_slice %174 {offsets = [0, 56], sizes = [6, 8], strides = [1, 1]} : vector<6x96xf32> to vector<6x8xf32>
    %237 = vector.extract_strided_slice %174 {offsets = [0, 88], sizes = [6, 8], strides = [1, 1]} : vector<6x96xf32> to vector<6x8xf32>
    %cst_88 = arith.constant dense<0.000000e+00> : vector<6x6xf32>
    %238 = tpu.matmul %235, %236, %cst_88 {dimension_numbers = #tpu.dot_dimension_numbers<[1], [1], [0], [0], [0, 0, 1, 0], [], []>} : vector<6x8xf32>, vector<6x8xf32>, vector<6x6xf32> -> vector<6x6xf32>
    %cst_89 = arith.constant dense<0xFF800000> : vector<6xf32>
    %239 = vector.multi_reduction <maximumf>, %238, %cst_89 [1] : vector<6x6xf32> to vector<6xf32>
    %240 = vector.shape_cast %239 : vector<6xf32> to vector<6x1xf32>
    %241 = vector.broadcast %240 : vector<6x1xf32> to vector<6x6xf32>
    %242 = arith.subf %238, %241 : vector<6x6xf32>
    %243 = math.exp %242 : vector<6x6xf32>
    %cst_90 = arith.constant dense<0.000000e+00> : vector<6xf32>
    %244 = vector.multi_reduction <add>, %243, %cst_90 [1] : vector<6x6xf32> to vector<6xf32>
    %245 = vector.shape_cast %244 : vector<6xf32> to vector<6x1xf32>
    %246 = vector.broadcast %245 : vector<6x1xf32> to vector<6x6xf32>
    %247 = arith.divf %243, %246 : vector<6x6xf32>
    %cst_91 = arith.constant dense<0.000000e+00> : vector<6x8xf32>
    %248 = tpu.matmul %247, %237, %cst_91 {dimension_numbers = #tpu.dot_dimension_numbers<[1], [0], [0], [1], [0, 0, 1, 1], [], []>} : vector<6x6xf32>, vector<6x8xf32>, vector<6x8xf32> -> vector<6x8xf32>
    %249 = vector.extract_strided_slice %157 {offsets = [24, 0], sizes = [8, 32], strides = [1, 1]} : vector<32x32xf32> to vector<8x32xf32>
    %cst_92 = arith.constant dense<0.000000e+00> : vector<6x32xf32>
    %250 = tpu.matmul %248, %249, %cst_92 {dimension_numbers = #tpu.dot_dimension_numbers<[1], [0], [0], [1], [0, 0, 1, 1], [], []>} : vector<6x8xf32>, vector<8x32xf32>, vector<6x32xf32> -> vector<6x32xf32>
    %251 = arith.addf %232, %250 : vector<6x32xf32>
    %252 = arith.addf %153, %251 : vector<6x32xf32>
    %cst_93 = arith.constant dense<0.000000e+00> : vector<6xf32>
    %253 = vector.multi_reduction <add>, %252, %cst_93 [1] : vector<6x32xf32> to vector<6xf32>
    %254 = vector.shape_cast %253 : vector<6xf32> to vector<6x1xf32>
    %cst_94 = arith.constant 3.200000e+01 : f32
    %255 = vector.broadcast %cst_94 : f32 to vector<6x1xf32>
    %256 = arith.divf %254, %255 : vector<6x1xf32>
    %257 = vector.broadcast %256 : vector<6x1xf32> to vector<6x32xf32>
    %258 = arith.subf %252, %257 : vector<6x32xf32>
    %259 = arith.mulf %258, %258 : vector<6x32xf32>
    %cst_95 = arith.constant dense<0.000000e+00> : vector<6xf32>
    %260 = vector.multi_reduction <add>, %259, %cst_95 [1] : vector<6x32xf32> to vector<6xf32>
    %261 = vector.shape_cast %260 : vector<6xf32> to vector<6x1xf32>
    %cst_96 = arith.constant 3.200000e+01 : f32
    %262 = vector.broadcast %cst_96 : f32 to vector<6x1xf32>
    %263 = arith.divf %261, %262 : vector<6x1xf32>
    %264 = vector.broadcast %256 : vector<6x1xf32> to vector<6x32xf32>
    %265 = arith.subf %252, %264 : vector<6x32xf32>
    %cst_97 = arith.constant 9.99999974E-6 : f32
    %266 = vector.broadcast %cst_97 : f32 to vector<6x1xf32>
    %267 = arith.addf %263, %266 : vector<6x1xf32>
    %268 = math.rsqrt %267 : vector<6x1xf32>
    %269 = vector.broadcast %268 : vector<6x1xf32> to vector<6x32xf32>
    %270 = arith.mulf %265, %269 : vector<6x32xf32>
    %271 = vector.broadcast %166 : vector<1x32xf32> to vector<6x32xf32>
    %272 = arith.mulf %270, %271 : vector<6x32xf32>
    %273 = vector.broadcast %167 : vector<1x32xf32> to vector<6x32xf32>
    %274 = arith.addf %272, %273 : vector<6x32xf32>
    %cst_98 = arith.constant dense<0.000000e+00> : vector<6x64xf32>
    %275 = tpu.matmul %274, %159, %cst_98 {dimension_numbers = #tpu.dot_dimension_numbers<[1], [0], [0], [1], [0, 0, 1, 1], [], []>} : vector<6x32xf32>, vector<32x64xf32>, vector<6x64xf32> -> vector<6x64xf32>
    %276 = vector.broadcast %168 : vector<1x64xf32> to vector<6x64xf32>
    %277 = arith.addf %275, %276 : vector<6x64xf32>
    %cst_99 = arith.constant 0.000000e+00 : f32
    %278 = vector.broadcast %cst_99 : f32 to vector<6x64xf32>
    %279 = arith.maximumf %277, %278 : vector<6x64xf32>
    %cst_100 = arith.constant dense<0.000000e+00> : vector<6x32xf32>
    %280 = tpu.matmul %279, %161, %cst_100 {dimension_numbers = #tpu.dot_dimension_numbers<[1], [0], [0], [1], [0, 0, 1, 1], [], []>} : vector<6x64xf32>, vector<64x32xf32>, vector<6x32xf32> -> vector<6x32xf32>
    %281 = vector.broadcast %169 : vector<1x32xf32> to vector<6x32xf32>
    %282 = arith.addf %280, %281 : vector<6x32xf32>
    %283 = arith.addf %274, %282 : vector<6x32xf32>
    %cst_101 = arith.constant dense<0.000000e+00> : vector<6xf32>
    %284 = vector.multi_reduction <add>, %283, %cst_101 [1] : vector<6x32xf32> to vector<6xf32>
    %285 = vector.shape_cast %284 : vector<6xf32> to vector<6x1xf32>
    %cst_102 = arith.constant 3.200000e+01 : f32
    %286 = vector.broadcast %cst_102 : f32 to vector<6x1xf32>
    %287 = arith.divf %285, %286 : vector<6x1xf32>
    %288 = vector.broadcast %287 : vector<6x1xf32> to vector<6x32xf32>
    %289 = arith.subf %283, %288 : vector<6x32xf32>
    %290 = arith.mulf %289, %289 : vector<6x32xf32>
    %cst_103 = arith.constant dense<0.000000e+00> : vector<6xf32>
    %291 = vector.multi_reduction <add>, %290, %cst_103 [1] : vector<6x32xf32> to vector<6xf32>
    %292 = vector.shape_cast %291 : vector<6xf32> to vector<6x1xf32>
    %cst_104 = arith.constant 3.200000e+01 : f32
    %293 = vector.broadcast %cst_104 : f32 to vector<6x1xf32>
    %294 = arith.divf %292, %293 : vector<6x1xf32>
    %295 = vector.broadcast %287 : vector<6x1xf32> to vector<6x32xf32>
    %296 = arith.subf %283, %295 : vector<6x32xf32>
    %cst_105 = arith.constant 9.99999974E-6 : f32
    %297 = vector.broadcast %cst_105 : f32 to vector<6x1xf32>
    %298 = arith.addf %294, %297 : vector<6x1xf32>
    %299 = math.rsqrt %298 : vector<6x1xf32>
    %300 = vector.broadcast %299 : vector<6x1xf32> to vector<6x32xf32>
    %301 = arith.mulf %296, %300 : vector<6x32xf32>
    %302 = vector.broadcast %170 : vector<1x32xf32> to vector<6x32xf32>
    %303 = arith.mulf %301, %302 : vector<6x32xf32>
    %304 = vector.broadcast %171 : vector<1x32xf32> to vector<6x32xf32>
    %305 = arith.addf %303, %304 : vector<6x32xf32>
    %c0_106 = arith.constant 0 : index
    %c0_107 = arith.constant 0 : index
    %c0_108 = arith.constant 0 : index
    %306 = vector.load %arg7[%c0_106, %c0_107, %c0_108] : memref<1x6x32xf32, #tpu.memory_space<vmem>>, vector<1x6x32xf32>
    %307 = vector.shape_cast %306 : vector<1x6x32xf32> to vector<6x32xf32>
    %308 = vector.shape_cast %305 : vector<6x32xf32> to vector<1x6x32xf32>
    tpu.vector_store %arg7[%c0_106, %c0_107, %c0_108], %308 {strides = array<i32>} : memref<1x6x32xf32, #tpu.memory_space<vmem>>, vector<1x6x32xf32>,
    return
  }
  func.func @transform_0(%arg0: i32) -> (i32, i32, i32) {
    %c0_i32 = arith.constant 0 : i32
    %c0_i32_0 = arith.constant 0 : i32
    %c0_i32_1 = arith.constant 0 : i32
    return %arg0, %c0_i32, %c0_i32_0 : i32, i32, i32
  }
  func.func @transform_1(%arg0: i32) -> (i32, i32, i32) {
    %c0_i32 = arith.constant 0 : i32
    %c0_i32_0 = arith.constant 0 : i32
    %c0_i32_1 = arith.constant 0 : i32
    %c0_i32_2 = arith.constant 0 : i32
    return %c0_i32, %c0_i32_0, %c0_i32_1 : i32, i32, i32
  }
  func.func @transform_2(%arg0: i32) -> (i32, i32, i32) {
    %c0_i32 = arith.constant 0 : i32
    %c0_i32_0 = arith.constant 0 : i32
    %c0_i32_1 = arith.constant 0 : i32
    %c0_i32_2 = arith.constant 0 : i32
    return %c0_i32, %c0_i32_0, %c0_i32_1 : i32, i32, i32
  }
  func.func @transform_3(%arg0: i32) -> (i32, i32, i32) {
    %c0_i32 = arith.constant 0 : i32
    %c0_i32_0 = arith.constant 0 : i32
    %c0_i32_1 = arith.constant 0 : i32
    %c0_i32_2 = arith.constant 0 : i32
    return %c0_i32, %c0_i32_0, %c0_i32_1 : i32, i32, i32
  }
  func.func @transform_4(%arg0: i32) -> (i32, i32, i32) {
    %c0_i32 = arith.constant 0 : i32
    %c0_i32_0 = arith.constant 0 : i32
    %c0_i32_1 = arith.constant 0 : i32
    %c0_i32_2 = arith.constant 0 : i32
    return %c0_i32, %c0_i32_0, %c0_i32_1 : i32, i32, i32
  }
  func.func @transform_5(%arg0: i32) -> (i32, i32, i32) {
    %c0_i32 = arith.constant 0 : i32
    %c0_i32_0 = arith.constant 0 : i32
    %c0_i32_1 = arith.constant 0 : i32
    %c0_i32_2 = arith.constant 0 : i32
    return %c0_i32, %c0_i32_0, %c0_i32_1 : i32, i32, i32
  }
  func.func @transform_6(%arg0: i32) -> (i32, i32, i32) {
    %c0_i32 = arith.constant 0 : i32
    %c0_i32_0 = arith.constant 0 : i32
    %c0_i32_1 = arith.constant 0 : i32
    return %arg0, %c0_i32, %c0_i32_0 : i32, i32, i32
  }
}

module attributes {stable_mosaic.version = 11 : i64} {
  func.func @_pool_decoder_kernel(%arg0: i32, %arg1: memref<2x6x32xf32, #tpu.memory_space<vmem>>, %arg2: memref<4x128xf32, #tpu.memory_space<vmem>>, %arg3: memref<32x32xf32, #tpu.memory_space<vmem>>, %arg4: memref<32x64xf32, #tpu.memory_space<vmem>>, %arg5: memref<2x64xf32, #tpu.memory_space<vmem>>) attributes {dimension_semantics = [#tpu.dimension_semantics<arbitrary>], iteration_bounds = array<i64: 1>, scalar_prefetch = 0 : i64, scratch_operands = 0 : i64, tpu.core_type = #tpu.core_type<tc>, window_params = [{pipeline_mode = #tpu.pipeline_mode<synchronous>, transform_indices = @transform_0, window_bounds = array<i64: 2, 6, 32>}, {pipeline_mode = #tpu.pipeline_mode<synchronous>, transform_indices = @transform_1, window_bounds = array<i64: 4, 128>}, {pipeline_mode = #tpu.pipeline_mode<synchronous>, transform_indices = @transform_2, window_bounds = array<i64: 32, 32>}, {pipeline_mode = #tpu.pipeline_mode<synchronous>, transform_indices = @transform_3, window_bounds = array<i64: 32, 64>}, {pipeline_mode = #tpu.pipeline_mode<synchronous>, transform_indices = @transform_4, window_bounds = array<i64: 2, 64>}]} {
    %c0 = arith.constant 0 : index
    %c0_0 = arith.constant 0 : index
    %0 = vector.load %arg2[%c0, %c0_0] : memref<4x128xf32, #tpu.memory_space<vmem>>, vector<1x32xf32>
    %c1 = arith.constant 1 : index
    %c0_1 = arith.constant 0 : index
    %1 = vector.load %arg2[%c1, %c0_1] : memref<4x128xf32, #tpu.memory_space<vmem>>, vector<1x1xf32>
    %c0_2 = arith.constant 0 : index
    %c0_3 = arith.constant 0 : index
    %2 = vector.load %arg3[%c0_2, %c0_3] : memref<32x32xf32, #tpu.memory_space<vmem>>, vector<32x32xf32>
    %c0_4 = arith.constant 0 : index
    %c0_5 = arith.constant 0 : index
    %3 = vector.load %arg4[%c0_4, %c0_5] : memref<32x64xf32, #tpu.memory_space<vmem>>, vector<32x64xf32>
    %c2 = arith.constant 2 : index
    %c0_6 = arith.constant 0 : index
    %4 = vector.load %arg2[%c2, %c0_6] : memref<4x128xf32, #tpu.memory_space<vmem>>, vector<1x32xf32>
    %c3 = arith.constant 3 : index
    %c0_7 = arith.constant 0 : index
    %5 = vector.load %arg2[%c3, %c0_7] : memref<4x128xf32, #tpu.memory_space<vmem>>, vector<1x64xf32>
    %c0_8 = arith.constant 0 : index
    %c0_9 = arith.constant 0 : index
    %c0_10 = arith.constant 0 : index
    %6 = vector.load %arg1[%c0_8, %c0_9, %c0_10] : memref<2x6x32xf32, #tpu.memory_space<vmem>>, vector<1x6x32xf32>
    %7 = vector.shape_cast %6 : vector<1x6x32xf32> to vector<6x32xf32>
    %8 = vector.broadcast %0 : vector<1x32xf32> to vector<6x32xf32>
    %9 = arith.mulf %7, %8 : vector<6x32xf32>
    %cst = arith.constant dense<0.000000e+00> : vector<6xf32>
    %10 = vector.multi_reduction <add>, %9, %cst [1] : vector<6x32xf32> to vector<6xf32>
    %11 = vector.shape_cast %10 : vector<6xf32> to vector<6x1xf32>
    %12 = vector.broadcast %1 : vector<1x1xf32> to vector<6x1xf32>
    %13 = arith.addf %11, %12 : vector<6x1xf32>
    %cst_11 = arith.constant dense<0xFF800000> : vector<1xf32>
    %14 = vector.multi_reduction <maximumf>, %13, %cst_11 [0] : vector<6x1xf32> to vector<1xf32>
    %15 = vector.shape_cast %14 : vector<1xf32> to vector<1x1xf32>
    %16 = vector.broadcast %15 : vector<1x1xf32> to vector<6x1xf32>
    %17 = arith.subf %13, %16 : vector<6x1xf32>
    %18 = math.exp %17 : vector<6x1xf32>
    %cst_12 = arith.constant dense<0.000000e+00> : vector<1xf32>
    %19 = vector.multi_reduction <add>, %18, %cst_12 [0] : vector<6x1xf32> to vector<1xf32>
    %20 = vector.shape_cast %19 : vector<1xf32> to vector<1x1xf32>
    %21 = vector.broadcast %20 : vector<1x1xf32> to vector<6x1xf32>
    %22 = arith.divf %18, %21 : vector<6x1xf32>
    %23 = vector.broadcast %22 : vector<6x1xf32> to vector<6x32xf32>
    %24 = arith.mulf %7, %23 : vector<6x32xf32>
    %cst_13 = arith.constant dense<0.000000e+00> : vector<32xf32>
    %25 = vector.multi_reduction <add>, %24, %cst_13 [0] : vector<6x32xf32> to vector<32xf32>
    %26 = vector.shape_cast %25 : vector<32xf32> to vector<1x32xf32>
    %cst_14 = arith.constant dense<0.000000e+00> : vector<1x32xf32>
    %27 = tpu.matmul %26, %2, %cst_14 {dimension_numbers = #tpu.dot_dimension_numbers<[1], [0], [0], [1], [0, 0, 1, 1], [], []>} : vector<1x32xf32>, vector<32x32xf32>, vector<1x32xf32> -> vector<1x32xf32>
    %28 = arith.addf %27, %4 : vector<1x32xf32>
    %cst_15 = arith.constant dense<0.000000e+00> : vector<1x64xf32>
    %29 = tpu.matmul %28, %3, %cst_15 {dimension_numbers = #tpu.dot_dimension_numbers<[1], [0], [0], [1], [0, 0, 1, 1], [], []>} : vector<1x32xf32>, vector<32x64xf32>, vector<1x64xf32> -> vector<1x64xf32>
    %30 = arith.addf %29, %5 : vector<1x64xf32>
    %c0_16 = arith.constant 0 : index
    %c0_17 = arith.constant 0 : index
    %31 = vector.load %arg5[%c0_16, %c0_17] : memref<2x64xf32, #tpu.memory_space<vmem>>, vector<1x64xf32>
    tpu.vector_store %arg5[%c0_16, %c0_17], %30 {strides = array<i32>} : memref<2x64xf32, #tpu.memory_space<vmem>>, vector<1x64xf32>,
    %c1_18 = arith.constant 1 : index
    %c0_19 = arith.constant 0 : index
    %c0_20 = arith.constant 0 : index
    %32 = vector.load %arg1[%c1_18, %c0_19, %c0_20] : memref<2x6x32xf32, #tpu.memory_space<vmem>>, vector<1x6x32xf32>
    %33 = vector.shape_cast %32 : vector<1x6x32xf32> to vector<6x32xf32>
    %34 = vector.broadcast %0 : vector<1x32xf32> to vector<6x32xf32>
    %35 = arith.mulf %33, %34 : vector<6x32xf32>
    %cst_21 = arith.constant dense<0.000000e+00> : vector<6xf32>
    %36 = vector.multi_reduction <add>, %35, %cst_21 [1] : vector<6x32xf32> to vector<6xf32>
    %37 = vector.shape_cast %36 : vector<6xf32> to vector<6x1xf32>
    %38 = vector.broadcast %1 : vector<1x1xf32> to vector<6x1xf32>
    %39 = arith.addf %37, %38 : vector<6x1xf32>
    %cst_22 = arith.constant dense<0xFF800000> : vector<1xf32>
    %40 = vector.multi_reduction <maximumf>, %39, %cst_22 [0] : vector<6x1xf32> to vector<1xf32>
    %41 = vector.shape_cast %40 : vector<1xf32> to vector<1x1xf32>
    %42 = vector.broadcast %41 : vector<1x1xf32> to vector<6x1xf32>
    %43 = arith.subf %39, %42 : vector<6x1xf32>
    %44 = math.exp %43 : vector<6x1xf32>
    %cst_23 = arith.constant dense<0.000000e+00> : vector<1xf32>
    %45 = vector.multi_reduction <add>, %44, %cst_23 [0] : vector<6x1xf32> to vector<1xf32>
    %46 = vector.shape_cast %45 : vector<1xf32> to vector<1x1xf32>
    %47 = vector.broadcast %46 : vector<1x1xf32> to vector<6x1xf32>
    %48 = arith.divf %44, %47 : vector<6x1xf32>
    %49 = vector.broadcast %48 : vector<6x1xf32> to vector<6x32xf32>
    %50 = arith.mulf %33, %49 : vector<6x32xf32>
    %cst_24 = arith.constant dense<0.000000e+00> : vector<32xf32>
    %51 = vector.multi_reduction <add>, %50, %cst_24 [0] : vector<6x32xf32> to vector<32xf32>
    %52 = vector.shape_cast %51 : vector<32xf32> to vector<1x32xf32>
    %cst_25 = arith.constant dense<0.000000e+00> : vector<1x32xf32>
    %53 = tpu.matmul %52, %2, %cst_25 {dimension_numbers = #tpu.dot_dimension_numbers<[1], [0], [0], [1], [0, 0, 1, 1], [], []>} : vector<1x32xf32>, vector<32x32xf32>, vector<1x32xf32> -> vector<1x32xf32>
    %54 = arith.addf %53, %4 : vector<1x32xf32>
    %cst_26 = arith.constant dense<0.000000e+00> : vector<1x64xf32>
    %55 = tpu.matmul %54, %3, %cst_26 {dimension_numbers = #tpu.dot_dimension_numbers<[1], [0], [0], [1], [0, 0, 1, 1], [], []>} : vector<1x32xf32>, vector<32x64xf32>, vector<1x64xf32> -> vector<1x64xf32>
    %56 = arith.addf %55, %5 : vector<1x64xf32>
    %c1_27 = arith.constant 1 : index
    %c0_28 = arith.constant 0 : index
    %57 = vector.load %arg5[%c1_27, %c0_28] : memref<2x64xf32, #tpu.memory_space<vmem>>, vector<1x64xf32>
    tpu.vector_store %arg5[%c1_27, %c0_28], %56 {strides = array<i32>} : memref<2x64xf32, #tpu.memory_space<vmem>>, vector<1x64xf32>,
    return
  }
  func.func @transform_0(%arg0: i32) -> (i32, i32, i32) {
    %c0_i32 = arith.constant 0 : i32
    %c0_i32_0 = arith.constant 0 : i32
    %c0_i32_1 = arith.constant 0 : i32
    %c0_i32_2 = arith.constant 0 : i32
    return %c0_i32, %c0_i32_0, %c0_i32_1 : i32, i32, i32
  }
  func.func @transform_1(%arg0: i32) -> (i32, i32) {
    %c0_i32 = arith.constant 0 : i32
    %c0_i32_0 = arith.constant 0 : i32
    %c0_i32_1 = arith.constant 0 : i32
    return %c0_i32, %c0_i32_0 : i32, i32
  }
  func.func @transform_2(%arg0: i32) -> (i32, i32) {
    %c0_i32 = arith.constant 0 : i32
    %c0_i32_0 = arith.constant 0 : i32
    %c0_i32_1 = arith.constant 0 : i32
    return %c0_i32, %c0_i32_0 : i32, i32
  }
  func.func @transform_3(%arg0: i32) -> (i32, i32) {
    %c0_i32 = arith.constant 0 : i32
    %c0_i32_0 = arith.constant 0 : i32
    %c0_i32_1 = arith.constant 0 : i32
    return %c0_i32, %c0_i32_0 : i32, i32
  }
  func.func @transform_4(%arg0: i32) -> (i32, i32) {
    %c0_i32 = arith.constant 0 : i32
    %c0_i32_0 = arith.constant 0 : i32
    %c0_i32_1 = arith.constant 0 : i32
    return %c0_i32, %c0_i32_0 : i32, i32
  }
}

module attributes {stable_mosaic.version = 11 : i64} {
  func.func @_head_kernel(%arg0: i32, %arg1: memref<2x64xf32, #tpu.memory_space<vmem>>, %arg2: memref<2x64xf32, #tpu.memory_space<vmem>>, %arg3: memref<128x64xf32, #tpu.memory_space<vmem>>, %arg4: memref<1x64xf32, #tpu.memory_space<vmem>>, %arg5: memref<64x1xf32, #tpu.memory_space<vmem>>, %arg6: memref<1x1xf32, #tpu.memory_space<vmem>>, %arg7: memref<2x1xf32, #tpu.memory_space<vmem>>) attributes {dimension_semantics = [#tpu.dimension_semantics<arbitrary>], iteration_bounds = array<i64: 1>, scalar_prefetch = 0 : i64, scratch_operands = 0 : i64, tpu.core_type = #tpu.core_type<tc>, window_params = [{pipeline_mode = #tpu.pipeline_mode<synchronous>, transform_indices = @transform_0, window_bounds = array<i64: 2, 64>}, {pipeline_mode = #tpu.pipeline_mode<synchronous>, transform_indices = @transform_1, window_bounds = array<i64: 2, 64>}, {pipeline_mode = #tpu.pipeline_mode<synchronous>, transform_indices = @transform_2, window_bounds = array<i64: 128, 64>}, {pipeline_mode = #tpu.pipeline_mode<synchronous>, transform_indices = @transform_3, window_bounds = array<i64: 1, 64>}, {pipeline_mode = #tpu.pipeline_mode<synchronous>, transform_indices = @transform_4, window_bounds = array<i64: 64, 1>}, {pipeline_mode = #tpu.pipeline_mode<synchronous>, transform_indices = @transform_5, window_bounds = array<i64: 1, 1>}, {pipeline_mode = #tpu.pipeline_mode<synchronous>, transform_indices = @transform_6, window_bounds = array<i64: 2, 1>}]} {
    %c0 = arith.constant 0 : index
    %c0_0 = arith.constant 0 : index
    %0 = vector.load %arg1[%c0, %c0_0] : memref<2x64xf32, #tpu.memory_space<vmem>>, vector<2x64xf32>
    %c0_1 = arith.constant 0 : index
    %c0_2 = arith.constant 0 : index
    %1 = vector.load %arg2[%c0_1, %c0_2] : memref<2x64xf32, #tpu.memory_space<vmem>>, vector<2x64xf32>
    %c0_3 = arith.constant 0 : index
    %c0_4 = arith.constant 0 : index
    %2 = vector.load %arg3[%c0_3, %c0_4] : memref<128x64xf32, #tpu.memory_space<vmem>>, vector<128x64xf32>
    %3 = vector.extract_strided_slice %2 {offsets = [0, 0], sizes = [64, 64], strides = [1, 1]} : vector<128x64xf32> to vector<64x64xf32>
    %cst = arith.constant dense<0.000000e+00> : vector<2x64xf32>
    %4 = tpu.matmul %0, %3, %cst {dimension_numbers = #tpu.dot_dimension_numbers<[1], [0], [0], [1], [0, 0, 1, 1], [], []>} : vector<2x64xf32>, vector<64x64xf32>, vector<2x64xf32> -> vector<2x64xf32>
    %5 = vector.extract_strided_slice %2 {offsets = [64, 0], sizes = [64, 64], strides = [1, 1]} : vector<128x64xf32> to vector<64x64xf32>
    %cst_5 = arith.constant dense<0.000000e+00> : vector<2x64xf32>
    %6 = tpu.matmul %1, %5, %cst_5 {dimension_numbers = #tpu.dot_dimension_numbers<[1], [0], [0], [1], [0, 0, 1, 1], [], []>} : vector<2x64xf32>, vector<64x64xf32>, vector<2x64xf32> -> vector<2x64xf32>
    %7 = arith.addf %4, %6 : vector<2x64xf32>
    %c0_6 = arith.constant 0 : index
    %c0_7 = arith.constant 0 : index
    %8 = vector.load %arg4[%c0_6, %c0_7] : memref<1x64xf32, #tpu.memory_space<vmem>>, vector<1x64xf32>
    %9 = vector.broadcast %8 : vector<1x64xf32> to vector<2x64xf32>
    %10 = arith.addf %7, %9 : vector<2x64xf32>
    %cst_8 = arith.constant 0.000000e+00 : f32
    %11 = vector.broadcast %cst_8 : f32 to vector<2x64xf32>
    %12 = arith.maximumf %10, %11 : vector<2x64xf32>
    %c0_9 = arith.constant 0 : index
    %c0_10 = arith.constant 0 : index
    %13 = vector.load %arg5[%c0_9, %c0_10] : memref<64x1xf32, #tpu.memory_space<vmem>>, vector<64x1xf32>
    %cst_11 = arith.constant dense<0.000000e+00> : vector<2x1xf32>
    %14 = tpu.matmul %12, %13, %cst_11 {dimension_numbers = #tpu.dot_dimension_numbers<[1], [0], [0], [1], [0, 0, 1, 1], [], []>} : vector<2x64xf32>, vector<64x1xf32>, vector<2x1xf32> -> vector<2x1xf32>
    %c0_12 = arith.constant 0 : index
    %c0_13 = arith.constant 0 : index
    %15 = vector.load %arg6[%c0_12, %c0_13] : memref<1x1xf32, #tpu.memory_space<vmem>>, vector<1x1xf32>
    %16 = vector.broadcast %15 : vector<1x1xf32> to vector<2x1xf32>
    %17 = arith.addf %14, %16 : vector<2x1xf32>
    %c0_14 = arith.constant 0 : index
    %c0_15 = arith.constant 0 : index
    %18 = vector.load %arg7[%c0_14, %c0_15] : memref<2x1xf32, #tpu.memory_space<vmem>>, vector<2x1xf32>
    tpu.vector_store %arg7[%c0_14, %c0_15], %17 {strides = array<i32>} : memref<2x1xf32, #tpu.memory_space<vmem>>, vector<2x1xf32>,
    return
  }
  func.func @transform_0(%arg0: i32) -> (i32, i32) {
    %c0_i32 = arith.constant 0 : i32
    %c0_i32_0 = arith.constant 0 : i32
    %c0_i32_1 = arith.constant 0 : i32
    return %c0_i32, %c0_i32_0 : i32, i32
  }
  func.func @transform_1(%arg0: i32) -> (i32, i32) {
    %c0_i32 = arith.constant 0 : i32
    %c0_i32_0 = arith.constant 0 : i32
    %c0_i32_1 = arith.constant 0 : i32
    return %c0_i32, %c0_i32_0 : i32, i32
  }
  func.func @transform_2(%arg0: i32) -> (i32, i32) {
    %c0_i32 = arith.constant 0 : i32
    %c0_i32_0 = arith.constant 0 : i32
    %c0_i32_1 = arith.constant 0 : i32
    return %c0_i32, %c0_i32_0 : i32, i32
  }
  func.func @transform_3(%arg0: i32) -> (i32, i32) {
    %c0_i32 = arith.constant 0 : i32
    %c0_i32_0 = arith.constant 0 : i32
    %c0_i32_1 = arith.constant 0 : i32
    return %c0_i32, %c0_i32_0 : i32, i32
  }
  func.func @transform_4(%arg0: i32) -> (i32, i32) {
    %c0_i32 = arith.constant 0 : i32
    %c0_i32_0 = arith.constant 0 : i32
    %c0_i32_1 = arith.constant 0 : i32
    return %c0_i32, %c0_i32_0 : i32, i32
  }
  func.func @transform_5(%arg0: i32) -> (i32, i32) {
    %c0_i32 = arith.constant 0 : i32
    %c0_i32_0 = arith.constant 0 : i32
    %c0_i32_1 = arith.constant 0 : i32
    return %c0_i32, %c0_i32_0 : i32, i32
  }
  func.func @transform_6(%arg0: i32) -> (i32, i32) {
    %c0_i32 = arith.constant 0 : i32
    %c0_i32_0 = arith.constant 0 : i32
    %c0_i32_1 = arith.constant 0 : i32
    return %c0_i32, %c0_i32_0 : i32, i32
  }
}

</mosaic_0001>

<bundles_post_ra>
// kernel: forward.11
= control target key start
LH: loop header
LB: loop body
LE: loop exit
PB: predicated region body
PF: predicated region fallthrough
CT: control target
= control target key end

     0   :  { %s865_s12 = smov 0   ;;  %s1192_s0 = inlined_call_operand.vmem [shape: f32[2,1,40], index: 0, kind: input, shape index: {}]   ;;  %s1193_s1 = inlined_call_operand.vmem [shape: f32[128,3], index: 1, kind: input, shape index: {}]   ;;  %s1194_s2 = inlined_call_operand.vmem [shape: f32[128,1], index: 2, kind: input, shape index: {}]   ;;  %s1195_s3 = inlined_call_operand.vmem [shape: f32[2,128,38], index: 3, kind: output, shape index: {}]  }
   0x1 LB: > { %s801_s13 = sadd.s32 4294967295, %s838_s12   ;;  %p805_p0 = scmp.ge.s32.totalorder %s838_s12, 1  ;;  %s838_s12 = sphi %s865_s12, %s13_s12  }
   0x2   : > { %p135_p1 = scmp.lt.s32.totalorder %s838_s12, 3 }
   0x4   : > { %p136_p2 = pnand %p805_p0, %p135_p1 }
   0x5   : > { %v168_v0 = vld [vmem:[%s1193_s1 + $0x10] sm:$0xff] (!%p136_p2)  ;;  %v840_v1 = vmov (!%p136_p2), 0   ;;  %v841_v2 = vmov (!%p136_p2), 1   ;;  %v166_v3 = vld [vmem:[%s1193_s1] sm:$0xff] (!%p136_p2)  ;;  %v169_v4 = vld [vmem:[%s1193_s1 + $0x18] sm:$0xff] (!%p136_p2)  ;;  %v842_v12 = vmov (!%p136_p2), 2  }
   0x6   : > { %139 = sbr.rel (%p136_p2) target bundleno = 402 (0x192), region = 32  ;;  %825 = vset.pattern.permute.xlu1 (!%p136_p2), %v840_v1  ;;  %826 = vset.pattern.permute.xlu0 (!%p136_p2), %v841_v2  ;;  %v171_v5 = vld [vmem:[%s1193_s1 + $0x28] sm:$0xff] (!%p136_p2)  ;;  %v173_v6 = vld [vmem:[%s1193_s1 + $0x38] sm:$0xff] (!%p136_p2)  ;;  %v170_v13 = vld [vmem:[%s1193_s1 + $0x20] sm:$0xff] (!%p136_p2)  ;;  %p157_p3 = scmp.lt.s32.totalorder (!%p136_p2), %s801_s13, 1  ;;  %vm732_vm0 = vcmask (!%p136_p2), 310272  }
   0x7   : > { %194 = vperm.xlu1 (!%p136_p2), %825, %v168_v0   ;;  %285 = vperm.xlu0 (!%p136_p2), %826, %v166_v3   ;;  %v175_v7 = vld [vmem:[%s1193_s1 + $0x48] sm:$0xff] (!%p136_p2)  ;;  %v177_v8 = vld [vmem:[%s1193_s1 + $0x58] sm:$0xff] (!%p136_p2)  ;;  %v172_v14 = vld [vmem:[%s1193_s1 + $0x30] sm:$0xff] (!%p136_p2)  ;;  %s843_s24 = smov (!%p136_p2), 127   ;;  %s844_s25 = smov (!%p136_p2), 126  }
   0x8   : > { %v179_v9 = vld [vmem:[%s1193_s1 + $0x68] sm:$0xff] (!%p136_p2)  ;;  %v181_v10 = vld [vmem:[%s1193_s1 + $0x78] sm:$0xff] (!%p136_p2)  ;;  %v174_v15 = vld [vmem:[%s1193_s1 + $0x40] sm:$0xff] (!%p136_p2) }
   0x9   : > { %v167_v11 = vld [vmem:[%s1193_s1 + $0x8] sm:$0xff] (!%p136_p2)  ;;  %v176_v16 = vld [vmem:[%s1193_s1 + $0x50] sm:$0xff] (!%p136_p2)  ;;  %v178_v17 = vld [vmem:[%s1193_s1 + $0x60] sm:$0xff] (!%p136_p2) }
   0xa   : > { %v180_v18 = vld [vmem:[%s1193_s1 + $0x70] sm:$0xff] (!%p136_p2) }
   0xb   : > { %199 = vperm.xlu1 (!%p136_p2), %825, %v169_v4   ;;  %297 = vperm.xlu0 (!%p136_p2), %826, %v169_v4  }
   0xd   : > { %s1197_s13 = smov (!%p157_p3, %s801_s13), 1 }
   0xe   : > { %s159_s23 = scalar_lea.vmem %s1192_s0, %s1197_s13 }
   0xf   : > { %209 = vperm.xlu1 %825, %v171_v5   ;;  %305 = vperm.xlu0 %826, %v171_v5   ;;  %v936_v20 = vld [vmem:[%s159_s23] ss:$0 sm:$0xff] }
  0x13   : > { %219 = vperm.xlu1 %825, %v173_v6   ;;  %313 = vperm.xlu0 %826, %v173_v6  }
  0x17   : > { %229 = vperm.xlu1 %825, %v175_v7   ;;  %321 = vperm.xlu0 %826, %v175_v7  }
  0x1b   : > { %239 = vperm.xlu1 %825, %v177_v8   ;;  %329 = vperm.xlu0 %826, %v177_v8  }
  0x1f   : > { %249 = vperm.xlu1 %825, %v179_v9   ;;  %337 = vperm.xlu0 %826, %v179_v9  }
  0x23   : > { %259 = vperm.xlu1 %825, %v181_v10   ;;  %345 = vperm.xlu0 %826, %v181_v10  }
  0x27   : > { %827 = vset.pattern.permute.xlu1 %v841_v2  ;;  %829 = vset.pattern.permute.xlu0 %v842_v12 }
  0x28   : > { %289 = vperm.xlu1 %827, %v167_v11   ;;  %449 = vperm.xlu0 %829, %v167_v11  }
  0x2c   : > { %293 = vperm.xlu1 %827, %v168_v0   ;;  %461 = vperm.xlu0 %829, %v170_v13  }
  0x30   : > { %301 = vperm.xlu1 %827, %v170_v13   ;;  %469 = vperm.xlu0 %829, %v172_v14  }
  0x34   : > { %309 = vperm.xlu1 %827, %v172_v14   ;;  %477 = vperm.xlu0 %829, %v174_v15  }
  0x38   : > { %317 = vperm.xlu1 %827, %v174_v15   ;;  %485 = vperm.xlu0 %829, %v176_v16  }
  0x3c   : > { %325 = vperm.xlu1 %827, %v176_v16   ;;  %493 = vperm.xlu0 %829, %v178_v17  }
  0x40   : > { %333 = vperm.xlu1 %827, %v178_v17   ;;  %501 = vperm.xlu0 %829, %v180_v18  }
  0x44   : > { %341 = vperm.xlu1 %827, %v180_v18   ;;  %830 = vset.pattern.permute.xlu0 %v840_v1 }
  0x45   : > { %184 = vperm.xlu0 %830, %v166_v3  }
  0x48   : > { %828 = vset.pattern.permute.xlu1 %v842_v12 }
  0x49   : > { %445 = vperm.xlu1 %828, %v166_v3   ;;  %189 = vperm.xlu0 %830, %v167_v11  }
  0x4d   : > { %453 = vperm.xlu1 %828, %v168_v0   ;;  %204 = vperm.xlu0 %830, %v170_v13  }
  0x51   : > { %457 = vperm.xlu1 %828, %v169_v4   ;;  %214 = vperm.xlu0 %830, %v172_v14  }
  0x55   : > { %465 = vperm.xlu1 %828, %v171_v5   ;;  %224 = vperm.xlu0 %830, %v174_v15  }
  0x59   : > { %473 = vperm.xlu1 %828, %v173_v6   ;;  %234 = vperm.xlu0 %830, %v176_v16  }
  0x5d   : > { %481 = vperm.xlu1 %828, %v175_v7   ;;  %244 = vperm.xlu0 %830, %v178_v17  }
  0x61   : > { %489 = vperm.xlu1 %828, %v177_v8   ;;  %254 = vperm.xlu0 %830, %v180_v18  }
  0x65   : > { %497 = vperm.xlu1 %828, %v179_v9  }
  0x69   : > { %505 = vperm.xlu1 %828, %v181_v10  }
  0x6d   : > { %831 = vset.pattern.permute.xlu1 %v840_v1 }
  0x86   : > { %v934_v19 = vpop.permute.xlu1 %194  ;;  %v286_v21 = vpop.permute.xlu0 %285 }
  0x87   : > { %v348_v22 = vmul.f32 %v936_v20, %v286_v21 }
  0x89   : > { %380 = vrot.lane.b32.xlu1 %v348_v22, %s843_s24 }
  0x8a   : > { %v940_v23 = vpop.permute.xlu1 %199  ;;  %v298_v27 = vpop.permute.xlu0 %297 }
  0x8b   : > { %v351_v35 = vmul.f32 %v936_v20, %v298_v27 }
  0x8e   : > { %v942_v24 = vpop.permute.xlu1 %209  ;;  %v306_v30 = vpop.permute.xlu0 %305 }
  0x8f   : > { %v353_v40 = vmul.f32 %v936_v20, %v306_v30 }
  0x92   : > { %v944_v25 = vpop.permute.xlu1 %219  ;;  %v314_v32 = vpop.permute.xlu0 %313 }
  0x93   : > { %v355_v44 = vmul.f32 %v936_v20, %v314_v32  ;;  %v604_v32 = vld [vmem:[%s1194_s2] sm:$0xff] }
  0x96   : > { %v946_v26 = vpop.permute.xlu1 %229  ;;  %v322_v37 = vpop.permute.xlu0 %321 }
  0x97   : > { %v357_v47 = vmul.f32 %v936_v20, %v322_v37  ;;  %v609_v37 = vld [vmem:[%s1194_s2 + $0x28] sm:$0xff] }
  0x9a   : > { %v948_v28 = vpop.permute.xlu1 %239  ;;  %v330_v42 = vpop.permute.xlu0 %329 }
  0x9b   : > { %v359_v51 = vmul.f32 %v936_v20, %v330_v42 }
  0x9e   : > { %v950_v29 = vpop.permute.xlu1 %249  ;;  %v338_v48 = vpop.permute.xlu0 %337 }
  0x9f   : > { %v361_v55 = vmul.f32 %v936_v20, %v338_v48  ;;  %v617_v48 = vld [vmem:[%s1194_s2 + $0x68] sm:$0xff] }
  0xa2   : > { %v952_v31 = vpop.permute.xlu1 %259  ;;  %v346_v53 = vpop.permute.xlu0 %345 }
  0xa3   : > { %v363_v59 = vmul.f32 %v936_v20, %v346_v53 }
  0xa7   : > { %v290_v33 = vpop.permute.xlu1 %289  ;;  %v450_v57 = vpop.permute.xlu0 %449 }
  0xa8   : > { %v349_v34 = vmul.f32 %v936_v20, %v290_v33  ;;  %v509_v61 = vmul.f32 %v936_v20, %v450_v57 }
  0xaa   : > { %382 = vrot.lane.b32.xlu0 %v349_v34, %s843_s24  ;;  %v607_v34 = vld [vmem:[%s1194_s2 + $0x18] sm:$0xff] }
  0xab   : > { %v294_v36 = vpop.permute.xlu1 %293  ;;  %v462_v62 = vpop.permute.xlu0 %461 }
  0xac   : > { %v350_v38 = vmul.f32 %v936_v20, %v294_v36  ;;  %v512_v5 = vmul.f32 %v936_v20, %v462_v62 }
  0xae   : > { %386 = vrot.lane.b32.xlu0 %v351_v35, %s843_s24  ;;  %384 = vrot.lane.b32.xlu1 %v350_v38, %s843_s24  ;;  %v605_v35 = vld [vmem:[%s1194_s2 + $0x8] sm:$0xff]  ;;  %v606_v38 = vld [vmem:[%s1194_s2 + $0x10] sm:$0xff] }
  0xaf   : > { %v302_v39 = vpop.permute.xlu1 %301  ;;  %v470_v3 = vpop.permute.xlu0 %469 }
  0xb0   : > { %v352_v41 = vmul.f32 %v936_v20, %v302_v39  ;;  %v514_v9 = vmul.f32 %v936_v20, %v470_v3 }
  0xb2   : > { %390 = vrot.lane.b32.xlu0 %v353_v40, %s843_s24  ;;  %388 = vrot.lane.b32.xlu1 %v352_v41, %s843_s24  ;;  %v611_v40 = vld [vmem:[%s1194_s2 + $0x38] sm:$0xff]  ;;  %v608_v41 = vld [vmem:[%s1194_s2 + $0x20] sm:$0xff] }
  0xb3   : > { %v310_v43 = vpop.permute.xlu1 %309  ;;  %v478_v7 = vpop.permute.xlu0 %477 }
  0xb4   : > { %v354_v45 = vmul.f32 %v936_v20, %v310_v43  ;;  %v516_v12 = vmul.f32 %v936_v20, %v478_v7  ;;  %v613_v43 = vld [vmem:[%s1194_s2 + $0x48] sm:$0xff] }
  0xb6   : > { %394 = vrot.lane.b32.xlu0 %v355_v44, %s843_s24  ;;  %392 = vrot.lane.b32.xlu1 %v354_v45, %s843_s24  ;;  %v610_v44 = vld [vmem:[%s1194_s2 + $0x30] sm:$0xff]  ;;  %v615_v45 = vld [vmem:[%s1194_s2 + $0x58] sm:$0xff] }
  0xb7   : > { %v318_v46 = vpop.permute.xlu1 %317  ;;  %v486_v14 = vpop.permute.xlu0 %485 }
  0xb8   : > { %v356_v49 = vmul.f32 %v936_v20, %v318_v46  ;;  %v518_v16 = vmul.f32 %v936_v20, %v486_v14  ;;  %v612_v46 = vld [vmem:[%s1194_s2 + $0x40] sm:$0xff] }
  0xba   : > { %398 = vrot.lane.b32.xlu0 %v357_v47, %s843_s24  ;;  %396 = vrot.lane.b32.xlu1 %v356_v49, %s843_s24  ;;  %v614_v49 = vld [vmem:[%s1194_s2 + $0x50] sm:$0xff] }
  0xbb   : > { %v326_v50 = vpop.permute.xlu1 %325  ;;  %v494_v18 = vpop.permute.xlu0 %493 }
  0xbc   : > { %v358_v52 = vmul.f32 %v936_v20, %v326_v50  ;;  %v520_v22 = vmul.f32 %v936_v20, %v494_v18 }
  0xbe   : > { %402 = vrot.lane.b32.xlu0 %v359_v51, %s843_s24  ;;  %400 = vrot.lane.b32.xlu1 %v358_v52, %s843_s24  ;;  %v619_v51 = vld [vmem:[%s1194_s2 + $0x78] sm:$0xff]  ;;  %v616_v52 = vld [vmem:[%s1194_s2 + $0x60] sm:$0xff] }
  0xbf   : > { %v334_v54 = vpop.permute.xlu1 %333  ;;  %v502_v36 = vpop.permute.xlu0 %501 }
  0xc0   : > { %v360_v56 = vmul.f32 %v936_v20, %v334_v54  ;;  %v618_v54 = vld [vmem:[%s1194_s2 + $0x70] sm:$0xff]  ;;  %v522_v57 = vmul.f32 %v936_v20, %v502_v36 }
  0xc2   : > { %406 = vrot.lane.b32.xlu0 %v361_v55, %s843_s24  ;;  %404 = vrot.lane.b32.xlu1 %v360_v56, %s843_s24 }
  0xc3   : > { %v342_v58 = vpop.permute.xlu1 %341 }
  0xc4   : > { %v362_v60 = vmul.f32 %v936_v20, %v342_v58  ;;  %v1027_v39 = vpop.permute.xlu0 %184 }
  0xc6   : > { %410 = vrot.lane.b32.xlu0 %v363_v59, %s843_s24  ;;  %408 = vrot.lane.b32.xlu1 %v362_v60, %s843_s24 }
  0xc8   : > { %v446_v63 = vpop.permute.xlu1 %445  ;;  %v190_v42 = vpop.permute.xlu0 %189 }
  0xc9   : > { %v508_v0 = vmul.f32 %v936_v20, %v446_v63 }
  0xca   : > { %542 = vrot.lane.b32.xlu1 %v509_v61, %s844_s25 }
  0xcb   : > { %540 = vrot.lane.b32.xlu0 %v508_v0, %s844_s25 }
  0xcc   : > { %v454_v1 = vpop.permute.xlu1 %453  ;;  %v1047_v47 = vpop.permute.xlu0 %204 }
  0xcd   : > { %v510_v2 = vmul.f32 %v936_v20, %v454_v1 }
  0xcf   : > { %544 = vrot.lane.b32.xlu0 %v510_v2, %s844_s25 }
  0xd0   : > { %v458_v4 = vpop.permute.xlu1 %457  ;;  %v1055_v50 = vpop.permute.xlu0 %214 }
  0xd1   : > { %v511_v6 = vmul.f32 %v936_v20, %v458_v4 }
  0xd3   : > { %548 = vrot.lane.b32.xlu0 %v512_v5, %s844_s25  ;;  %546 = vrot.lane.b32.xlu1 %v511_v6, %s844_s25 }
  0xd4   : > { %v466_v8 = vpop.permute.xlu1 %465  ;;  %v1067_v56 = vpop.permute.xlu0 %224 }
  0xd5   : > { %v513_v10 = vmul.f32 %v936_v20, %v466_v8 }
  0xd7   : > { %552 = vrot.lane.b32.xlu0 %v514_v9, %s844_s25  ;;  %550 = vrot.lane.b32.xlu1 %v513_v10, %s844_s25 }
  0xd8   : > { %v474_v11 = vpop.permute.xlu1 %473  ;;  %v1072_v58 = vpop.permute.xlu0 %234 }
  0xd9   : > { %v515_v13 = vmul.f32 %v936_v20, %v474_v11 }
  0xdb   : > { %556 = vrot.lane.b32.xlu0 %v516_v12, %s844_s25  ;;  %554 = vrot.lane.b32.xlu1 %v515_v13, %s844_s25 }
  0xdc   : > { %v482_v15 = vpop.permute.xlu1 %481  ;;  %v1074_v59 = vpop.permute.xlu0 %244 }
  0xdd   : > { %v517_v17 = vmul.f32 %v936_v20, %v482_v15 }
  0xdf   : > { %560 = vrot.lane.b32.xlu0 %v518_v16, %s844_s25  ;;  %558 = vrot.lane.b32.xlu1 %v517_v17, %s844_s25 }
  0xe0   : > { %v490_v21 = vpop.permute.xlu1 %489  ;;  %v1076_v60 = vpop.permute.xlu0 %254 }
  0xe1   : > { %v519_v27 = vmul.f32 %v936_v20, %v490_v21 }
  0xe3   : > { %564 = vrot.lane.b32.xlu0 %v520_v22, %s844_s25  ;;  %562 = vrot.lane.b32.xlu1 %v519_v27, %s844_s25 }
  0xe4   : > { %v498_v30 = vpop.permute.xlu1 %497 }
  0xe5   : > { %v521_v33 = vmul.f32 %v936_v20, %v498_v30 }
  0xe7   : > { %622 = vperm.xlu0 %830, %v604_v32   ;;  %566 = vrot.lane.b32.xlu1 %v521_v33, %s844_s25  ;;  %v268_v33 = vmul.f32 %v936_v20, %v1027_v39  ;;  %v270_v39 = vmul.f32 %v936_v20, %v934_v19 }
  0xe8   : > { %v506_v53 = vpop.permute.xlu1 %505 }
  0xe9   : > { %v523_v55 = vmul.f32 %v936_v20, %v506_v53 }
  0xeb   : > { %637 = vperm.xlu0 %830, %v607_v34   ;;  %627 = vperm.xlu1 %831, %v605_v35  }
  0xef   : > { %647 = vperm.xlu0 %830, %v609_v37   ;;  %632 = vperm.xlu1 %831, %v606_v38   ;;  %v271_v37 = vmul.f32 %v936_v20, %v940_v23  ;;  %v269_v38 = vmul.f32 %v936_v20, %v190_v42  ;;  %v273_v23 = vmul.f32 %v936_v20, %v942_v24 }
  0xf3   : > { %657 = vperm.xlu0 %830, %v611_v40   ;;  %642 = vperm.xlu1 %831, %v608_v41  }
  0xf7   : > { %667 = vperm.xlu0 %830, %v613_v43   ;;  %652 = vperm.xlu1 %831, %v610_v44  }
  0xfb   : > { %677 = vperm.xlu0 %830, %v615_v45   ;;  %662 = vperm.xlu1 %831, %v612_v46   ;;  %v381_v61 = vpop.permute.xlu1 %380 }
  0xfc   : > { %v428_v36 = vadd.f32 %v381_v61, %v268_v33  ;;  %v272_v61 = vmul.f32 %v936_v20, %v1047_v47  ;;  %v274_v47 = vmul.f32 %v936_v20, %v1055_v50  ;;  %v279_v50 = vmul.f32 %v936_v20, %v948_v28 }
  0xff   : > { %687 = vperm.xlu0 %830, %v617_v48   ;;  %672 = vperm.xlu1 %831, %v614_v49  }
 0x103   : > { %697 = vperm.xlu0 %830, %v619_v51   ;;  %682 = vperm.xlu1 %831, %v616_v52  }
 0x107   : > { %570 = vrot.lane.b32.xlu0 %v523_v55, %s844_s25  ;;  %692 = vperm.xlu1 %831, %v618_v54  }
 0x10b   : > { %568 = vrot.lane.b32.xlu1 %v522_v57, %s844_s25  ;;  %s811_s25 = sshll.u32 %s1197_s13, 7  ;;  %v275_v57 = vmul.f32 %v936_v20, %v944_v25  ;;  %v277_v25 = vmul.f32 %v936_v20, %v946_v26 }
 0x10c   : > { %s1117_s9 = scalar_lea.vmem %s1195_s3, %s811_s25 }
 0x11c   : > { %v383_v62 = vpop.permute.xlu0 %382 }
 0x11d   : > { %v429_v44 = vadd.f32 %v383_v62, %v269_v38 }
 0x120   : > { %v387_v63 = vpop.permute.xlu0 %386  ;;  %v385_v0 = vpop.permute.xlu1 %384 }
 0x121   : > { %v431_v45 = vadd.f32 %v387_v63, %v271_v37  ;;  %v430_v53 = vadd.f32 %v385_v0, %v270_v39 }
 0x124   : > { %v391_v1 = vpop.permute.xlu0 %390  ;;  %v389_v2 = vpop.permute.xlu1 %388 }
 0x125   : > { %v433_v54 = vadd.f32 %v391_v1, %v273_v23  ;;  %v432_v33 = vadd.f32 %v389_v2, %v272_v61 }
 0x128   : > { %v395_v3 = vpop.permute.xlu0 %394  ;;  %v1078_v4 = vpop.permute.xlu1 %392 }
 0x129   : > { %v435_v0 = vadd.f32 %v395_v3, %v275_v57  ;;  %v434_v3 = vadd.f32 %v1078_v4, %v274_v47 }
 0x12c   : > { %v1080_v5 = vpop.permute.xlu0 %398  ;;  %v1082_v6 = vpop.permute.xlu1 %396 }
 0x130   : > { %v1084_v7 = vpop.permute.xlu0 %402  ;;  %v1086_v8 = vpop.permute.xlu1 %400 }
 0x134   : > { %v1088_v9 = vpop.permute.xlu0 %406  ;;  %v1090_v10 = vpop.permute.xlu1 %404 }
 0x138   : > { %v1092_v11 = vpop.permute.xlu0 %410  ;;  %v1094_v12 = vpop.permute.xlu1 %408 }
 0x13c   : > { %v543_v14 = vpop.permute.xlu1 %542 }
 0x13d   : > { %v541_v13 = vpop.permute.xlu0 %540  ;;  %v589_v42 = vadd.f32 %v543_v14, %v429_v44 }
 0x13e   : > { %v588_v40 = vadd.f32 %v541_v13, %v428_v36 }
 0x141   : > { %v545_v15 = vpop.permute.xlu0 %544 }
 0x142   : > { %v590_v24 = vadd.f32 %v545_v15, %v430_v53 }
 0x145   : > { %v547_v16 = vpop.permute.xlu1 %546  ;;  %v549_v17 = vpop.permute.xlu0 %548 }
 0x146   : > { %v591_v48 = vadd.f32 %v547_v16, %v431_v45  ;;  %v592_v15 = vadd.f32 %v549_v17, %v432_v33  ;;  %v276_v17 = vmul.f32 %v936_v20, %v1067_v56  ;;  %v281_v56 = vmul.f32 %v936_v20, %v950_v29 }
 0x149   : > { %v551_v18 = vpop.permute.xlu1 %550  ;;  %v553_v21 = vpop.permute.xlu0 %552 }
 0x14a   : > { %v593_v62 = vadd.f32 %v551_v18, %v433_v54  ;;  %v441_v54 = vadd.f32 %v1088_v9, %v281_v56 }
 0x14d   : > { %v555_v22 = vpop.permute.xlu1 %554  ;;  %v1096_v27 = vpop.permute.xlu0 %556 }
 0x14e   : > { %v595_v18 = vadd.f32 %v555_v22, %v435_v0  ;;  %v594_v22 = vadd.f32 %v553_v21, %v434_v3  ;;  %v278_v21 = vmul.f32 %v936_v20, %v1072_v58 }
 0x150   : > { %v438_v53 = vadd.f32 %v1086_v8, %v278_v21 }
 0x151   : > { %v559_v30 = vpop.permute.xlu1 %558  ;;  %v1098_v32 = vpop.permute.xlu0 %560 }
 0x155   : > { %v1102_v34 = vpop.permute.xlu1 %562  ;;  %v1104_v35 = vpop.permute.xlu0 %564 }
 0x159   : > { %v1110_v41 = vpop.permute.xlu1 %566 }
 0x166   : > { %v623_v43 = vpop.permute.xlu0 %622 }
 0x167   : > { %v700_v46 = vadd.f32 %v623_v43, %v588_v40  ;;  %v437_v43 = vadd.f32 %v1080_v5, %v277_v25  ;;  %v436_v5 = vadd.f32 %v1082_v6, %v276_v17 }
 0x169   : > { %v716_v49 = vmax.f32 %v700_v46, 0.0  ;;  %v597_v45 = vadd.f32 %v559_v30, %v437_v43  ;;  %v596_v30 = vadd.f32 %v1096_v27, %v436_v5  ;;  %v280_v27 = vmul.f32 %v936_v20, %v1074_v59 }
 0x16a   : > { %v638_v51 = vpop.permute.xlu0 %637  ;;  %v628_v52 = vpop.permute.xlu1 %627 }
 0x16b   : > { %733 = vst.msk [vmem:[%s1117_s9] sm:$0xff] %vm732_vm0, %v716_v49  ;;  %v703_v19 = vadd.f32 %v638_v51, %v591_v48  ;;  %v701_v55 = vadd.f32 %v628_v52, %v589_v42  ;;  %v439_v42 = vadd.f32 %v1084_v7, %v279_v50  ;;  %v440_v9 = vadd.f32 %v1090_v10, %v280_v27 }
 0x16d   : > { %v719_v63 = vmax.f32 %v703_v19, 0.0  ;;  %v717_v13 = vmax.f32 %v701_v55, 0.0  ;;  %v599_v6 = vadd.f32 %v1102_v34, %v439_v42  ;;  %v598_v34 = vadd.f32 %v1098_v32, %v438_v53 }
 0x16e   : > { %v648_v14 = vpop.permute.xlu0 %647  ;;  %v633_v16 = vpop.permute.xlu1 %632  ;;  %v601_v19 = vadd.f32 %v1110_v41, %v441_v54  ;;  %v600_v59 = vadd.f32 %v1104_v35, %v440_v9  ;;  %v282_v35 = vmul.f32 %v936_v20, %v1076_v60 }
 0x16f   : > { %736 = vst.msk [vmem:[%s1117_s9 + $0x18] sm:$0xff] %vm732_vm0, %v719_v63  ;;  %734 = vst.msk [vmem:[%s1117_s9 + $0x8] sm:$0xff] %vm732_vm0, %v717_v13  ;;  %v705_v1 = vadd.f32 %v648_v14, %v593_v62  ;;  %v702_v36 = vadd.f32 %v633_v16, %v590_v24  ;;  %v283_v14 = vmul.f32 %v936_v20, %v952_v31 }
 0x170   : > { %v442_v31 = vadd.f32 %v1094_v12, %v282_v35 }
 0x171   : > { %v721_v37 = vmax.f32 %v705_v1, 0.0  ;;  %v718_v38 = vmax.f32 %v702_v36, 0.0  ;;  %v443_v16 = vadd.f32 %v1092_v11, %v283_v14 }
 0x172   : > { %v658_v2 = vpop.permute.xlu0 %657  ;;  %v643_v40 = vpop.permute.xlu1 %642 }
 0x173   : > { %738 = vst.msk [vmem:[%s1117_s9 + $0x28] sm:$0xff] %vm732_vm0, %v721_v37  ;;  %735 = vst.msk [vmem:[%s1117_s9 + $0x10] sm:$0xff] %vm732_vm0, %v718_v38  ;;  %v707_v26 = vadd.f32 %v658_v2, %v595_v18  ;;  %v704_v44 = vadd.f32 %v643_v40, %v592_v15 }
 0x175   : > { %v723_v46 = vmax.f32 %v707_v26, 0.0  ;;  %v720_v4 = vmax.f32 %v704_v44, 0.0 }
 0x176   : > { %v668_v39 = vpop.permute.xlu0 %667  ;;  %v653_v23 = vpop.permute.xlu1 %652 }
 0x177   : > { %740 = vst.msk [vmem:[%s1117_s9 + $0x38] sm:$0xff] %vm732_vm0, %v723_v46  ;;  %737 = vst.msk [vmem:[%s1117_s9 + $0x20] sm:$0xff] %vm732_vm0, %v720_v4  ;;  %v709_v28 = vadd.f32 %v668_v39, %v597_v45  ;;  %v706_v48 = vadd.f32 %v653_v23, %v594_v22 }
 0x179   : > { %v725_v49 = vmax.f32 %v709_v28, 0.0  ;;  %v722_v51 = vmax.f32 %v706_v48, 0.0 }
 0x17a   : > { %v678_v7 = vpop.permute.xlu0 %677  ;;  %v663_v52 = vpop.permute.xlu1 %662 }
 0x17b   : > { %742 = vst.msk [vmem:[%s1117_s9 + $0x48] sm:$0xff] %vm732_vm0, %v725_v49  ;;  %739 = vst.msk [vmem:[%s1117_s9 + $0x30] sm:$0xff] %vm732_vm0, %v722_v51  ;;  %v711_v29 = vadd.f32 %v678_v7, %v599_v6  ;;  %v708_v58 = vadd.f32 %v663_v52, %v596_v30 }
 0x17d   : > { %v727_v55 = vmax.f32 %v711_v29, 0.0  ;;  %v724_v57 = vmax.f32 %v708_v58, 0.0 }
 0x17e   : > { %v688_v8 = vpop.permute.xlu0 %687  ;;  %v673_v61 = vpop.permute.xlu1 %672 }
 0x17f   : > { %744 = vst.msk [vmem:[%s1117_s9 + $0x58] sm:$0xff] %vm732_vm0, %v727_v55  ;;  %741 = vst.msk [vmem:[%s1117_s9 + $0x40] sm:$0xff] %vm732_vm0, %v724_v57  ;;  %v713_v24 = vadd.f32 %v688_v8, %v601_v19  ;;  %v710_v62 = vadd.f32 %v673_v61, %v598_v34 }
 0x181   : > { %v729_v32 = vmax.f32 %v713_v24, 0.0  ;;  %v726_v63 = vmax.f32 %v710_v62, 0.0 }
 0x182   : > { %v698_v41 = vpop.permute.xlu0 %697  ;;  %v683_v13 = vpop.permute.xlu1 %682 }
 0x183   : > { %746 = vst.msk [vmem:[%s1117_s9 + $0x68] sm:$0xff] %vm732_vm0, %v729_v32  ;;  %743 = vst.msk [vmem:[%s1117_s9 + $0x50] sm:$0xff] %vm732_vm0, %v726_v63  ;;  %v712_v10 = vadd.f32 %v683_v13, %v600_v59 }
 0x185   : > { %v728_v33 = vmax.f32 %v712_v10, 0.0 }
 0x186   : > { %v571_v0 = vpop.permute.xlu0 %570  ;;  %v693_v1 = vpop.permute.xlu1 %692 }
 0x187   : > { %745 = vst.msk [vmem:[%s1117_s9 + $0x60] sm:$0xff] %vm732_vm0, %v728_v33  ;;  %v603_v36 = vadd.f32 %v571_v0, %v443_v16 }
 0x189   : > { %v715_v25 = vadd.f32 %v698_v41, %v603_v36 }
 0x18a   : > { %v569_v47 = vpop.permute.xlu1 %568 }
 0x18b   : > { %v731_v15 = vmax.f32 %v715_v25, 0.0  ;;  %v602_v18 = vadd.f32 %v569_v47, %v442_v31 }
 0x18d   : > { %748 = vst.msk [vmem:[%s1117_s9 + $0x78] sm:$0xff] %vm732_vm0, %v731_v15  ;;  %v714_v37 = vadd.f32 %v693_v1, %v602_v18 }
 0x18f   : > { %v730_v38 = vmax.f32 %v714_v37, 0.0 }
 0x191   : > { %747 = vst.msk [vmem:[%s1117_s9 + $0x70] sm:$0xff] %vm732_vm0, %v730_v38 }
 0x192 PF: > { %s13_s12 = sadd.s32 1, %s838_s12  }
 0x193   : > { %p10_p4 = scmp.ge.s32.totalorder %s13_s12, 4  }
 0x195   :  { %12 = sbr.rel (!%p10_p4) target bundleno = 1 (0x1), region = 62 }

// kernel: forward.12
= control target key start
LH: loop header
LB: loop body
LE: loop exit
PB: predicated region body
PF: predicated region fallthrough
CT: control target
= control target key end

     0   :  { %s713_s12 = smov 0   ;;  %s937_s0 = inlined_call_operand.vmem [shape: f32[2,38,384], index: 0, kind: input, shape index: {}]   ;;  %s938_s1 = inlined_call_operand.vmem [shape: f32[384,32], index: 1, kind: input, shape index: {}]   ;;  %s939_s2 = inlined_call_operand.vmem [shape: f32[1,32], index: 2, kind: input, shape index: {}]   ;;  %s940_s3 = inlined_call_operand.vmem [shape: f32[2,38,32], index: 3, kind: output, shape index: {}]  }
   0x1 LB: > { %s488_s13 = sadd.s32 4294967295, %s688_s12   ;;  %p492_p0 = scmp.ge.s32.totalorder %s688_s12, 1  ;;  %s688_s12 = sphi %s713_s12, %s13_s12  }
   0x2   : > { %p137_p1 = scmp.lt.s32.totalorder %s688_s12, 3 }
   0x4   : > { %p138_p2 = pnand %p492_p0, %p137_p1 }
   0x5   : > { %v202_v0 = vld [vmem:[%s938_s1 + $0x80] sm:$0xff] (!%p138_p2)  ;;  %v203_v1 = vld [vmem:[%s938_s1 + $0x88] sm:$0xff] (!%p138_p2)  ;;  %p732_p3 = scmp.lt.s32.totalorder (!%p138_p2), %s488_s13, 1  ;;  %v204_v5 = vld [vmem:[%s938_s1 + $0x90] sm:$0xff] (!%p138_p2)  ;;  %v690_v7 = vmov (!%p138_p2), 0.0|0.0   ;;  %vm691_vm0 = vmmov (!%p138_p2), 0  }
   0x6   : > { %141 = sbr.rel (%p138_p2) target bundleno = 278 (0x116), region = 32  ;;  %v186_v2 = vld [vmem:[%s938_s1] sm:$0xff] (!%p138_p2)  ;;  %v613_v3 = vpack.c.bf16 (!%p138_p2), %v203_v1, %v202_v0  ;;  %v187_v4 = vld [vmem:[%s938_s1 + $0x8] sm:$0xff] (!%p138_p2)  ;;  %v205_v6 = vld [vmem:[%s938_s1 + $0x98] sm:$0xff] (!%p138_p2)  ;;  %645 = vmatprep.subr.bf16.mxu1 (!%p138_p2), %v690_v7  ;;  %v692_v13 = vmov (!%p138_p2), 0.0   ;;  %vm426_vm1 = vcmask (!%p138_p2), 261120  }
   0x7   : > { %v615_v8 = vpack.c.bf16 (!%p138_p2), %v187_v4, %v186_v2  ;;  %v617_v9 = vpack.c.bf16 (!%p138_p2), %v205_v6, %v204_v5  ;;  %v188_v10 = vld [vmem:[%s938_s1 + $0x10] sm:$0xff] (!%p138_p2)  ;;  %v189_v11 = vld [vmem:[%s938_s1 + $0x18] sm:$0xff] (!%p138_p2)  ;;  %v218_v12 = vld [vmem:[%s938_s1 + $0x100] sm:$0xff] (!%p138_p2)  ;;  %598 = vmatprep.mubr.msk.f32.mxu1 (!%p138_p2), %vm691_vm0, %v692_v13  ;;  %vm431_vm2 = vcmask (!%p138_p2), 259072  }
   0x8   : > { %614 = vmatprep.subr.bf16.mxu0 (!%p138_p2), %v613_v3  ;;  %v219_v14 = vld [vmem:[%s938_s1 + $0x108] sm:$0xff] (!%p138_p2)  ;;  %v206_v15 = vld [vmem:[%s938_s1 + $0xa0] sm:$0xff] (!%p138_p2)  ;;  %v619_v17 = vpack.c.bf16 (!%p138_p2), %v189_v11, %v188_v10  ;;  %v220_v19 = vld [vmem:[%s938_s1 + $0x110] sm:$0xff] (!%p138_p2) }
   0x9   : > { %v207_v16 = vld [vmem:[%s938_s1 + $0xa8] sm:$0xff] (!%p138_p2)  ;;  %616 = vmatpush3.bf16.msra.mxu0 (!%p138_p2), %v615_v8  ;;  %v646_v18 = vpack.c.bf16 (!%p138_p2), %v219_v14, %v218_v12  ;;  %v190_v21 = vld [vmem:[%s938_s1 + $0x20] sm:$0xff] (!%p138_p2)  ;;  %v221_v23 = vld [vmem:[%s938_s1 + $0x118] sm:$0xff] (!%p138_p2) }
   0xa   : > { %618 = vmatprep.subr.bf16.mxu0 (!%p138_p2), %v617_v9  ;;  %v621_v20 = vpack.c.bf16 (!%p138_p2), %v207_v16, %v206_v15  ;;  %v191_v22 = vld [vmem:[%s938_s1 + $0x28] sm:$0xff] (!%p138_p2)  ;;  %v649_v24 = vpack.c.bf16 (!%p138_p2), %v221_v23, %v220_v19  ;;  %v208_v25 = vld [vmem:[%s938_s1 + $0xb0] sm:$0xff] (!%p138_p2)  ;;  %v209_v26 = vld [vmem:[%s938_s1 + $0xb8] sm:$0xff] (!%p138_p2) }
   0xb   : > { %647 = vmatpush3.bf16.msra.mxu1 (!%p138_p2), %v646_v18  ;;  %v222_v27 = vld [vmem:[%s938_s1 + $0x120] sm:$0xff] (!%p138_p2)  ;;  %v223_v28 = vld [vmem:[%s938_s1 + $0x128] sm:$0xff] (!%p138_p2)  ;;  %v623_v29 = vpack.c.bf16 (!%p138_p2), %v191_v22, %v190_v21  ;;  %v625_v30 = vpack.c.bf16 (!%p138_p2), %v209_v26, %v208_v25  ;;  %v192_v31 = vld [vmem:[%s938_s1 + $0x30] sm:$0xff] (!%p138_p2) }
   0xc   : > { %648 = vmatprep.subr.bf16.mxu1 (!%p138_p2), %v690_v7  ;;  %v193_v32 = vld [vmem:[%s938_s1 + $0x38] sm:$0xff] (!%p138_p2)  ;;  %v652_v33 = vpack.c.bf16 (!%p138_p2), %v223_v28, %v222_v27  ;;  %v210_v34 = vld [vmem:[%s938_s1 + $0xc0] sm:$0xff] (!%p138_p2)  ;;  %v211_v35 = vld [vmem:[%s938_s1 + $0xc8] sm:$0xff] (!%p138_p2) }
   0xd   : > { %s943_s13 = smov (!%p732_p3, %s488_s13), 1  ;;  %620 = vmatpush3.bf16.msra.mxu0 %v619_v17  ;;  %v224_v36 = vld [vmem:[%s938_s1 + $0x130] sm:$0xff]  ;;  %v225_v37 = vld [vmem:[%s938_s1 + $0x138] sm:$0xff]  ;;  %v627_v38 = vpack.c.bf16 %v193_v32, %v192_v31  ;;  %v629_v39 = vpack.c.bf16 %v211_v35, %v210_v34  ;;  %v194_v40 = vld [vmem:[%s938_s1 + $0x40] sm:$0xff] }
   0xe   : > { %s669_s30 = smul.u32 120, %s943_s13  ;;  %622 = vmatprep.subr.bf16.mxu0 %v621_v20  ;;  %v195_v41 = vld [vmem:[%s938_s1 + $0x48] sm:$0xff]  ;;  %v655_v42 = vpack.c.bf16 %v225_v37, %v224_v36  ;;  %v212_v43 = vld [vmem:[%s938_s1 + $0xd0] sm:$0xff]  ;;  %v213_v44 = vld [vmem:[%s938_s1 + $0xd8] sm:$0xff] }
   0xf   : > { %650 = vmatpush3.bf16.msra.mxu1 %v649_v24  ;;  %v226_v45 = vld [vmem:[%s938_s1 + $0x140] sm:$0xff]  ;;  %v227_v46 = vld [vmem:[%s938_s1 + $0x148] sm:$0xff]  ;;  %v631_v48 = vpack.c.bf16 %v195_v41, %v194_v40  ;;  %v633_v49 = vpack.c.bf16 %v213_v44, %v212_v43  ;;  %v196_v50 = vld [vmem:[%s938_s1 + $0x50] sm:$0xff]  ;;  %s670_s18 = smul.u32 40, %s943_s13 }
  0x10   : > { %651 = vmatprep.subr.bf16.mxu1 %v690_v7  ;;  %s820_s21 = scalar_lea.vmem %s937_s0, %s669_s30  ;;  %v197_v51 = vld [vmem:[%s938_s1 + $0x58] sm:$0xff]  ;;  %v658_v52 = vpack.c.bf16 %v227_v46, %v226_v45  ;;  %v214_v53 = vld [vmem:[%s938_s1 + $0xe0] sm:$0xff]  ;;  %v215_v54 = vld [vmem:[%s938_s1 + $0xe8] sm:$0xff] }
  0x11   : > { %624 = vmatpush3.bf16.msra.mxu0 %v623_v29  ;;  %v172_v47 = vld [vmem:[%s820_s21 + $0x8] sm:$0xff]  ;;  %v228_v55 = vld [vmem:[%s938_s1 + $0x150] sm:$0xff]  ;;  %v229_v56 = vld [vmem:[%s938_s1 + $0x158] sm:$0xff]  ;;  %v635_v57 = vpack.c.bf16 %v197_v51, %v196_v50  ;;  %v637_v58 = vpack.c.bf16 %v215_v54, %v214_v53  ;;  %s923_s22 = scalar_lea.vmem %s940_s3, %s670_s18 }
  0x12   : > { %626 = vmatprep.subr.bf16.mxu0 %v625_v30  ;;  %305 = vmatprep.mubr.f32.mxu0 %v172_v47  ;;  %v198_v59 = vld [vmem:[%s938_s1 + $0x60] sm:$0xff]  ;;  %v199_v60 = vld [vmem:[%s938_s1 + $0x68] sm:$0xff]  ;;  %v661_v61 = vpack.c.bf16 %v229_v56, %v228_v55  ;;  %v216_v62 = vld [vmem:[%s938_s1 + $0xf0] sm:$0xff] }
  0x13   : > { %653 = vmatpush3.bf16.msra.mxu1 %v652_v33  ;;  %v217_v63 = vld [vmem:[%s938_s1 + $0xf8] sm:$0xff]  ;;  %v230_v0 = vld [vmem:[%s938_s1 + $0x160] sm:$0xff]  ;;  %v231_v1 = vld [vmem:[%s938_s1 + $0x168] sm:$0xff]  ;;  %v639_v2 = vpack.c.bf16 %v199_v60, %v198_v59 }
  0x14   : > { %654 = vmatprep.subr.bf16.mxu1 %v690_v7  ;;  %v641_v3 = vpack.c.bf16 %v217_v63, %v216_v62  ;;  %v200_v4 = vld [vmem:[%s938_s1 + $0x70] sm:$0xff]  ;;  %v201_v5 = vld [vmem:[%s938_s1 + $0x78] sm:$0xff]  ;;  %v664_v6 = vpack.c.bf16 %v231_v1, %v230_v0  ;;  %v171_v12 = vld [vmem:[%s820_s21] sm:$0xff] }
  0x15   : > { %628 = vmatpush3.bf16.msra.mxu0 %v627_v38  ;;  %v232_v8 = vld [vmem:[%s938_s1 + $0x170] sm:$0xff]  ;;  %v233_v9 = vld [vmem:[%s938_s1 + $0x178] sm:$0xff]  ;;  %v643_v10 = vpack.c.bf16 %v201_v5, %v200_v4  ;;  %v175_v14 = vld [vmem:[%s820_s21 + $0x20] sm:$0xff] }
  0x16   : > { %630 = vmatprep.subr.bf16.mxu0 %v629_v39  ;;  %v667_v11 = vpack.c.bf16 %v233_v9, %v232_v8  ;;  %v173_v15 = vld [vmem:[%s820_s21 + $0x10] sm:$0xff]  ;;  %v174_v16 = vld [vmem:[%s820_s21 + $0x18] sm:$0xff]  ;;  %v176_v18 = vld [vmem:[%s820_s21 + $0x28] sm:$0xff] }
  0x17   : > { %656 = vmatpush3.bf16.msra.mxu1 %v655_v42  ;;  %v178_v17 = vld [vmem:[%s820_s21 + $0x38] sm:$0xff]  ;;  %v181_v19 = vld [vmem:[%s820_s21 + $0x50] sm:$0xff]  ;;  %v179_v20 = vld [vmem:[%s820_s21 + $0x40] sm:$0xff] }
  0x18   : > { %657 = vmatprep.subr.bf16.mxu1 %v690_v7  ;;  %v180_v21 = vld [vmem:[%s820_s21 + $0x48] sm:$0xff]  ;;  %v182_v23 = vld [vmem:[%s820_s21 + $0x58] sm:$0xff]  ;;  %v183_v24 = vld [vmem:[%s820_s21 + $0x60] sm:$0x3f] }
  0x19   : > { %632 = vmatpush3.bf16.msra.mxu0 %v631_v48  ;;  %v184_v22 = vld [vmem:[%s820_s21 + $0x68] sm:$0x3f]  ;;  %v185_v25 = vld [vmem:[%s820_s21 + $0x70] sm:$0x3f]  ;;  %v495_v28 = vld [vmem:[%s939_s2] ss:$0 sm:$0xff] }
  0x1a   : > { %634 = vmatprep.subr.bf16.mxu0 %v633_v49 }
  0x1b   : > { %659 = vmatpush3.bf16.msra.mxu1 %v658_v52 }
  0x1c   : > { %660 = vmatprep.subr.bf16.mxu1 %v690_v7 }
  0x1d   : > { %636 = vmatpush3.bf16.msra.mxu0 %v635_v57 }
  0x1e   : > { %638 = vmatprep.subr.bf16.mxu0 %v637_v58 }
  0x1f   : > { %662 = vmatpush3.bf16.msra.mxu1 %v661_v61 }
  0x20   : > { %663 = vmatprep.subr.bf16.mxu1 %v690_v7 }
  0x21   : > { %640 = vmatpush3.bf16.msra.mxu0 %v639_v2 }
  0x22   : > { %642 = vmatprep.subr.bf16.mxu0 %v641_v3 }
  0x23   : > { %665 = vmatpush3.bf16.msra.mxu1 %v664_v6 }
  0x24   : > { %666 = vmatprep.subr.bf16.mxu1 %v690_v7  ;;  %v177_v7 = vld [vmem:[%s820_s21 + $0x30] sm:$0xff] }
  0x25   : > { %644 = vmatpush3.bf16.msra.mxu0 %v643_v10 }
  0x27   : > { %668 = vmatpush3.bf16.msra.mxu1 %v667_v11 }
  0x28   : > { %306 = vmatmul.mubr.f32.vlgmr.msra.gmra.mrb[0].mxu0 %v171_v12 }
  0x29   : > { %310 = vmatprep.mubr.f32.mxu0 %v175_v14 }
  0x2a   : > { %599 = vmatmul.mubr.f32.vlgmr.msra.gmra.mrb[0].mxu1 %v173_v15 }
  0x2b   : > { %601 = vmatprep.mubr.msk.f32.mxu1 %vm691_vm0, %v692_v13 }
  0x2c   : > { %311 = vmatmul.mubr.f32.gmra.mrb[2].mxu0 %v174_v16 }
  0x2d   : > { %315 = vmatprep.mubr.f32.mxu0 %v178_v17 }
  0x2e   : > { %602 = vmatmul.mubr.f32.gmra.mrb[2].mxu1 %v176_v18 }
  0x2f   : > { %604 = vmatprep.mubr.msk.f32.mxu1 %vm691_vm0, %v692_v13 }
  0x30   : > { %316 = vmatmul.mubr.f32.gmra.mrb[4].mxu0 %v177_v7 }
  0x31   : > { %320 = vmatprep.mubr.f32.mxu0 %v181_v19 }
  0x32   : > { %605 = vmatmul.mubr.f32.gmra.mrb[4].mxu1 %v179_v20 }
  0x33   : > { %607 = vmatprep.mubr.msk.f32.mxu1 %vm691_vm0, %v692_v13 }
  0x34   : > { %321 = vmatmul.mubr.f32.gmra.mrb[6].mxu0 %v180_v21 }
  0x35   : > { %325 = vmatprep.mubr.f32.mxu0 %v184_v22 }
  0x36   : > { %608 = vmatmul.mubr.f32.gmra.mrb[6].mxu1 %v182_v23 }
  0x37   : > { %610 = vmatprep.mubr.msk.f32.mxu1 %vm691_vm0, %v692_v13 }
  0x38   : > { %326 = vmatmul.mubr.f32.gmra.mrb[8].mxu0 %v183_v24 }
  0x3a   : > { %611 = vmatmul.mubr.f32.gmra.mrb[8].mxu1 %v185_v25 }
  0xfb   : > { %v530_v26 = vpop.f32.mrb[0].mxu0 }
  0xfc   : > { %v531_v27 = vpop.f32.mrb[1].mxu0 }
  0xfd   : > { %v532_v29 = vadd.f32 %v531_v27, %v530_v26  ;;  %v397_v30 = vpop.f32.mrb[0].mxu1 }
  0xfe   : > { %v600_v31 = vpop.f32.mrb[1].mxu1 }
  0xff   : > { %v533_v32 = vpop.f32.mrb[2].mxu0  ;;  %v308_v33 = vadd.f32 %v532_v29, %v495_v28 }
 0x100   : > { %v534_v34 = vpop.f32.mrb[3].mxu0 }
 0x101   : > { %v398_v35 = vadd.f32 %v397_v30, %v308_v33  ;;  %v535_v36 = vadd.f32 %v534_v34, %v533_v32  ;;  %v402_v37 = vpop.f32.mrb[2].mxu1 }
 0x102   : > { %v603_v13 = vpop.f32.mrb[3].mxu1 }
 0x103   : > { %v421_v38 = vmax.f32 %v398_v35, 0.0  ;;  %v536_v39 = vpop.f32.mrb[4].mxu0  ;;  %v313_v40 = vadd.f32 %v535_v36, %v495_v28 }
 0x104   : > { %v537_v41 = vpop.f32.mrb[5].mxu0 }
 0x105   : > { %427 = vst.msk [vmem:[%s923_s22] sm:$0xff] %vm426_vm1, %v421_v38  ;;  %v403_v42 = vadd.f32 %v402_v37, %v313_v40  ;;  %v538_v43 = vadd.f32 %v537_v41, %v536_v39  ;;  %v407_v44 = vpop.f32.mrb[4].mxu1 }
 0x106   : > { %v606_v45 = vpop.f32.mrb[5].mxu1 }
 0x107   : > { %v422_v46 = vmax.f32 %v403_v42, 0.0  ;;  %v539_v47 = vpop.f32.mrb[6].mxu0  ;;  %v318_v48 = vadd.f32 %v538_v43, %v495_v28 }
 0x108   : > { %v540_v49 = vpop.f32.mrb[7].mxu0 }
 0x109   : > { %428 = vst.msk [vmem:[%s923_s22 + $0x8] sm:$0xff] %vm426_vm1, %v422_v46  ;;  %v408_v50 = vadd.f32 %v407_v44, %v318_v48  ;;  %v541_v51 = vadd.f32 %v540_v49, %v539_v47  ;;  %v412_v52 = vpop.f32.mrb[6].mxu1 }
 0x10a   : > { %v609_v53 = vpop.f32.mrb[7].mxu1 }
 0x10b   : > { %v423_v54 = vmax.f32 %v408_v50, 0.0  ;;  %v542_v55 = vpop.f32.mrb[8].mxu0  ;;  %v323_v56 = vadd.f32 %v541_v51, %v495_v28 }
 0x10c   : > { %v543_v57 = vpop.f32.mrb[9].mxu0 }
 0x10d   : > { %429 = vst.msk [vmem:[%s923_s22 + $0x10] sm:$0xff] %vm426_vm1, %v423_v54  ;;  %v413_v58 = vadd.f32 %v412_v52, %v323_v56  ;;  %v544_v59 = vadd.f32 %v543_v57, %v542_v55  ;;  %v417_v60 = vpop.f32.mrb[8].mxu1 }
 0x10e   : > { %v612_v61 = vpop.f32.mrb[9].mxu1 }
 0x10f   : > { %v424_v62 = vmax.f32 %v413_v58, 0.0  ;;  %v328_v63 = vadd.f32 %v544_v59, %v495_v28 }
 0x111   : > { %430 = vst.msk [vmem:[%s923_s22 + $0x18] sm:$0xff] %vm426_vm1, %v424_v62  ;;  %v418_v0 = vadd.f32 %v417_v60, %v328_v63 }
 0x113   : > { %v425_v1 = vmax.f32 %v418_v0, 0.0 }
 0x115   : > { %432 = vst.msk [vmem:[%s923_s22 + $0x20] sm:$0x3f] %vm431_vm2, %v425_v1 }
 0x116 PF: > { %s13_s12 = sadd.s32 1, %s688_s12  }
 0x117   : > { %p10_p4 = scmp.ge.s32.totalorder %s13_s12, 4  }
 0x119   :  { %12 = sbr.rel (!%p10_p4) target bundleno = 1 (0x1), region = 62 }

// kernel: forward.13
= control target key start
LH: loop header
LB: loop body
LE: loop exit
PB: predicated region body
PF: predicated region fallthrough
CT: control target
= control target key end

     0   :  { %s512_s12 = smov 0   ;;  %s588_s0 = inlined_call_operand.vmem [shape: f32[2,36,96], index: 0, kind: input, shape index: {}]   ;;  %s589_s1 = inlined_call_operand.vmem [shape: f32[96,32], index: 1, kind: input, shape index: {}]   ;;  %s590_s2 = inlined_call_operand.vmem [shape: f32[1,32], index: 2, kind: input, shape index: {}]   ;;  %s591_s3 = inlined_call_operand.vmem [shape: f32[2,36,32], index: 3, kind: output, shape index: {}]  }
   0x1 LB: > { %s368_s13 = sadd.s32 4294967295, %s487_s12   ;;  %p372_p0 = scmp.ge.s32.totalorder %s487_s12, 1  ;;  %s487_s12 = sphi %s512_s12, %s13_s12  }
   0x2   : > { %p137_p1 = scmp.lt.s32.totalorder %s487_s12, 3 }
   0x4   : > { %p138_p2 = pnand %p372_p0, %p137_p1 }
   0x5   : > { %v176_v0 = vld [vmem:[%s589_s1] sm:$0xff] (!%p138_p2)  ;;  %v177_v1 = vld [vmem:[%s589_s1 + $0x8] sm:$0xff] (!%p138_p2)  ;;  %v178_v2 = vld [vmem:[%s589_s1 + $0x10] sm:$0xff] (!%p138_p2)  ;;  %v489_v3 = vmov (!%p138_p2), 0.0|0.0   ;;  %vm490_vm0 = vmmov (!%p138_p2), 0   ;;  %v491_v6 = vmov (!%p138_p2), 0.0  }
   0x6   : > { %141 = sbr.rel (%p138_p2) target bundleno = 256 (0x100), region = 32  ;;  %439 = vmatprep.subr.bf16.mxu0 (!%p138_p2), %v489_v3  ;;  %v440_v4 = vpack.c.bf16 (!%p138_p2), %v177_v1, %v176_v0  ;;  %457 = vmatprep.subr.bf16.mxu1 (!%p138_p2), %v489_v3  ;;  %v179_v5 = vld [vmem:[%s589_s1 + $0x18] sm:$0xff] (!%p138_p2)  ;;  %v180_v8 = vld [vmem:[%s589_s1 + $0x20] sm:$0xff] (!%p138_p2)  ;;  %v181_v9 = vld [vmem:[%s589_s1 + $0x28] sm:$0xff] (!%p138_p2)  ;;  %p161_p3 = scmp.lt.s32.totalorder (!%p138_p2), %s368_s13, 1  ;;  %vm195_vm1 = vcmask (!%p138_p2), 785408  }
   0x7   : > { %424 = vmatprep.mubr.msk.f32.mxu0 (!%p138_p2), %vm490_vm0, %v491_v6  ;;  %433 = vmatprep.mubr.msk.f32.mxu1 (!%p138_p2), %vm490_vm0, %v491_v6  ;;  %v443_v7 = vpack.c.bf16 (!%p138_p2), %v179_v5, %v178_v2  ;;  %v446_v10 = vpack.c.bf16 (!%p138_p2), %v181_v9, %v180_v8  ;;  %v182_v11 = vld [vmem:[%s589_s1 + $0x30] sm:$0xff] (!%p138_p2)  ;;  %v183_v12 = vld [vmem:[%s589_s1 + $0x38] sm:$0xff] (!%p138_p2)  ;;  %v184_v14 = vld [vmem:[%s589_s1 + $0x40] sm:$0xff] (!%p138_p2)  ;;  %vm306_vm2 = vcmask (!%p138_p2), 261120   ;;  %vm311_vm3 = vcmask (!%p138_p2), 257024  }
   0x8   : > { %441 = vmatpush3.bf16.msra.mxu0 (!%p138_p2), %v440_v4  ;;  %463 = vmatpush3.bf16.msra.mxu1 (!%p138_p2), %v440_v4  ;;  %v449_v13 = vpack.c.bf16 (!%p138_p2), %v183_v12, %v182_v11  ;;  %v185_v15 = vld [vmem:[%s589_s1 + $0x48] sm:$0xff] (!%p138_p2)  ;;  %v186_v17 = vld [vmem:[%s589_s1 + $0x50] sm:$0xff] (!%p138_p2)  ;;  %v187_v18 = vld [vmem:[%s589_s1 + $0x58] sm:$0xff] (!%p138_p2) }
   0x9   : > { %442 = vmatprep.subr.bf16.mxu0 (!%p138_p2), %v489_v3  ;;  %458 = vmatprep.subr.bf16.mxu1 (!%p138_p2), %v489_v3  ;;  %v452_v16 = vpack.c.bf16 (!%p138_p2), %v185_v15, %v184_v14  ;;  %v455_v19 = vpack.c.bf16 (!%p138_p2), %v187_v18, %v186_v17  ;;  %v375_v25 = vld [vmem:[%s590_s2] ss:$0 sm:$0xff] (!%p138_p2) }
   0xc   : > { %444 = vmatpush3.bf16.msra.mxu0 (!%p138_p2), %v443_v7  ;;  %464 = vmatpush3.bf16.msra.mxu1 (!%p138_p2), %v443_v7 }
   0xd   : > { %445 = vmatprep.subr.bf16.mxu0 %v489_v3  ;;  %459 = vmatprep.subr.bf16.mxu1 %v489_v3  ;;  %s593_s13 = smov (!%p161_p3, %s368_s13), 1 }
   0xe   : > { %s469_s11 = smul.u32 40, %s593_s13 }
  0x10   : > { %447 = vmatpush3.bf16.msra.mxu0 %v446_v10  ;;  %465 = vmatpush3.bf16.msra.mxu1 %v446_v10  ;;  %s165_s16 = scalar_lea.vmem %s588_s0, %s469_s11  ;;  %s170_s21 = scalar_lea.vmem %s591_s3, %s469_s11 }
  0x11   : > { %448 = vmatprep.subr.bf16.mxu0 %v489_v3  ;;  %460 = vmatprep.subr.bf16.mxu1 %v489_v3  ;;  %v171_v20 = vld [vmem:[%s165_s16] sm:$0xff]  ;;  %v174_v21 = vld [vmem:[%s165_s16 + $0x18] sm:$0xff]  ;;  %v172_v22 = vld [vmem:[%s165_s16 + $0x8] sm:$0xff] }
  0x12   : > { %v175_v23 = vld [vmem:[%s165_s16 + $0x20] sm:$0xf]  ;;  %v173_v24 = vld [vmem:[%s165_s16 + $0x10] sm:$0xff] }
  0x14   : > { %450 = vmatpush3.bf16.msra.mxu0 %v449_v13  ;;  %466 = vmatpush3.bf16.msra.mxu1 %v449_v13 }
  0x15   : > { %451 = vmatprep.subr.bf16.mxu0 %v489_v3  ;;  %461 = vmatprep.subr.bf16.mxu1 %v489_v3 }
  0x18   : > { %453 = vmatpush3.bf16.msra.mxu0 %v452_v16  ;;  %467 = vmatpush3.bf16.msra.mxu1 %v452_v16 }
  0x19   : > { %454 = vmatprep.subr.bf16.mxu0 %v489_v3  ;;  %462 = vmatprep.subr.bf16.mxu1 %v489_v3 }
  0x1c   : > { %456 = vmatpush3.bf16.msra.mxu0 %v455_v19  ;;  %468 = vmatpush3.bf16.msra.mxu1 %v455_v19 }
  0x1f   : > { %425 = vmatmul.mubr.msk.f32.vlgmr.msra.gmra.mrb[0].mxu0 %vm195_vm1, %v171_v20  ;;  %434 = vmatmul.mubr.msk.f32.vlgmr.msra.gmra.mrb[0].mxu1 %vm195_vm1, %v174_v21 }
  0x20   : > { %427 = vmatprep.mubr.msk.f32.mxu0 %vm490_vm0, %v491_v6  ;;  %436 = vmatprep.mubr.msk.f32.mxu1 %vm490_vm0, %v491_v6 }
  0x23   : > { %428 = vmatmul.mubr.msk.f32.gmra.mrb[2].mxu0 %vm195_vm1, %v172_v22  ;;  %437 = vmatmul.mubr.msk.f32.gmra.mrb[2].mxu1 %vm195_vm1, %v175_v23 }
  0x24   : > { %430 = vmatprep.mubr.msk.f32.mxu0 %vm490_vm0, %v491_v6 }
  0x27   : > { %431 = vmatmul.mubr.msk.f32.gmra.mrb[4].mxu0 %vm195_vm1, %v173_v24 }
  0xf2   : > { %v277_v26 = vpop.f32.mrb[0].mxu0  ;;  %v292_v27 = vpop.f32.mrb[0].mxu1 }
  0xf3   : > { %v278_v28 = vadd.f32 %v375_v25, %v277_v26  ;;  %v426_v29 = vpop.f32.mrb[1].mxu0  ;;  %v293_v30 = vadd.f32 %v375_v25, %v292_v27  ;;  %v435_v31 = vpop.f32.mrb[1].mxu1 }
  0xf5   : > { %v301_v32 = vmax.f32 %v278_v28, 0.0  ;;  %v304_v33 = vmax.f32 %v293_v30, 0.0 }
  0xf6   : > { %v282_v34 = vpop.f32.mrb[2].mxu0  ;;  %v297_v35 = vpop.f32.mrb[2].mxu1 }
  0xf7   : > { %307 = vst.msk [vmem:[%s170_s21] sm:$0xff] %vm306_vm2, %v301_v32  ;;  %310 = vst.msk [vmem:[%s170_s21 + $0x18] sm:$0xff] %vm306_vm2, %v304_v33  ;;  %v283_v36 = vadd.f32 %v375_v25, %v282_v34  ;;  %v429_v37 = vpop.f32.mrb[3].mxu0  ;;  %v298_v38 = vadd.f32 %v375_v25, %v297_v35  ;;  %v438_v39 = vpop.f32.mrb[3].mxu1 }
  0xf9   : > { %v302_v40 = vmax.f32 %v283_v36, 0.0  ;;  %v305_v41 = vmax.f32 %v298_v38, 0.0 }
  0xfa   : > { %v287_v42 = vpop.f32.mrb[4].mxu0 }
  0xfb   : > { %308 = vst.msk [vmem:[%s170_s21 + $0x8] sm:$0xff] %vm306_vm2, %v302_v40  ;;  %v288_v43 = vadd.f32 %v375_v25, %v287_v42  ;;  %v432_v44 = vpop.f32.mrb[5].mxu0 }
  0xfc   : > { %312 = vst.msk [vmem:[%s170_s21 + $0x20] sm:$0xf] %vm311_vm3, %v305_v41 }
  0xfd   : > { %v303_v45 = vmax.f32 %v288_v43, 0.0 }
  0xff   : > { %309 = vst.msk [vmem:[%s170_s21 + $0x10] sm:$0xff] %vm306_vm2, %v303_v45 }
 0x100 PF: > { %s13_s12 = sadd.s32 1, %s487_s12  }
 0x101   : > { %p10_p4 = scmp.ge.s32.totalorder %s13_s12, 4  }
 0x103   :  { %12 = sbr.rel (!%p10_p4) target bundleno = 1 (0x1), region = 62 }

// kernel: forward.14
= control target key start
LH: loop header
LB: loop body
LE: loop exit
PB: predicated region body
PF: predicated region fallthrough
CT: control target
= control target key end

     0   :  { %s451_s12 = smov 0   ;;  %s516_s0 = inlined_call_operand.vmem [shape: f32[2,16,96], index: 0, kind: input, shape index: {}]   ;;  %s517_s1 = inlined_call_operand.vmem [shape: f32[96,32], index: 1, kind: input, shape index: {}]   ;;  %s518_s2 = inlined_call_operand.vmem [shape: f32[1,32], index: 2, kind: input, shape index: {}]   ;;  %s519_s3 = inlined_call_operand.vmem [shape: f32[2,16,32], index: 3, kind: output, shape index: {}]  }
   0x1 LB: > { %s334_s13 = sadd.s32 4294967295, %s429_s12   ;;  %p338_p0 = scmp.ge.s32.totalorder %s429_s12, 1  ;;  %s429_s12 = sphi %s451_s12, %s13_s12  }
   0x2   : > { %p137_p1 = scmp.lt.s32.totalorder %s429_s12, 3 }
   0x4   : > { %p138_p2 = pnand %p338_p0, %p137_p1 }
   0x5   : > { %v173_v0 = vld [vmem:[%s517_s1] sm:$0xff] (!%p138_p2)  ;;  %v174_v1 = vld [vmem:[%s517_s1 + $0x8] sm:$0xff] (!%p138_p2)  ;;  %v175_v2 = vld [vmem:[%s517_s1 + $0x10] sm:$0xff] (!%p138_p2)  ;;  %p161_p3 = scmp.lt.s32.totalorder (!%p138_p2), %s334_s13, 1  ;;  %vm192_vm0 = vcmask (!%p138_p2), 785408   ;;  %vm276_vm1 = vcmask (!%p138_p2), 261120  }
   0x6   : > { %141 = sbr.rel (%p138_p2) target bundleno = 250 (0xfa), region = 32  ;;  %v391_v3 = vpack.c.bf16 (!%p138_p2), %v174_v1, %v173_v0  ;;  %v176_v4 = vld [vmem:[%s517_s1 + $0x18] sm:$0xff] (!%p138_p2)  ;;  %v177_v6 = vld [vmem:[%s517_s1 + $0x20] sm:$0xff] (!%p138_p2)  ;;  %v178_v7 = vld [vmem:[%s517_s1 + $0x28] sm:$0xff] (!%p138_p2) }
   0x7   : > { %v395_v5 = vpack.c.bf16 (!%p138_p2), %v176_v4, %v175_v2  ;;  %v399_v8 = vpack.c.bf16 (!%p138_p2), %v178_v7, %v177_v6  ;;  %v179_v9 = vld [vmem:[%s517_s1 + $0x30] sm:$0xff] (!%p138_p2)  ;;  %v180_v10 = vld [vmem:[%s517_s1 + $0x38] sm:$0xff] (!%p138_p2)  ;;  %v181_v13 = vld [vmem:[%s517_s1 + $0x40] sm:$0xff] (!%p138_p2) }
   0x8   : > { %392 = vmatprep.subr.bf16.mxu0 (!%p138_p2), %v391_v3  ;;  %v403_v12 = vpack.c.bf16 (!%p138_p2), %v180_v10, %v179_v9  ;;  %v182_v14 = vld [vmem:[%s517_s1 + $0x48] sm:$0xff] (!%p138_p2)  ;;  %v183_v16 = vld [vmem:[%s517_s1 + $0x50] sm:$0xff] (!%p138_p2)  ;;  %v184_v17 = vld [vmem:[%s517_s1 + $0x58] sm:$0xff] (!%p138_p2) }
   0x9   : > { %394 = vmatpush3.bf16.msra.mxu0 (!%p138_p2), %v391_v3  ;;  %v407_v15 = vpack.c.bf16 (!%p138_p2), %v182_v14, %v181_v13  ;;  %v411_v18 = vpack.c.bf16 (!%p138_p2), %v184_v17, %v183_v16  ;;  %v343_v20 = vld [vmem:[%s518_s2] ss:$0 sm:$0xff] (!%p138_p2) }
   0xa   : > { %396 = vmatprep.subr.bf16.mxu0 (!%p138_p2), %v395_v5 }
   0xd   : > { %s521_s13 = smov (!%p161_p3, %s334_s13), 1  ;;  %398 = vmatpush3.bf16.msra.mxu0 %v395_v5 }
   0xe   : > { %s348_s26 = sshll.u32 %s521_s13, 4  ;;  %400 = vmatprep.subr.bf16.mxu0 %v399_v8 }
   0xf   : > { %s165_s29 = scalar_lea.vmem %s516_s0, %s348_s26  ;;  %s170_s21 = scalar_lea.vmem %s519_s3, %s348_s26 }
  0x10   : > { %v171_v11 = vld [vmem:[%s165_s29] sm:$0xff]  ;;  %v172_v19 = vld [vmem:[%s165_s29 + $0x8] sm:$0xff] }
  0x11   : > { %388 = vmatprep.mubr.msk.f32.mxu0 %vm192_vm0, %v171_v11  ;;  %402 = vmatpush3.bf16.msra.mxu0 %v399_v8 }
  0x12   : > { %404 = vmatprep.subr.bf16.mxu0 %v403_v12 }
  0x15   : > { %406 = vmatpush3.bf16.msra.mxu0 %v403_v12 }
  0x16   : > { %408 = vmatprep.subr.bf16.mxu0 %v407_v15 }
  0x19   : > { %410 = vmatpush3.bf16.msra.mxu0 %v407_v15 }
  0x1a   : > { %412 = vmatprep.subr.bf16.mxu0 %v411_v18 }
  0x1d   : > { %414 = vmatpush3.bf16.msra.mxu0 %v411_v18 }
  0x20   : > { %389 = vmatmul.mubr.msk.f32.vlgmr.msra.gmra.mrb[0].mxu0 %vm192_vm0, %v172_v19 }
  0xf3   : > { %v390_v21 = vpop.f32.mrb[0].mxu0 }
  0xf4   : > { %v271_v22 = vadd.f32 %v390_v21, %v343_v20  ;;  %v265_v23 = vpop.f32.mrb[1].mxu0 }
  0xf5   : > { %v266_v24 = vadd.f32 %v343_v20, %v265_v23 }
  0xf6   : > { %v275_v25 = vmax.f32 %v271_v22, 0.0 }
  0xf7   : > { %v274_v26 = vmax.f32 %v266_v24, 0.0 }
  0xf8   : > { %278 = vst.msk [vmem:[%s170_s21 + $0x8] sm:$0xff] %vm276_vm1, %v275_v25 }
  0xf9   : > { %277 = vst.msk [vmem:[%s170_s21] sm:$0xff] %vm276_vm1, %v274_v26 }
  0xfa PF: > { %s13_s12 = sadd.s32 1, %s429_s12  }
  0xfb   : > { %p10_p4 = scmp.ge.s32.totalorder %s13_s12, 4  }
  0xfd   :  { %12 = sbr.rel (!%p10_p4) target bundleno = 1 (0x1), region = 62 }

// kernel: forward.16
= control target key start
LH: loop header
LB: loop body
LE: loop exit
PB: predicated region body
PF: predicated region fallthrough
CT: control target
= control target key end

     0   :  { %vm43_vm0 = vcmask 261120   ;;  %v724_v7 = vmov 0   ;;  %vm52_vm1 = vcmask 7168   ;;  %v725_v42 = vmov 0.0|0.0   ;;  %s875_s0 = inlined_call_operand.vmem [shape: f32[2,8,32], index: 0, kind: input, shape index: {}]   ;;  %s876_s1 = inlined_call_operand.vmem [shape: f32[5,128], index: 1, kind: input, shape index: {}]   ;;  %s877_s2 = inlined_call_operand.vmem [shape: f32[32,32], index: 2, kind: input, shape index: {}]   ;;  %s878_s3 = inlined_call_operand.vmem [shape: f32[32,32], index: 3, kind: input, shape index: {}]   ;;  %s879_s4 = inlined_call_operand.vmem [shape: f32[32,64], index: 4, kind: input, shape index: {}]   ;;  %s880_s5 = inlined_call_operand.vmem [shape: f32[2,64], index: 5, kind: output, shape index: {}]  }
   0x1   :  { %v569_v0 = vld [vmem:[%s876_s1] ss:$0 sm:$0xff]  ;;  %v771_v4 = vld [vmem:[%s875_s0 + $0x8] sm:$0xff]  ;;  %714 = vset.pattern.permute.xlu0 %v724_v7  ;;  %715 = vset.pattern.permute.xlu1 %v724_v7  ;;  %v570_v8 = vld [vmem:[%s876_s1 + $0x1] ss:$0 sm:$0xff]  ;;  %vm726_vm2 = vmmov 0  }
   0x2   :  { %v764_v1 = vld [vmem:[%s875_s0] sm:$0xff]  ;;  %v308_v5 = vmul.f32 %v771_v4, %v569_v0  ;;  %v23_v39 = vld [vmem:[%s877_s2 + $0x8] sm:$0xff]  ;;  %674 = vmatprep.subr.bf16.mxu0 %v725_v42  ;;  %680 = vmatprep.subr.bf16.mxu1 %v725_v42  ;;  %v24_v44 = vld [vmem:[%s877_s2 + $0x10] sm:$0xff]  ;;  %v727_v48 = vmov 0.0   ;;  %vm304_vm3 = vcmask 516096  }
   0x3   :  { %v42_v2 = vmul.f32 %v569_v0, %v764_v1  ;;  %v22_v38 = vld [vmem:[%s877_s2] sm:$0xff]  ;;  %v25_v45 = vld [vmem:[%s877_s2 + $0x18] sm:$0xff]  ;;  %616 = vmatprep.mubr.msk.f32.mxu0 %vm726_vm2, %v727_v48  ;;  %627 = vmatprep.mubr.msk.f32.mxu1 %vm726_vm2, %v727_v48  ;;  %v27_v60 = vld [vmem:[%s878_s3 + $0x8] sm:$0xff] }
   0x4   :  { %v309_v6 = vsel %vm43_vm0, %v308_v5, 0.0  ;;  %v787_v40 = vpack.c.bf16 %v23_v39, %v22_v38  ;;  %v799_v46 = vpack.c.bf16 %v25_v45, %v24_v44  ;;  %v26_v59 = vld [vmem:[%s878_s3] sm:$0xff]  ;;  %v28_v61 = vld [vmem:[%s878_s3 + $0x10] sm:$0xff]  ;;  %v29_v63 = vld [vmem:[%s878_s3 + $0x18] sm:$0xff] }
   0x5   :  { %v44_v3 = vsel %vm43_vm0, %v42_v2, 0.0  ;;  %310 = vadd.xlane.f32.xlu1 %v309_v6  ;;  %v681_v62 = vpack.c.bf16 %v27_v60, %v26_v59  ;;  %v684_v0 = vpack.c.bf16 %v29_v63, %v28_v61 }
   0x6   :  { %45 = vadd.xlane.f32.xlu0 %v44_v3  ;;  %676 = vmatpush3.bf16.msra.mxu0 %v787_v40 }
   0x7   :  { %677 = vmatprep.subr.bf16.mxu0 %v725_v42  ;;  %682 = vmatpush3.bf16.msra.mxu1 %v681_v62 }
   0x8   :  { %683 = vmatprep.subr.bf16.mxu1 %v725_v42 }
   0xa   :  { %679 = vmatpush3.bf16.msra.mxu0 %v799_v46 }
   0xb   :  { %686 = vmatprep.subr.bf16.mxu0 %v725_v42  ;;  %685 = vmatpush3.bf16.msra.mxu1 %v684_v0 }
   0xc   :  { %692 = vmatprep.subr.bf16.mxu1 %v725_v42 }
  0x92   :  { %v311_v28 = vpop.xlane.xlu1 %310 }
  0x93   :  { %v46_v9 = vpop.xlane.xlu0 %45  ;;  %v312_v29 = vadd.f32 %v570_v8, %v311_v28 }
  0x94   :  { %v51_v10 = vadd.f32 %v570_v8, %v46_v9 }
  0x95   :  { %v313_v30 = vsel %vm52_vm1, %v312_v29, -inf }
  0x96   :  { %v53_v11 = vsel %vm52_vm1, %v51_v10, -inf  ;;  %v314_v32 = vrot.slane %v313_v30, 4 }
  0x97   :  { %v54_v12 = vrot.slane %v53_v11, 4 }
  0x98   :  { %v315_v34 = vmax.f32 %v313_v30, %v314_v32 }
  0x99   :  { %v55_v13 = vmax.f32 %v53_v11, %v54_v12  ;;  %v30_v12 = vld [vmem:[%s879_s4] sm:$0xff] }
  0x9a   :  { %v316_v35 = vrot.slane %v315_v34, 2 }
  0x9b   :  { %v56_v14 = vrot.slane %v55_v13, 2 }
  0x9c   :  { %v317_v36 = vmax.f32 %v315_v34, %v316_v35 }
  0x9d   :  { %v57_v15 = vmax.f32 %v55_v13, %v56_v14  ;;  %v32_v13 = vld [vmem:[%s879_s4 + $0x10] sm:$0xff] }
  0x9e   :  { %v318_v37 = vrot.slane %v317_v36, 1 }
  0x9f   :  { %v58_v16 = vrot.slane %v57_v15, 1 }
  0xa0   :  { %v319_v41 = vmax.f32 %v317_v36, %v318_v37  ;;  %v36_v36 = vld [vmem:[%s876_s1 + $0x4] sm:$0x1] }
  0xa1   :  { %v59_v17 = vmax.f32 %v57_v15, %v58_v16  ;;  %v33_v15 = vld [vmem:[%s879_s4 + $0x18] sm:$0xff] }
  0xa2   :  { %v320_v43 = vsub.f32 %v312_v29, %v319_v41  ;;  %v690_v16 = vpack.c.bf16 %v33_v15, %v32_v13  ;;  %v35_v29 = vld [vmem:[%s876_s1 + $0x3] sm:$0x1] }
  0xa3   :  { %v60_v18 = vsub.f32 %v51_v10, %v59_v17 }
  0xa4   :  { %v321_v47 = vmul.f32 1.442695, %v320_v43 }
  0xa5   :  { %v61_v19 = vmul.f32 1.442695, %v60_v18 }
  0xa7   :  { %716 = vpow2.f32 %v61_v19 }
  0xb1   :  { %v717_v20 = vpop.eup %716 }
  0xb2   :  { %v63_v21 = vsel %vm52_vm1, %v717_v20, 0.0 }
  0xb3   :  { %v64_v22 = vrot.slane %v63_v21, 4 }
  0xb5   :  { %v65_v23 = vadd.f32 %v64_v22, %v63_v21 }
  0xb7   :  { %v66_v24 = vrot.slane %v65_v23, 2 }
  0xb9   :  { %v67_v25 = vadd.f32 %v66_v24, %v65_v23  ;;  %v34_v23 = vld [vmem:[%s876_s1 + $0x2] sm:$0x1] }
  0xbb   :  { %v68_v26 = vrot.slane %v67_v25, 1 }
  0xbd   :  { %v69_v27 = vadd.f32 %v68_v26, %v67_v25 }
  0xbf   :  { %718 = vrcp.f32 %v69_v27 }
  0xc0   :  { %720 = vpow2.f32 %v321_v47 }
  0xc9   :  { %v719_v31 = vpop.eup %718 }
  0xca   :  { %v71_v33 = vmul.f32 %v719_v31, %v717_v20  ;;  %v721_v49 = vpop.eup %720 }
  0xcb   :  { %v323_v50 = vsel %vm52_vm1, %v721_v49, 0.0 }
  0xcc   :  { %74 = vperm.xlu0 %714, %v71_v33   ;;  %v324_v51 = vrot.slane %v323_v50, 4 }
  0xce   :  { %v325_v52 = vadd.f32 %v324_v51, %v323_v50 }
  0xd0   :  { %v326_v53 = vrot.slane %v325_v52, 2 }
  0xd2   :  { %v327_v54 = vadd.f32 %v326_v53, %v325_v52 }
  0xd4   :  { %v328_v55 = vrot.slane %v327_v54, 1 }
  0xd6   :  { %v329_v56 = vadd.f32 %v328_v55, %v327_v54 }
  0xd8   :  { %722 = vrcp.f32 %v329_v56 }
  0xe2   :  { %v723_v57 = vpop.eup %722 }
  0xe3   :  { %v331_v58 = vmul.f32 %v723_v57, %v721_v49 }
  0xe5   :  { %334 = vperm.xlu1 %715, %v331_v58  }
 0x14b   :  { %v75_v2 = vpop.permute.xlu0 %74 }
 0x14c   :  { %v77_v3 = vmul.f32 %v75_v2, %v764_v1  ;;  %v31_v1 = vld [vmem:[%s879_s4 + $0x8] sm:$0xff] }
 0x14d   :  { %v687_v14 = vpack.c.bf16 %v31_v1, %v30_v12 }
 0x14e   :  { %v78_v5 = vsel %vm43_vm0, %v77_v3, 0.0 }
 0x14f   :  { %v79_v6 = vrot.slane %v78_v5, 4 }
 0x151   :  { %v80_v7 = vadd.f32 %v79_v6, %v78_v5 }
 0x153   :  { %v81_v8 = vrot.slane %v80_v7, 2 }
 0x155   :  { %v82_v9 = vadd.f32 %v81_v8, %v80_v7 }
 0x157   :  { %v83_v10 = vrot.slane %v82_v9, 1 }
 0x159   :  { %v84_v11 = vadd.f32 %v83_v10, %v82_v9 }
 0x15b   :  { %617 = vmatmul.mubr.msk.f32.vlgmr.msra.gmra.mrb[0].mxu0 %vm43_vm0, %v84_v11 }
 0x15c   :  { %638 = vmatprep.mubr.msk.f32.mxu0 %vm726_vm2, %v727_v48  ;;  %688 = vmatpush3.bf16.msra.mxu0 %v687_v14 }
 0x15d   :  { %689 = vmatprep.subr.bf16.mxu0 %v725_v42 }
 0x160   :  { %691 = vmatpush3.bf16.msra.mxu0 %v690_v16 }
 0x161   :  { %698 = vmatprep.subr.bf16.mxu0 %v725_v42 }
 0x164   :  { %v335_v17 = vpop.permute.xlu1 %334 }
 0x165   :  { %v337_v18 = vmul.f32 %v771_v4, %v335_v17 }
 0x167   :  { %v338_v19 = vsel %vm43_vm0, %v337_v18, 0.0 }
 0x168   :  { %v339_v20 = vrot.slane %v338_v19, 4 }
 0x16a   :  { %v340_v21 = vadd.f32 %v339_v20, %v338_v19 }
 0x16c   :  { %v341_v22 = vrot.slane %v340_v21, 2 }
 0x16e   :  { %v342_v25 = vadd.f32 %v341_v22, %v340_v21 }
 0x170   :  { %v343_v4 = vrot.slane %v342_v25, 1 }
 0x172   :  { %v344_v28 = vadd.f32 %v343_v4, %v342_v25 }
 0x22e   :  { %v154_v24 = vpop.f32.mrb[0].mxu0 }
 0x22f   :  { %v155_v26 = vadd.f32 %v154_v24, %v34_v23  ;;  %v618_v27 = vpop.f32.mrb[1].mxu0 }
 0x231   :  { %628 = vmatmul.mubr.msk.f32.vlgmr.msra.gmra.mrb[0].mxu1 %vm43_vm0, %v155_v26 }
 0x232   :  { %694 = vmatpush3.bf16.msra.mxu1 %v787_v40  ;;  %649 = vmatprep.mubr.msk.f32.mxu1 %vm726_vm2, %v727_v48 }
 0x233   :  { %695 = vmatprep.subr.bf16.mxu1 %v725_v42 }
 0x236   :  { %697 = vmatpush3.bf16.msra.mxu1 %v799_v46 }
 0x237   :  { %704 = vmatprep.subr.bf16.mxu1 %v725_v42 }
 0x239   :  { %650 = vmatmul.mubr.msk.f32.vlgmr.msra.gmra.mrb[2].mxu1 %vm43_vm0, %v344_v28 }
 0x23a   :  { %706 = vmatpush3.bf16.msra.mxu1 %v687_v14  ;;  %671 = vmatprep.mubr.msk.f32.mxu1 %vm726_vm2, %v727_v48 }
 0x23b   :  { %707 = vmatprep.subr.bf16.mxu1 %v725_v42 }
 0x23e   :  { %709 = vmatpush3.bf16.msra.mxu1 %v690_v16 }
 0x304   :  { %v227_v30 = vpop.f32.mrb[0].mxu1 }
 0x305   :  { %v228_v31 = vadd.f32 %v227_v30, %v35_v29  ;;  %v629_v32 = vpop.f32.mrb[1].mxu1 }
 0x307   :  { %639 = vmatmul.mubr.msk.f32.vlgmr.msra.gmra.mrb[2].mxu0 %vm43_vm0, %v228_v31 }
 0x308   :  { %700 = vmatpush3.bf16.msra.mxu0 %v681_v62  ;;  %660 = vmatprep.mubr.msk.f32.mxu0 %vm726_vm2, %v727_v48 }
 0x309   :  { %701 = vmatprep.subr.bf16.mxu0 %v725_v42 }
 0x30c   :  { %v414_v33 = vpop.f32.mrb[2].mxu1  ;;  %703 = vmatpush3.bf16.msra.mxu0 %v684_v0 }
 0x30d   :  { %v415_v34 = vadd.f32 %v414_v33, %v34_v23  ;;  %v651_v35 = vpop.f32.mrb[3].mxu1 }
 0x30f   :  { %661 = vmatmul.mubr.msk.f32.vlgmr.msra.gmra.mrb[4].mxu0 %vm43_vm0, %v415_v34 }
 0x3da   :  { %v300_v37 = vpop.f32.mrb[2].mxu0 }
 0x3db   :  { %v301_v38 = vadd.f32 %v300_v37, %v36_v36  ;;  %v640_v39 = vpop.f32.mrb[3].mxu0 }
 0x3dd   :  { %305 = vst.msk [vmem:[%s880_s5] sm:$0x1] %vm304_vm3, %v301_v38 }
 0x3e2   :  { %v487_v40 = vpop.f32.mrb[4].mxu0 }
 0x3e3   :  { %v488_v41 = vadd.f32 %v487_v40, %v35_v29  ;;  %v662_v42 = vpop.f32.mrb[5].mxu0 }
 0x3e5   :  { %672 = vmatmul.mubr.msk.f32.vlgmr.msra.gmra.mrb[4].mxu1 %vm43_vm0, %v488_v41 }
 0x4b8   :  { %v560_v43 = vpop.f32.mrb[4].mxu1 }
 0x4b9   :  { %v561_v44 = vadd.f32 %v560_v43, %v36_v36  ;;  %v673_v45 = vpop.f32.mrb[5].mxu1 }
 0x4bb   :  { %564 = vst.msk [vmem:[%s880_s5 + $0x1] sm:$0x1] %vm304_vm3, %v561_v44 }

// kernel: forward.17
= control target key start
LH: loop header
LB: loop body
LE: loop exit
PB: predicated region body
PF: predicated region fallthrough
CT: control target
= control target key end

     0   :  { %s865_s12 = smov 0   ;;  %s1192_s0 = inlined_call_operand.vmem [shape: f32[2,1,10], index: 0, kind: input, shape index: {}]   ;;  %s1193_s1 = inlined_call_operand.vmem [shape: f32[128,3], index: 1, kind: input, shape index: {}]   ;;  %s1194_s2 = inlined_call_operand.vmem [shape: f32[128,1], index: 2, kind: input, shape index: {}]   ;;  %s1195_s3 = inlined_call_operand.vmem [shape: f32[2,128,8], index: 3, kind: output, shape index: {}]  }
   0x1 LB: > { %s801_s13 = sadd.s32 4294967295, %s838_s12   ;;  %p805_p0 = scmp.ge.s32.totalorder %s838_s12, 1  ;;  %s838_s12 = sphi %s865_s12, %s13_s12  }
   0x2   : > { %p135_p1 = scmp.lt.s32.totalorder %s838_s12, 3 }
   0x4   : > { %p136_p2 = pnand %p805_p0, %p135_p1 }
   0x5   : > { %v168_v0 = vld [vmem:[%s1193_s1 + $0x10] sm:$0xff] (!%p136_p2)  ;;  %v840_v1 = vmov (!%p136_p2), 0   ;;  %v841_v2 = vmov (!%p136_p2), 1   ;;  %v166_v3 = vld [vmem:[%s1193_s1] sm:$0xff] (!%p136_p2)  ;;  %v169_v4 = vld [vmem:[%s1193_s1 + $0x18] sm:$0xff] (!%p136_p2)  ;;  %v842_v12 = vmov (!%p136_p2), 2  }
   0x6   : > { %139 = sbr.rel (%p136_p2) target bundleno = 402 (0x192), region = 32  ;;  %825 = vset.pattern.permute.xlu1 (!%p136_p2), %v840_v1  ;;  %826 = vset.pattern.permute.xlu0 (!%p136_p2), %v841_v2  ;;  %v171_v5 = vld [vmem:[%s1193_s1 + $0x28] sm:$0xff] (!%p136_p2)  ;;  %v173_v6 = vld [vmem:[%s1193_s1 + $0x38] sm:$0xff] (!%p136_p2)  ;;  %v170_v13 = vld [vmem:[%s1193_s1 + $0x20] sm:$0xff] (!%p136_p2)  ;;  %p157_p3 = scmp.lt.s32.totalorder (!%p136_p2), %s801_s13, 1  ;;  %vm732_vm0 = vcmask (!%p136_p2), 64512  }
   0x7   : > { %194 = vperm.xlu1 (!%p136_p2), %825, %v168_v0   ;;  %285 = vperm.xlu0 (!%p136_p2), %826, %v166_v3   ;;  %v175_v7 = vld [vmem:[%s1193_s1 + $0x48] sm:$0xff] (!%p136_p2)  ;;  %v177_v8 = vld [vmem:[%s1193_s1 + $0x58] sm:$0xff] (!%p136_p2)  ;;  %v172_v14 = vld [vmem:[%s1193_s1 + $0x30] sm:$0xff] (!%p136_p2)  ;;  %s843_s24 = smov (!%p136_p2), 127   ;;  %s844_s25 = smov (!%p136_p2), 126  }
   0x8   : > { %v179_v9 = vld [vmem:[%s1193_s1 + $0x68] sm:$0xff] (!%p136_p2)  ;;  %v181_v10 = vld [vmem:[%s1193_s1 + $0x78] sm:$0xff] (!%p136_p2)  ;;  %v174_v15 = vld [vmem:[%s1193_s1 + $0x40] sm:$0xff] (!%p136_p2) }
   0x9   : > { %v167_v11 = vld [vmem:[%s1193_s1 + $0x8] sm:$0xff] (!%p136_p2)  ;;  %v176_v16 = vld [vmem:[%s1193_s1 + $0x50] sm:$0xff] (!%p136_p2)  ;;  %v178_v17 = vld [vmem:[%s1193_s1 + $0x60] sm:$0xff] (!%p136_p2) }
   0xa   : > { %v180_v18 = vld [vmem:[%s1193_s1 + $0x70] sm:$0xff] (!%p136_p2) }
   0xb   : > { %199 = vperm.xlu1 (!%p136_p2), %825, %v169_v4   ;;  %297 = vperm.xlu0 (!%p136_p2), %826, %v169_v4  }
   0xd   : > { %s1197_s13 = smov (!%p157_p3, %s801_s13), 1 }
   0xe   : > { %s159_s23 = scalar_lea.vmem %s1192_s0, %s1197_s13 }
   0xf   : > { %209 = vperm.xlu1 %825, %v171_v5   ;;  %305 = vperm.xlu0 %826, %v171_v5   ;;  %v936_v20 = vld [vmem:[%s159_s23] ss:$0 sm:$0xff] }
  0x13   : > { %219 = vperm.xlu1 %825, %v173_v6   ;;  %313 = vperm.xlu0 %826, %v173_v6  }
  0x17   : > { %229 = vperm.xlu1 %825, %v175_v7   ;;  %321 = vperm.xlu0 %826, %v175_v7  }
  0x1b   : > { %239 = vperm.xlu1 %825, %v177_v8   ;;  %329 = vperm.xlu0 %826, %v177_v8  }
  0x1f   : > { %249 = vperm.xlu1 %825, %v179_v9   ;;  %337 = vperm.xlu0 %826, %v179_v9  }
  0x23   : > { %259 = vperm.xlu1 %825, %v181_v10   ;;  %345 = vperm.xlu0 %826, %v181_v10  }
  0x27   : > { %827 = vset.pattern.permute.xlu1 %v841_v2  ;;  %829 = vset.pattern.permute.xlu0 %v842_v12 }
  0x28   : > { %289 = vperm.xlu1 %827, %v167_v11   ;;  %449 = vperm.xlu0 %829, %v167_v11  }
  0x2c   : > { %293 = vperm.xlu1 %827, %v168_v0   ;;  %461 = vperm.xlu0 %829, %v170_v13  }
  0x30   : > { %301 = vperm.xlu1 %827, %v170_v13   ;;  %469 = vperm.xlu0 %829, %v172_v14  }
  0x34   : > { %309 = vperm.xlu1 %827, %v172_v14   ;;  %477 = vperm.xlu0 %829, %v174_v15  }
  0x38   : > { %317 = vperm.xlu1 %827, %v174_v15   ;;  %485 = vperm.xlu0 %829, %v176_v16  }
  0x3c   : > { %325 = vperm.xlu1 %827, %v176_v16   ;;  %493 = vperm.xlu0 %829, %v178_v17  }
  0x40   : > { %333 = vperm.xlu1 %827, %v178_v17   ;;  %501 = vperm.xlu0 %829, %v180_v18  }
  0x44   : > { %341 = vperm.xlu1 %827, %v180_v18   ;;  %830 = vset.pattern.permute.xlu0 %v840_v1 }
  0x45   : > { %184 = vperm.xlu0 %830, %v166_v3  }
  0x48   : > { %828 = vset.pattern.permute.xlu1 %v842_v12 }
  0x49   : > { %445 = vperm.xlu1 %828, %v166_v3   ;;  %189 = vperm.xlu0 %830, %v167_v11  }
  0x4d   : > { %453 = vperm.xlu1 %828, %v168_v0   ;;  %204 = vperm.xlu0 %830, %v170_v13  }
  0x51   : > { %457 = vperm.xlu1 %828, %v169_v4   ;;  %214 = vperm.xlu0 %830, %v172_v14  }
  0x55   : > { %465 = vperm.xlu1 %828, %v171_v5   ;;  %224 = vperm.xlu0 %830, %v174_v15  }
  0x59   : > { %473 = vperm.xlu1 %828, %v173_v6   ;;  %234 = vperm.xlu0 %830, %v176_v16  }
  0x5d   : > { %481 = vperm.xlu1 %828, %v175_v7   ;;  %244 = vperm.xlu0 %830, %v178_v17  }
  0x61   : > { %489 = vperm.xlu1 %828, %v177_v8   ;;  %254 = vperm.xlu0 %830, %v180_v18  }
  0x65   : > { %497 = vperm.xlu1 %828, %v179_v9  }
  0x69   : > { %505 = vperm.xlu1 %828, %v181_v10  }
  0x6d   : > { %831 = vset.pattern.permute.xlu1 %v840_v1 }
  0x86   : > { %v934_v19 = vpop.permute.xlu1 %194  ;;  %v286_v21 = vpop.permute.xlu0 %285 }
  0x87   : > { %v348_v22 = vmul.f32 %v936_v20, %v286_v21 }
  0x89   : > { %380 = vrot.lane.b32.xlu1 %v348_v22, %s843_s24 }
  0x8a   : > { %v940_v23 = vpop.permute.xlu1 %199  ;;  %v298_v27 = vpop.permute.xlu0 %297 }
  0x8b   : > { %v351_v35 = vmul.f32 %v936_v20, %v298_v27 }
  0x8e   : > { %v942_v24 = vpop.permute.xlu1 %209  ;;  %v306_v30 = vpop.permute.xlu0 %305 }
  0x8f   : > { %v353_v40 = vmul.f32 %v936_v20, %v306_v30 }
  0x92   : > { %v944_v25 = vpop.permute.xlu1 %219  ;;  %v314_v32 = vpop.permute.xlu0 %313 }
  0x93   : > { %v355_v44 = vmul.f32 %v936_v20, %v314_v32  ;;  %v604_v32 = vld [vmem:[%s1194_s2] sm:$0xff] }
  0x96   : > { %v946_v26 = vpop.permute.xlu1 %229  ;;  %v322_v37 = vpop.permute.xlu0 %321 }
  0x97   : > { %v357_v47 = vmul.f32 %v936_v20, %v322_v37  ;;  %v609_v37 = vld [vmem:[%s1194_s2 + $0x28] sm:$0xff] }
  0x9a   : > { %v948_v28 = vpop.permute.xlu1 %239  ;;  %v330_v42 = vpop.permute.xlu0 %329 }
  0x9b   : > { %v359_v51 = vmul.f32 %v936_v20, %v330_v42 }
  0x9e   : > { %v950_v29 = vpop.permute.xlu1 %249  ;;  %v338_v48 = vpop.permute.xlu0 %337 }
  0x9f   : > { %v361_v55 = vmul.f32 %v936_v20, %v338_v48  ;;  %v617_v48 = vld [vmem:[%s1194_s2 + $0x68] sm:$0xff] }
  0xa2   : > { %v952_v31 = vpop.permute.xlu1 %259  ;;  %v346_v53 = vpop.permute.xlu0 %345 }
  0xa3   : > { %v363_v59 = vmul.f32 %v936_v20, %v346_v53 }
  0xa7   : > { %v290_v33 = vpop.permute.xlu1 %289  ;;  %v450_v57 = vpop.permute.xlu0 %449 }
  0xa8   : > { %v349_v34 = vmul.f32 %v936_v20, %v290_v33  ;;  %v509_v61 = vmul.f32 %v936_v20, %v450_v57 }
  0xaa   : > { %382 = vrot.lane.b32.xlu0 %v349_v34, %s843_s24  ;;  %v607_v34 = vld [vmem:[%s1194_s2 + $0x18] sm:$0xff] }
  0xab   : > { %v294_v36 = vpop.permute.xlu1 %293  ;;  %v462_v62 = vpop.permute.xlu0 %461 }
  0xac   : > { %v350_v38 = vmul.f32 %v936_v20, %v294_v36  ;;  %v512_v5 = vmul.f32 %v936_v20, %v462_v62 }
  0xae   : > { %386 = vrot.lane.b32.xlu0 %v351_v35, %s843_s24  ;;  %384 = vrot.lane.b32.xlu1 %v350_v38, %s843_s24  ;;  %v605_v35 = vld [vmem:[%s1194_s2 + $0x8] sm:$0xff]  ;;  %v606_v38 = vld [vmem:[%s1194_s2 + $0x10] sm:$0xff] }
  0xaf   : > { %v302_v39 = vpop.permute.xlu1 %301  ;;  %v470_v3 = vpop.permute.xlu0 %469 }
  0xb0   : > { %v352_v41 = vmul.f32 %v936_v20, %v302_v39  ;;  %v514_v9 = vmul.f32 %v936_v20, %v470_v3 }
  0xb2   : > { %390 = vrot.lane.b32.xlu0 %v353_v40, %s843_s24  ;;  %388 = vrot.lane.b32.xlu1 %v352_v41, %s843_s24  ;;  %v611_v40 = vld [vmem:[%s1194_s2 + $0x38] sm:$0xff]  ;;  %v608_v41 = vld [vmem:[%s1194_s2 + $0x20] sm:$0xff] }
  0xb3   : > { %v310_v43 = vpop.permute.xlu1 %309  ;;  %v478_v7 = vpop.permute.xlu0 %477 }
  0xb4   : > { %v354_v45 = vmul.f32 %v936_v20, %v310_v43  ;;  %v516_v12 = vmul.f32 %v936_v20, %v478_v7  ;;  %v613_v43 = vld [vmem:[%s1194_s2 + $0x48] sm:$0xff] }
  0xb6   : > { %394 = vrot.lane.b32.xlu0 %v355_v44, %s843_s24  ;;  %392 = vrot.lane.b32.xlu1 %v354_v45, %s843_s24  ;;  %v610_v44 = vld [vmem:[%s1194_s2 + $0x30] sm:$0xff]  ;;  %v615_v45 = vld [vmem:[%s1194_s2 + $0x58] sm:$0xff] }
  0xb7   : > { %v318_v46 = vpop.permute.xlu1 %317  ;;  %v486_v14 = vpop.permute.xlu0 %485 }
  0xb8   : > { %v356_v49 = vmul.f32 %v936_v20, %v318_v46  ;;  %v518_v16 = vmul.f32 %v936_v20, %v486_v14  ;;  %v612_v46 = vld [vmem:[%s1194_s2 + $0x40] sm:$0xff] }
  0xba   : > { %398 = vrot.lane.b32.xlu0 %v357_v47, %s843_s24  ;;  %396 = vrot.lane.b32.xlu1 %v356_v49, %s843_s24  ;;  %v614_v49 = vld [vmem:[%s1194_s2 + $0x50] sm:$0xff] }
  0xbb   : > { %v326_v50 = vpop.permute.xlu1 %325  ;;  %v494_v18 = vpop.permute.xlu0 %493 }
  0xbc   : > { %v358_v52 = vmul.f32 %v936_v20, %v326_v50  ;;  %v520_v22 = vmul.f32 %v936_v20, %v494_v18 }
  0xbe   : > { %402 = vrot.lane.b32.xlu0 %v359_v51, %s843_s24  ;;  %400 = vrot.lane.b32.xlu1 %v358_v52, %s843_s24  ;;  %v619_v51 = vld [vmem:[%s1194_s2 + $0x78] sm:$0xff]  ;;  %v616_v52 = vld [vmem:[%s1194_s2 + $0x60] sm:$0xff] }
  0xbf   : > { %v334_v54 = vpop.permute.xlu1 %333  ;;  %v502_v36 = vpop.permute.xlu0 %501 }
  0xc0   : > { %v360_v56 = vmul.f32 %v936_v20, %v334_v54  ;;  %v618_v54 = vld [vmem:[%s1194_s2 + $0x70] sm:$0xff]  ;;  %v522_v57 = vmul.f32 %v936_v20, %v502_v36 }
  0xc2   : > { %406 = vrot.lane.b32.xlu0 %v361_v55, %s843_s24  ;;  %404 = vrot.lane.b32.xlu1 %v360_v56, %s843_s24 }
  0xc3   : > { %v342_v58 = vpop.permute.xlu1 %341 }
  0xc4   : > { %v362_v60 = vmul.f32 %v936_v20, %v342_v58  ;;  %v1027_v39 = vpop.permute.xlu0 %184 }
  0xc6   : > { %410 = vrot.lane.b32.xlu0 %v363_v59, %s843_s24  ;;  %408 = vrot.lane.b32.xlu1 %v362_v60, %s843_s24 }
  0xc8   : > { %v446_v63 = vpop.permute.xlu1 %445  ;;  %v190_v42 = vpop.permute.xlu0 %189 }
  0xc9   : > { %v508_v0 = vmul.f32 %v936_v20, %v446_v63 }
  0xca   : > { %542 = vrot.lane.b32.xlu1 %v509_v61, %s844_s25 }
  0xcb   : > { %540 = vrot.lane.b32.xlu0 %v508_v0, %s844_s25 }
  0xcc   : > { %v454_v1 = vpop.permute.xlu1 %453  ;;  %v1047_v47 = vpop.permute.xlu0 %204 }
  0xcd   : > { %v510_v2 = vmul.f32 %v936_v20, %v454_v1 }
  0xcf   : > { %544 = vrot.lane.b32.xlu0 %v510_v2, %s844_s25 }
  0xd0   : > { %v458_v4 = vpop.permute.xlu1 %457  ;;  %v1055_v50 = vpop.permute.xlu0 %214 }
  0xd1   : > { %v511_v6 = vmul.f32 %v936_v20, %v458_v4 }
  0xd3   : > { %548 = vrot.lane.b32.xlu0 %v512_v5, %s844_s25  ;;  %546 = vrot.lane.b32.xlu1 %v511_v6, %s844_s25 }
  0xd4   : > { %v466_v8 = vpop.permute.xlu1 %465  ;;  %v1067_v56 = vpop.permute.xlu0 %224 }
  0xd5   : > { %v513_v10 = vmul.f32 %v936_v20, %v466_v8 }
  0xd7   : > { %552 = vrot.lane.b32.xlu0 %v514_v9, %s844_s25  ;;  %550 = vrot.lane.b32.xlu1 %v513_v10, %s844_s25 }
  0xd8   : > { %v474_v11 = vpop.permute.xlu1 %473  ;;  %v1072_v58 = vpop.permute.xlu0 %234 }
  0xd9   : > { %v515_v13 = vmul.f32 %v936_v20, %v474_v11 }
  0xdb   : > { %556 = vrot.lane.b32.xlu0 %v516_v12, %s844_s25  ;;  %554 = vrot.lane.b32.xlu1 %v515_v13, %s844_s25 }
  0xdc   : > { %v482_v15 = vpop.permute.xlu1 %481  ;;  %v1074_v59 = vpop.permute.xlu0 %244 }
  0xdd   : > { %v517_v17 = vmul.f32 %v936_v20, %v482_v15 }
  0xdf   : > { %560 = vrot.lane.b32.xlu0 %v518_v16, %s844_s25  ;;  %558 = vrot.lane.b32.xlu1 %v517_v17, %s844_s25 }
  0xe0   : > { %v490_v21 = vpop.permute.xlu1 %489  ;;  %v1076_v60 = vpop.permute.xlu0 %254 }
  0xe1   : > { %v519_v27 = vmul.f32 %v936_v20, %v490_v21 }
  0xe3   : > { %564 = vrot.lane.b32.xlu0 %v520_v22, %s844_s25  ;;  %562 = vrot.lane.b32.xlu1 %v519_v27, %s844_s25 }
  0xe4   : > { %v498_v30 = vpop.permute.xlu1 %497 }
  0xe5   : > { %v521_v33 = vmul.f32 %v936_v20, %v498_v30 }
  0xe7   : > { %622 = vperm.xlu0 %830, %v604_v32   ;;  %566 = vrot.lane.b32.xlu1 %v521_v33, %s844_s25  ;;  %v268_v33 = vmul.f32 %v936_v20, %v1027_v39  ;;  %v270_v39 = vmul.f32 %v936_v20, %v934_v19 }
  0xe8   : > { %v506_v53 = vpop.permute.xlu1 %505 }
  0xe9   : > { %v523_v55 = vmul.f32 %v936_v20, %v506_v53 }
  0xeb   : > { %637 = vperm.xlu0 %830, %v607_v34   ;;  %627 = vperm.xlu1 %831, %v605_v35  }
  0xef   : > { %647 = vperm.xlu0 %830, %v609_v37   ;;  %632 = vperm.xlu1 %831, %v606_v38   ;;  %v271_v37 = vmul.f32 %v936_v20, %v940_v23  ;;  %v269_v38 = vmul.f32 %v936_v20, %v190_v42  ;;  %v273_v23 = vmul.f32 %v936_v20, %v942_v24 }
  0xf3   : > { %657 = vperm.xlu0 %830, %v611_v40   ;;  %642 = vperm.xlu1 %831, %v608_v41  }
  0xf7   : > { %667 = vperm.xlu0 %830, %v613_v43   ;;  %652 = vperm.xlu1 %831, %v610_v44  }
  0xfb   : > { %677 = vperm.xlu0 %830, %v615_v45   ;;  %662 = vperm.xlu1 %831, %v612_v46   ;;  %v381_v61 = vpop.permute.xlu1 %380 }
  0xfc   : > { %v428_v36 = vadd.f32 %v381_v61, %v268_v33  ;;  %v272_v61 = vmul.f32 %v936_v20, %v1047_v47  ;;  %v274_v47 = vmul.f32 %v936_v20, %v1055_v50  ;;  %v279_v50 = vmul.f32 %v936_v20, %v948_v28 }
  0xff   : > { %687 = vperm.xlu0 %830, %v617_v48   ;;  %672 = vperm.xlu1 %831, %v614_v49  }
 0x103   : > { %697 = vperm.xlu0 %830, %v619_v51   ;;  %682 = vperm.xlu1 %831, %v616_v52  }
 0x107   : > { %570 = vrot.lane.b32.xlu0 %v523_v55, %s844_s25  ;;  %692 = vperm.xlu1 %831, %v618_v54  }
 0x10b   : > { %568 = vrot.lane.b32.xlu1 %v522_v57, %s844_s25  ;;  %s811_s25 = sshll.u32 %s1197_s13, 7  ;;  %v275_v57 = vmul.f32 %v936_v20, %v944_v25  ;;  %v277_v25 = vmul.f32 %v936_v20, %v946_v26 }
 0x10c   : > { %s1117_s9 = scalar_lea.vmem %s1195_s3, %s811_s25 }
 0x11c   : > { %v383_v62 = vpop.permute.xlu0 %382 }
 0x11d   : > { %v429_v44 = vadd.f32 %v383_v62, %v269_v38 }
 0x120   : > { %v387_v63 = vpop.permute.xlu0 %386  ;;  %v385_v0 = vpop.permute.xlu1 %384 }
 0x121   : > { %v431_v45 = vadd.f32 %v387_v63, %v271_v37  ;;  %v430_v53 = vadd.f32 %v385_v0, %v270_v39 }
 0x124   : > { %v391_v1 = vpop.permute.xlu0 %390  ;;  %v389_v2 = vpop.permute.xlu1 %388 }
 0x125   : > { %v433_v54 = vadd.f32 %v391_v1, %v273_v23  ;;  %v432_v33 = vadd.f32 %v389_v2, %v272_v61 }
 0x128   : > { %v395_v3 = vpop.permute.xlu0 %394  ;;  %v1078_v4 = vpop.permute.xlu1 %392 }
 0x129   : > { %v435_v0 = vadd.f32 %v395_v3, %v275_v57  ;;  %v434_v3 = vadd.f32 %v1078_v4, %v274_v47 }
 0x12c   : > { %v1080_v5 = vpop.permute.xlu0 %398  ;;  %v1082_v6 = vpop.permute.xlu1 %396 }
 0x130   : > { %v1084_v7 = vpop.permute.xlu0 %402  ;;  %v1086_v8 = vpop.permute.xlu1 %400 }
 0x134   : > { %v1088_v9 = vpop.permute.xlu0 %406  ;;  %v1090_v10 = vpop.permute.xlu1 %404 }
 0x138   : > { %v1092_v11 = vpop.permute.xlu0 %410  ;;  %v1094_v12 = vpop.permute.xlu1 %408 }
 0x13c   : > { %v543_v14 = vpop.permute.xlu1 %542 }
 0x13d   : > { %v541_v13 = vpop.permute.xlu0 %540  ;;  %v589_v42 = vadd.f32 %v543_v14, %v429_v44 }
 0x13e   : > { %v588_v40 = vadd.f32 %v541_v13, %v428_v36 }
 0x141   : > { %v545_v15 = vpop.permute.xlu0 %544 }
 0x142   : > { %v590_v24 = vadd.f32 %v545_v15, %v430_v53 }
 0x145   : > { %v547_v16 = vpop.permute.xlu1 %546  ;;  %v549_v17 = vpop.permute.xlu0 %548 }
 0x146   : > { %v591_v48 = vadd.f32 %v547_v16, %v431_v45  ;;  %v592_v15 = vadd.f32 %v549_v17, %v432_v33  ;;  %v276_v17 = vmul.f32 %v936_v20, %v1067_v56  ;;  %v281_v56 = vmul.f32 %v936_v20, %v950_v29 }
 0x149   : > { %v551_v18 = vpop.permute.xlu1 %550  ;;  %v553_v21 = vpop.permute.xlu0 %552 }
 0x14a   : > { %v593_v62 = vadd.f32 %v551_v18, %v433_v54  ;;  %v441_v54 = vadd.f32 %v1088_v9, %v281_v56 }
 0x14d   : > { %v555_v22 = vpop.permute.xlu1 %554  ;;  %v1096_v27 = vpop.permute.xlu0 %556 }
 0x14e   : > { %v595_v18 = vadd.f32 %v555_v22, %v435_v0  ;;  %v594_v22 = vadd.f32 %v553_v21, %v434_v3  ;;  %v278_v21 = vmul.f32 %v936_v20, %v1072_v58 }
 0x150   : > { %v438_v53 = vadd.f32 %v1086_v8, %v278_v21 }
 0x151   : > { %v559_v30 = vpop.permute.xlu1 %558  ;;  %v1098_v32 = vpop.permute.xlu0 %560 }
 0x155   : > { %v1102_v34 = vpop.permute.xlu1 %562  ;;  %v1104_v35 = vpop.permute.xlu0 %564 }
 0x159   : > { %v1110_v41 = vpop.permute.xlu1 %566 }
 0x166   : > { %v623_v43 = vpop.permute.xlu0 %622 }
 0x167   : > { %v700_v46 = vadd.f32 %v623_v43, %v588_v40  ;;  %v437_v43 = vadd.f32 %v1080_v5, %v277_v25  ;;  %v436_v5 = vadd.f32 %v1082_v6, %v276_v17 }
 0x169   : > { %v716_v49 = vmax.f32 %v700_v46, 0.0  ;;  %v597_v45 = vadd.f32 %v559_v30, %v437_v43  ;;  %v596_v30 = vadd.f32 %v1096_v27, %v436_v5  ;;  %v280_v27 = vmul.f32 %v936_v20, %v1074_v59 }
 0x16a   : > { %v638_v51 = vpop.permute.xlu0 %637  ;;  %v628_v52 = vpop.permute.xlu1 %627 }
 0x16b   : > { %733 = vst.msk [vmem:[%s1117_s9] sm:$0xff] %vm732_vm0, %v716_v49  ;;  %v703_v19 = vadd.f32 %v638_v51, %v591_v48  ;;  %v701_v55 = vadd.f32 %v628_v52, %v589_v42  ;;  %v439_v42 = vadd.f32 %v1084_v7, %v279_v50  ;;  %v440_v9 = vadd.f32 %v1090_v10, %v280_v27 }
 0x16d   : > { %v719_v63 = vmax.f32 %v703_v19, 0.0  ;;  %v717_v13 = vmax.f32 %v701_v55, 0.0  ;;  %v599_v6 = vadd.f32 %v1102_v34, %v439_v42  ;;  %v598_v34 = vadd.f32 %v1098_v32, %v438_v53 }
 0x16e   : > { %v648_v14 = vpop.permute.xlu0 %647  ;;  %v633_v16 = vpop.permute.xlu1 %632  ;;  %v601_v19 = vadd.f32 %v1110_v41, %v441_v54  ;;  %v600_v59 = vadd.f32 %v1104_v35, %v440_v9  ;;  %v282_v35 = vmul.f32 %v936_v20, %v1076_v60 }
 0x16f   : > { %736 = vst.msk [vmem:[%s1117_s9 + $0x18] sm:$0xff] %vm732_vm0, %v719_v63  ;;  %734 = vst.msk [vmem:[%s1117_s9 + $0x8] sm:$0xff] %vm732_vm0, %v717_v13  ;;  %v705_v1 = vadd.f32 %v648_v14, %v593_v62  ;;  %v702_v36 = vadd.f32 %v633_v16, %v590_v24  ;;  %v283_v14 = vmul.f32 %v936_v20, %v952_v31 }
 0x170   : > { %v442_v31 = vadd.f32 %v1094_v12, %v282_v35 }
 0x171   : > { %v721_v37 = vmax.f32 %v705_v1, 0.0  ;;  %v718_v38 = vmax.f32 %v702_v36, 0.0  ;;  %v443_v16 = vadd.f32 %v1092_v11, %v283_v14 }
 0x172   : > { %v658_v2 = vpop.permute.xlu0 %657  ;;  %v643_v40 = vpop.permute.xlu1 %642 }
 0x173   : > { %738 = vst.msk [vmem:[%s1117_s9 + $0x28] sm:$0xff] %vm732_vm0, %v721_v37  ;;  %735 = vst.msk [vmem:[%s1117_s9 + $0x10] sm:$0xff] %vm732_vm0, %v718_v38  ;;  %v707_v26 = vadd.f32 %v658_v2, %v595_v18  ;;  %v704_v44 = vadd.f32 %v643_v40, %v592_v15 }
 0x175   : > { %v723_v46 = vmax.f32 %v707_v26, 0.0  ;;  %v720_v4 = vmax.f32 %v704_v44, 0.0 }
 0x176   : > { %v668_v39 = vpop.permute.xlu0 %667  ;;  %v653_v23 = vpop.permute.xlu1 %652 }
 0x177   : > { %740 = vst.msk [vmem:[%s1117_s9 + $0x38] sm:$0xff] %vm732_vm0, %v723_v46  ;;  %737 = vst.msk [vmem:[%s1117_s9 + $0x20] sm:$0xff] %vm732_vm0, %v720_v4  ;;  %v709_v28 = vadd.f32 %v668_v39, %v597_v45  ;;  %v706_v48 = vadd.f32 %v653_v23, %v594_v22 }
 0x179   : > { %v725_v49 = vmax.f32 %v709_v28, 0.0  ;;  %v722_v51 = vmax.f32 %v706_v48, 0.0 }
 0x17a   : > { %v678_v7 = vpop.permute.xlu0 %677  ;;  %v663_v52 = vpop.permute.xlu1 %662 }
 0x17b   : > { %742 = vst.msk [vmem:[%s1117_s9 + $0x48] sm:$0xff] %vm732_vm0, %v725_v49  ;;  %739 = vst.msk [vmem:[%s1117_s9 + $0x30] sm:$0xff] %vm732_vm0, %v722_v51  ;;  %v711_v29 = vadd.f32 %v678_v7, %v599_v6  ;;  %v708_v58 = vadd.f32 %v663_v52, %v596_v30 }
 0x17d   : > { %v727_v55 = vmax.f32 %v711_v29, 0.0  ;;  %v724_v57 = vmax.f32 %v708_v58, 0.0 }
 0x17e   : > { %v688_v8 = vpop.permute.xlu0 %687  ;;  %v673_v61 = vpop.permute.xlu1 %672 }
 0x17f   : > { %744 = vst.msk [vmem:[%s1117_s9 + $0x58] sm:$0xff] %vm732_vm0, %v727_v55  ;;  %741 = vst.msk [vmem:[%s1117_s9 + $0x40] sm:$0xff] %vm732_vm0, %v724_v57  ;;  %v713_v24 = vadd.f32 %v688_v8, %v601_v19  ;;  %v710_v62 = vadd.f32 %v673_v61, %v598_v34 }
 0x181   : > { %v729_v32 = vmax.f32 %v713_v24, 0.0  ;;  %v726_v63 = vmax.f32 %v710_v62, 0.0 }
 0x182   : > { %v698_v41 = vpop.permute.xlu0 %697  ;;  %v683_v13 = vpop.permute.xlu1 %682 }
 0x183   : > { %746 = vst.msk [vmem:[%s1117_s9 + $0x68] sm:$0xff] %vm732_vm0, %v729_v32  ;;  %743 = vst.msk [vmem:[%s1117_s9 + $0x50] sm:$0xff] %vm732_vm0, %v726_v63  ;;  %v712_v10 = vadd.f32 %v683_v13, %v600_v59 }
 0x185   : > { %v728_v33 = vmax.f32 %v712_v10, 0.0 }
 0x186   : > { %v571_v0 = vpop.permute.xlu0 %570  ;;  %v693_v1 = vpop.permute.xlu1 %692 }
 0x187   : > { %745 = vst.msk [vmem:[%s1117_s9 + $0x60] sm:$0xff] %vm732_vm0, %v728_v33  ;;  %v603_v36 = vadd.f32 %v571_v0, %v443_v16 }
 0x189   : > { %v715_v25 = vadd.f32 %v698_v41, %v603_v36 }
 0x18a   : > { %v569_v47 = vpop.permute.xlu1 %568 }
 0x18b   : > { %v731_v15 = vmax.f32 %v715_v25, 0.0  ;;  %v602_v18 = vadd.f32 %v569_v47, %v442_v31 }
 0x18d   : > { %748 = vst.msk [vmem:[%s1117_s9 + $0x78] sm:$0xff] %vm732_vm0, %v731_v15  ;;  %v714_v37 = vadd.f32 %v693_v1, %v602_v18 }
 0x18f   : > { %v730_v38 = vmax.f32 %v714_v37, 0.0 }
 0x191   : > { %747 = vst.msk [vmem:[%s1117_s9 + $0x70] sm:$0xff] %vm732_vm0, %v730_v38 }
 0x192 PF: > { %s13_s12 = sadd.s32 1, %s838_s12  }
 0x193   : > { %p10_p4 = scmp.ge.s32.totalorder %s13_s12, 4  }
 0x195   :  { %12 = sbr.rel (!%p10_p4) target bundleno = 1 (0x1), region = 62 }

// kernel: forward.18
= control target key start
LH: loop header
LB: loop body
LE: loop exit
PB: predicated region body
PF: predicated region fallthrough
CT: control target
= control target key end

     0   :  { %s619_s12 = smov 0   ;;  %s810_s0 = inlined_call_operand.vmem [shape: f32[2,6,384], index: 0, kind: input, shape index: {}]   ;;  %s811_s1 = inlined_call_operand.vmem [shape: f32[384,32], index: 1, kind: input, shape index: {}]   ;;  %s812_s2 = inlined_call_operand.vmem [shape: f32[1,32], index: 2, kind: input, shape index: {}]   ;;  %s813_s3 = inlined_call_operand.vmem [shape: f32[2,6,32], index: 3, kind: output, shape index: {}]  }
   0x1 LB: > { %s423_s13 = sadd.s32 4294967295, %s594_s12   ;;  %p427_p0 = scmp.ge.s32.totalorder %s594_s12, 1  ;;  %s594_s12 = sphi %s619_s12, %s13_s12  }
   0x2   : > { %p137_p1 = scmp.lt.s32.totalorder %s594_s12, 3 }
   0x4   : > { %p138_p2 = pnand %p427_p0, %p137_p1 }
   0x5   : > { %v188_v0 = vld [vmem:[%s811_s1 + $0x80] sm:$0xff] (!%p138_p2)  ;;  %v189_v1 = vld [vmem:[%s811_s1 + $0x88] sm:$0xff] (!%p138_p2)  ;;  %p638_p3 = scmp.lt.s32.totalorder (!%p138_p2), %s423_s13, 1  ;;  %v190_v5 = vld [vmem:[%s811_s1 + $0x90] sm:$0xff] (!%p138_p2)  ;;  %v596_v7 = vmov (!%p138_p2), 0.0|0.0   ;;  %vm597_vm0 = vmmov (!%p138_p2), 0  }
   0x6   : > { %141 = sbr.rel (%p138_p2) target bundleno = 262 (0x106), region = 32  ;;  %v172_v2 = vld [vmem:[%s811_s1] sm:$0xff] (!%p138_p2)  ;;  %v520_v3 = vpack.c.bf16 (!%p138_p2), %v189_v1, %v188_v0  ;;  %v173_v4 = vld [vmem:[%s811_s1 + $0x8] sm:$0xff] (!%p138_p2)  ;;  %v191_v6 = vld [vmem:[%s811_s1 + $0x98] sm:$0xff] (!%p138_p2)  ;;  %552 = vmatprep.subr.bf16.mxu1 (!%p138_p2), %v596_v7  ;;  %v598_v13 = vmov (!%p138_p2), 0.0   ;;  %vm368_vm1 = vcmask (!%p138_p2), 259072  }
   0x7   : > { %v522_v8 = vpack.c.bf16 (!%p138_p2), %v173_v4, %v172_v2  ;;  %v524_v9 = vpack.c.bf16 (!%p138_p2), %v191_v6, %v190_v5  ;;  %v174_v10 = vld [vmem:[%s811_s1 + $0x10] sm:$0xff] (!%p138_p2)  ;;  %v175_v11 = vld [vmem:[%s811_s1 + $0x18] sm:$0xff] (!%p138_p2)  ;;  %v204_v12 = vld [vmem:[%s811_s1 + $0x100] sm:$0xff] (!%p138_p2)  ;;  %517 = vmatprep.mubr.msk.f32.mxu1 (!%p138_p2), %vm597_vm0, %v598_v13 }
   0x8   : > { %521 = vmatprep.subr.bf16.mxu0 (!%p138_p2), %v520_v3  ;;  %v205_v14 = vld [vmem:[%s811_s1 + $0x108] sm:$0xff] (!%p138_p2)  ;;  %v192_v15 = vld [vmem:[%s811_s1 + $0xa0] sm:$0xff] (!%p138_p2)  ;;  %v526_v17 = vpack.c.bf16 (!%p138_p2), %v175_v11, %v174_v10  ;;  %v206_v19 = vld [vmem:[%s811_s1 + $0x110] sm:$0xff] (!%p138_p2) }
   0x9   : > { %v193_v16 = vld [vmem:[%s811_s1 + $0xa8] sm:$0xff] (!%p138_p2)  ;;  %523 = vmatpush3.bf16.msra.mxu0 (!%p138_p2), %v522_v8  ;;  %v553_v18 = vpack.c.bf16 (!%p138_p2), %v205_v14, %v204_v12  ;;  %v176_v21 = vld [vmem:[%s811_s1 + $0x20] sm:$0xff] (!%p138_p2)  ;;  %v207_v23 = vld [vmem:[%s811_s1 + $0x118] sm:$0xff] (!%p138_p2) }
   0xa   : > { %525 = vmatprep.subr.bf16.mxu0 (!%p138_p2), %v524_v9  ;;  %v528_v20 = vpack.c.bf16 (!%p138_p2), %v193_v16, %v192_v15  ;;  %v177_v22 = vld [vmem:[%s811_s1 + $0x28] sm:$0xff] (!%p138_p2)  ;;  %v556_v24 = vpack.c.bf16 (!%p138_p2), %v207_v23, %v206_v19  ;;  %v194_v25 = vld [vmem:[%s811_s1 + $0xb0] sm:$0xff] (!%p138_p2)  ;;  %v195_v26 = vld [vmem:[%s811_s1 + $0xb8] sm:$0xff] (!%p138_p2) }
   0xb   : > { %554 = vmatpush3.bf16.msra.mxu1 (!%p138_p2), %v553_v18  ;;  %v208_v27 = vld [vmem:[%s811_s1 + $0x120] sm:$0xff] (!%p138_p2)  ;;  %v209_v28 = vld [vmem:[%s811_s1 + $0x128] sm:$0xff] (!%p138_p2)  ;;  %v530_v29 = vpack.c.bf16 (!%p138_p2), %v177_v22, %v176_v21  ;;  %v532_v30 = vpack.c.bf16 (!%p138_p2), %v195_v26, %v194_v25  ;;  %v178_v31 = vld [vmem:[%s811_s1 + $0x30] sm:$0xff] (!%p138_p2) }
   0xc   : > { %555 = vmatprep.subr.bf16.mxu1 (!%p138_p2), %v596_v7  ;;  %v179_v32 = vld [vmem:[%s811_s1 + $0x38] sm:$0xff] (!%p138_p2)  ;;  %v559_v33 = vpack.c.bf16 (!%p138_p2), %v209_v28, %v208_v27  ;;  %v196_v34 = vld [vmem:[%s811_s1 + $0xc0] sm:$0xff] (!%p138_p2)  ;;  %v197_v35 = vld [vmem:[%s811_s1 + $0xc8] sm:$0xff] (!%p138_p2) }
   0xd   : > { %s816_s13 = smov (!%p638_p3, %s423_s13), 1  ;;  %527 = vmatpush3.bf16.msra.mxu0 %v526_v17  ;;  %v210_v36 = vld [vmem:[%s811_s1 + $0x130] sm:$0xff]  ;;  %v211_v37 = vld [vmem:[%s811_s1 + $0x138] sm:$0xff]  ;;  %v534_v38 = vpack.c.bf16 %v179_v32, %v178_v31  ;;  %v536_v39 = vpack.c.bf16 %v197_v35, %v196_v34  ;;  %v180_v40 = vld [vmem:[%s811_s1 + $0x40] sm:$0xff] }
   0xe   : > { %s576_s30 = smul.u32 24, %s816_s13  ;;  %529 = vmatprep.subr.bf16.mxu0 %v528_v20  ;;  %v181_v41 = vld [vmem:[%s811_s1 + $0x48] sm:$0xff]  ;;  %v562_v42 = vpack.c.bf16 %v211_v37, %v210_v36  ;;  %v198_v43 = vld [vmem:[%s811_s1 + $0xd0] sm:$0xff]  ;;  %v199_v44 = vld [vmem:[%s811_s1 + $0xd8] sm:$0xff]  ;;  %s429_s18 = sshll.u32 %s816_s13, 3 }
   0xf   : > { %557 = vmatpush3.bf16.msra.mxu1 %v556_v24  ;;  %v212_v45 = vld [vmem:[%s811_s1 + $0x140] sm:$0xff]  ;;  %v213_v46 = vld [vmem:[%s811_s1 + $0x148] sm:$0xff]  ;;  %v538_v48 = vpack.c.bf16 %v181_v41, %v180_v40  ;;  %v540_v49 = vpack.c.bf16 %v199_v44, %v198_v43  ;;  %v182_v50 = vld [vmem:[%s811_s1 + $0x50] sm:$0xff]  ;;  %s168_s20 = scalar_lea.vmem %s813_s3, %s429_s18 }
  0x10   : > { %558 = vmatprep.subr.bf16.mxu1 %v596_v7  ;;  %s724_s21 = scalar_lea.vmem %s810_s0, %s576_s30  ;;  %v183_v51 = vld [vmem:[%s811_s1 + $0x58] sm:$0xff]  ;;  %v565_v52 = vpack.c.bf16 %v213_v46, %v212_v45  ;;  %v200_v53 = vld [vmem:[%s811_s1 + $0xe0] sm:$0xff]  ;;  %v201_v54 = vld [vmem:[%s811_s1 + $0xe8] sm:$0xff] }
  0x11   : > { %531 = vmatpush3.bf16.msra.mxu0 %v530_v29  ;;  %v170_v47 = vld [vmem:[%s724_s21 + $0x8] sm:$0x3f]  ;;  %v214_v55 = vld [vmem:[%s811_s1 + $0x150] sm:$0xff]  ;;  %v215_v56 = vld [vmem:[%s811_s1 + $0x158] sm:$0xff]  ;;  %v542_v57 = vpack.c.bf16 %v183_v51, %v182_v50  ;;  %v544_v58 = vpack.c.bf16 %v201_v54, %v200_v53 }
  0x12   : > { %533 = vmatprep.subr.bf16.mxu0 %v532_v30  ;;  %291 = vmatprep.mubr.f32.mxu0 %v170_v47  ;;  %v184_v59 = vld [vmem:[%s811_s1 + $0x60] sm:$0xff]  ;;  %v185_v60 = vld [vmem:[%s811_s1 + $0x68] sm:$0xff]  ;;  %v568_v61 = vpack.c.bf16 %v215_v56, %v214_v55  ;;  %v202_v62 = vld [vmem:[%s811_s1 + $0xf0] sm:$0xff] }
  0x13   : > { %560 = vmatpush3.bf16.msra.mxu1 %v559_v33  ;;  %v203_v63 = vld [vmem:[%s811_s1 + $0xf8] sm:$0xff]  ;;  %v216_v0 = vld [vmem:[%s811_s1 + $0x160] sm:$0xff]  ;;  %v217_v1 = vld [vmem:[%s811_s1 + $0x168] sm:$0xff]  ;;  %v546_v2 = vpack.c.bf16 %v185_v60, %v184_v59 }
  0x14   : > { %561 = vmatprep.subr.bf16.mxu1 %v596_v7  ;;  %v548_v3 = vpack.c.bf16 %v203_v63, %v202_v62  ;;  %v186_v4 = vld [vmem:[%s811_s1 + $0x70] sm:$0xff]  ;;  %v187_v5 = vld [vmem:[%s811_s1 + $0x78] sm:$0xff]  ;;  %v571_v6 = vpack.c.bf16 %v217_v1, %v216_v0  ;;  %v169_v12 = vld [vmem:[%s724_s21] sm:$0x3f] }
  0x15   : > { %535 = vmatpush3.bf16.msra.mxu0 %v534_v38  ;;  %v218_v8 = vld [vmem:[%s811_s1 + $0x170] sm:$0xff]  ;;  %v219_v9 = vld [vmem:[%s811_s1 + $0x178] sm:$0xff]  ;;  %v550_v10 = vpack.c.bf16 %v187_v5, %v186_v4  ;;  %v430_v16 = vld [vmem:[%s812_s2] ss:$0 sm:$0xff] }
  0x16   : > { %537 = vmatprep.subr.bf16.mxu0 %v536_v39  ;;  %v574_v11 = vpack.c.bf16 %v219_v9, %v218_v8  ;;  %v171_v13 = vld [vmem:[%s724_s21 + $0x10] sm:$0x3f] }
  0x17   : > { %563 = vmatpush3.bf16.msra.mxu1 %v562_v42 }
  0x18   : > { %564 = vmatprep.subr.bf16.mxu1 %v596_v7 }
  0x19   : > { %539 = vmatpush3.bf16.msra.mxu0 %v538_v48 }
  0x1a   : > { %541 = vmatprep.subr.bf16.mxu0 %v540_v49 }
  0x1b   : > { %566 = vmatpush3.bf16.msra.mxu1 %v565_v52 }
  0x1c   : > { %567 = vmatprep.subr.bf16.mxu1 %v596_v7 }
  0x1d   : > { %543 = vmatpush3.bf16.msra.mxu0 %v542_v57 }
  0x1e   : > { %545 = vmatprep.subr.bf16.mxu0 %v544_v58 }
  0x1f   : > { %569 = vmatpush3.bf16.msra.mxu1 %v568_v61 }
  0x20   : > { %570 = vmatprep.subr.bf16.mxu1 %v596_v7 }
  0x21   : > { %547 = vmatpush3.bf16.msra.mxu0 %v546_v2 }
  0x22   : > { %549 = vmatprep.subr.bf16.mxu0 %v548_v3 }
  0x23   : > { %572 = vmatpush3.bf16.msra.mxu1 %v571_v6 }
  0x24   : > { %573 = vmatprep.subr.bf16.mxu1 %v596_v7 }
  0x25   : > { %551 = vmatpush3.bf16.msra.mxu0 %v550_v10 }
  0x27   : > { %575 = vmatpush3.bf16.msra.mxu1 %v574_v11 }
  0x28   : > { %292 = vmatmul.mubr.f32.vlgmr.msra.gmra.mrb[0].mxu0 %v169_v12 }
  0x2a   : > { %518 = vmatmul.mubr.f32.vlgmr.msra.gmra.mrb[0].mxu1 %v171_v13 }
  0xfb   : > { %v465_v14 = vpop.f32.mrb[0].mxu0 }
  0xfc   : > { %v466_v15 = vpop.f32.mrb[1].mxu0 }
  0xfd   : > { %v467_v17 = vadd.f32 %v466_v15, %v465_v14  ;;  %v363_v18 = vpop.f32.mrb[0].mxu1 }
  0xfe   : > { %v519_v19 = vpop.f32.mrb[1].mxu1 }
  0xff   : > { %v294_v20 = vadd.f32 %v467_v17, %v430_v16 }
 0x101   : > { %v364_v21 = vadd.f32 %v363_v18, %v294_v20 }
 0x103   : > { %v367_v7 = vmax.f32 %v364_v21, 0.0 }
 0x105   : > { %369 = vst.msk [vmem:[%s168_s20] sm:$0x3f] %vm368_vm1, %v367_v7 }
 0x106 PF: > { %s13_s12 = sadd.s32 1, %s594_s12  }
 0x107   : > { %p10_p4 = scmp.ge.s32.totalorder %s13_s12, 4  }
 0x109   :  { %12 = sbr.rel (!%p10_p4) target bundleno = 1 (0x1), region = 62 }

// kernel: forward.15
= control target key start
LH: loop header
LB: loop body
LE: loop exit
PB: predicated region body
PF: predicated region fallthrough
CT: control target
= control target key end

     0   :  { %s3358_s21 = smov 0   ;;  %s3797_s0 = inlined_call_operand.vmem [shape: f32[2,8,32], index: 0, kind: input, shape index: {}]   ;;  %s3798_s1 = inlined_call_operand.vmem [shape: f32[2,32,96], index: 1, kind: input, shape index: {}]   ;;  %s3799_s2 = inlined_call_operand.vmem [shape: f32[2,32,32], index: 2, kind: input, shape index: {}]   ;;  %s3800_s3 = inlined_call_operand.vmem [shape: f32[2,32,64], index: 3, kind: input, shape index: {}]   ;;  %s3801_s4 = inlined_call_operand.vmem [shape: f32[2,64,32], index: 4, kind: input, shape index: {}]   ;;  %s3802_s5 = inlined_call_operand.vmem [shape: f32[2,8,128], index: 5, kind: input, shape index: {}]   ;;  %s3803_s6 = inlined_call_operand.vmem [shape: f32[2,8,32], index: 6, kind: output, shape index: {}]  }
   0x1 LB: > { %s2835_s22 = sadd.s32 4294967295, %s3307_s21   ;;  %p2839_p0 = scmp.ge.s32.totalorder %s3307_s21, 1  ;;  %s3307_s21 = sphi %s3358_s21, %s16_s21  }
   0x2   : > { %p211_p1 = scmp.lt.s32.totalorder %s3307_s21, 3 }
   0x4   : > { %p212_p2 = pnand %p2839_p0, %p211_p1 }
   0x5   : > { %v248_v0 = vld [vmem:[%s3798_s1] sm:$0xff] (!%p212_p2)  ;;  %v249_v1 = vld [vmem:[%s3798_s1 + $0x8] sm:$0xff] (!%p212_p2)  ;;  %v250_v2 = vld [vmem:[%s3798_s1 + $0x10] sm:$0xff] (!%p212_p2)  ;;  %v3309_v3 = vmov (!%p212_p2), 0.0|0.0   ;;  %vm3310_vm0 = vmmov (!%p212_p2), 0   ;;  %v3311_v6 = vmov (!%p212_p2), 0.0   ;;  %v269_v9 = vlaneseq (!%p212_p2) }
   0x6   : > { %215 = sbr.rel (%p212_p2) target bundleno = 7886 (0x1ece), region = 44  ;;  %3191 = vmatprep.subr.bf16.mxu0 (!%p212_p2), %v3309_v3  ;;  %v3192_v4 = vpack.c.bf16 (!%p212_p2), %v249_v1, %v248_v0  ;;  %v251_v5 = vld [vmem:[%s3798_s1 + $0x18] sm:$0xff] (!%p212_p2)  ;;  %2997 = vmatprep.mubr.msk.f32.mxu0 (!%p212_p2), %vm3310_vm0, %v3311_v6  ;;  %p239_p3 = scmp.lt.s32.totalorder (!%p212_p2), %s2835_s22, 1  ;;  %vm273_vm1 = vcmask (!%p212_p2), 261120   ;;  %v3406_v12 = vld [vmem:[%s3802_s5] sm:$0xff] (!%p212_p2)  ;;  %vm351_vm2 = vcmask (!%p212_p2), 64512  }
   0x7   : > { %3005 = vmatprep.subr.mxu1 (!%p212_p2), %v3311_v6  ;;  %3007 = vmatprep.mubr.msk.f32.mxu1 (!%p212_p2), %vm3310_vm0, %v3311_v6  ;;  %v3195_v7 = vpack.c.bf16 (!%p212_p2), %v251_v5, %v250_v2  ;;  %v3400_v10 = vshrl.u32 (!%p212_p2), %v269_v9, 7  ;;  %s3312_s13 = smov (!%p212_p2), 64   ;;  %s3313_s14 = smov (!%p212_p2), 96   ;;  %v252_v28 = vld [vmem:[%s3799_s2] sm:$0xff] (!%p212_p2)  ;;  %v253_v52 = vld [vmem:[%s3799_s2 + $0x8] sm:$0xff] (!%p212_p2)  ;;  %vm1416_vm3 = vcmask (!%p212_p2), 523264  }
   0x8   : > { %3193 = vmatpush3.bf16.msra.mxu0 (!%p212_p2), %v3192_v4  ;;  %s3314_s15 = smov (!%p212_p2), 88   ;;  %s3315_s16 = smov (!%p212_p2), 56  }
   0x9   : > { %3194 = vmatprep.subr.bf16.mxu0 (!%p212_p2), %v3309_v3  ;;  %v271_v11 = vsub.s32 (!%p212_p2), 0, %v3400_v10  ;;  %s3316_s17 = smov (!%p212_p2), 80   ;;  %s3317_s18 = smov (!%p212_p2), 120   ;;  %v589_v0 = vsub.s32 (!%p212_p2), 1, %v3400_v10 }
   0xa   : > { %s3318_s23 = smov (!%p212_p2), 112   ;;  %s3319_s26 = smov (!%p212_p2), 48  }
   0xb   : > { %v272_v13 = vrot.slane (!%p212_p2), %v3406_v12, %v271_v11  ;;  %s3320_s27 = smov (!%p212_p2), 72   ;;  %s3321_s28 = smov (!%p212_p2), 104   ;;  %v590_v1 = vrot.slane (!%p212_p2), %v3406_v12, %v589_v0 }
   0xc   : > { %3196 = vmatpush3.bf16.msra.mxu0 (!%p212_p2), %v3195_v7  ;;  %s3322_s8 = smov (!%p212_p2), 40  }
   0xd   : > { %s3805_s22 = smov (!%p239_p3, %s2835_s22), 1  ;;  %3000 = vmatprep.subr.mxu0 %v3311_v6 }
   0xe   : > { %s2840_s7 = sshll.u32 %s3805_s22, 3 }
   0xf   : > { %s242_s10 = scalar_lea.vmem %s3797_s0, %s2840_s7  ;;  %s246_s29 = scalar_lea.vmem %s3803_s6, %s2840_s7 }
  0x10   : > { %v3393_v8 = vld [vmem:[%s242_s10] sm:$0xff] }
  0x11   : > { %2998 = vmatmul.mubr.msk.f32.vlgmr.msra.gmra.mrb[0].mxu0 %vm273_vm1, %v3393_v8 }
  0x12   : > { %3002 = vmatprep.mubr.msk.f32.mxu0 %vm3310_vm0, %v3311_v6 }
  0xe4   : > { %v343_v14 = vpop.f32.mrb[0].mxu0 }
  0xe5   : > { %v3411_v15 = vadd.f32 %v343_v14, %v272_v13  ;;  %v2999_v16 = vpop.f32.mrb[1].mxu0 }
  0xe7   : > { %438 = vrot.lane.b32.xlu1 %v3411_v15, %s3312_s13  ;;  %349 = vrot.lane.b32.xlu0 %v3411_v15, %s3313_s14  ;;  %v3421_v19 = vmul.f32 0.35355338, %v3411_v15 }
  0xeb   : > { %594 = vrot.lane.b32.xlu1 %v3411_v15, %s3314_s15 }
 0x159   : > { %v439_v17 = vpop.permute.xlu1 %438  ;;  %v350_v18 = vpop.permute.xlu0 %349 }
 0x15a   : > { %3001 = vmatpush3.xpose.msk.msra.mxu0 %vm351_vm2, %v350_v18  ;;  %3006 = vmatpush3.msra.mxu1 %v439_v17  ;;  %v254_v18 = vld [vmem:[%s3799_s2 + $0x10] sm:$0xff] }
 0x15b   : > { %3015 = vmatprep.subr.mxu1 %v3311_v6  ;;  %3010 = vmatprep.subr.mxu0 %v3311_v6 }
 0x15d   : > { %3003 = vmatmul.mubr.msk.f32.vlgmr.msra.gmra.mrb[2].mxu0 %vm351_vm2, %v3421_v19  ;;  %v595_v29 = vpop.permute.xlu1 %594 }
 0x15e   : > { %3012 = vmatprep.mubr.msk.f32.mxu0 %vm3310_vm0, %v3311_v6  ;;  %3011 = vmatpush3.msra.mxu0 %v252_v28 }
 0x15f   : > { %3020 = vmatprep.subr.mxu0 %v3311_v6 }
 0x230   : > { %v423_v20 = vpop.f32.mrb[2].mxu0 }
 0x231   : > { %v3004_v21 = vpop.f32.mrb[3].mxu0  ;;  %v427_v22 = vsel %vm351_vm2, %v423_v20, -inf }
 0x232   : > { %428 = vmax.xlane.f32.xlu0 %v427_v22 }
 0x248   : > { %681 = vrot.lane.b32.xlu0 %v3411_v15, %s3315_s16 }
 0x24c   : > { %833 = vrot.lane.b32.xlu0 %v3411_v15, %s3316_s17 }
 0x2bf   : > { %v429_v23 = vpop.xlane.xlu0 %428 }
 0x2c0   : > { %v430_v24 = vsub.f32 %v423_v20, %v429_v23 }
 0x2c2   : > { %v431_v25 = vmul.f32 1.442695, %v430_v24 }
 0x2c3   : > { %v682_v35 = vpop.permute.xlu0 %681 }
 0x2c4   : > { %3261 = vpow2.f32 %v431_v25 }
 0x2c7   : > { %v834_v47 = vpop.permute.xlu0 %833 }
 0x2ce   : > { %v3262_v26 = vpop.eup %3261 }
 0x2cf   : > { %v433_v27 = vsel %vm351_vm2, %v3262_v26, 0.0 }
 0x2d0   : > { %434 = vadd.xlane.f32.xlu1 %v433_v27 }
 0x2e1   : > { %592 = vrot.lane.b32.xlu1 %v3421_v19, %s3317_s18 }
 0x35d   : > { %v435_v30 = vpop.xlane.xlu1 %434 }
 0x35e   : > { %3263 = vrcp.f32 %v435_v30 }
 0x361   : > { %v593_v33 = vpop.permute.xlu1 %592 }
 0x368   : > { %v3264_v31 = vpop.eup %3263 }
 0x369   : > { %v437_v32 = vmul.f32 %v3264_v31, %v3262_v26 }
 0x36b   : > { %3008 = vmatmul.mubr.msk.f32.vlgmr.msra.gmra.mrb[0].mxu1 %vm351_vm2, %v437_v32 }
 0x36c   : > { %3016 = vmatpush3.xpose.msk.msra.mxu1 %vm351_vm2, %v595_v29  ;;  %3017 = vmatprep.mubr.msk.f32.mxu1 %vm3310_vm0, %v3311_v6  ;;  %v255_v29 = vld [vmem:[%s3799_s2 + $0x18] sm:$0xff] }
 0x36d   : > { %3025 = vmatprep.subr.mxu1 %v3311_v6 }
 0x36f   : > { %3018 = vmatmul.mubr.msk.f32.vlgmr.msra.gmra.mrb[2].mxu1 %vm351_vm2, %v593_v33 }
 0x370   : > { %3027 = vmatprep.mubr.msk.f32.mxu1 %vm3310_vm0, %v3311_v6  ;;  %3026 = vmatpush3.msra.mxu1 %v253_v52 }
 0x371   : > { %3035 = vmatprep.subr.mxu1 %v3311_v6 }
 0x43e   : > { %v510_v34 = vpop.f32.mrb[0].mxu1 }
 0x43f   : > { %v3009_v36 = vpop.f32.mrb[1].mxu1  ;;  %3013 = vmatmul.mubr.msk.f32.vlgmr.msra.gmra.mrb[4].mxu0 %vm351_vm2, %v510_v34 }
 0x440   : > { %3021 = vmatpush3.msra.mxu0 %v682_v35  ;;  %3022 = vmatprep.mubr.msk.f32.mxu0 %vm3310_vm0, %v3311_v6 }
 0x441   : > { %3030 = vmatprep.subr.mxu0 %v3311_v6 }
 0x442   : > { %v666_v37 = vpop.f32.mrb[2].mxu1 }
 0x443   : > { %v3019_v38 = vpop.f32.mrb[3].mxu1  ;;  %v670_v39 = vsel %vm351_vm2, %v666_v37, -inf }
 0x444   : > { %671 = vmax.xlane.f32.xlu1 %v670_v39 }
 0x4d1   : > { %v672_v40 = vpop.xlane.xlu1 %671 }
 0x4d2   : > { %v673_v41 = vsub.f32 %v666_v37, %v672_v40 }
 0x4d4   : > { %v674_v42 = vmul.f32 1.442695, %v673_v41 }
 0x4d6   : > { %3265 = vpow2.f32 %v674_v42 }
 0x4e0   : > { %v3266_v43 = vpop.eup %3265 }
 0x4e1   : > { %v676_v44 = vsel %vm351_vm2, %v3266_v43, 0.0 }
 0x4e2   : > { %677 = vadd.xlane.f32.xlu0 %v676_v44 }
 0x4f8   : > { %831 = vrot.lane.b32.xlu0 %v3421_v19, %s3318_s23 }
 0x512   : > { %v583_v45 = vpop.f32.mrb[4].mxu0 }
 0x513   : > { %v3014_v46 = vpop.f32.mrb[5].mxu0  ;;  %v591_v2 = vadd.f32 %v590_v1, %v583_v45 }
 0x56f   : > { %v678_v48 = vpop.xlane.xlu0 %677 }
 0x570   : > { %3267 = vrcp.f32 %v678_v48  ;;  %v256_v48 = vld [vmem:[%s3800_s3] sm:$0xff] }
 0x573   : > { %v832_v51 = vpop.permute.xlu0 %831 }
 0x57a   : > { %v3268_v49 = vpop.eup %3267 }
 0x57b   : > { %v680_v50 = vmul.f32 %v3268_v49, %v3266_v43  ;;  %v257_v49 = vld [vmem:[%s3800_s3 + $0x8] sm:$0xff] }
 0x57d   : > { %3023 = vmatmul.mubr.msk.f32.vlgmr.msra.gmra.mrb[6].mxu0 %vm351_vm2, %v680_v50  ;;  %v3198_v50 = vpack.c.bf16 %v257_v49, %v256_v48 }
 0x57e   : > { %3031 = vmatpush3.xpose.msk.msra.mxu0 %vm351_vm2, %v834_v47  ;;  %3032 = vmatprep.mubr.msk.f32.mxu0 %vm3310_vm0, %v3311_v6 }
 0x57f   : > { %3040 = vmatprep.subr.mxu0 %v3311_v6 }
 0x581   : > { %3033 = vmatmul.mubr.msk.f32.vlgmr.msra.gmra.mrb[8].mxu0 %vm351_vm2, %v832_v51  ;;  %v259_v51 = vld [vmem:[%s3800_s3 + $0x18] sm:$0xff] }
 0x582   : > { %3042 = vmatprep.mubr.msk.f32.mxu0 %vm3310_vm0, %v3311_v6  ;;  %3041 = vmatpush3.msra.mxu0 %v254_v18  ;;  %v267_v18 = vld [vmem:[%s3801_s4 + $0x38] sm:$0xff] }
 0x583   : > { %3050 = vmatprep.subr.mxu0 %v3311_v6 }
 0x650   : > { %v753_v53 = vpop.f32.mrb[6].mxu0 }
 0x651   : > { %v3024_v54 = vpop.f32.mrb[7].mxu0  ;;  %3028 = vmatmul.mubr.msk.f32.vlgmr.msra.gmra.mrb[4].mxu1 %vm351_vm2, %v753_v53  ;;  %v260_v53 = vld [vmem:[%s3801_s4] sm:$0xff] }
 0x652   : > { %3037 = vmatprep.mubr.msk.f32.mxu1 %vm3310_vm0, %v3311_v6  ;;  %v261_v54 = vld [vmem:[%s3801_s4 + $0x8] sm:$0xff] }
 0x654   : > { %v905_v55 = vpop.f32.mrb[8].mxu0 }
 0x655   : > { %v3034_v56 = vpop.f32.mrb[9].mxu0  ;;  %v909_v57 = vsel %vm351_vm2, %v905_v55, -inf }
 0x656   : > { %910 = vmax.xlane.f32.xlu1 %v909_v57  ;;  %v3204_v56 = vpack.c.bf16 %v261_v54, %v260_v53  ;;  %v263_v57 = vld [vmem:[%s3801_s4 + $0x18] sm:$0xff]  ;;  %v3615_v53 = vld [vmem:[%s3802_s5 + $0x8] sm:$0xff] }
 0x657   : > { %v1543_v54 = vrot.slane %v3615_v53, %v271_v11 }
 0x667   : > { %920 = vrot.lane.b32.xlu1 %v3411_v15, %s3319_s26 }
 0x66b   : > { %1072 = vrot.lane.b32.xlu1 %v3411_v15, %s3320_s27 }
 0x66f   : > { %1070 = vrot.lane.b32.xlu1 %v3421_v19, %s3321_s28 }
 0x6e3   : > { %v911_v58 = vpop.xlane.xlu1 %910 }
 0x6e4   : > { %v912_v59 = vsub.f32 %v905_v55, %v911_v58  ;;  %v262_v55 = vld [vmem:[%s3801_s4 + $0x10] sm:$0xff] }
 0x6e5   : > { %v3207_v58 = vpack.c.bf16 %v263_v57, %v262_v55 }
 0x6e6   : > { %v913_v60 = vmul.f32 1.442695, %v912_v59  ;;  %v264_v59 = vld [vmem:[%s3801_s4 + $0x20] sm:$0xff] }
 0x6e7   : > { %v921_v61 = vpop.permute.xlu1 %920 }
 0x6e8   : > { %3269 = vpow2.f32 %v913_v60  ;;  %3036 = vmatpush3.msra.mxu1 %v921_v61  ;;  %v265_v60 = vld [vmem:[%s3801_s4 + $0x28] sm:$0xff] }
 0x6e9   : > { %3045 = vmatprep.subr.mxu1 %v3311_v6  ;;  %v3210_v61 = vpack.c.bf16 %v265_v60, %v264_v59 }
 0x6eb   : > { %v1073_v14 = vpop.permute.xlu1 %1072 }
 0x6ef   : > { %v1071_v17 = vpop.permute.xlu1 %1070 }
 0x6f2   : > { %v3270_v62 = vpop.eup %3269 }
 0x6f3   : > { %v915_v63 = vsel %vm351_vm2, %v3270_v62, 0.0 }
 0x6f4   : > { %916 = vadd.xlane.f32.xlu0 %v915_v63 }
 0x724   : > { %v826_v4 = vpop.f32.mrb[4].mxu1 }
 0x725   : > { %v830_v5 = vadd.f32 %v826_v4, %v591_v2  ;;  %v3029_v7 = vpop.f32.mrb[5].mxu1  ;;  %v1326_v2 = vsub.s32 2, %v3400_v10  ;;  %v1331_v4 = vsub.s32 3, %v3400_v10 }
 0x781   : > { %v917_v9 = vpop.xlane.xlu0 %916 }
 0x782   : > { %3271 = vrcp.f32 %v917_v9 }
 0x78c   : > { %v3272_v13 = vpop.eup %3271 }
 0x78d   : > { %v919_v16 = vmul.f32 %v3272_v13, %v3270_v62  ;;  %v1332_v13 = vrot.slane %v3406_v12, %v1331_v4 }
 0x78f   : > { %3038 = vmatmul.mubr.msk.f32.vlgmr.msra.gmra.mrb[6].mxu1 %vm351_vm2, %v919_v16 }
 0x790   : > { %3046 = vmatpush3.xpose.msk.msra.mxu1 %vm351_vm2, %v1073_v14  ;;  %3047 = vmatprep.mubr.msk.f32.mxu1 %vm3310_vm0, %v3311_v6 }
 0x791   : > { %3055 = vmatprep.subr.mxu1 %v3311_v6 }
 0x793   : > { %3048 = vmatmul.mubr.msk.f32.vlgmr.msra.gmra.mrb[8].mxu1 %vm351_vm2, %v1071_v17  ;;  %v266_v17 = vld [vmem:[%s3801_s4 + $0x30] sm:$0xff] }
 0x794   : > { %3057 = vmatprep.mubr.msk.f32.mxu1 %vm3310_vm0, %v3311_v6  ;;  %3056 = vmatpush3.msra.mxu1 %v255_v29 }
 0x795   : > { %3203 = vmatprep.subr.bf16.mxu1 %v3309_v3 }
 0x862   : > { %v992_v19 = vpop.f32.mrb[6].mxu1 }
 0x863   : > { %v3039_v20 = vpop.f32.mrb[7].mxu1  ;;  %3043 = vmatmul.mubr.msk.f32.vlgmr.msra.gmra.mrb[10].mxu0 %vm351_vm2, %v992_v19  ;;  %v3213_v19 = vpack.c.bf16 %v267_v18, %v266_v17 }
 0x864   : > { %3052 = vmatprep.mubr.msk.f32.mxu0 %vm3310_vm0, %v3311_v6  ;;  %v1336_v20 = vsub.s32 4, %v3400_v10 }
 0x866   : > { %v1144_v21 = vpop.f32.mrb[8].mxu1 }
 0x867   : > { %v3049_v22 = vpop.f32.mrb[9].mxu1  ;;  %v1148_v23 = vsel %vm351_vm2, %v1144_v21, -inf }
 0x868   : > { %1149 = vmax.xlane.f32.xlu1 %v1148_v23 }
 0x8f5   : > { %v1150_v24 = vpop.xlane.xlu1 %1149 }
 0x8f6   : > { %v1151_v25 = vsub.f32 %v1144_v21, %v1150_v24  ;;  %v1337_v21 = vrot.slane %v3406_v12, %v1336_v20 }
 0x8f8   : > { %v1152_v26 = vmul.f32 1.442695, %v1151_v25 }
 0x8fa   : > { %3273 = vpow2.f32 %v1152_v26  ;;  %v1414_v26 = vsub.s32 5, %v3400_v10 }
 0x904   : > { %v3274_v27 = vpop.eup %3273 }
 0x905   : > { %v1154_v28 = vsel %vm351_vm2, %v3274_v27, 0.0 }
 0x906   : > { %1155 = vadd.xlane.f32.xlu0 %v1154_v28 }
 0x91c   : > { %1159 = vrot.lane.b32.xlu0 %v3411_v15, %s3322_s8 }
 0x936   : > { %v1065_v30 = vpop.f32.mrb[10].mxu0 }
 0x937   : > { %v1069_v31 = vadd.f32 %v1065_v30, %v830_v5  ;;  %v3044_v32 = vpop.f32.mrb[11].mxu0  ;;  %v1327_v5 = vrot.slane %v3406_v12, %v1326_v2 }
 0x993   : > { %v1156_v33 = vpop.xlane.xlu0 %1155 }
 0x994   : > { %3275 = vrcp.f32 %v1156_v33 }
 0x997   : > { %v1160_v34 = vpop.permute.xlu0 %1159 }
 0x998   : > { %3051 = vmatpush3.msra.mxu0 %v1160_v34 }
 0x999   : > { %3197 = vmatprep.subr.bf16.mxu0 %v3309_v3 }
 0x99e   : > { %v3276_v35 = vpop.eup %3275 }
 0x99f   : > { %v1158_v36 = vmul.f32 %v3276_v35, %v3274_v27  ;;  %v1415_v27 = vrot.slane %v3406_v12, %v1414_v26 }
 0x9a1   : > { %3053 = vmatmul.mubr.msk.f32.vlgmr.msra.gmra.mrb[12].mxu0 %vm351_vm2, %v1158_v36 }
 0x9a2   : > { %3068 = vmatprep.mubr.msk.f32.mxu0 %vm3310_vm0, %v3311_v6  ;;  %3199 = vmatpush3.bf16.msra.mxu0 %v3198_v50 }
 0x9a3   : > { %3200 = vmatprep.subr.bf16.mxu0 %v3309_v3 }
 0xa74   : > { %v1231_v15 = vpop.f32.mrb[12].mxu0 }
 0xa75   : > { %v3054_v37 = vpop.f32.mrb[13].mxu0  ;;  %3058 = vmatmul.mubr.msk.f32.vlgmr.msra.gmra.mrb[10].mxu1 %vm351_vm2, %v1231_v15 }
 0xa76   : > { %3087 = vmatprep.mubr.msk.f32.mxu1 %vm3310_vm0, %v3311_v6  ;;  %3205 = vmatpush3.bf16.msra.mxu1 %v3204_v56  ;;  %v2861_v37 = vld [vmem:[%s3798_s1 + $0x20] sm:$0xff] }
 0xa77   : > { %3206 = vmatprep.subr.bf16.mxu1 %v3309_v3 }
 0xa7a   : > { %3208 = vmatpush3.bf16.msra.mxu1 %v3207_v58 }
 0xa7b   : > { %3209 = vmatprep.subr.bf16.mxu1 %v3309_v3 }
 0xa7e   : > { %3211 = vmatpush3.bf16.msra.mxu1 %v3210_v61 }
 0xa7f   : > { %3212 = vmatprep.subr.bf16.mxu1 %v3309_v3 }
 0xa82   : > { %3214 = vmatpush3.bf16.msra.mxu1 %v3213_v19 }
 0xa83   : > { %3106 = vmatprep.subr.mxu1 %v3311_v6 }
 0xb48   : > { %v1304_v38 = vpop.f32.mrb[10].mxu1 }
 0xb49   : > { %v1308_v39 = vadd.f32 %v1304_v38, %v1069_v31  ;;  %v3059_v40 = vpop.f32.mrb[11].mxu1  ;;  %v2862_v38 = vld [vmem:[%s3798_s1 + $0x28] sm:$0xff] }
 0xb4a   : > { %v2863_v40 = vld [vmem:[%s3798_s1 + $0x30] sm:$0xff] }
 0xb4b   : > { %v1309_v41 = vadd.f32 %v1308_v39, %v3393_v8  ;;  %v258_v8 = vld [vmem:[%s3800_s3 + $0x10] sm:$0xff]  ;;  %v3216_v39 = vpack.c.bf16 %v2862_v38, %v2861_v37  ;;  %v2866_v38 = vld [vmem:[%s3799_s2 + $0x28] sm:$0xff] }
 0xb4c   : > { %v3201_v52 = vpack.c.bf16 %v259_v51, %v258_v8 }
 0xb4d   : > { %v1310_v42 = vsel %vm273_vm1, %v1309_v41, 0.0 }
 0xb4e   : > { %1311 = vadd.xlane.f32.xlu0 %v1310_v42  ;;  %3202 = vmatpush3.bf16.msra.mxu0 %v3201_v52 }
 0xb4f   : > { %3215 = vmatprep.subr.bf16.mxu0 %v3309_v3 }
 0xbdb   : > { %v1312_v43 = vpop.xlane.xlu0 %1311 }
 0xbdc   : > { %v1314_v44 = vmul.f32 0.03125, %v1312_v43 }
 0xbde   : > { %v1315_v45 = vsub.f32 %v1309_v41, %v1314_v44  ;;  %v2864_v41 = vld [vmem:[%s3798_s1 + $0x38] sm:$0xff] }
 0xbdf   : > { %v3219_v42 = vpack.c.bf16 %v2864_v41, %v2863_v40 }
 0xbe0   : > { %v1316_v46 = vmul.f32 %v1315_v45, %v1315_v45 }
 0xbe2   : > { %v1317_v47 = vsel %vm273_vm1, %v1316_v46, 0.0  ;;  %v1506_v46 = vsub.s32 6, %v3400_v10 }
 0xbe3   : > { %1318 = vadd.xlane.f32.xlu1 %v1317_v47  ;;  %v1511_v47 = vsub.s32 7, %v3400_v10 }
 0xbe4   : > { %v1507_v48 = vrot.slane %v3406_v12, %v1506_v46 }
 0xbe5   : > { %v1512_v8 = vrot.slane %v3406_v12, %v1511_v47 }
 0xc70   : > { %v1319_v62 = vpop.xlane.xlu1 %1318 }
 0xc71   : > { %v1320_v63 = vmul.f32 0.03125, %v1319_v62 }
 0xc73   : > { %v1321_v1 = vadd.f32 1e-05, %v1320_v63 }
 0xc75   : > { %3277 = vrsqrt.f32 %v1321_v1 }
 0xc7f   : > { %v3278_v7 = vpop.eup %3277 }
 0xc80   : > { %v1323_v9 = vmul.f32 %v3278_v7, %v1315_v45 }
 0xc82   : > { %v1328_v14 = vmul.f32 %v1327_v5, %v1323_v9  ;;  %v2865_v9 = vld [vmem:[%s3799_s2 + $0x20] sm:$0xff] }
 0xc84   : > { %v1333_v16 = vadd.f32 %v1332_v13, %v1328_v14 }
 0xc86   : > { %3069 = vmatmul.mubr.msk.f32.vlgmr.msra.gmra.mrb[14].mxu0 %vm273_vm1, %v1333_v16 }
 0xc87   : > { %3098 = vmatprep.mubr.msk.f32.mxu0 %vm3310_vm0, %v3311_v6  ;;  %3217 = vmatpush3.bf16.msra.mxu0 %v3216_v39 }
 0xc88   : > { %3218 = vmatprep.subr.bf16.mxu0 %v3309_v3 }
 0xc8b   : > { %3220 = vmatpush3.bf16.msra.mxu0 %v3219_v42 }
 0xc8c   : > { %3101 = vmatprep.subr.mxu0 %v3311_v6 }
 0xd59   : > { %v1407_v22 = vpop.f32.mrb[14].mxu0 }
 0xd5a   : > { %v1408_v23 = vadd.f32 %v1407_v22, %v1337_v21  ;;  %v3070_v24 = vpop.f32.mrb[15].mxu0 }
 0xd5c   : > { %v1411_v25 = vmax.f32 %v1408_v23, 0.0 }
 0xd5e   : > { %3088 = vmatmul.mubr.msk.f32.vlgmr.msra.gmra.mrb[12].mxu1 %vm1416_vm3, %v1411_v25 }
 0xd5f   : > { %3108 = vmatprep.mubr.msk.f32.mxu1 %vm3310_vm0, %v3311_v6 }
 0xe31   : > { %v1486_v28 = vpop.f32.mrb[12].mxu1 }
 0xe32   : > { %v1487_v29 = vadd.f32 %v1486_v28, %v1415_v27  ;;  %v3089_v30 = vpop.f32.mrb[13].mxu1 }
 0xe34   : > { %v1490_v31 = vadd.f32 %v1487_v29, %v1333_v16 }
 0xe36   : > { %v1491_v32 = vsel %vm273_vm1, %v1490_v31, 0.0 }
 0xe37   : > { %1492 = vadd.xlane.f32.xlu1 %v1491_v32 }
 0xec4   : > { %v1493_v33 = vpop.xlane.xlu1 %1492 }
 0xec5   : > { %v1494_v34 = vmul.f32 0.03125, %v1493_v33 }
 0xec7   : > { %v1495_v35 = vsub.f32 %v1490_v31, %v1494_v34 }
 0xec9   : > { %v1496_v36 = vmul.f32 %v1495_v35, %v1495_v35 }
 0xecb   : > { %v1497_v15 = vsel %vm273_vm1, %v1496_v36, 0.0 }
 0xecc   : > { %1498 = vadd.xlane.f32.xlu1 %v1497_v15 }
 0xf59   : > { %v1499_v43 = vpop.xlane.xlu1 %1498 }
 0xf5a   : > { %v1500_v44 = vmul.f32 0.03125, %v1499_v43 }
 0xf5c   : > { %v1501_v45 = vadd.f32 1e-05, %v1500_v44 }
 0xf5e   : > { %3279 = vrsqrt.f32 %v1501_v45 }
 0xf68   : > { %v3280_v49 = vpop.eup %3279 }
 0xf69   : > { %v1503_v50 = vmul.f32 %v3280_v49, %v1495_v35 }
 0xf6b   : > { %v1508_v51 = vmul.f32 %v1507_v48, %v1503_v50 }
 0xf6d   : > { %v3606_v52 = vadd.f32 %v1512_v8, %v1508_v51  ;;  %v1859_v51 = vrot.slane %v3615_v53, %v589_v0  ;;  %v2867_v0 = vld [vmem:[%s3799_s2 + $0x30] sm:$0xff] }
 0xf6f   : > { %3099 = vmatmul.mubr.msk.f32.vlgmr.msra.gmra.mrb[16].mxu0 %vm273_vm1, %v3606_v52 }
 0xf70   : > { %3103 = vmatprep.mubr.msk.f32.mxu0 %vm3310_vm0, %v3311_v6 }
0x1042   : > { %v1613_v55 = vpop.f32.mrb[16].mxu0 }
0x1043   : > { %v3620_v12 = vadd.f32 %v1613_v55, %v1543_v54  ;;  %v3100_v56 = vpop.f32.mrb[17].mxu0 }
0x1045   : > { %1619 = vrot.lane.b32.xlu1 %v3620_v12, %s3313_s14  ;;  %v3626_v58 = vmul.f32 0.35355338, %v3620_v12 }
0x10b7   : > { %v1620_v57 = vpop.permute.xlu1 %1619 }
0x10b8   : > { %3102 = vmatpush3.xpose.msk.msra.mxu0 %vm351_vm2, %v1620_v57 }
0x10b9   : > { %3111 = vmatprep.subr.mxu0 %v3311_v6 }
0x10bb   : > { %3104 = vmatmul.mubr.msk.f32.vlgmr.msra.gmra.mrb[18].mxu0 %vm351_vm2, %v3626_v58 }
0x10bc   : > { %3113 = vmatprep.mubr.msk.f32.mxu0 %vm3310_vm0, %v3311_v6  ;;  %3112 = vmatpush3.msra.mxu0 %v2865_v9 }
0x10bd   : > { %3121 = vmatprep.subr.mxu0 %v3311_v6 }
0x118e   : > { %v1692_v11 = vpop.f32.mrb[18].mxu0 }
0x118f   : > { %v3105_v59 = vpop.f32.mrb[19].mxu0  ;;  %v1696_v60 = vsel %vm351_vm2, %v1692_v11, -inf }
0x1190   : > { %1697 = vmax.xlane.f32.xlu0 %v1696_v60 }
0x11a6   : > { %1707 = vrot.lane.b32.xlu0 %v3620_v12, %s3312_s13 }
0x11aa   : > { %1863 = vrot.lane.b32.xlu0 %v3620_v12, %s3314_s15 }
0x11ae   : > { %1861 = vrot.lane.b32.xlu0 %v3626_v58, %s3317_s18 }
0x121d   : > { %v1698_v61 = vpop.xlane.xlu0 %1697 }
0x121e   : > { %v1699_v62 = vsub.f32 %v1692_v11, %v1698_v61 }
0x1220   : > { %v1700_v63 = vmul.f32 1.442695, %v1699_v62 }
0x1221   : > { %v1708_v1 = vpop.permute.xlu0 %1707 }
0x1222   : > { %3281 = vpow2.f32 %v1700_v63  ;;  %3107 = vmatpush3.msra.mxu1 %v1708_v1 }
0x1223   : > { %3116 = vmatprep.subr.mxu1 %v3311_v6 }
0x1225   : > { %v1864_v16 = vpop.permute.xlu0 %1863 }
0x1229   : > { %v1862_v18 = vpop.permute.xlu0 %1861 }
0x122c   : > { %v3282_v5 = vpop.eup %3281 }
0x122d   : > { %v1702_v7 = vsel %vm351_vm2, %v3282_v5, 0.0 }
0x122e   : > { %1703 = vadd.xlane.f32.xlu1 %v1702_v7 }
0x123f   : > { %1950 = vrot.lane.b32.xlu1 %v3620_v12, %s3315_s16 }
0x1243   : > { %2102 = vrot.lane.b32.xlu1 %v3620_v12, %s3316_s17 }
0x12bb   : > { %v1704_v13 = vpop.xlane.xlu1 %1703 }
0x12bc   : > { %3283 = vrcp.f32 %v1704_v13 }
0x12bf   : > { %v1951_v21 = vpop.permute.xlu1 %1950 }
0x12c3   : > { %v2103_v34 = vpop.permute.xlu1 %2102 }
0x12c6   : > { %v3284_v14 = vpop.eup %3283 }
0x12c7   : > { %v1706_v17 = vmul.f32 %v3284_v14, %v3282_v5 }
0x12c9   : > { %3109 = vmatmul.mubr.msk.f32.vlgmr.msra.gmra.mrb[14].mxu1 %vm351_vm2, %v1706_v17 }
0x12ca   : > { %3117 = vmatpush3.xpose.msk.msra.mxu1 %vm351_vm2, %v1864_v16  ;;  %3118 = vmatprep.mubr.msk.f32.mxu1 %vm3310_vm0, %v3311_v6 }
0x12cb   : > { %3126 = vmatprep.subr.mxu1 %v3311_v6 }
0x12cd   : > { %3119 = vmatmul.mubr.msk.f32.vlgmr.msra.gmra.mrb[16].mxu1 %vm351_vm2, %v1862_v18  ;;  %v2868_v18 = vld [vmem:[%s3799_s2 + $0x38] sm:$0xff] }
0x12ce   : > { %3128 = vmatprep.mubr.msk.f32.mxu1 %vm3310_vm0, %v3311_v6  ;;  %3127 = vmatpush3.msra.mxu1 %v2866_v38  ;;  %v2869_v38 = vld [vmem:[%s3800_s3 + $0x20] sm:$0xff] }
0x12cf   : > { %3136 = vmatprep.subr.mxu1 %v3311_v6 }
0x139c   : > { %v1779_v19 = vpop.f32.mrb[14].mxu1 }
0x139d   : > { %v3110_v22 = vpop.f32.mrb[15].mxu1  ;;  %3114 = vmatmul.mubr.msk.f32.vlgmr.msra.gmra.mrb[20].mxu0 %vm351_vm2, %v1779_v19 }
0x139e   : > { %3122 = vmatpush3.msra.mxu0 %v1951_v21  ;;  %3123 = vmatprep.mubr.msk.f32.mxu0 %vm3310_vm0, %v3311_v6 }
0x139f   : > { %3131 = vmatprep.subr.mxu0 %v3311_v6 }
0x13a0   : > { %v1935_v23 = vpop.f32.mrb[16].mxu1 }
0x13a1   : > { %v3120_v24 = vpop.f32.mrb[17].mxu1  ;;  %v1939_v25 = vsel %vm351_vm2, %v1935_v23, -inf }
0x13a2   : > { %1940 = vmax.xlane.f32.xlu0 %v1939_v25 }
0x142f   : > { %v1941_v27 = vpop.xlane.xlu0 %1940 }
0x1430   : > { %v1942_v28 = vsub.f32 %v1935_v23, %v1941_v27 }
0x1432   : > { %v1943_v29 = vmul.f32 1.442695, %v1942_v28 }
0x1434   : > { %3285 = vpow2.f32 %v1943_v29 }
0x143e   : > { %v3286_v30 = vpop.eup %3285 }
0x143f   : > { %v1945_v31 = vsel %vm351_vm2, %v3286_v30, 0.0 }
0x1440   : > { %1946 = vadd.xlane.f32.xlu1 %v1945_v31 }
0x1451   : > { %2100 = vrot.lane.b32.xlu1 %v3626_v58, %s3318_s23 }
0x1470   : > { %v1852_v32 = vpop.f32.mrb[20].mxu0 }
0x1471   : > { %v3115_v33 = vpop.f32.mrb[21].mxu0  ;;  %v1860_v54 = vadd.f32 %v1859_v51, %v1852_v32 }
0x14cd   : > { %v1947_v35 = vpop.xlane.xlu1 %1946 }
0x14ce   : > { %3287 = vrcp.f32 %v1947_v35 }
0x14d1   : > { %v2101_v37 = vpop.permute.xlu1 %2100 }
0x14d8   : > { %v3288_v36 = vpop.eup %3287 }
0x14d9   : > { %v1949_v15 = vmul.f32 %v3288_v36, %v3286_v30 }
0x14db   : > { %3124 = vmatmul.mubr.msk.f32.vlgmr.msra.gmra.mrb[22].mxu0 %vm351_vm2, %v1949_v15 }
0x14dc   : > { %3132 = vmatpush3.xpose.msk.msra.mxu0 %vm351_vm2, %v2103_v34  ;;  %3133 = vmatprep.mubr.msk.f32.mxu0 %vm3310_vm0, %v3311_v6 }
0x14dd   : > { %3141 = vmatprep.subr.mxu0 %v3311_v6 }
0x14df   : > { %3134 = vmatmul.mubr.msk.f32.vlgmr.msra.gmra.mrb[24].mxu0 %vm351_vm2, %v2101_v37 }
0x14e0   : > { %3143 = vmatprep.mubr.msk.f32.mxu0 %vm3310_vm0, %v3311_v6  ;;  %3142 = vmatpush3.msra.mxu0 %v2867_v0  ;;  %v2880_v0 = vld [vmem:[%s3801_s4 + $0x78] sm:$0xff] }
0x14e1   : > { %3151 = vmatprep.subr.mxu0 %v3311_v6 }
0x15ae   : > { %v2022_v39 = vpop.f32.mrb[22].mxu0 }
0x15af   : > { %v3125_v40 = vpop.f32.mrb[23].mxu0  ;;  %3129 = vmatmul.mubr.msk.f32.vlgmr.msra.gmra.mrb[18].mxu1 %vm351_vm2, %v2022_v39 }
0x15b0   : > { %3138 = vmatprep.mubr.msk.f32.mxu1 %vm3310_vm0, %v3311_v6  ;;  %v2872_v40 = vld [vmem:[%s3800_s3 + $0x38] sm:$0xff] }
0x15b2   : > { %v2174_v41 = vpop.f32.mrb[24].mxu0 }
0x15b3   : > { %v3135_v42 = vpop.f32.mrb[25].mxu0  ;;  %v2178_v43 = vsel %vm351_vm2, %v2174_v41, -inf }
0x15b4   : > { %2179 = vmax.xlane.f32.xlu0 %v2178_v43  ;;  %v2873_v42 = vld [vmem:[%s3801_s4 + $0x40] sm:$0xff]  ;;  %v2874_v43 = vld [vmem:[%s3801_s4 + $0x48] sm:$0xff] }
0x15ca   : > { %2189 = vrot.lane.b32.xlu0 %v3620_v12, %s3319_s26 }
0x15ce   : > { %2341 = vrot.lane.b32.xlu0 %v3620_v12, %s3320_s27 }
0x15d2   : > { %2339 = vrot.lane.b32.xlu0 %v3626_v58, %s3321_s28 }
0x1641   : > { %v2180_v44 = vpop.xlane.xlu0 %2179 }
0x1642   : > { %v2181_v45 = vsub.f32 %v2174_v41, %v2180_v44  ;;  %v2875_v44 = vld [vmem:[%s3801_s4 + $0x50] sm:$0xff] }
0x1644   : > { %v2182_v48 = vmul.f32 1.442695, %v2181_v45  ;;  %v3228_v45 = vpack.c.bf16 %v2874_v43, %v2873_v42 }
0x1645   : > { %v2190_v49 = vpop.permute.xlu0 %2189 }
0x1646   : > { %3289 = vpow2.f32 %v2182_v48  ;;  %3137 = vmatpush3.msra.mxu1 %v2190_v49  ;;  %v2876_v48 = vld [vmem:[%s3801_s4 + $0x58] sm:$0xff] }
0x1647   : > { %3146 = vmatprep.subr.mxu1 %v3311_v6  ;;  %v3231_v49 = vpack.c.bf16 %v2876_v48, %v2875_v44 }
0x1649   : > { %v2342_v59 = vpop.permute.xlu0 %2341 }
0x164d   : > { %v2340_v61 = vpop.permute.xlu0 %2339 }
0x1650   : > { %v3290_v50 = vpop.eup %3289 }
0x1651   : > { %v2184_v8 = vsel %vm351_vm2, %v3290_v50, 0.0 }
0x1652   : > { %2185 = vadd.xlane.f32.xlu1 %v2184_v8  ;;  %v2878_v8 = vld [vmem:[%s3801_s4 + $0x68] sm:$0xff] }
0x1682   : > { %v2095_v55 = vpop.f32.mrb[18].mxu1 }
0x1683   : > { %v2099_v56 = vadd.f32 %v2095_v55, %v1860_v54  ;;  %v3130_v57 = vpop.f32.mrb[19].mxu1 }
0x1684   : > { %v2595_v57 = vrot.slane %v3615_v53, %v1326_v2  ;;  %v2605_v2 = vrot.slane %v3615_v53, %v1336_v20 }
0x16df   : > { %v2186_v58 = vpop.xlane.xlu1 %2185 }
0x16e0   : > { %3291 = vrcp.f32 %v2186_v58 }
0x16ea   : > { %v3292_v11 = vpop.eup %3291 }
0x16eb   : > { %v2188_v60 = vmul.f32 %v3292_v11, %v3290_v50  ;;  %v2877_v50 = vld [vmem:[%s3801_s4 + $0x60] sm:$0xff] }
0x16ec   : > { %v3234_v51 = vpack.c.bf16 %v2878_v8, %v2877_v50 }
0x16ed   : > { %3139 = vmatmul.mubr.msk.f32.vlgmr.msra.gmra.mrb[20].mxu1 %vm351_vm2, %v2188_v60 }
0x16ee   : > { %3147 = vmatpush3.xpose.msk.msra.mxu1 %vm351_vm2, %v2342_v59  ;;  %3148 = vmatprep.mubr.msk.f32.mxu1 %vm3310_vm0, %v3311_v6  ;;  %v2600_v59 = vrot.slane %v3615_v53, %v1331_v4 }
0x16ef   : > { %3156 = vmatprep.subr.mxu1 %v3311_v6 }
0x16f1   : > { %3149 = vmatmul.mubr.msk.f32.vlgmr.msra.gmra.mrb[22].mxu1 %vm351_vm2, %v2340_v61 }
0x16f2   : > { %3158 = vmatprep.mubr.msk.f32.mxu1 %vm3310_vm0, %v3311_v6  ;;  %3157 = vmatpush3.msra.mxu1 %v2868_v18 }
0x16f3   : > { %3227 = vmatprep.subr.bf16.mxu1 %v3309_v3 }
0x17c0   : > { %v2261_v62 = vpop.f32.mrb[20].mxu1 }
0x17c1   : > { %v3140_v63 = vpop.f32.mrb[21].mxu1  ;;  %3144 = vmatmul.mubr.msk.f32.vlgmr.msra.gmra.mrb[26].mxu0 %vm351_vm2, %v2261_v62 }
0x17c2   : > { %3153 = vmatprep.mubr.msk.f32.mxu0 %vm3310_vm0, %v3311_v6 }
0x17c4   : > { %v2413_v1 = vpop.f32.mrb[22].mxu1 }
0x17c5   : > { %v3150_v5 = vpop.f32.mrb[23].mxu1  ;;  %v2417_v7 = vsel %vm351_vm2, %v2413_v1, -inf }
0x17c6   : > { %2418 = vmax.xlane.f32.xlu0 %v2417_v7  ;;  %v2683_v7 = vrot.slane %v3615_v53, %v1414_v26  ;;  %v2774_v26 = vrot.slane %v3615_v53, %v1506_v46 }
0x1853   : > { %v2419_v9 = vpop.xlane.xlu0 %2418 }
0x1854   : > { %v2420_v13 = vsub.f32 %v2413_v1, %v2419_v9 }
0x1856   : > { %v2421_v14 = vmul.f32 1.442695, %v2420_v13 }
0x1858   : > { %3293 = vpow2.f32 %v2421_v14 }
0x1862   : > { %v3294_v16 = vpop.eup %3293 }
0x1863   : > { %v2423_v17 = vsel %vm351_vm2, %v3294_v16, 0.0 }
0x1864   : > { %2424 = vadd.xlane.f32.xlu1 %v2423_v17 }
0x1875   : > { %2428 = vrot.lane.b32.xlu1 %v3620_v12, %s3322_s8 }
0x1894   : > { %v2334_v19 = vpop.f32.mrb[26].mxu0 }
0x1895   : > { %v2338_v21 = vadd.f32 %v2334_v19, %v2099_v56  ;;  %v3145_v22 = vpop.f32.mrb[27].mxu0 }
0x18f1   : > { %v2425_v23 = vpop.xlane.xlu1 %2424 }
0x18f2   : > { %3295 = vrcp.f32 %v2425_v23 }
0x18f5   : > { %v2429_v24 = vpop.permute.xlu1 %2428 }
0x18f6   : > { %3152 = vmatpush3.msra.mxu0 %v2429_v24 }
0x18f7   : > { %3221 = vmatprep.subr.bf16.mxu0 %v3309_v3 }
0x18fc   : > { %v3296_v25 = vpop.eup %3295 }
0x18fd   : > { %v2427_v27 = vmul.f32 %v3296_v25, %v3294_v16 }
0x18ff   : > { %3154 = vmatmul.mubr.msk.f32.vlgmr.msra.gmra.mrb[28].mxu0 %vm351_vm2, %v2427_v27 }
0x1900   : > { %3169 = vmatprep.mubr.msk.f32.mxu0 %vm3310_vm0, %v3311_v6 }
0x19d2   : > { %v2500_v12 = vpop.f32.mrb[28].mxu0 }
0x19d3   : > { %v3155_v28 = vpop.f32.mrb[29].mxu0  ;;  %3159 = vmatmul.mubr.msk.f32.vlgmr.msra.gmra.mrb[24].mxu1 %vm351_vm2, %v2500_v12  ;;  %v2779_v12 = vrot.slane %v3615_v53, %v1511_v47 }
0x19d4   : > { %3188 = vmatprep.mubr.msk.f32.mxu1 %vm3310_vm0, %v3311_v6  ;;  %v2870_v6 = vld [vmem:[%s3800_s3 + $0x28] sm:$0xff]  ;;  %3229 = vmatpush3.bf16.msra.mxu1 %v3228_v45 }
0x19d5   : > { %v3222_v39 = vpack.c.bf16 %v2870_v6, %v2869_v38  ;;  %3230 = vmatprep.subr.bf16.mxu1 %v3309_v3 }
0x19d7   : > { %3223 = vmatpush3.bf16.msra.mxu0 %v3222_v39 }
0x19d8   : > { %3224 = vmatprep.subr.bf16.mxu0 %v3309_v3  ;;  %3232 = vmatpush3.bf16.msra.mxu1 %v3231_v49 }
0x19d9   : > { %3233 = vmatprep.subr.bf16.mxu1 %v3309_v3 }
0x19dc   : > { %3235 = vmatpush3.bf16.msra.mxu1 %v3234_v51 }
0x19dd   : > { %3236 = vmatprep.subr.bf16.mxu1 %v3309_v3  ;;  %v2879_v3 = vld [vmem:[%s3801_s4 + $0x70] sm:$0xff] }
0x19de   : > { %v3237_v62 = vpack.c.bf16 %v2880_v0, %v2879_v3 }
0x19e0   : > { %3238 = vmatpush3.bf16.msra.mxu1 %v3237_v62 }
0x1aa6   : > { %v2573_v29 = vpop.f32.mrb[24].mxu1 }
0x1aa7   : > { %v2577_v30 = vadd.f32 %v2573_v29, %v2338_v21  ;;  %v3160_v31 = vpop.f32.mrb[25].mxu1 }
0x1aa9   : > { %v2578_v32 = vadd.f32 %v2577_v30, %v3606_v52  ;;  %v2871_v52 = vld [vmem:[%s3800_s3 + $0x30] sm:$0xff] }
0x1aaa   : > { %v3225_v41 = vpack.c.bf16 %v2872_v40, %v2871_v52 }
0x1aab   : > { %v2579_v33 = vsel %vm273_vm1, %v2578_v32, 0.0 }
0x1aac   : > { %2580 = vadd.xlane.f32.xlu1 %v2579_v33  ;;  %3226 = vmatpush3.bf16.msra.mxu0 %v3225_v41 }
0x1b39   : > { %v2581_v34 = vpop.xlane.xlu1 %2580 }
0x1b3a   : > { %v2582_v35 = vmul.f32 0.03125, %v2581_v34 }
0x1b3c   : > { %v2583_v36 = vsub.f32 %v2578_v32, %v2582_v35 }
0x1b3e   : > { %v2584_v15 = vmul.f32 %v2583_v36, %v2583_v36 }
0x1b40   : > { %v2585_v37 = vsel %vm273_vm1, %v2584_v15, 0.0 }
0x1b41   : > { %2586 = vadd.xlane.f32.xlu0 %v2585_v37 }
0x1bce   : > { %v2587_v54 = vpop.xlane.xlu0 %2586 }
0x1bcf   : > { %v2588_v55 = vmul.f32 0.03125, %v2587_v54 }
0x1bd1   : > { %v2589_v56 = vadd.f32 1e-05, %v2588_v55 }
0x1bd3   : > { %3297 = vrsqrt.f32 %v2589_v56 }
0x1bdd   : > { %v3298_v58 = vpop.eup %3297 }
0x1bde   : > { %v2591_v11 = vmul.f32 %v3298_v58, %v2583_v36 }
0x1be0   : > { %v2596_v60 = vmul.f32 %v2595_v57, %v2591_v11 }
0x1be2   : > { %v2601_v61 = vadd.f32 %v2600_v59, %v2596_v60 }
0x1be4   : > { %3170 = vmatmul.mubr.msk.f32.vlgmr.msra.gmra.mrb[30].mxu0 %vm273_vm1, %v2601_v61 }
0x1cb7   : > { %v2675_v63 = vpop.f32.mrb[30].mxu0 }
0x1cb8   : > { %v2676_v4 = vadd.f32 %v2675_v63, %v2605_v2  ;;  %v3171_v1 = vpop.f32.mrb[31].mxu0 }
0x1cba   : > { %v2679_v5 = vmax.f32 %v2676_v4, 0.0 }
0x1cbc   : > { %3189 = vmatmul.mubr.msk.f32.vlgmr.msra.gmra.mrb[26].mxu1 %vm1416_vm3, %v2679_v5 }
0x1d8f   : > { %v2753_v9 = vpop.f32.mrb[26].mxu1 }
0x1d90   : > { %v2754_v13 = vadd.f32 %v2753_v9, %v2683_v7  ;;  %v3190_v14 = vpop.f32.mrb[27].mxu1 }
0x1d92   : > { %v2757_v16 = vadd.f32 %v2754_v13, %v2601_v61 }
0x1d94   : > { %v2758_v17 = vsel %vm273_vm1, %v2757_v16, 0.0 }
0x1d95   : > { %2759 = vadd.xlane.f32.xlu0 %v2758_v17 }
0x1e22   : > { %v2760_v18 = vpop.xlane.xlu0 %2759 }
0x1e23   : > { %v2761_v20 = vmul.f32 0.03125, %v2760_v18 }
0x1e25   : > { %v2762_v19 = vsub.f32 %v2757_v16, %v2761_v20 }
0x1e27   : > { %v2763_v21 = vmul.f32 %v2762_v19, %v2762_v19 }
0x1e29   : > { %v2764_v22 = vsel %vm273_vm1, %v2763_v21, 0.0 }
0x1e2a   : > { %2765 = vadd.xlane.f32.xlu0 %v2764_v22 }
0x1eb7   : > { %v2766_v23 = vpop.xlane.xlu0 %2765 }
0x1eb8   : > { %v2767_v24 = vmul.f32 0.03125, %v2766_v23 }
0x1eba   : > { %v2768_v25 = vadd.f32 1e-05, %v2767_v24 }
0x1ebc   : > { %3299 = vrsqrt.f32 %v2768_v25 }
0x1ec6   : > { %v3300_v27 = vpop.eup %3299 }
0x1ec7   : > { %v2770_v28 = vmul.f32 %v3300_v27, %v2762_v19 }
0x1ec9   : > { %v2775_v29 = vmul.f32 %v2774_v26, %v2770_v28 }
0x1ecb   : > { %v2780_v30 = vadd.f32 %v2779_v12, %v2775_v29 }
0x1ecd   : > { %2781 = vst.msk [vmem:[%s246_s29] sm:$0xff] %vm273_vm1, %v2780_v30 }
0x1ece PF: > { %s16_s21 = sadd.s32 1, %s3307_s21  }
0x1ecf   : > { %p13_p4 = scmp.ge.s32.totalorder %s16_s21, 4  }
0x1ed1   :  { %15 = sbr.rel (!%p13_p4) target bundleno = 1 (0x1), region = 79 }

// kernel: forward.20
= control target key start
LH: loop header
LB: loop body
LE: loop exit
PB: predicated region body
PF: predicated region fallthrough
CT: control target
= control target key end

     0   :  { %vm35_vm0 = vcmask 259072   ;;  %v525_v7 = vmov 0   ;;  %vm44_vm1 = vcmask 5120   ;;  %v526_v54 = vmov 0.0|0.0   ;;  %s626_s0 = inlined_call_operand.vmem [shape: f32[2,6,32], index: 0, kind: input, shape index: {}]   ;;  %s627_s1 = inlined_call_operand.vmem [shape: f32[4,128], index: 1, kind: input, shape index: {}]   ;;  %s628_s2 = inlined_call_operand.vmem [shape: f32[32,32], index: 2, kind: input, shape index: {}]   ;;  %s629_s3 = inlined_call_operand.vmem [shape: f32[32,64], index: 3, kind: input, shape index: {}]   ;;  %s630_s4 = inlined_call_operand.vmem [shape: f32[2,64], index: 4, kind: output, shape index: {}]  }
   0x1   :  { %v416_v0 = vld [vmem:[%s627_s1] ss:$0 sm:$0xff]  ;;  %v565_v2 = vld [vmem:[%s626_s0 + $0x8] sm:$0x3f]  ;;  %515 = vset.pattern.permute.xlu1 %v525_v7  ;;  %516 = vset.pattern.permute.xlu0 %v525_v7  ;;  %v417_v8 = vld [vmem:[%s627_s1 + $0x1] ss:$0 sm:$0xff] }
   0x2   :  { %v560_v1 = vld [vmem:[%s626_s0] sm:$0x3f]  ;;  %v228_v4 = vmul.f32 %v565_v2, %v416_v0  ;;  %v20_v52 = vld [vmem:[%s628_s2 + $0x8] sm:$0xff]  ;;  %487 = vmatprep.subr.bf16.mxu0 %v526_v54  ;;  %493 = vmatprep.subr.bf16.mxu1 %v526_v54  ;;  %v21_v55 = vld [vmem:[%s628_s2 + $0x10] sm:$0xff]  ;;  %vm527_vm2 = vmmov 0   ;;  %v528_v58 = vmov 0.0  }
   0x3   :  { %v34_v3 = vmul.f32 %v416_v0, %v560_v1  ;;  %v19_v51 = vld [vmem:[%s628_s2] sm:$0xff]  ;;  %v22_v56 = vld [vmem:[%s628_s2 + $0x18] sm:$0xff]  ;;  %451 = vmatprep.mubr.msk.f32.mxu0 %vm527_vm2, %v528_v58  ;;  %462 = vmatprep.mubr.msk.f32.mxu1 %vm527_vm2, %v528_v58  ;;  %v24_v60 = vld [vmem:[%s629_s3 + $0x8] sm:$0xff]  ;;  %vm77_vm3 = vcmask 261120   ;;  %vm224_vm4 = vcmask 516096  }
   0x4   :  { %v229_v6 = vsel %vm35_vm0, %v228_v4, 0.0  ;;  %v488_v53 = vpack.c.bf16 %v20_v52, %v19_v51  ;;  %v491_v57 = vpack.c.bf16 %v22_v56, %v21_v55  ;;  %v23_v59 = vld [vmem:[%s629_s3] sm:$0xff]  ;;  %v25_v61 = vld [vmem:[%s629_s3 + $0x10] sm:$0xff]  ;;  %v26_v63 = vld [vmem:[%s629_s3 + $0x18] sm:$0xff] }
   0x5   :  { %v36_v5 = vsel %vm35_vm0, %v34_v3, 0.0  ;;  %v494_v62 = vpack.c.bf16 %v24_v60, %v23_v59  ;;  %v497_v0 = vpack.c.bf16 %v26_v63, %v25_v61 }
   0x6   :  { %37 = vadd.xlane.f32.xlu0 %v36_v5  ;;  %489 = vmatpush3.bf16.msra.mxu0 %v488_v53 }
   0x7   :  { %490 = vmatprep.subr.bf16.mxu0 %v526_v54  ;;  %495 = vmatpush3.bf16.msra.mxu1 %v494_v62 }
   0x8   :  { %496 = vmatprep.subr.bf16.mxu1 %v526_v54 }
   0xa   :  { %230 = vadd.xlane.f32.xlu0 %v229_v6  ;;  %492 = vmatpush3.bf16.msra.mxu0 %v491_v57 }
   0xb   :  { %499 = vmatprep.subr.bf16.mxu0 %v526_v54  ;;  %498 = vmatpush3.bf16.msra.mxu1 %v497_v0 }
   0xc   :  { %505 = vmatprep.subr.bf16.mxu1 %v526_v54 }
  0x93   :  { %v38_v9 = vpop.xlane.xlu0 %37 }
  0x94   :  { %v43_v10 = vadd.f32 %v417_v8, %v38_v9 }
  0x96   :  { %v45_v11 = vsel %vm44_vm1, %v43_v10, -inf }
  0x97   :  { %v46_v12 = vrot.slane %v45_v11, 4  ;;  %v231_v13 = vpop.xlane.xlu0 %230 }
  0x98   :  { %v232_v14 = vadd.f32 %v417_v8, %v231_v13 }
  0x99   :  { %v47_v15 = vmax.f32 %v45_v11, %v46_v12 }
  0x9a   :  { %v233_v16 = vsel %vm44_vm1, %v232_v14, -inf }
  0x9b   :  { %v48_v17 = vrot.slane %v47_v15, 2  ;;  %v234_v18 = vrot.slane %v233_v16, 4 }
  0x9d   :  { %v49_v19 = vmax.f32 %v47_v15, %v48_v17  ;;  %v235_v20 = vmax.f32 %v233_v16, %v234_v18 }
  0x9f   :  { %v50_v21 = vrot.slane %v49_v19, 1  ;;  %v236_v22 = vrot.slane %v235_v20, 2 }
  0xa1   :  { %v51_v23 = vmax.f32 %v49_v19, %v50_v21  ;;  %v237_v24 = vmax.f32 %v235_v20, %v236_v22  ;;  %v27_v19 = vld [vmem:[%s627_s1 + $0x2] sm:$0x1] }
  0xa3   :  { %v52_v25 = vsub.f32 %v43_v10, %v51_v23  ;;  %v238_v26 = vrot.slane %v237_v24, 1 }
  0xa5   :  { %v53_v27 = vmul.f32 1.442695, %v52_v25  ;;  %v239_v28 = vmax.f32 %v237_v24, %v238_v26  ;;  %v28_v26 = vld [vmem:[%s627_s1 + $0x3] sm:$0x1] }
  0xa7   :  { %517 = vpow2.f32 %v53_v27  ;;  %v240_v29 = vsub.f32 %v232_v14, %v239_v28 }
  0xa9   :  { %v241_v30 = vmul.f32 1.442695, %v240_v29 }
  0xab   :  { %519 = vpow2.f32 %v241_v30 }
  0xb1   :  { %v518_v31 = vpop.eup %517 }
  0xb2   :  { %v55_v32 = vsel %vm44_vm1, %v518_v31, 0.0 }
  0xb3   :  { %v56_v33 = vrot.slane %v55_v32, 4 }
  0xb5   :  { %v520_v34 = vpop.eup %519  ;;  %v57_v35 = vadd.f32 %v56_v33, %v55_v32 }
  0xb6   :  { %v243_v36 = vsel %vm44_vm1, %v520_v34, 0.0 }
  0xb7   :  { %v58_v37 = vrot.slane %v57_v35, 2  ;;  %v244_v38 = vrot.slane %v243_v36, 4 }
  0xb9   :  { %v59_v39 = vadd.f32 %v58_v37, %v57_v35  ;;  %v245_v40 = vadd.f32 %v244_v38, %v243_v36 }
  0xbb   :  { %v246_v41 = vrot.slane %v245_v40, 2  ;;  %v60_v42 = vrot.slane %v59_v39, 1 }
  0xbd   :  { %v61_v43 = vadd.f32 %v60_v42, %v59_v39  ;;  %v247_v44 = vadd.f32 %v246_v41, %v245_v40 }
  0xbf   :  { %521 = vrcp.f32 %v61_v43  ;;  %v248_v45 = vrot.slane %v247_v44, 1 }
  0xc1   :  { %v249_v46 = vadd.f32 %v248_v45, %v247_v44 }
  0xc3   :  { %523 = vrcp.f32 %v249_v46 }
  0xc9   :  { %v522_v47 = vpop.eup %521 }
  0xca   :  { %v63_v48 = vmul.f32 %v522_v47, %v518_v31 }
  0xcc   :  { %66 = vperm.xlu1 %515, %v63_v48  }
  0xcd   :  { %v524_v49 = vpop.eup %523 }
  0xce   :  { %v251_v50 = vmul.f32 %v524_v49, %v520_v34 }
  0xd0   :  { %254 = vperm.xlu1 %515, %v251_v50  }
 0x14b   :  { %v67_v3 = vpop.permute.xlu1 %66 }
 0x14c   :  { %v69_v4 = vmul.f32 %v67_v3, %v560_v1 }
 0x14e   :  { %v70_v5 = vsel %vm35_vm0, %v69_v4, 0.0 }
 0x14f   :  { %v71_v6 = vrot.slane %v70_v5, 4  ;;  %v255_v7 = vpop.permute.xlu1 %254 }
 0x150   :  { %v257_v8 = vmul.f32 %v565_v2, %v255_v7 }
 0x151   :  { %v72_v9 = vadd.f32 %v71_v6, %v70_v5 }
 0x152   :  { %v258_v10 = vsel %vm35_vm0, %v257_v8, 0.0 }
 0x153   :  { %v73_v11 = vrot.slane %v72_v9, 2  ;;  %v259_v12 = vrot.slane %v258_v10, 4 }
 0x155   :  { %v74_v13 = vadd.f32 %v73_v11, %v72_v9  ;;  %v260_v14 = vadd.f32 %v259_v12, %v258_v10 }
 0x157   :  { %v75_v15 = vrot.slane %v74_v13, 1  ;;  %v261_v16 = vrot.slane %v260_v14, 2 }
 0x159   :  { %v262_v17 = vadd.f32 %v261_v16, %v260_v14  ;;  %v76_v18 = vadd.f32 %v75_v15, %v74_v13 }
 0x15b   :  { %452 = vmatmul.mubr.msk.f32.vlgmr.msra.gmra.mrb[0].mxu0 %vm77_vm3, %v76_v18  ;;  %v263_v1 = vrot.slane %v262_v17, 1 }
 0x15c   :  { %501 = vmatpush3.bf16.msra.mxu0 %v488_v53  ;;  %473 = vmatprep.mubr.msk.f32.mxu0 %vm527_vm2, %v528_v58 }
 0x15d   :  { %502 = vmatprep.subr.bf16.mxu0 %v526_v54  ;;  %v264_v2 = vadd.f32 %v263_v1, %v262_v17 }
 0x160   :  { %504 = vmatpush3.bf16.msra.mxu0 %v491_v57 }
 0x163   :  { %474 = vmatmul.mubr.msk.f32.vlgmr.msra.gmra.mrb[2].mxu0 %vm77_vm3, %v264_v2 }
 0x22e   :  { %v147_v20 = vpop.f32.mrb[0].mxu0 }
 0x22f   :  { %v148_v21 = vadd.f32 %v147_v20, %v27_v19  ;;  %v453_v22 = vpop.f32.mrb[1].mxu0 }
 0x231   :  { %463 = vmatmul.mubr.msk.f32.vlgmr.msra.gmra.mrb[0].mxu1 %vm77_vm3, %v148_v21 }
 0x232   :  { %507 = vmatpush3.bf16.msra.mxu1 %v494_v62  ;;  %484 = vmatprep.mubr.msk.f32.mxu1 %vm527_vm2, %v528_v58 }
 0x233   :  { %508 = vmatprep.subr.bf16.mxu1 %v526_v54 }
 0x236   :  { %v334_v23 = vpop.f32.mrb[2].mxu0  ;;  %510 = vmatpush3.bf16.msra.mxu1 %v497_v0 }
 0x237   :  { %v335_v24 = vadd.f32 %v334_v23, %v27_v19  ;;  %v475_v25 = vpop.f32.mrb[3].mxu0 }
 0x239   :  { %485 = vmatmul.mubr.msk.f32.vlgmr.msra.gmra.mrb[2].mxu1 %vm77_vm3, %v335_v24 }
 0x304   :  { %v220_v27 = vpop.f32.mrb[0].mxu1 }
 0x305   :  { %v221_v28 = vadd.f32 %v220_v27, %v28_v26  ;;  %v464_v29 = vpop.f32.mrb[1].mxu1 }
 0x307   :  { %225 = vst.msk [vmem:[%s630_s4] sm:$0x1] %vm224_vm4, %v221_v28 }
 0x30c   :  { %v407_v30 = vpop.f32.mrb[2].mxu1 }
 0x30d   :  { %v408_v31 = vadd.f32 %v407_v30, %v28_v26  ;;  %v486_v32 = vpop.f32.mrb[3].mxu1 }
 0x30f   :  { %411 = vst.msk [vmem:[%s630_s4 + $0x1] sm:$0x1] %vm224_vm4, %v408_v31 }

// kernel: forward.19
= control target key start
LH: loop header
LB: loop body
LE: loop exit
PB: predicated region body
PF: predicated region fallthrough
CT: control target
= control target key end

     0   :  { %s3378_s21 = smov 0   ;;  %s3825_s0 = inlined_call_operand.vmem [shape: f32[2,6,32], index: 0, kind: input, shape index: {}]   ;;  %s3826_s1 = inlined_call_operand.vmem [shape: f32[2,32,96], index: 1, kind: input, shape index: {}]   ;;  %s3827_s2 = inlined_call_operand.vmem [shape: f32[2,32,32], index: 2, kind: input, shape index: {}]   ;;  %s3828_s3 = inlined_call_operand.vmem [shape: f32[2,32,64], index: 3, kind: input, shape index: {}]   ;;  %s3829_s4 = inlined_call_operand.vmem [shape: f32[2,64,32], index: 4, kind: input, shape index: {}]   ;;  %s3830_s5 = inlined_call_operand.vmem [shape: f32[2,8,128], index: 5, kind: input, shape index: {}]   ;;  %s3831_s6 = inlined_call_operand.vmem [shape: f32[2,6,32], index: 6, kind: output, shape index: {}]  }
   0x1 LB: > { %s2847_s22 = sadd.s32 4294967295, %s3327_s21   ;;  %p2851_p0 = scmp.ge.s32.totalorder %s3327_s21, 1  ;;  %s3327_s21 = sphi %s3378_s21, %s16_s21  }
   0x2   : > { %p211_p1 = scmp.lt.s32.totalorder %s3327_s21, 3 }
   0x4   : > { %p212_p2 = pnand %p2851_p0, %p211_p1 }
   0x5   : > { %v248_v0 = vld [vmem:[%s3826_s1] sm:$0xff] (!%p212_p2)  ;;  %v249_v1 = vld [vmem:[%s3826_s1 + $0x8] sm:$0xff] (!%p212_p2)  ;;  %v250_v2 = vld [vmem:[%s3826_s1 + $0x10] sm:$0xff] (!%p212_p2)  ;;  %v3329_v3 = vmov (!%p212_p2), 0.0|0.0   ;;  %vm3330_vm0 = vmmov (!%p212_p2), 0   ;;  %v3331_v6 = vmov (!%p212_p2), 0.0   ;;  %v269_v9 = vlaneseq (!%p212_p2) }
   0x6   : > { %215 = sbr.rel (%p212_p2) target bundleno = 7886 (0x1ece), region = 44  ;;  %3211 = vmatprep.subr.bf16.mxu0 (!%p212_p2), %v3329_v3  ;;  %v3212_v4 = vpack.c.bf16 (!%p212_p2), %v249_v1, %v248_v0  ;;  %v251_v5 = vld [vmem:[%s3826_s1 + $0x18] sm:$0xff] (!%p212_p2)  ;;  %3017 = vmatprep.mubr.msk.f32.mxu0 (!%p212_p2), %vm3330_vm0, %v3331_v6  ;;  %p239_p3 = scmp.lt.s32.totalorder (!%p212_p2), %s2847_s22, 1  ;;  %vm273_vm1 = vcmask (!%p212_p2), 261120   ;;  %v3426_v12 = vld [vmem:[%s3830_s5] sm:$0xff] (!%p212_p2)  ;;  %vm351_vm2 = vcmask (!%p212_p2), 64512  }
   0x7   : > { %3025 = vmatprep.subr.mxu1 (!%p212_p2), %v3331_v6  ;;  %3027 = vmatprep.mubr.msk.f32.mxu1 (!%p212_p2), %vm3330_vm0, %v3331_v6  ;;  %v3215_v7 = vpack.c.bf16 (!%p212_p2), %v251_v5, %v250_v2  ;;  %v3420_v10 = vshrl.u32 (!%p212_p2), %v269_v9, 7  ;;  %s3332_s13 = smov (!%p212_p2), 64   ;;  %s3333_s14 = smov (!%p212_p2), 96   ;;  %vm445_vm3 = vcmask (!%p212_p2), 1045504   ;;  %vm427_vm4 = vcmask (!%p212_p2), 46080   ;;  %v252_v28 = vld [vmem:[%s3827_s2] sm:$0xff] (!%p212_p2) }
   0x8   : > { %3213 = vmatpush3.bf16.msra.mxu0 (!%p212_p2), %v3212_v4  ;;  %s3334_s15 = smov (!%p212_p2), 88   ;;  %s3335_s16 = smov (!%p212_p2), 56   ;;  %vm441_vm5 = vcmask (!%p212_p2), 48128   ;;  %v253_v52 = vld [vmem:[%s3827_s2 + $0x8] sm:$0xff] (!%p212_p2)  ;;  %vm1317_vm6 = vcmask (!%p212_p2), 259072   ;;  %vm1424_vm7 = vcmask (!%p212_p2), 523264  }
   0x9   : > { %3214 = vmatprep.subr.bf16.mxu0 (!%p212_p2), %v3329_v3  ;;  %v271_v11 = vsub.s32 (!%p212_p2), 0, %v3420_v10  ;;  %s3336_s17 = smov (!%p212_p2), 80   ;;  %s3337_s18 = smov (!%p212_p2), 120   ;;  %v593_v0 = vsub.s32 (!%p212_p2), 1, %v3420_v10 }
   0xa   : > { %s3338_s23 = smov (!%p212_p2), 112   ;;  %s3339_s26 = smov (!%p212_p2), 48  }
   0xb   : > { %v272_v13 = vrot.slane (!%p212_p2), %v3426_v12, %v271_v11  ;;  %s3340_s27 = smov (!%p212_p2), 72   ;;  %s3341_s28 = smov (!%p212_p2), 104   ;;  %v594_v1 = vrot.slane (!%p212_p2), %v3426_v12, %v593_v0 }
   0xc   : > { %3216 = vmatpush3.bf16.msra.mxu0 (!%p212_p2), %v3215_v7  ;;  %s3342_s8 = smov (!%p212_p2), 40  }
   0xd   : > { %s3833_s22 = smov (!%p239_p3, %s2847_s22), 1  ;;  %3020 = vmatprep.subr.mxu0 %v3331_v6 }
   0xe   : > { %s2852_s7 = sshll.u32 %s3833_s22, 3 }
   0xf   : > { %s242_s10 = scalar_lea.vmem %s3825_s0, %s2852_s7  ;;  %s246_s29 = scalar_lea.vmem %s3831_s6, %s2852_s7 }
  0x10   : > { %v3413_v8 = vld [vmem:[%s242_s10] sm:$0x3f] }
  0x11   : > { %3018 = vmatmul.mubr.msk.f32.vlgmr.msra.gmra.mrb[0].mxu0 %vm273_vm1, %v3413_v8 }
  0x12   : > { %3022 = vmatprep.mubr.msk.f32.mxu0 %vm3330_vm0, %v3331_v6 }
  0xe4   : > { %v343_v14 = vpop.f32.mrb[0].mxu0 }
  0xe5   : > { %v3431_v15 = vadd.f32 %v343_v14, %v272_v13  ;;  %v3019_v16 = vpop.f32.mrb[1].mxu0 }
  0xe7   : > { %439 = vrot.lane.b32.xlu1 %v3431_v15, %s3332_s13  ;;  %349 = vrot.lane.b32.xlu0 %v3431_v15, %s3333_s14  ;;  %v3442_v19 = vmul.f32 0.35355338, %v3431_v15 }
  0xeb   : > { %598 = vrot.lane.b32.xlu1 %v3431_v15, %s3334_s15 }
 0x159   : > { %v440_v17 = vpop.permute.xlu1 %439  ;;  %v350_v18 = vpop.permute.xlu0 %349 }
 0x15a   : > { %3021 = vmatpush3.xpose.msk.msra.mxu0 %vm351_vm2, %v350_v18  ;;  %3026 = vmatpush3.msk.msra.mxu1 %vm445_vm3, %v440_v17  ;;  %v254_v18 = vld [vmem:[%s3827_s2 + $0x10] sm:$0xff] }
 0x15b   : > { %3035 = vmatprep.subr.mxu1 %v3331_v6  ;;  %3030 = vmatprep.subr.mxu0 %v3331_v6 }
 0x15d   : > { %3023 = vmatmul.mubr.msk.f32.vlgmr.msra.gmra.mrb[2].mxu0 %vm351_vm2, %v3442_v19  ;;  %v599_v29 = vpop.permute.xlu1 %598 }
 0x15e   : > { %3032 = vmatprep.mubr.msk.f32.mxu0 %vm3330_vm0, %v3331_v6  ;;  %3031 = vmatpush3.msra.mxu0 %v252_v28 }
 0x15f   : > { %3040 = vmatprep.subr.mxu0 %v3331_v6 }
 0x230   : > { %v423_v20 = vpop.f32.mrb[2].mxu0 }
 0x231   : > { %v3024_v21 = vpop.f32.mrb[3].mxu0  ;;  %v428_v22 = vsel %vm427_vm4, %v423_v20, -inf }
 0x232   : > { %429 = vmax.xlane.f32.xlu0 %v428_v22 }
 0x248   : > { %685 = vrot.lane.b32.xlu0 %v3431_v15, %s3335_s16 }
 0x24c   : > { %838 = vrot.lane.b32.xlu0 %v3431_v15, %s3336_s17 }
 0x2bf   : > { %v430_v23 = vpop.xlane.xlu0 %429 }
 0x2c0   : > { %v431_v24 = vsub.f32 %v423_v20, %v430_v23 }
 0x2c2   : > { %v432_v25 = vmul.f32 1.442695, %v431_v24 }
 0x2c3   : > { %v686_v35 = vpop.permute.xlu0 %685 }
 0x2c4   : > { %3281 = vpow2.f32 %v432_v25 }
 0x2c7   : > { %v839_v47 = vpop.permute.xlu0 %838 }
 0x2ce   : > { %v3282_v26 = vpop.eup %3281 }
 0x2cf   : > { %v434_v27 = vsel %vm427_vm4, %v3282_v26, 0.0 }
 0x2d0   : > { %435 = vadd.xlane.f32.xlu1 %v434_v27 }
 0x2e1   : > { %596 = vrot.lane.b32.xlu1 %v3442_v19, %s3337_s18 }
 0x35d   : > { %v436_v30 = vpop.xlane.xlu1 %435 }
 0x35e   : > { %3283 = vrcp.f32 %v436_v30 }
 0x361   : > { %v597_v33 = vpop.permute.xlu1 %596 }
 0x368   : > { %v3284_v31 = vpop.eup %3283 }
 0x369   : > { %v438_v32 = vmul.f32 %v3284_v31, %v3282_v26 }
 0x36b   : > { %3028 = vmatmul.mubr.msk.f32.vlgmr.msra.gmra.mrb[0].mxu1 %vm441_vm5, %v438_v32 }
 0x36c   : > { %3036 = vmatpush3.xpose.msk.msra.mxu1 %vm351_vm2, %v599_v29  ;;  %3037 = vmatprep.mubr.msk.f32.mxu1 %vm3330_vm0, %v3331_v6  ;;  %v255_v29 = vld [vmem:[%s3827_s2 + $0x18] sm:$0xff] }
 0x36d   : > { %3045 = vmatprep.subr.mxu1 %v3331_v6 }
 0x36f   : > { %3038 = vmatmul.mubr.msk.f32.vlgmr.msra.gmra.mrb[2].mxu1 %vm351_vm2, %v597_v33 }
 0x370   : > { %3047 = vmatprep.mubr.msk.f32.mxu1 %vm3330_vm0, %v3331_v6  ;;  %3046 = vmatpush3.msra.mxu1 %v253_v52 }
 0x371   : > { %3055 = vmatprep.subr.mxu1 %v3331_v6 }
 0x43e   : > { %v514_v34 = vpop.f32.mrb[0].mxu1 }
 0x43f   : > { %v3029_v36 = vpop.f32.mrb[1].mxu1  ;;  %3033 = vmatmul.mubr.msk.f32.vlgmr.msra.gmra.mrb[4].mxu0 %vm351_vm2, %v514_v34 }
 0x440   : > { %3041 = vmatpush3.msk.msra.mxu0 %vm445_vm3, %v686_v35  ;;  %3042 = vmatprep.mubr.msk.f32.mxu0 %vm3330_vm0, %v3331_v6 }
 0x441   : > { %3050 = vmatprep.subr.mxu0 %v3331_v6 }
 0x442   : > { %v670_v37 = vpop.f32.mrb[2].mxu1 }
 0x443   : > { %v3039_v38 = vpop.f32.mrb[3].mxu1  ;;  %v674_v39 = vsel %vm427_vm4, %v670_v37, -inf }
 0x444   : > { %675 = vmax.xlane.f32.xlu1 %v674_v39 }
 0x4d1   : > { %v676_v40 = vpop.xlane.xlu1 %675 }
 0x4d2   : > { %v677_v41 = vsub.f32 %v670_v37, %v676_v40 }
 0x4d4   : > { %v678_v42 = vmul.f32 1.442695, %v677_v41 }
 0x4d6   : > { %3285 = vpow2.f32 %v678_v42 }
 0x4e0   : > { %v3286_v43 = vpop.eup %3285 }
 0x4e1   : > { %v680_v44 = vsel %vm427_vm4, %v3286_v43, 0.0 }
 0x4e2   : > { %681 = vadd.xlane.f32.xlu0 %v680_v44 }
 0x4f8   : > { %836 = vrot.lane.b32.xlu0 %v3442_v19, %s3338_s23 }
 0x512   : > { %v587_v45 = vpop.f32.mrb[4].mxu0 }
 0x513   : > { %v3034_v46 = vpop.f32.mrb[5].mxu0  ;;  %v595_v2 = vadd.f32 %v594_v1, %v587_v45 }
 0x56f   : > { %v682_v48 = vpop.xlane.xlu0 %681 }
 0x570   : > { %3287 = vrcp.f32 %v682_v48  ;;  %v256_v48 = vld [vmem:[%s3828_s3] sm:$0xff] }
 0x573   : > { %v837_v51 = vpop.permute.xlu0 %836 }
 0x57a   : > { %v3288_v49 = vpop.eup %3287 }
 0x57b   : > { %v684_v50 = vmul.f32 %v3288_v49, %v3286_v43  ;;  %v257_v49 = vld [vmem:[%s3828_s3 + $0x8] sm:$0xff] }
 0x57d   : > { %3043 = vmatmul.mubr.msk.f32.vlgmr.msra.gmra.mrb[6].mxu0 %vm441_vm5, %v684_v50  ;;  %v3218_v50 = vpack.c.bf16 %v257_v49, %v256_v48 }
 0x57e   : > { %3051 = vmatpush3.xpose.msk.msra.mxu0 %vm351_vm2, %v839_v47  ;;  %3052 = vmatprep.mubr.msk.f32.mxu0 %vm3330_vm0, %v3331_v6 }
 0x57f   : > { %3060 = vmatprep.subr.mxu0 %v3331_v6 }
 0x581   : > { %3053 = vmatmul.mubr.msk.f32.vlgmr.msra.gmra.mrb[8].mxu0 %vm351_vm2, %v837_v51  ;;  %v259_v51 = vld [vmem:[%s3828_s3 + $0x18] sm:$0xff] }
 0x582   : > { %3062 = vmatprep.mubr.msk.f32.mxu0 %vm3330_vm0, %v3331_v6  ;;  %3061 = vmatpush3.msra.mxu0 %v254_v18  ;;  %v267_v18 = vld [vmem:[%s3829_s4 + $0x38] sm:$0xff] }
 0x583   : > { %3070 = vmatprep.subr.mxu0 %v3331_v6 }
 0x650   : > { %v758_v53 = vpop.f32.mrb[6].mxu0 }
 0x651   : > { %v3044_v54 = vpop.f32.mrb[7].mxu0  ;;  %3048 = vmatmul.mubr.msk.f32.vlgmr.msra.gmra.mrb[4].mxu1 %vm351_vm2, %v758_v53  ;;  %v260_v53 = vld [vmem:[%s3829_s4] sm:$0xff] }
 0x652   : > { %3057 = vmatprep.mubr.msk.f32.mxu1 %vm3330_vm0, %v3331_v6  ;;  %v261_v54 = vld [vmem:[%s3829_s4 + $0x8] sm:$0xff] }
 0x654   : > { %v910_v55 = vpop.f32.mrb[8].mxu0 }
 0x655   : > { %v3054_v56 = vpop.f32.mrb[9].mxu0  ;;  %v914_v57 = vsel %vm427_vm4, %v910_v55, -inf }
 0x656   : > { %915 = vmax.xlane.f32.xlu1 %v914_v57  ;;  %v3224_v56 = vpack.c.bf16 %v261_v54, %v260_v53  ;;  %v263_v57 = vld [vmem:[%s3829_s4 + $0x18] sm:$0xff]  ;;  %v3639_v53 = vld [vmem:[%s3830_s5 + $0x8] sm:$0xff] }
 0x657   : > { %v1551_v54 = vrot.slane %v3639_v53, %v271_v11 }
 0x667   : > { %925 = vrot.lane.b32.xlu1 %v3431_v15, %s3339_s26 }
 0x66b   : > { %1078 = vrot.lane.b32.xlu1 %v3431_v15, %s3340_s27 }
 0x66f   : > { %1076 = vrot.lane.b32.xlu1 %v3442_v19, %s3341_s28 }
 0x6e3   : > { %v916_v58 = vpop.xlane.xlu1 %915 }
 0x6e4   : > { %v917_v59 = vsub.f32 %v910_v55, %v916_v58  ;;  %v262_v55 = vld [vmem:[%s3829_s4 + $0x10] sm:$0xff] }
 0x6e5   : > { %v3227_v58 = vpack.c.bf16 %v263_v57, %v262_v55 }
 0x6e6   : > { %v918_v60 = vmul.f32 1.442695, %v917_v59  ;;  %v264_v59 = vld [vmem:[%s3829_s4 + $0x20] sm:$0xff] }
 0x6e7   : > { %v926_v61 = vpop.permute.xlu1 %925 }
 0x6e8   : > { %3289 = vpow2.f32 %v918_v60  ;;  %3056 = vmatpush3.msk.msra.mxu1 %vm445_vm3, %v926_v61  ;;  %v265_v60 = vld [vmem:[%s3829_s4 + $0x28] sm:$0xff] }
 0x6e9   : > { %3065 = vmatprep.subr.mxu1 %v3331_v6  ;;  %v3230_v61 = vpack.c.bf16 %v265_v60, %v264_v59 }
 0x6eb   : > { %v1079_v14 = vpop.permute.xlu1 %1078 }
 0x6ef   : > { %v1077_v17 = vpop.permute.xlu1 %1076 }
 0x6f2   : > { %v3290_v62 = vpop.eup %3289 }
 0x6f3   : > { %v920_v63 = vsel %vm427_vm4, %v3290_v62, 0.0 }
 0x6f4   : > { %921 = vadd.xlane.f32.xlu0 %v920_v63 }
 0x724   : > { %v831_v4 = vpop.f32.mrb[4].mxu1 }
 0x725   : > { %v835_v5 = vadd.f32 %v831_v4, %v595_v2  ;;  %v3049_v7 = vpop.f32.mrb[5].mxu1  ;;  %v1334_v2 = vsub.s32 2, %v3420_v10  ;;  %v1339_v4 = vsub.s32 3, %v3420_v10 }
 0x781   : > { %v922_v9 = vpop.xlane.xlu0 %921 }
 0x782   : > { %3291 = vrcp.f32 %v922_v9 }
 0x78c   : > { %v3292_v13 = vpop.eup %3291 }
 0x78d   : > { %v924_v16 = vmul.f32 %v3292_v13, %v3290_v62  ;;  %v1340_v13 = vrot.slane %v3426_v12, %v1339_v4 }
 0x78f   : > { %3058 = vmatmul.mubr.msk.f32.vlgmr.msra.gmra.mrb[6].mxu1 %vm441_vm5, %v924_v16 }
 0x790   : > { %3066 = vmatpush3.xpose.msk.msra.mxu1 %vm351_vm2, %v1079_v14  ;;  %3067 = vmatprep.mubr.msk.f32.mxu1 %vm3330_vm0, %v3331_v6 }
 0x791   : > { %3075 = vmatprep.subr.mxu1 %v3331_v6 }
 0x793   : > { %3068 = vmatmul.mubr.msk.f32.vlgmr.msra.gmra.mrb[8].mxu1 %vm351_vm2, %v1077_v17  ;;  %v266_v17 = vld [vmem:[%s3829_s4 + $0x30] sm:$0xff] }
 0x794   : > { %3077 = vmatprep.mubr.msk.f32.mxu1 %vm3330_vm0, %v3331_v6  ;;  %3076 = vmatpush3.msra.mxu1 %v255_v29 }
 0x795   : > { %3223 = vmatprep.subr.bf16.mxu1 %v3329_v3 }
 0x862   : > { %v998_v19 = vpop.f32.mrb[6].mxu1 }
 0x863   : > { %v3059_v20 = vpop.f32.mrb[7].mxu1  ;;  %3063 = vmatmul.mubr.msk.f32.vlgmr.msra.gmra.mrb[10].mxu0 %vm351_vm2, %v998_v19  ;;  %v3233_v19 = vpack.c.bf16 %v267_v18, %v266_v17 }
 0x864   : > { %3072 = vmatprep.mubr.msk.f32.mxu0 %vm3330_vm0, %v3331_v6  ;;  %v1344_v20 = vsub.s32 4, %v3420_v10 }
 0x866   : > { %v1150_v21 = vpop.f32.mrb[8].mxu1 }
 0x867   : > { %v3069_v22 = vpop.f32.mrb[9].mxu1  ;;  %v1154_v23 = vsel %vm427_vm4, %v1150_v21, -inf }
 0x868   : > { %1155 = vmax.xlane.f32.xlu1 %v1154_v23 }
 0x8f5   : > { %v1156_v24 = vpop.xlane.xlu1 %1155 }
 0x8f6   : > { %v1157_v25 = vsub.f32 %v1150_v21, %v1156_v24  ;;  %v1345_v21 = vrot.slane %v3426_v12, %v1344_v20 }
 0x8f8   : > { %v1158_v26 = vmul.f32 1.442695, %v1157_v25 }
 0x8fa   : > { %3293 = vpow2.f32 %v1158_v26  ;;  %v1422_v26 = vsub.s32 5, %v3420_v10 }
 0x904   : > { %v3294_v27 = vpop.eup %3293 }
 0x905   : > { %v1160_v28 = vsel %vm427_vm4, %v3294_v27, 0.0 }
 0x906   : > { %1161 = vadd.xlane.f32.xlu0 %v1160_v28 }
 0x91c   : > { %1165 = vrot.lane.b32.xlu0 %v3431_v15, %s3342_s8 }
 0x936   : > { %v1071_v30 = vpop.f32.mrb[10].mxu0 }
 0x937   : > { %v1075_v31 = vadd.f32 %v1071_v30, %v835_v5  ;;  %v3064_v32 = vpop.f32.mrb[11].mxu0  ;;  %v1335_v5 = vrot.slane %v3426_v12, %v1334_v2 }
 0x993   : > { %v1162_v33 = vpop.xlane.xlu0 %1161 }
 0x994   : > { %3295 = vrcp.f32 %v1162_v33 }
 0x997   : > { %v1166_v34 = vpop.permute.xlu0 %1165 }
 0x998   : > { %3071 = vmatpush3.msk.msra.mxu0 %vm445_vm3, %v1166_v34 }
 0x999   : > { %3217 = vmatprep.subr.bf16.mxu0 %v3329_v3 }
 0x99e   : > { %v3296_v35 = vpop.eup %3295 }
 0x99f   : > { %v1164_v36 = vmul.f32 %v3296_v35, %v3294_v27  ;;  %v1423_v27 = vrot.slane %v3426_v12, %v1422_v26 }
 0x9a1   : > { %3073 = vmatmul.mubr.msk.f32.vlgmr.msra.gmra.mrb[12].mxu0 %vm441_vm5, %v1164_v36 }
 0x9a2   : > { %3088 = vmatprep.mubr.msk.f32.mxu0 %vm3330_vm0, %v3331_v6  ;;  %3219 = vmatpush3.bf16.msra.mxu0 %v3218_v50 }
 0x9a3   : > { %3220 = vmatprep.subr.bf16.mxu0 %v3329_v3 }
 0xa74   : > { %v1238_v15 = vpop.f32.mrb[12].mxu0 }
 0xa75   : > { %v3074_v37 = vpop.f32.mrb[13].mxu0  ;;  %3078 = vmatmul.mubr.msk.f32.vlgmr.msra.gmra.mrb[10].mxu1 %vm351_vm2, %v1238_v15 }
 0xa76   : > { %3107 = vmatprep.mubr.msk.f32.mxu1 %vm3330_vm0, %v3331_v6  ;;  %3225 = vmatpush3.bf16.msra.mxu1 %v3224_v56  ;;  %v2877_v37 = vld [vmem:[%s3826_s1 + $0x20] sm:$0xff] }
 0xa77   : > { %3226 = vmatprep.subr.bf16.mxu1 %v3329_v3 }
 0xa7a   : > { %3228 = vmatpush3.bf16.msra.mxu1 %v3227_v58 }
 0xa7b   : > { %3229 = vmatprep.subr.bf16.mxu1 %v3329_v3 }
 0xa7e   : > { %3231 = vmatpush3.bf16.msra.mxu1 %v3230_v61 }
 0xa7f   : > { %3232 = vmatprep.subr.bf16.mxu1 %v3329_v3 }
 0xa82   : > { %3234 = vmatpush3.bf16.msra.mxu1 %v3233_v19 }
 0xa83   : > { %3126 = vmatprep.subr.mxu1 %v3331_v6 }
 0xb48   : > { %v1311_v38 = vpop.f32.mrb[10].mxu1 }
 0xb49   : > { %v1315_v39 = vadd.f32 %v1311_v38, %v1075_v31  ;;  %v3079_v40 = vpop.f32.mrb[11].mxu1  ;;  %v2878_v38 = vld [vmem:[%s3826_s1 + $0x28] sm:$0xff] }
 0xb4a   : > { %v2879_v40 = vld [vmem:[%s3826_s1 + $0x30] sm:$0xff] }
 0xb4b   : > { %v1316_v41 = vadd.f32 %v1315_v39, %v3413_v8  ;;  %v258_v8 = vld [vmem:[%s3828_s3 + $0x10] sm:$0xff]  ;;  %v3236_v39 = vpack.c.bf16 %v2878_v38, %v2877_v37  ;;  %v2882_v38 = vld [vmem:[%s3827_s2 + $0x28] sm:$0xff] }
 0xb4c   : > { %v3221_v52 = vpack.c.bf16 %v259_v51, %v258_v8 }
 0xb4d   : > { %v1318_v42 = vsel %vm1317_vm6, %v1316_v41, 0.0 }
 0xb4e   : > { %1319 = vadd.xlane.f32.xlu0 %v1318_v42  ;;  %3222 = vmatpush3.bf16.msra.mxu0 %v3221_v52 }
 0xb4f   : > { %3235 = vmatprep.subr.bf16.mxu0 %v3329_v3 }
 0xbdb   : > { %v1320_v43 = vpop.xlane.xlu0 %1319 }
 0xbdc   : > { %v1322_v44 = vmul.f32 0.03125, %v1320_v43 }
 0xbde   : > { %v1323_v45 = vsub.f32 %v1316_v41, %v1322_v44  ;;  %v2880_v41 = vld [vmem:[%s3826_s1 + $0x38] sm:$0xff] }
 0xbdf   : > { %v3239_v42 = vpack.c.bf16 %v2880_v41, %v2879_v40 }
 0xbe0   : > { %v1324_v46 = vmul.f32 %v1323_v45, %v1323_v45 }
 0xbe2   : > { %v1325_v47 = vsel %vm1317_vm6, %v1324_v46, 0.0  ;;  %v1514_v46 = vsub.s32 6, %v3420_v10 }
 0xbe3   : > { %1326 = vadd.xlane.f32.xlu1 %v1325_v47  ;;  %v1519_v47 = vsub.s32 7, %v3420_v10 }
 0xbe4   : > { %v1515_v48 = vrot.slane %v3426_v12, %v1514_v46 }
 0xbe5   : > { %v1520_v8 = vrot.slane %v3426_v12, %v1519_v47 }
 0xc70   : > { %v1327_v62 = vpop.xlane.xlu1 %1326 }
 0xc71   : > { %v1328_v63 = vmul.f32 0.03125, %v1327_v62 }
 0xc73   : > { %v1329_v1 = vadd.f32 1e-05, %v1328_v63 }
 0xc75   : > { %3297 = vrsqrt.f32 %v1329_v1 }
 0xc7f   : > { %v3298_v7 = vpop.eup %3297 }
 0xc80   : > { %v1331_v9 = vmul.f32 %v3298_v7, %v1323_v45 }
 0xc82   : > { %v1336_v14 = vmul.f32 %v1335_v5, %v1331_v9  ;;  %v2881_v9 = vld [vmem:[%s3827_s2 + $0x20] sm:$0xff] }
 0xc84   : > { %v1341_v16 = vadd.f32 %v1340_v13, %v1336_v14 }
 0xc86   : > { %3089 = vmatmul.mubr.msk.f32.vlgmr.msra.gmra.mrb[14].mxu0 %vm273_vm1, %v1341_v16 }
 0xc87   : > { %3118 = vmatprep.mubr.msk.f32.mxu0 %vm3330_vm0, %v3331_v6  ;;  %3237 = vmatpush3.bf16.msra.mxu0 %v3236_v39 }
 0xc88   : > { %3238 = vmatprep.subr.bf16.mxu0 %v3329_v3 }
 0xc8b   : > { %3240 = vmatpush3.bf16.msra.mxu0 %v3239_v42 }
 0xc8c   : > { %3121 = vmatprep.subr.mxu0 %v3331_v6 }
 0xd59   : > { %v1415_v22 = vpop.f32.mrb[14].mxu0 }
 0xd5a   : > { %v1416_v23 = vadd.f32 %v1415_v22, %v1345_v21  ;;  %v3090_v24 = vpop.f32.mrb[15].mxu0 }
 0xd5c   : > { %v1419_v25 = vmax.f32 %v1416_v23, 0.0 }
 0xd5e   : > { %3108 = vmatmul.mubr.msk.f32.vlgmr.msra.gmra.mrb[12].mxu1 %vm1424_vm7, %v1419_v25 }
 0xd5f   : > { %3128 = vmatprep.mubr.msk.f32.mxu1 %vm3330_vm0, %v3331_v6 }
 0xe31   : > { %v1494_v28 = vpop.f32.mrb[12].mxu1 }
 0xe32   : > { %v1495_v29 = vadd.f32 %v1494_v28, %v1423_v27  ;;  %v3109_v30 = vpop.f32.mrb[13].mxu1 }
 0xe34   : > { %v1498_v31 = vadd.f32 %v1495_v29, %v1341_v16 }
 0xe36   : > { %v1499_v32 = vsel %vm1317_vm6, %v1498_v31, 0.0 }
 0xe37   : > { %1500 = vadd.xlane.f32.xlu1 %v1499_v32 }
 0xec4   : > { %v1501_v33 = vpop.xlane.xlu1 %1500 }
 0xec5   : > { %v1502_v34 = vmul.f32 0.03125, %v1501_v33 }
 0xec7   : > { %v1503_v35 = vsub.f32 %v1498_v31, %v1502_v34 }
 0xec9   : > { %v1504_v36 = vmul.f32 %v1503_v35, %v1503_v35 }
 0xecb   : > { %v1505_v15 = vsel %vm1317_vm6, %v1504_v36, 0.0 }
 0xecc   : > { %1506 = vadd.xlane.f32.xlu1 %v1505_v15 }
 0xf59   : > { %v1507_v43 = vpop.xlane.xlu1 %1506 }
 0xf5a   : > { %v1508_v44 = vmul.f32 0.03125, %v1507_v43 }
 0xf5c   : > { %v1509_v45 = vadd.f32 1e-05, %v1508_v44 }
 0xf5e   : > { %3299 = vrsqrt.f32 %v1509_v45 }
 0xf68   : > { %v3300_v49 = vpop.eup %3299 }
 0xf69   : > { %v1511_v50 = vmul.f32 %v3300_v49, %v1503_v35 }
 0xf6b   : > { %v1516_v51 = vmul.f32 %v1515_v48, %v1511_v50 }
 0xf6d   : > { %v3630_v52 = vadd.f32 %v1520_v8, %v1516_v51  ;;  %v1868_v51 = vrot.slane %v3639_v53, %v593_v0  ;;  %v2883_v0 = vld [vmem:[%s3827_s2 + $0x30] sm:$0xff] }
 0xf6f   : > { %3119 = vmatmul.mubr.msk.f32.vlgmr.msra.gmra.mrb[16].mxu0 %vm273_vm1, %v3630_v52 }
 0xf70   : > { %3123 = vmatprep.mubr.msk.f32.mxu0 %vm3330_vm0, %v3331_v6 }
0x1042   : > { %v1621_v55 = vpop.f32.mrb[16].mxu0 }
0x1043   : > { %v3644_v12 = vadd.f32 %v1621_v55, %v1551_v54  ;;  %v3120_v56 = vpop.f32.mrb[17].mxu0 }
0x1045   : > { %1627 = vrot.lane.b32.xlu1 %v3644_v12, %s3333_s14  ;;  %v3650_v58 = vmul.f32 0.35355338, %v3644_v12 }
0x10b7   : > { %v1628_v57 = vpop.permute.xlu1 %1627 }
0x10b8   : > { %3122 = vmatpush3.xpose.msk.msra.mxu0 %vm351_vm2, %v1628_v57 }
0x10b9   : > { %3131 = vmatprep.subr.mxu0 %v3331_v6 }
0x10bb   : > { %3124 = vmatmul.mubr.msk.f32.vlgmr.msra.gmra.mrb[18].mxu0 %vm351_vm2, %v3650_v58 }
0x10bc   : > { %3133 = vmatprep.mubr.msk.f32.mxu0 %vm3330_vm0, %v3331_v6  ;;  %3132 = vmatpush3.msra.mxu0 %v2881_v9 }
0x10bd   : > { %3141 = vmatprep.subr.mxu0 %v3331_v6 }
0x118e   : > { %v1700_v11 = vpop.f32.mrb[18].mxu0 }
0x118f   : > { %v3125_v59 = vpop.f32.mrb[19].mxu0  ;;  %v1704_v60 = vsel %vm427_vm4, %v1700_v11, -inf }
0x1190   : > { %1705 = vmax.xlane.f32.xlu0 %v1704_v60 }
0x11a6   : > { %1715 = vrot.lane.b32.xlu0 %v3644_v12, %s3332_s13 }
0x11aa   : > { %1872 = vrot.lane.b32.xlu0 %v3644_v12, %s3334_s15 }
0x11ae   : > { %1870 = vrot.lane.b32.xlu0 %v3650_v58, %s3337_s18 }
0x121d   : > { %v1706_v61 = vpop.xlane.xlu0 %1705 }
0x121e   : > { %v1707_v62 = vsub.f32 %v1700_v11, %v1706_v61 }
0x1220   : > { %v1708_v63 = vmul.f32 1.442695, %v1707_v62 }
0x1221   : > { %v1716_v1 = vpop.permute.xlu0 %1715 }
0x1222   : > { %3301 = vpow2.f32 %v1708_v63  ;;  %3127 = vmatpush3.msk.msra.mxu1 %vm445_vm3, %v1716_v1 }
0x1223   : > { %3136 = vmatprep.subr.mxu1 %v3331_v6 }
0x1225   : > { %v1873_v16 = vpop.permute.xlu0 %1872 }
0x1229   : > { %v1871_v18 = vpop.permute.xlu0 %1870 }
0x122c   : > { %v3302_v5 = vpop.eup %3301 }
0x122d   : > { %v1710_v7 = vsel %vm427_vm4, %v3302_v5, 0.0 }
0x122e   : > { %1711 = vadd.xlane.f32.xlu1 %v1710_v7 }
0x123f   : > { %1959 = vrot.lane.b32.xlu1 %v3644_v12, %s3335_s16 }
0x1243   : > { %2112 = vrot.lane.b32.xlu1 %v3644_v12, %s3336_s17 }
0x12bb   : > { %v1712_v13 = vpop.xlane.xlu1 %1711 }
0x12bc   : > { %3303 = vrcp.f32 %v1712_v13 }
0x12bf   : > { %v1960_v21 = vpop.permute.xlu1 %1959 }
0x12c3   : > { %v2113_v34 = vpop.permute.xlu1 %2112 }
0x12c6   : > { %v3304_v14 = vpop.eup %3303 }
0x12c7   : > { %v1714_v17 = vmul.f32 %v3304_v14, %v3302_v5 }
0x12c9   : > { %3129 = vmatmul.mubr.msk.f32.vlgmr.msra.gmra.mrb[14].mxu1 %vm441_vm5, %v1714_v17 }
0x12ca   : > { %3137 = vmatpush3.xpose.msk.msra.mxu1 %vm351_vm2, %v1873_v16  ;;  %3138 = vmatprep.mubr.msk.f32.mxu1 %vm3330_vm0, %v3331_v6 }
0x12cb   : > { %3146 = vmatprep.subr.mxu1 %v3331_v6 }
0x12cd   : > { %3139 = vmatmul.mubr.msk.f32.vlgmr.msra.gmra.mrb[16].mxu1 %vm351_vm2, %v1871_v18  ;;  %v2884_v18 = vld [vmem:[%s3827_s2 + $0x38] sm:$0xff] }
0x12ce   : > { %3148 = vmatprep.mubr.msk.f32.mxu1 %vm3330_vm0, %v3331_v6  ;;  %3147 = vmatpush3.msra.mxu1 %v2882_v38  ;;  %v2885_v38 = vld [vmem:[%s3828_s3 + $0x20] sm:$0xff] }
0x12cf   : > { %3156 = vmatprep.subr.mxu1 %v3331_v6 }
0x139c   : > { %v1788_v19 = vpop.f32.mrb[14].mxu1 }
0x139d   : > { %v3130_v22 = vpop.f32.mrb[15].mxu1  ;;  %3134 = vmatmul.mubr.msk.f32.vlgmr.msra.gmra.mrb[20].mxu0 %vm351_vm2, %v1788_v19 }
0x139e   : > { %3142 = vmatpush3.msk.msra.mxu0 %vm445_vm3, %v1960_v21  ;;  %3143 = vmatprep.mubr.msk.f32.mxu0 %vm3330_vm0, %v3331_v6 }
0x139f   : > { %3151 = vmatprep.subr.mxu0 %v3331_v6 }
0x13a0   : > { %v1944_v23 = vpop.f32.mrb[16].mxu1 }
0x13a1   : > { %v3140_v24 = vpop.f32.mrb[17].mxu1  ;;  %v1948_v25 = vsel %vm427_vm4, %v1944_v23, -inf }
0x13a2   : > { %1949 = vmax.xlane.f32.xlu0 %v1948_v25 }
0x142f   : > { %v1950_v27 = vpop.xlane.xlu0 %1949 }
0x1430   : > { %v1951_v28 = vsub.f32 %v1944_v23, %v1950_v27 }
0x1432   : > { %v1952_v29 = vmul.f32 1.442695, %v1951_v28 }
0x1434   : > { %3305 = vpow2.f32 %v1952_v29 }
0x143e   : > { %v3306_v30 = vpop.eup %3305 }
0x143f   : > { %v1954_v31 = vsel %vm427_vm4, %v3306_v30, 0.0 }
0x1440   : > { %1955 = vadd.xlane.f32.xlu1 %v1954_v31 }
0x1451   : > { %2110 = vrot.lane.b32.xlu1 %v3650_v58, %s3338_s23 }
0x1470   : > { %v1861_v32 = vpop.f32.mrb[20].mxu0 }
0x1471   : > { %v3135_v33 = vpop.f32.mrb[21].mxu0  ;;  %v1869_v54 = vadd.f32 %v1868_v51, %v1861_v32 }
0x14cd   : > { %v1956_v35 = vpop.xlane.xlu1 %1955 }
0x14ce   : > { %3307 = vrcp.f32 %v1956_v35 }
0x14d1   : > { %v2111_v37 = vpop.permute.xlu1 %2110 }
0x14d8   : > { %v3308_v36 = vpop.eup %3307 }
0x14d9   : > { %v1958_v15 = vmul.f32 %v3308_v36, %v3306_v30 }
0x14db   : > { %3144 = vmatmul.mubr.msk.f32.vlgmr.msra.gmra.mrb[22].mxu0 %vm441_vm5, %v1958_v15 }
0x14dc   : > { %3152 = vmatpush3.xpose.msk.msra.mxu0 %vm351_vm2, %v2113_v34  ;;  %3153 = vmatprep.mubr.msk.f32.mxu0 %vm3330_vm0, %v3331_v6 }
0x14dd   : > { %3161 = vmatprep.subr.mxu0 %v3331_v6 }
0x14df   : > { %3154 = vmatmul.mubr.msk.f32.vlgmr.msra.gmra.mrb[24].mxu0 %vm351_vm2, %v2111_v37 }
0x14e0   : > { %3163 = vmatprep.mubr.msk.f32.mxu0 %vm3330_vm0, %v3331_v6  ;;  %3162 = vmatpush3.msra.mxu0 %v2883_v0  ;;  %v2896_v0 = vld [vmem:[%s3829_s4 + $0x78] sm:$0xff] }
0x14e1   : > { %3171 = vmatprep.subr.mxu0 %v3331_v6 }
0x15ae   : > { %v2032_v39 = vpop.f32.mrb[22].mxu0 }
0x15af   : > { %v3145_v40 = vpop.f32.mrb[23].mxu0  ;;  %3149 = vmatmul.mubr.msk.f32.vlgmr.msra.gmra.mrb[18].mxu1 %vm351_vm2, %v2032_v39 }
0x15b0   : > { %3158 = vmatprep.mubr.msk.f32.mxu1 %vm3330_vm0, %v3331_v6  ;;  %v2888_v40 = vld [vmem:[%s3828_s3 + $0x38] sm:$0xff] }
0x15b2   : > { %v2184_v41 = vpop.f32.mrb[24].mxu0 }
0x15b3   : > { %v3155_v42 = vpop.f32.mrb[25].mxu0  ;;  %v2188_v43 = vsel %vm427_vm4, %v2184_v41, -inf }
0x15b4   : > { %2189 = vmax.xlane.f32.xlu0 %v2188_v43  ;;  %v2889_v42 = vld [vmem:[%s3829_s4 + $0x40] sm:$0xff]  ;;  %v2890_v43 = vld [vmem:[%s3829_s4 + $0x48] sm:$0xff] }
0x15ca   : > { %2199 = vrot.lane.b32.xlu0 %v3644_v12, %s3339_s26 }
0x15ce   : > { %2352 = vrot.lane.b32.xlu0 %v3644_v12, %s3340_s27 }
0x15d2   : > { %2350 = vrot.lane.b32.xlu0 %v3650_v58, %s3341_s28 }
0x1641   : > { %v2190_v44 = vpop.xlane.xlu0 %2189 }
0x1642   : > { %v2191_v45 = vsub.f32 %v2184_v41, %v2190_v44  ;;  %v2891_v44 = vld [vmem:[%s3829_s4 + $0x50] sm:$0xff] }
0x1644   : > { %v2192_v48 = vmul.f32 1.442695, %v2191_v45  ;;  %v3248_v45 = vpack.c.bf16 %v2890_v43, %v2889_v42 }
0x1645   : > { %v2200_v49 = vpop.permute.xlu0 %2199 }
0x1646   : > { %3309 = vpow2.f32 %v2192_v48  ;;  %3157 = vmatpush3.msk.msra.mxu1 %vm445_vm3, %v2200_v49  ;;  %v2892_v48 = vld [vmem:[%s3829_s4 + $0x58] sm:$0xff] }
0x1647   : > { %3166 = vmatprep.subr.mxu1 %v3331_v6  ;;  %v3251_v49 = vpack.c.bf16 %v2892_v48, %v2891_v44 }
0x1649   : > { %v2353_v59 = vpop.permute.xlu0 %2352 }
0x164d   : > { %v2351_v61 = vpop.permute.xlu0 %2350 }
0x1650   : > { %v3310_v50 = vpop.eup %3309 }
0x1651   : > { %v2194_v8 = vsel %vm427_vm4, %v3310_v50, 0.0 }
0x1652   : > { %2195 = vadd.xlane.f32.xlu1 %v2194_v8  ;;  %v2894_v8 = vld [vmem:[%s3829_s4 + $0x68] sm:$0xff] }
0x1682   : > { %v2105_v55 = vpop.f32.mrb[18].mxu1 }
0x1683   : > { %v2109_v56 = vadd.f32 %v2105_v55, %v1869_v54  ;;  %v3150_v57 = vpop.f32.mrb[19].mxu1 }
0x1684   : > { %v2607_v57 = vrot.slane %v3639_v53, %v1334_v2  ;;  %v2617_v2 = vrot.slane %v3639_v53, %v1344_v20 }
0x16df   : > { %v2196_v58 = vpop.xlane.xlu1 %2195 }
0x16e0   : > { %3311 = vrcp.f32 %v2196_v58 }
0x16ea   : > { %v3312_v11 = vpop.eup %3311 }
0x16eb   : > { %v2198_v60 = vmul.f32 %v3312_v11, %v3310_v50  ;;  %v2893_v50 = vld [vmem:[%s3829_s4 + $0x60] sm:$0xff] }
0x16ec   : > { %v3254_v51 = vpack.c.bf16 %v2894_v8, %v2893_v50 }
0x16ed   : > { %3159 = vmatmul.mubr.msk.f32.vlgmr.msra.gmra.mrb[20].mxu1 %vm441_vm5, %v2198_v60 }
0x16ee   : > { %3167 = vmatpush3.xpose.msk.msra.mxu1 %vm351_vm2, %v2353_v59  ;;  %3168 = vmatprep.mubr.msk.f32.mxu1 %vm3330_vm0, %v3331_v6  ;;  %v2612_v59 = vrot.slane %v3639_v53, %v1339_v4 }
0x16ef   : > { %3176 = vmatprep.subr.mxu1 %v3331_v6 }
0x16f1   : > { %3169 = vmatmul.mubr.msk.f32.vlgmr.msra.gmra.mrb[22].mxu1 %vm351_vm2, %v2351_v61 }
0x16f2   : > { %3178 = vmatprep.mubr.msk.f32.mxu1 %vm3330_vm0, %v3331_v6  ;;  %3177 = vmatpush3.msra.mxu1 %v2884_v18 }
0x16f3   : > { %3247 = vmatprep.subr.bf16.mxu1 %v3329_v3 }
0x17c0   : > { %v2272_v62 = vpop.f32.mrb[20].mxu1 }
0x17c1   : > { %v3160_v63 = vpop.f32.mrb[21].mxu1  ;;  %3164 = vmatmul.mubr.msk.f32.vlgmr.msra.gmra.mrb[26].mxu0 %vm351_vm2, %v2272_v62 }
0x17c2   : > { %3173 = vmatprep.mubr.msk.f32.mxu0 %vm3330_vm0, %v3331_v6 }
0x17c4   : > { %v2424_v1 = vpop.f32.mrb[22].mxu1 }
0x17c5   : > { %v3170_v5 = vpop.f32.mrb[23].mxu1  ;;  %v2428_v7 = vsel %vm427_vm4, %v2424_v1, -inf }
0x17c6   : > { %2429 = vmax.xlane.f32.xlu0 %v2428_v7  ;;  %v2695_v7 = vrot.slane %v3639_v53, %v1422_v26  ;;  %v2786_v26 = vrot.slane %v3639_v53, %v1514_v46 }
0x1853   : > { %v2430_v9 = vpop.xlane.xlu0 %2429 }
0x1854   : > { %v2431_v13 = vsub.f32 %v2424_v1, %v2430_v9 }
0x1856   : > { %v2432_v14 = vmul.f32 1.442695, %v2431_v13 }
0x1858   : > { %3313 = vpow2.f32 %v2432_v14 }
0x1862   : > { %v3314_v16 = vpop.eup %3313 }
0x1863   : > { %v2434_v17 = vsel %vm427_vm4, %v3314_v16, 0.0 }
0x1864   : > { %2435 = vadd.xlane.f32.xlu1 %v2434_v17 }
0x1875   : > { %2439 = vrot.lane.b32.xlu1 %v3644_v12, %s3342_s8 }
0x1894   : > { %v2345_v19 = vpop.f32.mrb[26].mxu0 }
0x1895   : > { %v2349_v21 = vadd.f32 %v2345_v19, %v2109_v56  ;;  %v3165_v22 = vpop.f32.mrb[27].mxu0 }
0x18f1   : > { %v2436_v23 = vpop.xlane.xlu1 %2435 }
0x18f2   : > { %3315 = vrcp.f32 %v2436_v23 }
0x18f5   : > { %v2440_v24 = vpop.permute.xlu1 %2439 }
0x18f6   : > { %3172 = vmatpush3.msk.msra.mxu0 %vm445_vm3, %v2440_v24 }
0x18f7   : > { %3241 = vmatprep.subr.bf16.mxu0 %v3329_v3 }
0x18fc   : > { %v3316_v25 = vpop.eup %3315 }
0x18fd   : > { %v2438_v27 = vmul.f32 %v3316_v25, %v3314_v16 }
0x18ff   : > { %3174 = vmatmul.mubr.msk.f32.vlgmr.msra.gmra.mrb[28].mxu0 %vm441_vm5, %v2438_v27 }
0x1900   : > { %3189 = vmatprep.mubr.msk.f32.mxu0 %vm3330_vm0, %v3331_v6 }
0x19d2   : > { %v2512_v12 = vpop.f32.mrb[28].mxu0 }
0x19d3   : > { %v3175_v28 = vpop.f32.mrb[29].mxu0  ;;  %3179 = vmatmul.mubr.msk.f32.vlgmr.msra.gmra.mrb[24].mxu1 %vm351_vm2, %v2512_v12  ;;  %v2791_v12 = vrot.slane %v3639_v53, %v1519_v47 }
0x19d4   : > { %3208 = vmatprep.mubr.msk.f32.mxu1 %vm3330_vm0, %v3331_v6  ;;  %v2886_v6 = vld [vmem:[%s3828_s3 + $0x28] sm:$0xff]  ;;  %3249 = vmatpush3.bf16.msra.mxu1 %v3248_v45 }
0x19d5   : > { %v3242_v39 = vpack.c.bf16 %v2886_v6, %v2885_v38  ;;  %3250 = vmatprep.subr.bf16.mxu1 %v3329_v3 }
0x19d7   : > { %3243 = vmatpush3.bf16.msra.mxu0 %v3242_v39 }
0x19d8   : > { %3244 = vmatprep.subr.bf16.mxu0 %v3329_v3  ;;  %3252 = vmatpush3.bf16.msra.mxu1 %v3251_v49 }
0x19d9   : > { %3253 = vmatprep.subr.bf16.mxu1 %v3329_v3 }
0x19dc   : > { %3255 = vmatpush3.bf16.msra.mxu1 %v3254_v51 }
0x19dd   : > { %3256 = vmatprep.subr.bf16.mxu1 %v3329_v3  ;;  %v2895_v3 = vld [vmem:[%s3829_s4 + $0x70] sm:$0xff] }
0x19de   : > { %v3257_v62 = vpack.c.bf16 %v2896_v0, %v2895_v3 }
0x19e0   : > { %3258 = vmatpush3.bf16.msra.mxu1 %v3257_v62 }
0x1aa6   : > { %v2585_v29 = vpop.f32.mrb[24].mxu1 }
0x1aa7   : > { %v2589_v30 = vadd.f32 %v2585_v29, %v2349_v21  ;;  %v3180_v31 = vpop.f32.mrb[25].mxu1 }
0x1aa9   : > { %v2590_v32 = vadd.f32 %v2589_v30, %v3630_v52  ;;  %v2887_v52 = vld [vmem:[%s3828_s3 + $0x30] sm:$0xff] }
0x1aaa   : > { %v3245_v41 = vpack.c.bf16 %v2888_v40, %v2887_v52 }
0x1aab   : > { %v2591_v33 = vsel %vm1317_vm6, %v2590_v32, 0.0 }
0x1aac   : > { %2592 = vadd.xlane.f32.xlu1 %v2591_v33  ;;  %3246 = vmatpush3.bf16.msra.mxu0 %v3245_v41 }
0x1b39   : > { %v2593_v34 = vpop.xlane.xlu1 %2592 }
0x1b3a   : > { %v2594_v35 = vmul.f32 0.03125, %v2593_v34 }
0x1b3c   : > { %v2595_v36 = vsub.f32 %v2590_v32, %v2594_v35 }
0x1b3e   : > { %v2596_v15 = vmul.f32 %v2595_v36, %v2595_v36 }
0x1b40   : > { %v2597_v37 = vsel %vm1317_vm6, %v2596_v15, 0.0 }
0x1b41   : > { %2598 = vadd.xlane.f32.xlu0 %v2597_v37 }
0x1bce   : > { %v2599_v54 = vpop.xlane.xlu0 %2598 }
0x1bcf   : > { %v2600_v55 = vmul.f32 0.03125, %v2599_v54 }
0x1bd1   : > { %v2601_v56 = vadd.f32 1e-05, %v2600_v55 }
0x1bd3   : > { %3317 = vrsqrt.f32 %v2601_v56 }
0x1bdd   : > { %v3318_v58 = vpop.eup %3317 }
0x1bde   : > { %v2603_v11 = vmul.f32 %v3318_v58, %v2595_v36 }
0x1be0   : > { %v2608_v60 = vmul.f32 %v2607_v57, %v2603_v11 }
0x1be2   : > { %v2613_v61 = vadd.f32 %v2612_v59, %v2608_v60 }
0x1be4   : > { %3190 = vmatmul.mubr.msk.f32.vlgmr.msra.gmra.mrb[30].mxu0 %vm273_vm1, %v2613_v61 }
0x1cb7   : > { %v2687_v63 = vpop.f32.mrb[30].mxu0 }
0x1cb8   : > { %v2688_v4 = vadd.f32 %v2687_v63, %v2617_v2  ;;  %v3191_v1 = vpop.f32.mrb[31].mxu0 }
0x1cba   : > { %v2691_v5 = vmax.f32 %v2688_v4, 0.0 }
0x1cbc   : > { %3209 = vmatmul.mubr.msk.f32.vlgmr.msra.gmra.mrb[26].mxu1 %vm1424_vm7, %v2691_v5 }
0x1d8f   : > { %v2765_v9 = vpop.f32.mrb[26].mxu1 }
0x1d90   : > { %v2766_v13 = vadd.f32 %v2765_v9, %v2695_v7  ;;  %v3210_v14 = vpop.f32.mrb[27].mxu1 }
0x1d92   : > { %v2769_v16 = vadd.f32 %v2766_v13, %v2613_v61 }
0x1d94   : > { %v2770_v17 = vsel %vm1317_vm6, %v2769_v16, 0.0 }
0x1d95   : > { %2771 = vadd.xlane.f32.xlu0 %v2770_v17 }
0x1e22   : > { %v2772_v18 = vpop.xlane.xlu0 %2771 }
0x1e23   : > { %v2773_v20 = vmul.f32 0.03125, %v2772_v18 }
0x1e25   : > { %v2774_v19 = vsub.f32 %v2769_v16, %v2773_v20 }
0x1e27   : > { %v2775_v21 = vmul.f32 %v2774_v19, %v2774_v19 }
0x1e29   : > { %v2776_v22 = vsel %vm1317_vm6, %v2775_v21, 0.0 }
0x1e2a   : > { %2777 = vadd.xlane.f32.xlu0 %v2776_v22 }
0x1eb7   : > { %v2778_v23 = vpop.xlane.xlu0 %2777 }
0x1eb8   : > { %v2779_v24 = vmul.f32 0.03125, %v2778_v23 }
0x1eba   : > { %v2780_v25 = vadd.f32 1e-05, %v2779_v24 }
0x1ebc   : > { %3319 = vrsqrt.f32 %v2780_v25 }
0x1ec6   : > { %v3320_v27 = vpop.eup %3319 }
0x1ec7   : > { %v2782_v28 = vmul.f32 %v3320_v27, %v2774_v19 }
0x1ec9   : > { %v2787_v29 = vmul.f32 %v2786_v26, %v2782_v28 }
0x1ecb   : > { %v2792_v30 = vadd.f32 %v2791_v12, %v2787_v29 }
0x1ecd   : > { %2793 = vst.msk [vmem:[%s246_s29] sm:$0x3f] %vm1317_vm6, %v2792_v30 }
0x1ece PF: > { %s16_s21 = sadd.s32 1, %s3327_s21  }
0x1ecf   : > { %p13_p4 = scmp.ge.s32.totalorder %s16_s21, 4  }
0x1ed1   :  { %15 = sbr.rel (!%p13_p4) target bundleno = 1 (0x1), region = 79 }

// kernel: forward.21
= control target key start
LH: loop header
LB: loop body
LE: loop exit
PB: predicated region body
PF: predicated region fallthrough
CT: control target
= control target key end

     0   :  { %v421_v0 = vmov 0.0|0.0   ;;  %vm422_vm0 = vmmov 0   ;;  %v423_v8 = vmov 0.0   ;;  %vm43_vm1 = vcmask 523264   ;;  %s564_s2 = inlined_call_operand.vmem [shape: f32[128,64], index: 2, kind: input, shape index: {}]   ;;  %s565_s4 = inlined_call_operand.vmem [shape: f32[64,1], index: 4, kind: input, shape index: {}]   ;;  %s566_s1 = inlined_call_operand.vmem [shape: f32[2,64], index: 1, kind: input, shape index: {}]   ;;  %s567_s0 = inlined_call_operand.vmem [shape: f32[2,64], index: 0, kind: input, shape index: {}]   ;;  %s568_s5 = inlined_call_operand.<no memory space> [shape: f32[1,1], index: 5, kind: input, shape index: {}]   ;;  %s569_s3 = inlined_call_operand.vmem [shape: f32[1,64], index: 3, kind: input, shape index: {}]   ;;  %s570_s6 = inlined_call_operand.vmem [shape: f32[2,1], index: 6, kind: output, shape index: {}]  }
   0x1   :  { %382 = vmatprep.subr.bf16.mxu0 %v421_v0  ;;  %394 = vmatprep.subr.bf16.mxu1 %v421_v0  ;;  %v35_v1 = vld [vmem:[%s564_s2 + $0x40] sm:$0xff]  ;;  %v36_v2 = vld [vmem:[%s564_s2 + $0x48] sm:$0xff]  ;;  %v37_v6 = vld [vmem:[%s564_s2 + $0x50] sm:$0xff]  ;;  %v11_v40 = vstv %s568_s5  ;;  %vm287_vm2 = vcmask 1024  }
   0x2   :  { %v27_v3 = vld [vmem:[%s564_s2] sm:$0xff]  ;;  %v383_v4 = vpack.c.bf16 %v36_v2, %v35_v1  ;;  %v28_v5 = vld [vmem:[%s564_s2 + $0x8] sm:$0xff]  ;;  %v38_v7 = vld [vmem:[%s564_s2 + $0x58] sm:$0xff]  ;;  %341 = vmatprep.mubr.msk.f32.mxu0 %vm422_vm0, %v423_v8  ;;  %360 = vmatprep.mubr.msk.f32.mxu1 %vm422_vm0, %v423_v8  ;;  %12 = vst [vmem:[#allocation2] sm:$0x1] %v11_v40 }
   0x3   :  { %v395_v9 = vpack.c.bf16 %v28_v5, %v27_v3  ;;  %v29_v10 = vld [vmem:[%s564_s2 + $0x10] sm:$0xff]  ;;  %v30_v11 = vld [vmem:[%s564_s2 + $0x18] sm:$0xff]  ;;  %v386_v12 = vpack.c.bf16 %v38_v7, %v37_v6  ;;  %v39_v14 = vld [vmem:[%s564_s2 + $0x60] sm:$0xff] }
   0x4   :  { %384 = vmatpush3.bf16.msra.mxu0 %v383_v4  ;;  %v398_v13 = vpack.c.bf16 %v30_v11, %v29_v10  ;;  %v40_v15 = vld [vmem:[%s564_s2 + $0x68] sm:$0xff]  ;;  %v31_v16 = vld [vmem:[%s564_s2 + $0x20] sm:$0xff]  ;;  %v41_v20 = vld [vmem:[%s564_s2 + $0x70] sm:$0xff] }
   0x5   :  { %396 = vmatpush3.bf16.msra.mxu1 %v395_v9  ;;  %385 = vmatprep.subr.bf16.mxu0 %v421_v0  ;;  %v32_v17 = vld [vmem:[%s564_s2 + $0x28] sm:$0xff]  ;;  %v389_v18 = vpack.c.bf16 %v40_v15, %v39_v14  ;;  %v42_v21 = vld [vmem:[%s564_s2 + $0x78] sm:$0xff]  ;;  %v33_v22 = vld [vmem:[%s564_s2 + $0x30] sm:$0xff] }
   0x6   :  { %397 = vmatprep.subr.bf16.mxu1 %v421_v0  ;;  %v401_v19 = vpack.c.bf16 %v32_v17, %v31_v16  ;;  %v34_v23 = vld [vmem:[%s564_s2 + $0x38] sm:$0xff]  ;;  %v392_v24 = vpack.c.bf16 %v42_v21, %v41_v20  ;;  %v199_v26 = vld [vmem:[%s565_s4] sm:$0xff]  ;;  %v200_v27 = vld [vmem:[%s565_s4 + $0x8] sm:$0xff] }
   0x7   :  { %v404_v25 = vpack.c.bf16 %v34_v23, %v33_v22  ;;  %v26_v28 = vld [vmem:[%s566_s1] sm:$0x3]  ;;  %v407_v29 = vpack.c.bf16 %v200_v27, %v199_v26  ;;  %v201_v31 = vld [vmem:[%s565_s4 + $0x10] sm:$0xff]  ;;  %v202_v32 = vld [vmem:[%s565_s4 + $0x18] sm:$0xff] }
   0x8   :  { %387 = vmatpush3.bf16.msra.mxu0 %v386_v12  ;;  %v25_v30 = vld [vmem:[%s567_s0] sm:$0x3]  ;;  %v410_v33 = vpack.c.bf16 %v202_v32, %v201_v31  ;;  %v204_v35 = vld [vmem:[%s565_s4 + $0x28] sm:$0xff]  ;;  %v205_v37 = vld [vmem:[%s565_s4 + $0x30] sm:$0xff] }
   0x9   :  { %399 = vmatpush3.bf16.msra.mxu1 %v398_v13  ;;  %388 = vmatprep.subr.bf16.mxu0 %v421_v0  ;;  %v203_v34 = vld [vmem:[%s565_s4 + $0x20] sm:$0xff]  ;;  %v206_v38 = vld [vmem:[%s565_s4 + $0x38] sm:$0xff] }
   0xa   :  { %400 = vmatprep.subr.bf16.mxu1 %v421_v0  ;;  %v413_v36 = vpack.c.bf16 %v204_v35, %v203_v34  ;;  %v416_v39 = vpack.c.bf16 %v206_v38, %v205_v37  ;;  %v295_v43 = vld [vmem:[%s569_s3] ss:$0 sm:$0xff] }
   0xb   :  { %v296_v49 = vld [vmem:[#allocation2] ss:$0 sm:$0xff] }
   0xc   :  { %390 = vmatpush3.bf16.msra.mxu0 %v389_v18 }
   0xd   :  { %402 = vmatpush3.bf16.msra.mxu1 %v401_v19  ;;  %391 = vmatprep.subr.bf16.mxu0 %v421_v0 }
   0xe   :  { %403 = vmatprep.subr.bf16.mxu1 %v421_v0 }
  0x10   :  { %393 = vmatpush3.bf16.msra.mxu0 %v392_v24 }
  0x11   :  { %405 = vmatpush3.bf16.msra.mxu1 %v404_v25  ;;  %406 = vmatprep.subr.bf16.mxu0 %v421_v0 }
  0x13   :  { %342 = vmatmul.mubr.msk.f32.vlgmr.msra.gmra.mrb[0].mxu0 %vm43_vm1, %v26_v28 }
  0x14   :  { %361 = vmatmul.mubr.msk.f32.vlgmr.msra.gmra.mrb[0].mxu1 %vm43_vm1, %v25_v30  ;;  %408 = vmatpush3.bf16.msra.mxu0 %v407_v29 }
  0x15   :  { %409 = vmatprep.subr.bf16.mxu0 %v421_v0  ;;  %379 = vmatprep.mubr.msk.f32.mxu0 %vm422_vm0, %v423_v8 }
  0x18   :  { %411 = vmatpush3.bf16.msra.mxu0 %v410_v33 }
  0x19   :  { %412 = vmatprep.subr.bf16.mxu0 %v421_v0 }
  0x1c   :  { %414 = vmatpush3.bf16.msra.mxu0 %v413_v36 }
  0x1d   :  { %415 = vmatprep.subr.bf16.mxu0 %v421_v0 }
  0x20   :  { %417 = vmatpush3.bf16.msra.mxu0 %v416_v39 }
  0xe6   :  { %v113_v41 = vpop.f32.mrb[0].mxu0 }
  0xe7   :  { %v186_v42 = vpop.f32.mrb[0].mxu1  ;;  %v343_v44 = vpop.f32.mrb[1].mxu0 }
  0xe8   :  { %v187_v45 = vadd.f32 %v186_v42, %v113_v41  ;;  %v362_v46 = vpop.f32.mrb[1].mxu1 }
  0xea   :  { %v197_v47 = vadd.f32 %v295_v43, %v187_v45 }
  0xec   :  { %v198_v48 = vmax.f32 %v197_v47, 0.0 }
  0xee   :  { %380 = vmatmul.mubr.msk.f32.vlgmr.msra.gmra.mrb[2].mxu0 %vm43_vm1, %v198_v48 }
 0x1c1   :  { %v283_v50 = vpop.f32.mrb[2].mxu0 }
 0x1c2   :  { %v284_v51 = vadd.f32 %v296_v49, %v283_v50  ;;  %v381_v52 = vpop.f32.mrb[3].mxu0 }
 0x1c4   :  { %288 = vst.msk [vmem:[%s570_s6] sm:$0x3] %vm287_vm2, %v284_v51 }

</bundles_post_ra>
